<compile_context>
chip_gen: v7x
topology: tpu7x:2x2x1
jax: 0.10.0
libtpu: 0.0.40
codegen_flags: <defaults>
</compile_context>

<pallas_src>
import functools

import jax
import jax.numpy as jnp
from jax.experimental import pallas as pl
from jax.experimental.pallas import tpu as pltpu


# ----------------------------- tiling helper ---------------------------------

def _pick_m_tile(M, row_bytes, budget_bytes=2 << 20):
    """Largest multiple-of-128 tile along the lane (M) axis that divides M and
    keeps one (rows, tile) block under `budget_bytes`.  Falls back to the full
    extent for small / awkward M (full-dim blocks are always legal)."""
    cap = max(128, (budget_bytes // max(row_bytes, 1)) // 128 * 128)
    for c in (4096, 2048, 1024, 512, 256, 128):
        if c <= cap and M % c == 0:
            return c
    return M


# ----------------------------- Pallas kernels --------------------------------

def _matmul_bias_act_kernel(w_ref, x_ref, b_ref, o_ref, *, relu):
    """(Cout, K) @ (K, Mt) on the MXU with f32 accumulation; bias (+ReLU)
    fused in the epilogue.  Output is lane-dense: Mt (multiple of 128 for
    tiled calls) sits on the 128-lane axis, Cout on sublanes."""
    acc = jnp.dot(w_ref[...], x_ref[...], preferred_element_type=jnp.float32)
    acc = acc + b_ref[...]                       # (Cout, 1) broadcast over lanes
    if relu:
        acc = jnp.maximum(acc, 0.0)
    o_ref[...] = acc.astype(o_ref.dtype)


def _max4_kernel(a_ref, b_ref, c_ref, d_ref, o_ref):
    """Elementwise max of the four 2x2-window corners (MaxPool2d(2,2))."""
    o_ref[...] = jnp.maximum(jnp.maximum(a_ref[...], b_ref[...]),
                             jnp.maximum(c_ref[...], d_ref[...]))


# ------------------------------ op wrappers -----------------------------------

def _matmul_cn(wt, x2d, bias, *, relu, out_dtype=jnp.bfloat16):
    """out (Cout, M) = wt (Cout, K) @ x2d (K, M) + bias, tiled over M."""
    Cout, K = wt.shape
    K2, M = x2d.shape
    assert K == K2, (wt.shape, x2d.shape)
    mt = _pick_m_tile(M, row_bytes=2 * K)
    grid = (M // mt,)
    cost = pl.CostEstimate(
        flops=2 * Cout * K * M,
        transcendentals=0,
        bytes_accessed=2 * (Cout * K + K * M + Cout * M) + 4 * Cout)
    # NOTE: weights / bias are whole-array VMEM-resident (constant index_map);
    # K = 9*Cin stays small in UNet++ so no K tiling / accumulator is needed.
    # vmem_limit_bytes left at the scoped default: per-call footprint is
    # ~2x(2 MiB cols tile) + weights + output tiles.
    return pl.pallas_call(
        functools.partial(_matmul_bias_act_kernel, relu=relu),
        out_shape=jax.ShapeDtypeStruct((Cout, M), out_dtype),
        grid=grid,
        in_specs=[
            pl.BlockSpec((Cout, K), lambda i: (0, 0)),    # weights (resident)
            pl.BlockSpec((K, mt), lambda i: (0, i)),      # activation tile
            pl.BlockSpec((Cout, 1), lambda i: (0, 0)),    # bias (resident)
        ],
        out_specs=pl.BlockSpec((Cout, mt), lambda i: (0, i)),
        compiler_params=pltpu.CompilerParams(
            dimension_semantics=("parallel",)),
        cost_estimate=cost,
    )(wt, x2d, bias.reshape(Cout, 1).astype(jnp.float32))


def conv3x3(x, wt, b, relu=True):
    """3x3 conv, stride 1, pad 1 on channels-first (C, N, H, W) activations.
    im2col is JAX glue; the matmul+bias+ReLU hot path runs in Pallas with the
    N*H*W dim on the 128-lane output axis."""
    C, N, H, W = x.shape
    Cout = wt.shape[0]
    xp = jnp.pad(x, ((0, 0), (0, 0), (1, 1), (1, 1)))
    # Tap order (ky, kx, cin) matches the HWIO weight flattening in init_params.
    cols = jnp.concatenate(
        [xp[:, :, ky:ky + H, kx:kx + W] for ky in range(3) for kx in range(3)],
        axis=0).reshape(9 * C, N * H * W)
    # TODO(synk): move im2col into the kernel (halo-row manual DMA) to remove
    # the 9x HBM expansion of the activation, and fuse both convs of a block.
    y = _matmul_cn(wt, cols, b, relu=relu)
    return y.reshape(Cout, N, H, W)


def conv1x1(x, wt, b, out_dtype=jnp.bfloat16):
    """1x1 conv (no activation), same lane-dense tiled matmul."""
    C, N, H, W = x.shape
    Cout = wt.shape[0]
    y = _matmul_cn(wt, x.reshape(C, N * H * W), b, relu=False,
                   out_dtype=out_dtype)
    return y.reshape(Cout, N, H, W)


def maxpool2(x):
    """MaxPool2d(kernel=2, stride=2) on (C, N, H, W).  Corner selection is JAX
    glue; the 4-way max runs in a lane-dense (C, N*Ho*Wo) Pallas kernel."""
    C, N, H, W = x.shape
    Ho, Wo = H // 2, W // 2
    M = N * Ho * Wo
    corners = [x[:, :, dy::2, dx::2].reshape(C, M)
               for dy in (0, 1) for dx in (0, 1)]
    mt = _pick_m_tile(M, row_bytes=2 * C * 4)
    out = pl.pallas_call(
        _max4_kernel,
        out_shape=jax.ShapeDtypeStruct((C, M), x.dtype),
        grid=(M // mt,),
        in_specs=[pl.BlockSpec((C, mt), lambda i: (0, i))] * 4,
        out_specs=pl.BlockSpec((C, mt), lambda i: (0, i)),
        compiler_params=pltpu.CompilerParams(
            dimension_semantics=("parallel",)),
    )(*corners)
    return out.reshape(C, N, Ho, Wo)


def upsample2_bilinear(x):
    """Bilinear x2 upsample, align_corners=True (matches nn.Upsample), on
    (C, N, H, W).  Implemented as two small interpolation-matrix contractions.
    TODO(synk): fuse the fixed 2x stencil into the consumer conv's tap loop to
    avoid materializing the 4x-larger intermediate in HBM."""
    C, N, H, W = x.shape

    def interp_mat(n_in, n_out):
        if n_in == 1:
            return jnp.ones((n_out, 1), jnp.float32)
        pos = jnp.arange(n_out, dtype=jnp.float32) * (n_in - 1) / (n_out - 1)
        lo = jnp.clip(jnp.floor(pos).astype(jnp.int32), 0, n_in - 2)
        frac = pos - lo.astype(jnp.float32)
        rows = jnp.arange(n_out)
        m = jnp.zeros((n_out, n_in), jnp.float32)
        m = m.at[rows, lo].set(1.0 - frac)
        m = m.at[rows, lo + 1].add(frac)
        return m

    Ah = interp_mat(H, 2 * H)
    Aw = interp_mat(W, 2 * W)
    y = jnp.einsum('oh,cnhw->cnow', Ah, x.astype(jnp.float32))
    y = jnp.einsum('pw,cnow->cnop', Aw, y)
    return y.astype(x.dtype)


# ------------------------------ parameters -----------------------------------

def _init_conv(key, kh, kw, cin, cout):
    wk, bk = jax.random.split(key)
    fan_in = float(kh * kw * cin)
    w = jax.random.normal(wk, (kh, kw, cin, cout), jnp.float32) / jnp.sqrt(fan_in)
    b = 0.01 * jax.random.normal(bk, (cout,), jnp.float32)
    return w, b


def _fold_bn(w, b, cout, eps=1e-5):
    # Identity-initialized BatchNorm (eval mode) folded into conv weights.
    gamma = jnp.ones((cout,), jnp.float32)
    beta = jnp.zeros((cout,), jnp.float32)
    mean = jnp.zeros((cout,), jnp.float32)
    var = jnp.ones((cout,), jnp.float32)
    scale = gamma / jnp.sqrt(var + eps)
    return w * scale, (b - mean) * scale + beta


def init_params(key, in_ch=3, out_ch=1, n1=8):
    f = [n1, n1 * 2, n1 * 4, n1 * 8, n1 * 16]
    block_io = {
        'conv0_0': (in_ch, f[0]), 'conv1_0': (f[0], f[1]), 'conv2_0': (f[1], f[2]),
        'conv3_0': (f[2], f[3]), 'conv4_0': (f[3], f[4]),
        'conv0_1': (f[0] + f[1], f[0]), 'conv1_1': (f[1] + f[2], f[1]),
        'conv2_1': (f[2] + f[3], f[2]), 'conv3_1': (f[3] + f[4], f[3]),
        'conv0_2': (2 * f[0] + f[1], f[0]), 'conv1_2': (2 * f[1] + f[2], f[1]),
        'conv2_2': (2 * f[2] + f[3], f[2]),
        'conv0_3': (3 * f[0] + f[1], f[0]), 'conv1_3': (3 * f[1] + f[2], f[1]),
        'conv0_4': (4 * f[0] + f[1], f[0]),
    }
    keys = jax.random.split(key, 2 * len(block_io) + 5)
    params, ki = {}, 0
    for name, (cin, cout) in block_io.items():
        w1, b1 = _init_conv(keys[ki], 3, 3, cin, cout); ki += 1
        w2, b2 = _init_conv(keys[ki], 3, 3, cout, cout); ki += 1
        w1, b1 = _fold_bn(w1, b1, cout)
        w2, b2 = _fold_bn(w2, b2, cout)
        # Store transposed (Cout, 9*Cin) bf16 for the lane-dense matmul;
        # K index = ky*3*Cin + kx*Cin + cin, matching conv3x3's tap concat.
        params[name] = dict(
            w1=w1.reshape(9 * cin, cout).T.astype(jnp.bfloat16), b1=b1,
            w2=w2.reshape(9 * cout, cout).T.astype(jnp.bfloat16), b2=b2)
    for head in ('final1', 'final2', 'final3', 'final4', 'final'):
        w, b = _init_conv(keys[ki], 1, 1, f[0], out_ch); ki += 1
        params[head] = dict(w=w[0, 0].T.astype(jnp.bfloat16), b=b)  # (out_ch, f0)
    return params


# -------------------------------- forward ------------------------------------

def _conv_block(x, p):
    x = conv3x3(x, p['w1'], p['b1'], relu=True)
    x = conv3x3(x, p['w2'], p['b2'], relu=True)
    return x


def unetpp_forward(x_nchw, params, supervision=True):
    # NCHW -> channels-first (C, N, H, W), bf16: skip concats become cheap
    # leading-axis concats and N*H*W lands on the 128-lane matmul axis.
    x = jnp.transpose(x_nchw, (1, 0, 2, 3)).astype(jnp.bfloat16)
    cb = lambda name, v: _conv_block(v, params[name])
    up = upsample2_bilinear
    cat = lambda *ts: jnp.concatenate(ts, axis=0)
    # TODO(synk): replace the channel concats with split-K accumulation over
    # separate input refs inside the matmul kernel.

    x0_0 = cb('conv0_0', x)
    x1_0 = cb('conv1_0', maxpool2(x0_0))
    x0_1 = cb('conv0_1', cat(x0_0, up(x1_0)))

    x2_0 = cb('conv2_0', maxpool2(x1_0))
    x1_1 = cb('conv1_1', cat(x1_0, up(x2_0)))
    x0_2 = cb('conv0_2', cat(x0_0, x0_1, up(x1_1)))

    x3_0 = cb('conv3_0', maxpool2(x2_0))
    x2_1 = cb('conv2_1', cat(x2_0, up(x3_0)))
    x1_2 = cb('conv1_2', cat(x1_0, x1_1, up(x2_1)))
    x0_3 = cb('conv0_3', cat(x0_0, x0_1, x0_2, up(x1_2)))

    x4_0 = cb('conv4_0', maxpool2(x3_0))
    x3_1 = cb('conv3_1', cat(x3_0, up(x4_0)))
    x2_2 = cb('conv2_2', cat(x2_0, x2_1, up(x3_1)))
    x1_3 = cb('conv1_3', cat(x1_0, x1_1, x1_2, up(x2_2)))
    x0_4 = cb('conv0_4', cat(x0_0, x0_1, x0_2, x0_3, up(x1_3)))

    if supervision:
        # Deep supervision fused into ONE lane-dense 1x1-conv matmul:
        # mean_k(x0_k @ Wk + bk) == cat(x0_1..x0_4) @ cat(Wk)/4 + mean(bk).
        w_comb = (jnp.concatenate(
            [params[f'final{k}']['w'].astype(jnp.float32) for k in (1, 2, 3, 4)],
            axis=1) * 0.25).astype(jnp.bfloat16)
        b_comb = 0.25 * sum(params[f'final{k}']['b'] for k in (1, 2, 3, 4))
        out = conv1x1(cat(x0_1, x0_2, x0_3, x0_4), w_comb, b_comb,
                      out_dtype=jnp.float32)
    else:
        out = conv1x1(x0_4, params['final']['w'], params['final']['b'],
                      out_dtype=jnp.float32)
    return jnp.transpose(out, (1, 0, 2, 3))  # (out_ch, N, H, W) -> NCHW


# --------------------------------- driver -------------------------------------

if __name__ == "__main__":
    key = jax.random.PRNGKey(0)
    kx, kp = jax.random.split(key)

    N, in_ch, out_ch, n1 = 2, 3, 1, 8
    H = W = 16
    x = jax.random.normal(kx, (N, in_ch, H, W), jnp.float32)  # NCHW like PyTorch
    params = init_params(kp, in_ch=in_ch, out_ch=out_ch, n1=n1)

    fwd = jax.jit(unetpp_forward, static_argnames=('supervision',))
    out = fwd(x, params, supervision=True)
    out = jax.block_until_ready(out)

    assert out.shape == (N, out_ch, H, W), out.shape
    assert bool(jnp.isfinite(out).all())
    print("KERNEL_OK")
</pallas_src>

<mosaic_0001>
module attributes {stable_mosaic.version = 11 : i64} {
  func.func private @main(%arg0: i32) attributes {dimension_semantics = [#tpu.dimension_semantics<core_parallel>], iteration_bounds = array<i64: 2>, tpu.core_type = #tpu.core_type<sc_scalar_subcore>, window_params = []} {
    return
  }
}

module attributes {stable_mosaic.version = 11 : i64} {
  func.func private @main(%arg0: i32) attributes {dimension_semantics = [#tpu.dimension_semantics<core_parallel>], iteration_bounds = array<i64: 2>, tpu.core_type = #tpu.core_type<sc_scalar_subcore>, window_params = []} {
    return
  }
}

module attributes {stable_mosaic.version = 11 : i64} {
  func.func @_matmul_bias_act_kernel(%arg0: i32, %arg1: memref<8x27xbf16, #tpu.memory_space<vmem>>, %arg2: memref<27x512xbf16, #tpu.memory_space<vmem>>, %arg3: memref<8x1xf32, #tpu.memory_space<vmem>>, %arg4: memref<8x512xbf16, #tpu.memory_space<vmem>>) attributes {dimension_semantics = [#tpu.dimension_semantics<parallel>], iteration_bounds = array<i64: 1>, scalar_prefetch = 0 : i64, scratch_operands = 0 : i64, tpu.core_type = #tpu.core_type<tc>, window_params = [{pipeline_mode = #tpu.pipeline_mode<synchronous>, transform_indices = @transform_0, window_bounds = array<i64: 8, 27>}, {transform_indices = @transform_1, window_bounds = array<i64: 27, 512>}, {pipeline_mode = #tpu.pipeline_mode<synchronous>, transform_indices = @transform_2, window_bounds = array<i64: 8, 1>}, {transform_indices = @transform_3, window_bounds = array<i64: 8, 512>}]} {
    %c0 = arith.constant 0 : index
    %c0_0 = arith.constant 0 : index
    %0 = vector.load %arg1[%c0, %c0_0] : memref<8x27xbf16, #tpu.memory_space<vmem>>, vector<8x27xbf16>
    %c0_1 = arith.constant 0 : index
    %c0_2 = arith.constant 0 : index
    %1 = vector.load %arg2[%c0_1, %c0_2] : memref<27x512xbf16, #tpu.memory_space<vmem>>, vector<27x512xbf16>
    %cst = arith.constant dense<0.000000e+00> : vector<8x512xf32>
    %2 = tpu.matmul %0, %1, %cst {dimension_numbers = #tpu.dot_dimension_numbers<[1], [0], [0], [1], [0, 0, 1, 1], [], []>} : vector<8x27xbf16>, vector<27x512xbf16>, vector<8x512xf32> -> vector<8x512xf32>
    %c0_3 = arith.constant 0 : index
    %c0_4 = arith.constant 0 : index
    %3 = vector.load %arg3[%c0_3, %c0_4] : memref<8x1xf32, #tpu.memory_space<vmem>>, vector<8x1xf32>
    %4 = vector.broadcast %3 : vector<8x1xf32> to vector<8x512xf32>
    %5 = arith.addf %2, %4 : vector<8x512xf32>
    %cst_5 = arith.constant 0.000000e+00 : f32
    %6 = vector.broadcast %cst_5 : f32 to vector<8x512xf32>
    %7 = arith.maximumf %5, %6 : vector<8x512xf32>
    %8 = arith.truncf %7 : vector<8x512xf32> to vector<8x512xbf16>
    %c0_6 = arith.constant 0 : index
    %c0_7 = arith.constant 0 : index
    %9 = vector.load %arg4[%c0_6, %c0_7] : memref<8x512xbf16, #tpu.memory_space<vmem>>, vector<8x512xbf16>
    tpu.vector_store %arg4[%c0_6, %c0_7], %8 {strides = array<i32>} : memref<8x512xbf16, #tpu.memory_space<vmem>>, vector<8x512xbf16>,
    return
  }
  func.func @transform_0(%arg0: i32) -> (i32, i32) {
    %c0_i32 = arith.constant 0 : i32
    %c0_i32_0 = arith.constant 0 : i32
    %c0_i32_1 = arith.constant 0 : i32
    return %c0_i32, %c0_i32_0 : i32, i32
  }
  func.func @transform_1(%arg0: i32) -> (i32, i32) {
    %c0_i32 = arith.constant 0 : i32
    %c0_i32_0 = arith.constant 0 : i32
    return %c0_i32, %arg0 : i32, i32
  }
  func.func @transform_2(%arg0: i32) -> (i32, i32) {
    %c0_i32 = arith.constant 0 : i32
    %c0_i32_0 = arith.constant 0 : i32
    %c0_i32_1 = arith.constant 0 : i32
    return %c0_i32, %c0_i32_0 : i32, i32
  }
  func.func @transform_3(%arg0: i32) -> (i32, i32) {
    %c0_i32 = arith.constant 0 : i32
    %c0_i32_0 = arith.constant 0 : i32
    return %c0_i32, %arg0 : i32, i32
  }
}

module attributes {stable_mosaic.version = 11 : i64} {
  func.func @_matmul_bias_act_kernel(%arg0: i32, %arg1: memref<8x72xbf16, #tpu.memory_space<vmem>>, %arg2: memref<72x512xbf16, #tpu.memory_space<vmem>>, %arg3: memref<8x1xf32, #tpu.memory_space<vmem>>, %arg4: memref<8x512xbf16, #tpu.memory_space<vmem>>) attributes {dimension_semantics = [#tpu.dimension_semantics<parallel>], iteration_bounds = array<i64: 1>, scalar_prefetch = 0 : i64, scratch_operands = 0 : i64, tpu.core_type = #tpu.core_type<tc>, window_params = [{pipeline_mode = #tpu.pipeline_mode<synchronous>, transform_indices = @transform_0, window_bounds = array<i64: 8, 72>}, {transform_indices = @transform_1, window_bounds = array<i64: 72, 512>}, {pipeline_mode = #tpu.pipeline_mode<synchronous>, transform_indices = @transform_2, window_bounds = array<i64: 8, 1>}, {transform_indices = @transform_3, window_bounds = array<i64: 8, 512>}]} {
    %c0 = arith.constant 0 : index
    %c0_0 = arith.constant 0 : index
    %0 = vector.load %arg1[%c0, %c0_0] : memref<8x72xbf16, #tpu.memory_space<vmem>>, vector<8x72xbf16>
    %c0_1 = arith.constant 0 : index
    %c0_2 = arith.constant 0 : index
    %1 = vector.load %arg2[%c0_1, %c0_2] : memref<72x512xbf16, #tpu.memory_space<vmem>>, vector<72x512xbf16>
    %cst = arith.constant dense<0.000000e+00> : vector<8x512xf32>
    %2 = tpu.matmul %0, %1, %cst {dimension_numbers = #tpu.dot_dimension_numbers<[1], [0], [0], [1], [0, 0, 1, 1], [], []>} : vector<8x72xbf16>, vector<72x512xbf16>, vector<8x512xf32> -> vector<8x512xf32>
    %c0_3 = arith.constant 0 : index
    %c0_4 = arith.constant 0 : index
    %3 = vector.load %arg3[%c0_3, %c0_4] : memref<8x1xf32, #tpu.memory_space<vmem>>, vector<8x1xf32>
    %4 = vector.broadcast %3 : vector<8x1xf32> to vector<8x512xf32>
    %5 = arith.addf %2, %4 : vector<8x512xf32>
    %cst_5 = arith.constant 0.000000e+00 : f32
    %6 = vector.broadcast %cst_5 : f32 to vector<8x512xf32>
    %7 = arith.maximumf %5, %6 : vector<8x512xf32>
    %8 = arith.truncf %7 : vector<8x512xf32> to vector<8x512xbf16>
    %c0_6 = arith.constant 0 : index
    %c0_7 = arith.constant 0 : index
    %9 = vector.load %arg4[%c0_6, %c0_7] : memref<8x512xbf16, #tpu.memory_space<vmem>>, vector<8x512xbf16>
    tpu.vector_store %arg4[%c0_6, %c0_7], %8 {strides = array<i32>} : memref<8x512xbf16, #tpu.memory_space<vmem>>, vector<8x512xbf16>,
    return
  }
  func.func @transform_0(%arg0: i32) -> (i32, i32) {
    %c0_i32 = arith.constant 0 : i32
    %c0_i32_0 = arith.constant 0 : i32
    %c0_i32_1 = arith.constant 0 : i32
    return %c0_i32, %c0_i32_0 : i32, i32
  }
  func.func @transform_1(%arg0: i32) -> (i32, i32) {
    %c0_i32 = arith.constant 0 : i32
    %c0_i32_0 = arith.constant 0 : i32
    return %c0_i32, %arg0 : i32, i32
  }
  func.func @transform_2(%arg0: i32) -> (i32, i32) {
    %c0_i32 = arith.constant 0 : i32
    %c0_i32_0 = arith.constant 0 : i32
    %c0_i32_1 = arith.constant 0 : i32
    return %c0_i32, %c0_i32_0 : i32, i32
  }
  func.func @transform_3(%arg0: i32) -> (i32, i32) {
    %c0_i32 = arith.constant 0 : i32
    %c0_i32_0 = arith.constant 0 : i32
    return %c0_i32, %arg0 : i32, i32
  }
}

module attributes {stable_mosaic.version = 11 : i64} {
  func.func @_max4_kernel(%arg0: i32, %arg1: memref<8x128xbf16, #tpu.memory_space<vmem>>, %arg2: memref<8x128xbf16, #tpu.memory_space<vmem>>, %arg3: memref<8x128xbf16, #tpu.memory_space<vmem>>, %arg4: memref<8x128xbf16, #tpu.memory_space<vmem>>, %arg5: memref<8x128xbf16, #tpu.memory_space<vmem>>) attributes {dimension_semantics = [#tpu.dimension_semantics<parallel>], iteration_bounds = array<i64: 1>, scalar_prefetch = 0 : i64, scratch_operands = 0 : i64, tpu.core_type = #tpu.core_type<tc>, window_params = [{transform_indices = @transform_0, window_bounds = array<i64: 8, 128>}, {transform_indices = @transform_1, window_bounds = array<i64: 8, 128>}, {transform_indices = @transform_2, window_bounds = array<i64: 8, 128>}, {transform_indices = @transform_3, window_bounds = array<i64: 8, 128>}, {transform_indices = @transform_4, window_bounds = array<i64: 8, 128>}]} {
    %c0 = arith.constant 0 : index
    %c0_0 = arith.constant 0 : index
    %0 = vector.load %arg1[%c0, %c0_0] : memref<8x128xbf16, #tpu.memory_space<vmem>>, vector<8x128xbf16>
    %c0_1 = arith.constant 0 : index
    %c0_2 = arith.constant 0 : index
    %1 = vector.load %arg2[%c0_1, %c0_2] : memref<8x128xbf16, #tpu.memory_space<vmem>>, vector<8x128xbf16>
    %2 = arith.maximumf %0, %1 : vector<8x128xbf16>
    %c0_3 = arith.constant 0 : index
    %c0_4 = arith.constant 0 : index
    %3 = vector.load %arg3[%c0_3, %c0_4] : memref<8x128xbf16, #tpu.memory_space<vmem>>, vector<8x128xbf16>
    %c0_5 = arith.constant 0 : index
    %c0_6 = arith.constant 0 : index
    %4 = vector.load %arg4[%c0_5, %c0_6] : memref<8x128xbf16, #tpu.memory_space<vmem>>, vector<8x128xbf16>
    %5 = arith.maximumf %3, %4 : vector<8x128xbf16>
    %6 = arith.maximumf %2, %5 : vector<8x128xbf16>
    %c0_7 = arith.constant 0 : index
    %c0_8 = arith.constant 0 : index
    %7 = vector.load %arg5[%c0_7, %c0_8] : memref<8x128xbf16, #tpu.memory_space<vmem>>, vector<8x128xbf16>
    tpu.vector_store %arg5[%c0_7, %c0_8], %6 {strides = array<i32>} : memref<8x128xbf16, #tpu.memory_space<vmem>>, vector<8x128xbf16>,
    return
  }
  func.func @transform_0(%arg0: i32) -> (i32, i32) {
    %c0_i32 = arith.constant 0 : i32
    %c0_i32_0 = arith.constant 0 : i32
    return %c0_i32, %arg0 : i32, i32
  }
  func.func @transform_1(%arg0: i32) -> (i32, i32) {
    %c0_i32 = arith.constant 0 : i32
    %c0_i32_0 = arith.constant 0 : i32
    return %c0_i32, %arg0 : i32, i32
  }
  func.func @transform_2(%arg0: i32) -> (i32, i32) {
    %c0_i32 = arith.constant 0 : i32
    %c0_i32_0 = arith.constant 0 : i32
    return %c0_i32, %arg0 : i32, i32
  }
  func.func @transform_3(%arg0: i32) -> (i32, i32) {
    %c0_i32 = arith.constant 0 : i32
    %c0_i32_0 = arith.constant 0 : i32
    return %c0_i32, %arg0 : i32, i32
  }
  func.func @transform_4(%arg0: i32) -> (i32, i32) {
    %c0_i32 = arith.constant 0 : i32
    %c0_i32_0 = arith.constant 0 : i32
    return %c0_i32, %arg0 : i32, i32
  }
}

module attributes {stable_mosaic.version = 11 : i64} {
  func.func @_matmul_bias_act_kernel(%arg0: i32, %arg1: memref<16x72xbf16, #tpu.memory_space<vmem>>, %arg2: memref<72x128xbf16, #tpu.memory_space<vmem>>, %arg3: memref<16x1xf32, #tpu.memory_space<vmem>>, %arg4: memref<16x128xbf16, #tpu.memory_space<vmem>>) attributes {dimension_semantics = [#tpu.dimension_semantics<parallel>], iteration_bounds = array<i64: 1>, scalar_prefetch = 0 : i64, scratch_operands = 0 : i64, tpu.core_type = #tpu.core_type<tc>, window_params = [{pipeline_mode = #tpu.pipeline_mode<synchronous>, transform_indices = @transform_0, window_bounds = array<i64: 16, 72>}, {transform_indices = @transform_1, window_bounds = array<i64: 72, 128>}, {pipeline_mode = #tpu.pipeline_mode<synchronous>, transform_indices = @transform_2, window_bounds = array<i64: 16, 1>}, {transform_indices = @transform_3, window_bounds = array<i64: 16, 128>}]} {
    %c0 = arith.constant 0 : index
    %c0_0 = arith.constant 0 : index
    %0 = vector.load %arg1[%c0, %c0_0] : memref<16x72xbf16, #tpu.memory_space<vmem>>, vector<16x72xbf16>
    %c0_1 = arith.constant 0 : index
    %c0_2 = arith.constant 0 : index
    %1 = vector.load %arg2[%c0_1, %c0_2] : memref<72x128xbf16, #tpu.memory_space<vmem>>, vector<72x128xbf16>
    %cst = arith.constant dense<0.000000e+00> : vector<16x128xf32>
    %2 = tpu.matmul %0, %1, %cst {dimension_numbers = #tpu.dot_dimension_numbers<[1], [0], [0], [1], [0, 0, 1, 1], [], []>} : vector<16x72xbf16>, vector<72x128xbf16>, vector<16x128xf32> -> vector<16x128xf32>
    %c0_3 = arith.constant 0 : index
    %c0_4 = arith.constant 0 : index
    %3 = vector.load %arg3[%c0_3, %c0_4] : memref<16x1xf32, #tpu.memory_space<vmem>>, vector<16x1xf32>
    %4 = vector.broadcast %3 : vector<16x1xf32> to vector<16x128xf32>
    %5 = arith.addf %2, %4 : vector<16x128xf32>
    %cst_5 = arith.constant 0.000000e+00 : f32
    %6 = vector.broadcast %cst_5 : f32 to vector<16x128xf32>
    %7 = arith.maximumf %5, %6 : vector<16x128xf32>
    %8 = arith.truncf %7 : vector<16x128xf32> to vector<16x128xbf16>
    %c0_6 = arith.constant 0 : index
    %c0_7 = arith.constant 0 : index
    %9 = vector.load %arg4[%c0_6, %c0_7] : memref<16x128xbf16, #tpu.memory_space<vmem>>, vector<16x128xbf16>
    tpu.vector_store %arg4[%c0_6, %c0_7], %8 {strides = array<i32>} : memref<16x128xbf16, #tpu.memory_space<vmem>>, vector<16x128xbf16>,
    return
  }
  func.func @transform_0(%arg0: i32) -> (i32, i32) {
    %c0_i32 = arith.constant 0 : i32
    %c0_i32_0 = arith.constant 0 : i32
    %c0_i32_1 = arith.constant 0 : i32
    return %c0_i32, %c0_i32_0 : i32, i32
  }
  func.func @transform_1(%arg0: i32) -> (i32, i32) {
    %c0_i32 = arith.constant 0 : i32
    %c0_i32_0 = arith.constant 0 : i32
    return %c0_i32, %arg0 : i32, i32
  }
  func.func @transform_2(%arg0: i32) -> (i32, i32) {
    %c0_i32 = arith.constant 0 : i32
    %c0_i32_0 = arith.constant 0 : i32
    %c0_i32_1 = arith.constant 0 : i32
    return %c0_i32, %c0_i32_0 : i32, i32
  }
  func.func @transform_3(%arg0: i32) -> (i32, i32) {
    %c0_i32 = arith.constant 0 : i32
    %c0_i32_0 = arith.constant 0 : i32
    return %c0_i32, %arg0 : i32, i32
  }
}

module attributes {stable_mosaic.version = 11 : i64} {
  func.func @_matmul_bias_act_kernel(%arg0: i32, %arg1: memref<16x144xbf16, #tpu.memory_space<vmem>>, %arg2: memref<144x128xbf16, #tpu.memory_space<vmem>>, %arg3: memref<16x1xf32, #tpu.memory_space<vmem>>, %arg4: memref<16x128xbf16, #tpu.memory_space<vmem>>) attributes {dimension_semantics = [#tpu.dimension_semantics<parallel>], iteration_bounds = array<i64: 1>, scalar_prefetch = 0 : i64, scratch_operands = 0 : i64, tpu.core_type = #tpu.core_type<tc>, window_params = [{pipeline_mode = #tpu.pipeline_mode<synchronous>, transform_indices = @transform_0, window_bounds = array<i64: 16, 144>}, {transform_indices = @transform_1, window_bounds = array<i64: 144, 128>}, {pipeline_mode = #tpu.pipeline_mode<synchronous>, transform_indices = @transform_2, window_bounds = array<i64: 16, 1>}, {transform_indices = @transform_3, window_bounds = array<i64: 16, 128>}]} {
    %c0 = arith.constant 0 : index
    %c0_0 = arith.constant 0 : index
    %0 = vector.load %arg1[%c0, %c0_0] : memref<16x144xbf16, #tpu.memory_space<vmem>>, vector<16x144xbf16>
    %c0_1 = arith.constant 0 : index
    %c0_2 = arith.constant 0 : index
    %1 = vector.load %arg2[%c0_1, %c0_2] : memref<144x128xbf16, #tpu.memory_space<vmem>>, vector<144x128xbf16>
    %cst = arith.constant dense<0.000000e+00> : vector<16x128xf32>
    %2 = tpu.matmul %0, %1, %cst {dimension_numbers = #tpu.dot_dimension_numbers<[1], [0], [0], [1], [0, 0, 1, 1], [], []>} : vector<16x144xbf16>, vector<144x128xbf16>, vector<16x128xf32> -> vector<16x128xf32>
    %c0_3 = arith.constant 0 : index
    %c0_4 = arith.constant 0 : index
    %3 = vector.load %arg3[%c0_3, %c0_4] : memref<16x1xf32, #tpu.memory_space<vmem>>, vector<16x1xf32>
    %4 = vector.broadcast %3 : vector<16x1xf32> to vector<16x128xf32>
    %5 = arith.addf %2, %4 : vector<16x128xf32>
    %cst_5 = arith.constant 0.000000e+00 : f32
    %6 = vector.broadcast %cst_5 : f32 to vector<16x128xf32>
    %7 = arith.maximumf %5, %6 : vector<16x128xf32>
    %8 = arith.truncf %7 : vector<16x128xf32> to vector<16x128xbf16>
    %c0_6 = arith.constant 0 : index
    %c0_7 = arith.constant 0 : index
    %9 = vector.load %arg4[%c0_6, %c0_7] : memref<16x128xbf16, #tpu.memory_space<vmem>>, vector<16x128xbf16>
    tpu.vector_store %arg4[%c0_6, %c0_7], %8 {strides = array<i32>} : memref<16x128xbf16, #tpu.memory_space<vmem>>, vector<16x128xbf16>,
    return
  }
  func.func @transform_0(%arg0: i32) -> (i32, i32) {
    %c0_i32 = arith.constant 0 : i32
    %c0_i32_0 = arith.constant 0 : i32
    %c0_i32_1 = arith.constant 0 : i32
    return %c0_i32, %c0_i32_0 : i32, i32
  }
  func.func @transform_1(%arg0: i32) -> (i32, i32) {
    %c0_i32 = arith.constant 0 : i32
    %c0_i32_0 = arith.constant 0 : i32
    return %c0_i32, %arg0 : i32, i32
  }
  func.func @transform_2(%arg0: i32) -> (i32, i32) {
    %c0_i32 = arith.constant 0 : i32
    %c0_i32_0 = arith.constant 0 : i32
    %c0_i32_1 = arith.constant 0 : i32
    return %c0_i32, %c0_i32_0 : i32, i32
  }
  func.func @transform_3(%arg0: i32) -> (i32, i32) {
    %c0_i32 = arith.constant 0 : i32
    %c0_i32_0 = arith.constant 0 : i32
    return %c0_i32, %arg0 : i32, i32
  }
}

module attributes {stable_mosaic.version = 11 : i64} {
  func.func @_max4_kernel(%arg0: i32, %arg1: memref<16x32xbf16, #tpu.memory_space<vmem>>, %arg2: memref<16x32xbf16, #tpu.memory_space<vmem>>, %arg3: memref<16x32xbf16, #tpu.memory_space<vmem>>, %arg4: memref<16x32xbf16, #tpu.memory_space<vmem>>, %arg5: memref<16x32xbf16, #tpu.memory_space<vmem>>) attributes {dimension_semantics = [#tpu.dimension_semantics<parallel>], iteration_bounds = array<i64: 1>, scalar_prefetch = 0 : i64, scratch_operands = 0 : i64, tpu.core_type = #tpu.core_type<tc>, window_params = [{transform_indices = @transform_0, window_bounds = array<i64: 16, 32>}, {transform_indices = @transform_1, window_bounds = array<i64: 16, 32>}, {transform_indices = @transform_2, window_bounds = array<i64: 16, 32>}, {transform_indices = @transform_3, window_bounds = array<i64: 16, 32>}, {transform_indices = @transform_4, window_bounds = array<i64: 16, 32>}]} {
    %c0 = arith.constant 0 : index
    %c0_0 = arith.constant 0 : index
    %0 = vector.load %arg1[%c0, %c0_0] : memref<16x32xbf16, #tpu.memory_space<vmem>>, vector<16x32xbf16>
    %c0_1 = arith.constant 0 : index
    %c0_2 = arith.constant 0 : index
    %1 = vector.load %arg2[%c0_1, %c0_2] : memref<16x32xbf16, #tpu.memory_space<vmem>>, vector<16x32xbf16>
    %2 = arith.maximumf %0, %1 : vector<16x32xbf16>
    %c0_3 = arith.constant 0 : index
    %c0_4 = arith.constant 0 : index
    %3 = vector.load %arg3[%c0_3, %c0_4] : memref<16x32xbf16, #tpu.memory_space<vmem>>, vector<16x32xbf16>
    %c0_5 = arith.constant 0 : index
    %c0_6 = arith.constant 0 : index
    %4 = vector.load %arg4[%c0_5, %c0_6] : memref<16x32xbf16, #tpu.memory_space<vmem>>, vector<16x32xbf16>
    %5 = arith.maximumf %3, %4 : vector<16x32xbf16>
    %6 = arith.maximumf %2, %5 : vector<16x32xbf16>
    %c0_7 = arith.constant 0 : index
    %c0_8 = arith.constant 0 : index
    %7 = vector.load %arg5[%c0_7, %c0_8] : memref<16x32xbf16, #tpu.memory_space<vmem>>, vector<16x32xbf16>
    tpu.vector_store %arg5[%c0_7, %c0_8], %6 {strides = array<i32>} : memref<16x32xbf16, #tpu.memory_space<vmem>>, vector<16x32xbf16>,
    return
  }
  func.func @transform_0(%arg0: i32) -> (i32, i32) {
    %c0_i32 = arith.constant 0 : i32
    %c0_i32_0 = arith.constant 0 : i32
    return %c0_i32, %arg0 : i32, i32
  }
  func.func @transform_1(%arg0: i32) -> (i32, i32) {
    %c0_i32 = arith.constant 0 : i32
    %c0_i32_0 = arith.constant 0 : i32
    return %c0_i32, %arg0 : i32, i32
  }
  func.func @transform_2(%arg0: i32) -> (i32, i32) {
    %c0_i32 = arith.constant 0 : i32
    %c0_i32_0 = arith.constant 0 : i32
    return %c0_i32, %arg0 : i32, i32
  }
  func.func @transform_3(%arg0: i32) -> (i32, i32) {
    %c0_i32 = arith.constant 0 : i32
    %c0_i32_0 = arith.constant 0 : i32
    return %c0_i32, %arg0 : i32, i32
  }
  func.func @transform_4(%arg0: i32) -> (i32, i32) {
    %c0_i32 = arith.constant 0 : i32
    %c0_i32_0 = arith.constant 0 : i32
    return %c0_i32, %arg0 : i32, i32
  }
}

module attributes {stable_mosaic.version = 11 : i64} {
  func.func @_matmul_bias_act_kernel(%arg0: i32, %arg1: memref<32x144xbf16, #tpu.memory_space<vmem>>, %arg2: memref<144x32xbf16, #tpu.memory_space<vmem>>, %arg3: memref<32x1xf32, #tpu.memory_space<vmem>>, %arg4: memref<32x32xbf16, #tpu.memory_space<vmem>>) attributes {dimension_semantics = [#tpu.dimension_semantics<parallel>], iteration_bounds = array<i64: 1>, scalar_prefetch = 0 : i64, scratch_operands = 0 : i64, tpu.core_type = #tpu.core_type<tc>, window_params = [{pipeline_mode = #tpu.pipeline_mode<synchronous>, transform_indices = @transform_0, window_bounds = array<i64: 32, 144>}, {transform_indices = @transform_1, window_bounds = array<i64: 144, 32>}, {pipeline_mode = #tpu.pipeline_mode<synchronous>, transform_indices = @transform_2, window_bounds = array<i64: 32, 1>}, {transform_indices = @transform_3, window_bounds = array<i64: 32, 32>}]} {
    %c0 = arith.constant 0 : index
    %c0_0 = arith.constant 0 : index
    %0 = vector.load %arg1[%c0, %c0_0] : memref<32x144xbf16, #tpu.memory_space<vmem>>, vector<32x144xbf16>
    %c0_1 = arith.constant 0 : index
    %c0_2 = arith.constant 0 : index
    %1 = vector.load %arg2[%c0_1, %c0_2] : memref<144x32xbf16, #tpu.memory_space<vmem>>, vector<144x32xbf16>
    %cst = arith.constant dense<0.000000e+00> : vector<32x32xf32>
    %2 = tpu.matmul %0, %1, %cst {dimension_numbers = #tpu.dot_dimension_numbers<[1], [0], [0], [1], [0, 0, 1, 1], [], []>} : vector<32x144xbf16>, vector<144x32xbf16>, vector<32x32xf32> -> vector<32x32xf32>
    %c0_3 = arith.constant 0 : index
    %c0_4 = arith.constant 0 : index
    %3 = vector.load %arg3[%c0_3, %c0_4] : memref<32x1xf32, #tpu.memory_space<vmem>>, vector<32x1xf32>
    %4 = vector.broadcast %3 : vector<32x1xf32> to vector<32x32xf32>
    %5 = arith.addf %2, %4 : vector<32x32xf32>
    %cst_5 = arith.constant 0.000000e+00 : f32
    %6 = vector.broadcast %cst_5 : f32 to vector<32x32xf32>
    %7 = arith.maximumf %5, %6 : vector<32x32xf32>
    %8 = arith.truncf %7 : vector<32x32xf32> to vector<32x32xbf16>
    %c0_6 = arith.constant 0 : index
    %c0_7 = arith.constant 0 : index
    %9 = vector.load %arg4[%c0_6, %c0_7] : memref<32x32xbf16, #tpu.memory_space<vmem>>, vector<32x32xbf16>
    tpu.vector_store %arg4[%c0_6, %c0_7], %8 {strides = array<i32>} : memref<32x32xbf16, #tpu.memory_space<vmem>>, vector<32x32xbf16>,
    return
  }
  func.func @transform_0(%arg0: i32) -> (i32, i32) {
    %c0_i32 = arith.constant 0 : i32
    %c0_i32_0 = arith.constant 0 : i32
    %c0_i32_1 = arith.constant 0 : i32
    return %c0_i32, %c0_i32_0 : i32, i32
  }
  func.func @transform_1(%arg0: i32) -> (i32, i32) {
    %c0_i32 = arith.constant 0 : i32
    %c0_i32_0 = arith.constant 0 : i32
    return %c0_i32, %arg0 : i32, i32
  }
  func.func @transform_2(%arg0: i32) -> (i32, i32) {
    %c0_i32 = arith.constant 0 : i32
    %c0_i32_0 = arith.constant 0 : i32
    %c0_i32_1 = arith.constant 0 : i32
    return %c0_i32, %c0_i32_0 : i32, i32
  }
  func.func @transform_3(%arg0: i32) -> (i32, i32) {
    %c0_i32 = arith.constant 0 : i32
    %c0_i32_0 = arith.constant 0 : i32
    return %c0_i32, %arg0 : i32, i32
  }
}

module attributes {stable_mosaic.version = 11 : i64} {
  func.func @_matmul_bias_act_kernel(%arg0: i32, %arg1: memref<32x288xbf16, #tpu.memory_space<vmem>>, %arg2: memref<288x32xbf16, #tpu.memory_space<vmem>>, %arg3: memref<32x1xf32, #tpu.memory_space<vmem>>, %arg4: memref<32x32xbf16, #tpu.memory_space<vmem>>) attributes {dimension_semantics = [#tpu.dimension_semantics<parallel>], iteration_bounds = array<i64: 1>, scalar_prefetch = 0 : i64, scratch_operands = 0 : i64, tpu.core_type = #tpu.core_type<tc>, window_params = [{pipeline_mode = #tpu.pipeline_mode<synchronous>, transform_indices = @transform_0, window_bounds = array<i64: 32, 288>}, {transform_indices = @transform_1, window_bounds = array<i64: 288, 32>}, {pipeline_mode = #tpu.pipeline_mode<synchronous>, transform_indices = @transform_2, window_bounds = array<i64: 32, 1>}, {transform_indices = @transform_3, window_bounds = array<i64: 32, 32>}]} {
    %c0 = arith.constant 0 : index
    %c0_0 = arith.constant 0 : index
    %0 = vector.load %arg1[%c0, %c0_0] : memref<32x288xbf16, #tpu.memory_space<vmem>>, vector<32x288xbf16>
    %c0_1 = arith.constant 0 : index
    %c0_2 = arith.constant 0 : index
    %1 = vector.load %arg2[%c0_1, %c0_2] : memref<288x32xbf16, #tpu.memory_space<vmem>>, vector<288x32xbf16>
    %cst = arith.constant dense<0.000000e+00> : vector<32x32xf32>
    %2 = tpu.matmul %0, %1, %cst {dimension_numbers = #tpu.dot_dimension_numbers<[1], [0], [0], [1], [0, 0, 1, 1], [], []>} : vector<32x288xbf16>, vector<288x32xbf16>, vector<32x32xf32> -> vector<32x32xf32>
    %c0_3 = arith.constant 0 : index
    %c0_4 = arith.constant 0 : index
    %3 = vector.load %arg3[%c0_3, %c0_4] : memref<32x1xf32, #tpu.memory_space<vmem>>, vector<32x1xf32>
    %4 = vector.broadcast %3 : vector<32x1xf32> to vector<32x32xf32>
    %5 = arith.addf %2, %4 : vector<32x32xf32>
    %cst_5 = arith.constant 0.000000e+00 : f32
    %6 = vector.broadcast %cst_5 : f32 to vector<32x32xf32>
    %7 = arith.maximumf %5, %6 : vector<32x32xf32>
    %8 = arith.truncf %7 : vector<32x32xf32> to vector<32x32xbf16>
    %c0_6 = arith.constant 0 : index
    %c0_7 = arith.constant 0 : index
    %9 = vector.load %arg4[%c0_6, %c0_7] : memref<32x32xbf16, #tpu.memory_space<vmem>>, vector<32x32xbf16>
    tpu.vector_store %arg4[%c0_6, %c0_7], %8 {strides = array<i32>} : memref<32x32xbf16, #tpu.memory_space<vmem>>, vector<32x32xbf16>,
    return
  }
  func.func @transform_0(%arg0: i32) -> (i32, i32) {
    %c0_i32 = arith.constant 0 : i32
    %c0_i32_0 = arith.constant 0 : i32
    %c0_i32_1 = arith.constant 0 : i32
    return %c0_i32, %c0_i32_0 : i32, i32
  }
  func.func @transform_1(%arg0: i32) -> (i32, i32) {
    %c0_i32 = arith.constant 0 : i32
    %c0_i32_0 = arith.constant 0 : i32
    return %c0_i32, %arg0 : i32, i32
  }
  func.func @transform_2(%arg0: i32) -> (i32, i32) {
    %c0_i32 = arith.constant 0 : i32
    %c0_i32_0 = arith.constant 0 : i32
    %c0_i32_1 = arith.constant 0 : i32
    return %c0_i32, %c0_i32_0 : i32, i32
  }
  func.func @transform_3(%arg0: i32) -> (i32, i32) {
    %c0_i32 = arith.constant 0 : i32
    %c0_i32_0 = arith.constant 0 : i32
    return %c0_i32, %arg0 : i32, i32
  }
}

module attributes {stable_mosaic.version = 11 : i64} {
  func.func @_matmul_bias_act_kernel(%arg0: i32, %arg1: memref<16x432xbf16, #tpu.memory_space<vmem>>, %arg2: memref<432x128xbf16, #tpu.memory_space<vmem>>, %arg3: memref<16x1xf32, #tpu.memory_space<vmem>>, %arg4: memref<16x128xbf16, #tpu.memory_space<vmem>>) attributes {dimension_semantics = [#tpu.dimension_semantics<parallel>], iteration_bounds = array<i64: 1>, scalar_prefetch = 0 : i64, scratch_operands = 0 : i64, tpu.core_type = #tpu.core_type<tc>, window_params = [{pipeline_mode = #tpu.pipeline_mode<synchronous>, transform_indices = @transform_0, window_bounds = array<i64: 16, 432>}, {transform_indices = @transform_1, window_bounds = array<i64: 432, 128>}, {pipeline_mode = #tpu.pipeline_mode<synchronous>, transform_indices = @transform_2, window_bounds = array<i64: 16, 1>}, {transform_indices = @transform_3, window_bounds = array<i64: 16, 128>}]} {
    %c0 = arith.constant 0 : index
    %c0_0 = arith.constant 0 : index
    %0 = vector.load %arg1[%c0, %c0_0] : memref<16x432xbf16, #tpu.memory_space<vmem>>, vector<16x432xbf16>
    %c0_1 = arith.constant 0 : index
    %c0_2 = arith.constant 0 : index
    %1 = vector.load %arg2[%c0_1, %c0_2] : memref<432x128xbf16, #tpu.memory_space<vmem>>, vector<432x128xbf16>
    %cst = arith.constant dense<0.000000e+00> : vector<16x128xf32>
    %2 = tpu.matmul %0, %1, %cst {dimension_numbers = #tpu.dot_dimension_numbers<[1], [0], [0], [1], [0, 0, 1, 1], [], []>} : vector<16x432xbf16>, vector<432x128xbf16>, vector<16x128xf32> -> vector<16x128xf32>
    %c0_3 = arith.constant 0 : index
    %c0_4 = arith.constant 0 : index
    %3 = vector.load %arg3[%c0_3, %c0_4] : memref<16x1xf32, #tpu.memory_space<vmem>>, vector<16x1xf32>
    %4 = vector.broadcast %3 : vector<16x1xf32> to vector<16x128xf32>
    %5 = arith.addf %2, %4 : vector<16x128xf32>
    %cst_5 = arith.constant 0.000000e+00 : f32
    %6 = vector.broadcast %cst_5 : f32 to vector<16x128xf32>
    %7 = arith.maximumf %5, %6 : vector<16x128xf32>
    %8 = arith.truncf %7 : vector<16x128xf32> to vector<16x128xbf16>
    %c0_6 = arith.constant 0 : index
    %c0_7 = arith.constant 0 : index
    %9 = vector.load %arg4[%c0_6, %c0_7] : memref<16x128xbf16, #tpu.memory_space<vmem>>, vector<16x128xbf16>
    tpu.vector_store %arg4[%c0_6, %c0_7], %8 {strides = array<i32>} : memref<16x128xbf16, #tpu.memory_space<vmem>>, vector<16x128xbf16>,
    return
  }
  func.func @transform_0(%arg0: i32) -> (i32, i32) {
    %c0_i32 = arith.constant 0 : i32
    %c0_i32_0 = arith.constant 0 : i32
    %c0_i32_1 = arith.constant 0 : i32
    return %c0_i32, %c0_i32_0 : i32, i32
  }
  func.func @transform_1(%arg0: i32) -> (i32, i32) {
    %c0_i32 = arith.constant 0 : i32
    %c0_i32_0 = arith.constant 0 : i32
    return %c0_i32, %arg0 : i32, i32
  }
  func.func @transform_2(%arg0: i32) -> (i32, i32) {
    %c0_i32 = arith.constant 0 : i32
    %c0_i32_0 = arith.constant 0 : i32
    %c0_i32_1 = arith.constant 0 : i32
    return %c0_i32, %c0_i32_0 : i32, i32
  }
  func.func @transform_3(%arg0: i32) -> (i32, i32) {
    %c0_i32 = arith.constant 0 : i32
    %c0_i32_0 = arith.constant 0 : i32
    return %c0_i32, %arg0 : i32, i32
  }
}

module attributes {stable_mosaic.version = 11 : i64} {
  func.func @_max4_kernel(%arg0: i32, %arg1: memref<32x8xbf16, #tpu.memory_space<vmem>>, %arg2: memref<32x8xbf16, #tpu.memory_space<vmem>>, %arg3: memref<32x8xbf16, #tpu.memory_space<vmem>>, %arg4: memref<32x8xbf16, #tpu.memory_space<vmem>>, %arg5: memref<32x8xbf16, #tpu.memory_space<vmem>>) attributes {dimension_semantics = [#tpu.dimension_semantics<parallel>], iteration_bounds = array<i64: 1>, scalar_prefetch = 0 : i64, scratch_operands = 0 : i64, tpu.core_type = #tpu.core_type<tc>, window_params = [{transform_indices = @transform_0, window_bounds = array<i64: 32, 8>}, {transform_indices = @transform_1, window_bounds = array<i64: 32, 8>}, {transform_indices = @transform_2, window_bounds = array<i64: 32, 8>}, {transform_indices = @transform_3, window_bounds = array<i64: 32, 8>}, {transform_indices = @transform_4, window_bounds = array<i64: 32, 8>}]} {
    %c0 = arith.constant 0 : index
    %c0_0 = arith.constant 0 : index
    %0 = vector.load %arg1[%c0, %c0_0] : memref<32x8xbf16, #tpu.memory_space<vmem>>, vector<32x8xbf16>
    %c0_1 = arith.constant 0 : index
    %c0_2 = arith.constant 0 : index
    %1 = vector.load %arg2[%c0_1, %c0_2] : memref<32x8xbf16, #tpu.memory_space<vmem>>, vector<32x8xbf16>
    %2 = arith.maximumf %0, %1 : vector<32x8xbf16>
    %c0_3 = arith.constant 0 : index
    %c0_4 = arith.constant 0 : index
    %3 = vector.load %arg3[%c0_3, %c0_4] : memref<32x8xbf16, #tpu.memory_space<vmem>>, vector<32x8xbf16>
    %c0_5 = arith.constant 0 : index
    %c0_6 = arith.constant 0 : index
    %4 = vector.load %arg4[%c0_5, %c0_6] : memref<32x8xbf16, #tpu.memory_space<vmem>>, vector<32x8xbf16>
    %5 = arith.maximumf %3, %4 : vector<32x8xbf16>
    %6 = arith.maximumf %2, %5 : vector<32x8xbf16>
    %c0_7 = arith.constant 0 : index
    %c0_8 = arith.constant 0 : index
    %7 = vector.load %arg5[%c0_7, %c0_8] : memref<32x8xbf16, #tpu.memory_space<vmem>>, vector<32x8xbf16>
    tpu.vector_store %arg5[%c0_7, %c0_8], %6 {strides = array<i32>} : memref<32x8xbf16, #tpu.memory_space<vmem>>, vector<32x8xbf16>,
    return
  }
  func.func @transform_0(%arg0: i32) -> (i32, i32) {
    %c0_i32 = arith.constant 0 : i32
    %c0_i32_0 = arith.constant 0 : i32
    return %c0_i32, %arg0 : i32, i32
  }
  func.func @transform_1(%arg0: i32) -> (i32, i32) {
    %c0_i32 = arith.constant 0 : i32
    %c0_i32_0 = arith.constant 0 : i32
    return %c0_i32, %arg0 : i32, i32
  }
  func.func @transform_2(%arg0: i32) -> (i32, i32) {
    %c0_i32 = arith.constant 0 : i32
    %c0_i32_0 = arith.constant 0 : i32
    return %c0_i32, %arg0 : i32, i32
  }
  func.func @transform_3(%arg0: i32) -> (i32, i32) {
    %c0_i32 = arith.constant 0 : i32
    %c0_i32_0 = arith.constant 0 : i32
    return %c0_i32, %arg0 : i32, i32
  }
  func.func @transform_4(%arg0: i32) -> (i32, i32) {
    %c0_i32 = arith.constant 0 : i32
    %c0_i32_0 = arith.constant 0 : i32
    return %c0_i32, %arg0 : i32, i32
  }
}

module attributes {stable_mosaic.version = 11 : i64} {
  func.func @_matmul_bias_act_kernel(%arg0: i32, %arg1: memref<64x288xbf16, #tpu.memory_space<vmem>>, %arg2: memref<288x8xbf16, #tpu.memory_space<vmem>>, %arg3: memref<64x1xf32, #tpu.memory_space<vmem>>, %arg4: memref<64x8xbf16, #tpu.memory_space<vmem>>) attributes {dimension_semantics = [#tpu.dimension_semantics<parallel>], iteration_bounds = array<i64: 1>, scalar_prefetch = 0 : i64, scratch_operands = 0 : i64, tpu.core_type = #tpu.core_type<tc>, window_params = [{pipeline_mode = #tpu.pipeline_mode<synchronous>, transform_indices = @transform_0, window_bounds = array<i64: 64, 288>}, {transform_indices = @transform_1, window_bounds = array<i64: 288, 8>}, {pipeline_mode = #tpu.pipeline_mode<synchronous>, transform_indices = @transform_2, window_bounds = array<i64: 64, 1>}, {transform_indices = @transform_3, window_bounds = array<i64: 64, 8>}]} {
    %c0 = arith.constant 0 : index
    %c0_0 = arith.constant 0 : index
    %0 = vector.load %arg1[%c0, %c0_0] : memref<64x288xbf16, #tpu.memory_space<vmem>>, vector<64x288xbf16>
    %c0_1 = arith.constant 0 : index
    %c0_2 = arith.constant 0 : index
    %1 = vector.load %arg2[%c0_1, %c0_2] : memref<288x8xbf16, #tpu.memory_space<vmem>>, vector<288x8xbf16>
    %cst = arith.constant dense<0.000000e+00> : vector<64x8xf32>
    %2 = tpu.matmul %0, %1, %cst {dimension_numbers = #tpu.dot_dimension_numbers<[1], [0], [0], [1], [0, 0, 1, 1], [], []>} : vector<64x288xbf16>, vector<288x8xbf16>, vector<64x8xf32> -> vector<64x8xf32>
    %c0_3 = arith.constant 0 : index
    %c0_4 = arith.constant 0 : index
    %3 = vector.load %arg3[%c0_3, %c0_4] : memref<64x1xf32, #tpu.memory_space<vmem>>, vector<64x1xf32>
    %4 = vector.broadcast %3 : vector<64x1xf32> to vector<64x8xf32>
    %5 = arith.addf %2, %4 : vector<64x8xf32>
    %cst_5 = arith.constant 0.000000e+00 : f32
    %6 = vector.broadcast %cst_5 : f32 to vector<64x8xf32>
    %7 = arith.maximumf %5, %6 : vector<64x8xf32>
    %8 = arith.truncf %7 : vector<64x8xf32> to vector<64x8xbf16>
    %c0_6 = arith.constant 0 : index
    %c0_7 = arith.constant 0 : index
    %9 = vector.load %arg4[%c0_6, %c0_7] : memref<64x8xbf16, #tpu.memory_space<vmem>>, vector<64x8xbf16>
    tpu.vector_store %arg4[%c0_6, %c0_7], %8 {strides = array<i32>} : memref<64x8xbf16, #tpu.memory_space<vmem>>, vector<64x8xbf16>,
    return
  }
  func.func @transform_0(%arg0: i32) -> (i32, i32) {
    %c0_i32 = arith.constant 0 : i32
    %c0_i32_0 = arith.constant 0 : i32
    %c0_i32_1 = arith.constant 0 : i32
    return %c0_i32, %c0_i32_0 : i32, i32
  }
  func.func @transform_1(%arg0: i32) -> (i32, i32) {
    %c0_i32 = arith.constant 0 : i32
    %c0_i32_0 = arith.constant 0 : i32
    return %c0_i32, %arg0 : i32, i32
  }
  func.func @transform_2(%arg0: i32) -> (i32, i32) {
    %c0_i32 = arith.constant 0 : i32
    %c0_i32_0 = arith.constant 0 : i32
    %c0_i32_1 = arith.constant 0 : i32
    return %c0_i32, %c0_i32_0 : i32, i32
  }
  func.func @transform_3(%arg0: i32) -> (i32, i32) {
    %c0_i32 = arith.constant 0 : i32
    %c0_i32_0 = arith.constant 0 : i32
    return %c0_i32, %arg0 : i32, i32
  }
}

module attributes {stable_mosaic.version = 11 : i64} {
  func.func @_matmul_bias_act_kernel(%arg0: i32, %arg1: memref<64x576xbf16, #tpu.memory_space<vmem>>, %arg2: memref<576x8xbf16, #tpu.memory_space<vmem>>, %arg3: memref<64x1xf32, #tpu.memory_space<vmem>>, %arg4: memref<64x8xbf16, #tpu.memory_space<vmem>>) attributes {dimension_semantics = [#tpu.dimension_semantics<parallel>], iteration_bounds = array<i64: 1>, scalar_prefetch = 0 : i64, scratch_operands = 0 : i64, tpu.core_type = #tpu.core_type<tc>, window_params = [{pipeline_mode = #tpu.pipeline_mode<synchronous>, transform_indices = @transform_0, window_bounds = array<i64: 64, 576>}, {transform_indices = @transform_1, window_bounds = array<i64: 576, 8>}, {pipeline_mode = #tpu.pipeline_mode<synchronous>, transform_indices = @transform_2, window_bounds = array<i64: 64, 1>}, {transform_indices = @transform_3, window_bounds = array<i64: 64, 8>}]} {
    %c0 = arith.constant 0 : index
    %c0_0 = arith.constant 0 : index
    %0 = vector.load %arg1[%c0, %c0_0] : memref<64x576xbf16, #tpu.memory_space<vmem>>, vector<64x576xbf16>
    %c0_1 = arith.constant 0 : index
    %c0_2 = arith.constant 0 : index
    %1 = vector.load %arg2[%c0_1, %c0_2] : memref<576x8xbf16, #tpu.memory_space<vmem>>, vector<576x8xbf16>
    %cst = arith.constant dense<0.000000e+00> : vector<64x8xf32>
    %2 = tpu.matmul %0, %1, %cst {dimension_numbers = #tpu.dot_dimension_numbers<[1], [0], [0], [1], [0, 0, 1, 1], [], []>} : vector<64x576xbf16>, vector<576x8xbf16>, vector<64x8xf32> -> vector<64x8xf32>
    %c0_3 = arith.constant 0 : index
    %c0_4 = arith.constant 0 : index
    %3 = vector.load %arg3[%c0_3, %c0_4] : memref<64x1xf32, #tpu.memory_space<vmem>>, vector<64x1xf32>
    %4 = vector.broadcast %3 : vector<64x1xf32> to vector<64x8xf32>
    %5 = arith.addf %2, %4 : vector<64x8xf32>
    %cst_5 = arith.constant 0.000000e+00 : f32
    %6 = vector.broadcast %cst_5 : f32 to vector<64x8xf32>
    %7 = arith.maximumf %5, %6 : vector<64x8xf32>
    %8 = arith.truncf %7 : vector<64x8xf32> to vector<64x8xbf16>
    %c0_6 = arith.constant 0 : index
    %c0_7 = arith.constant 0 : index
    %9 = vector.load %arg4[%c0_6, %c0_7] : memref<64x8xbf16, #tpu.memory_space<vmem>>, vector<64x8xbf16>
    tpu.vector_store %arg4[%c0_6, %c0_7], %8 {strides = array<i32>} : memref<64x8xbf16, #tpu.memory_space<vmem>>, vector<64x8xbf16>,
    return
  }
  func.func @transform_0(%arg0: i32) -> (i32, i32) {
    %c0_i32 = arith.constant 0 : i32
    %c0_i32_0 = arith.constant 0 : i32
    %c0_i32_1 = arith.constant 0 : i32
    return %c0_i32, %c0_i32_0 : i32, i32
  }
  func.func @transform_1(%arg0: i32) -> (i32, i32) {
    %c0_i32 = arith.constant 0 : i32
    %c0_i32_0 = arith.constant 0 : i32
    return %c0_i32, %arg0 : i32, i32
  }
  func.func @transform_2(%arg0: i32) -> (i32, i32) {
    %c0_i32 = arith.constant 0 : i32
    %c0_i32_0 = arith.constant 0 : i32
    %c0_i32_1 = arith.constant 0 : i32
    return %c0_i32, %c0_i32_0 : i32, i32
  }
  func.func @transform_3(%arg0: i32) -> (i32, i32) {
    %c0_i32 = arith.constant 0 : i32
    %c0_i32_0 = arith.constant 0 : i32
    return %c0_i32, %arg0 : i32, i32
  }
}

module attributes {stable_mosaic.version = 11 : i64} {
  func.func @_matmul_bias_act_kernel(%arg0: i32, %arg1: memref<32x864xbf16, #tpu.memory_space<vmem>>, %arg2: memref<864x32xbf16, #tpu.memory_space<vmem>>, %arg3: memref<32x1xf32, #tpu.memory_space<vmem>>, %arg4: memref<32x32xbf16, #tpu.memory_space<vmem>>) attributes {dimension_semantics = [#tpu.dimension_semantics<parallel>], iteration_bounds = array<i64: 1>, scalar_prefetch = 0 : i64, scratch_operands = 0 : i64, tpu.core_type = #tpu.core_type<tc>, window_params = [{pipeline_mode = #tpu.pipeline_mode<synchronous>, transform_indices = @transform_0, window_bounds = array<i64: 32, 864>}, {transform_indices = @transform_1, window_bounds = array<i64: 864, 32>}, {pipeline_mode = #tpu.pipeline_mode<synchronous>, transform_indices = @transform_2, window_bounds = array<i64: 32, 1>}, {transform_indices = @transform_3, window_bounds = array<i64: 32, 32>}]} {
    %c0 = arith.constant 0 : index
    %c0_0 = arith.constant 0 : index
    %0 = vector.load %arg1[%c0, %c0_0] : memref<32x864xbf16, #tpu.memory_space<vmem>>, vector<32x864xbf16>
    %c0_1 = arith.constant 0 : index
    %c0_2 = arith.constant 0 : index
    %1 = vector.load %arg2[%c0_1, %c0_2] : memref<864x32xbf16, #tpu.memory_space<vmem>>, vector<864x32xbf16>
    %cst = arith.constant dense<0.000000e+00> : vector<32x32xf32>
    %2 = tpu.matmul %0, %1, %cst {dimension_numbers = #tpu.dot_dimension_numbers<[1], [0], [0], [1], [0, 0, 1, 1], [], []>} : vector<32x864xbf16>, vector<864x32xbf16>, vector<32x32xf32> -> vector<32x32xf32>
    %c0_3 = arith.constant 0 : index
    %c0_4 = arith.constant 0 : index
    %3 = vector.load %arg3[%c0_3, %c0_4] : memref<32x1xf32, #tpu.memory_space<vmem>>, vector<32x1xf32>
    %4 = vector.broadcast %3 : vector<32x1xf32> to vector<32x32xf32>
    %5 = arith.addf %2, %4 : vector<32x32xf32>
    %cst_5 = arith.constant 0.000000e+00 : f32
    %6 = vector.broadcast %cst_5 : f32 to vector<32x32xf32>
    %7 = arith.maximumf %5, %6 : vector<32x32xf32>
    %8 = arith.truncf %7 : vector<32x32xf32> to vector<32x32xbf16>
    %c0_6 = arith.constant 0 : index
    %c0_7 = arith.constant 0 : index
    %9 = vector.load %arg4[%c0_6, %c0_7] : memref<32x32xbf16, #tpu.memory_space<vmem>>, vector<32x32xbf16>
    tpu.vector_store %arg4[%c0_6, %c0_7], %8 {strides = array<i32>} : memref<32x32xbf16, #tpu.memory_space<vmem>>, vector<32x32xbf16>,
    return
  }
  func.func @transform_0(%arg0: i32) -> (i32, i32) {
    %c0_i32 = arith.constant 0 : i32
    %c0_i32_0 = arith.constant 0 : i32
    %c0_i32_1 = arith.constant 0 : i32
    return %c0_i32, %c0_i32_0 : i32, i32
  }
  func.func @transform_1(%arg0: i32) -> (i32, i32) {
    %c0_i32 = arith.constant 0 : i32
    %c0_i32_0 = arith.constant 0 : i32
    return %c0_i32, %arg0 : i32, i32
  }
  func.func @transform_2(%arg0: i32) -> (i32, i32) {
    %c0_i32 = arith.constant 0 : i32
    %c0_i32_0 = arith.constant 0 : i32
    %c0_i32_1 = arith.constant 0 : i32
    return %c0_i32, %c0_i32_0 : i32, i32
  }
  func.func @transform_3(%arg0: i32) -> (i32, i32) {
    %c0_i32 = arith.constant 0 : i32
    %c0_i32_0 = arith.constant 0 : i32
    return %c0_i32, %arg0 : i32, i32
  }
}

module attributes {stable_mosaic.version = 11 : i64} {
  func.func @_matmul_bias_act_kernel(%arg0: i32, %arg1: memref<16x576xbf16, #tpu.memory_space<vmem>>, %arg2: memref<576x128xbf16, #tpu.memory_space<vmem>>, %arg3: memref<16x1xf32, #tpu.memory_space<vmem>>, %arg4: memref<16x128xbf16, #tpu.memory_space<vmem>>) attributes {dimension_semantics = [#tpu.dimension_semantics<parallel>], iteration_bounds = array<i64: 1>, scalar_prefetch = 0 : i64, scratch_operands = 0 : i64, tpu.core_type = #tpu.core_type<tc>, window_params = [{pipeline_mode = #tpu.pipeline_mode<synchronous>, transform_indices = @transform_0, window_bounds = array<i64: 16, 576>}, {transform_indices = @transform_1, window_bounds = array<i64: 576, 128>}, {pipeline_mode = #tpu.pipeline_mode<synchronous>, transform_indices = @transform_2, window_bounds = array<i64: 16, 1>}, {transform_indices = @transform_3, window_bounds = array<i64: 16, 128>}]} {
    %c0 = arith.constant 0 : index
    %c0_0 = arith.constant 0 : index
    %0 = vector.load %arg1[%c0, %c0_0] : memref<16x576xbf16, #tpu.memory_space<vmem>>, vector<16x576xbf16>
    %c0_1 = arith.constant 0 : index
    %c0_2 = arith.constant 0 : index
    %1 = vector.load %arg2[%c0_1, %c0_2] : memref<576x128xbf16, #tpu.memory_space<vmem>>, vector<576x128xbf16>
    %cst = arith.constant dense<0.000000e+00> : vector<16x128xf32>
    %2 = tpu.matmul %0, %1, %cst {dimension_numbers = #tpu.dot_dimension_numbers<[1], [0], [0], [1], [0, 0, 1, 1], [], []>} : vector<16x576xbf16>, vector<576x128xbf16>, vector<16x128xf32> -> vector<16x128xf32>
    %c0_3 = arith.constant 0 : index
    %c0_4 = arith.constant 0 : index
    %3 = vector.load %arg3[%c0_3, %c0_4] : memref<16x1xf32, #tpu.memory_space<vmem>>, vector<16x1xf32>
    %4 = vector.broadcast %3 : vector<16x1xf32> to vector<16x128xf32>
    %5 = arith.addf %2, %4 : vector<16x128xf32>
    %cst_5 = arith.constant 0.000000e+00 : f32
    %6 = vector.broadcast %cst_5 : f32 to vector<16x128xf32>
    %7 = arith.maximumf %5, %6 : vector<16x128xf32>
    %8 = arith.truncf %7 : vector<16x128xf32> to vector<16x128xbf16>
    %c0_6 = arith.constant 0 : index
    %c0_7 = arith.constant 0 : index
    %9 = vector.load %arg4[%c0_6, %c0_7] : memref<16x128xbf16, #tpu.memory_space<vmem>>, vector<16x128xbf16>
    tpu.vector_store %arg4[%c0_6, %c0_7], %8 {strides = array<i32>} : memref<16x128xbf16, #tpu.memory_space<vmem>>, vector<16x128xbf16>,
    return
  }
  func.func @transform_0(%arg0: i32) -> (i32, i32) {
    %c0_i32 = arith.constant 0 : i32
    %c0_i32_0 = arith.constant 0 : i32
    %c0_i32_1 = arith.constant 0 : i32
    return %c0_i32, %c0_i32_0 : i32, i32
  }
  func.func @transform_1(%arg0: i32) -> (i32, i32) {
    %c0_i32 = arith.constant 0 : i32
    %c0_i32_0 = arith.constant 0 : i32
    return %c0_i32, %arg0 : i32, i32
  }
  func.func @transform_2(%arg0: i32) -> (i32, i32) {
    %c0_i32 = arith.constant 0 : i32
    %c0_i32_0 = arith.constant 0 : i32
    %c0_i32_1 = arith.constant 0 : i32
    return %c0_i32, %c0_i32_0 : i32, i32
  }
  func.func @transform_3(%arg0: i32) -> (i32, i32) {
    %c0_i32 = arith.constant 0 : i32
    %c0_i32_0 = arith.constant 0 : i32
    return %c0_i32, %arg0 : i32, i32
  }
}

module attributes {stable_mosaic.version = 11 : i64} {
  func.func @_max4_kernel(%arg0: i32, %arg1: memref<64x2xbf16, #tpu.memory_space<vmem>>, %arg2: memref<64x2xbf16, #tpu.memory_space<vmem>>, %arg3: memref<64x2xbf16, #tpu.memory_space<vmem>>, %arg4: memref<64x2xbf16, #tpu.memory_space<vmem>>, %arg5: memref<64x2xbf16, #tpu.memory_space<vmem>>) attributes {dimension_semantics = [#tpu.dimension_semantics<parallel>], iteration_bounds = array<i64: 1>, scalar_prefetch = 0 : i64, scratch_operands = 0 : i64, tpu.core_type = #tpu.core_type<tc>, window_params = [{transform_indices = @transform_0, window_bounds = array<i64: 64, 2>}, {transform_indices = @transform_1, window_bounds = array<i64: 64, 2>}, {transform_indices = @transform_2, window_bounds = array<i64: 64, 2>}, {transform_indices = @transform_3, window_bounds = array<i64: 64, 2>}, {transform_indices = @transform_4, window_bounds = array<i64: 64, 2>}]} {
    %c0 = arith.constant 0 : index
    %c0_0 = arith.constant 0 : index
    %0 = vector.load %arg1[%c0, %c0_0] : memref<64x2xbf16, #tpu.memory_space<vmem>>, vector<64x2xbf16>
    %c0_1 = arith.constant 0 : index
    %c0_2 = arith.constant 0 : index
    %1 = vector.load %arg2[%c0_1, %c0_2] : memref<64x2xbf16, #tpu.memory_space<vmem>>, vector<64x2xbf16>
    %2 = arith.maximumf %0, %1 : vector<64x2xbf16>
    %c0_3 = arith.constant 0 : index
    %c0_4 = arith.constant 0 : index
    %3 = vector.load %arg3[%c0_3, %c0_4] : memref<64x2xbf16, #tpu.memory_space<vmem>>, vector<64x2xbf16>
    %c0_5 = arith.constant 0 : index
    %c0_6 = arith.constant 0 : index
    %4 = vector.load %arg4[%c0_5, %c0_6] : memref<64x2xbf16, #tpu.memory_space<vmem>>, vector<64x2xbf16>
    %5 = arith.maximumf %3, %4 : vector<64x2xbf16>
    %6 = arith.maximumf %2, %5 : vector<64x2xbf16>
    %c0_7 = arith.constant 0 : index
    %c0_8 = arith.constant 0 : index
    %7 = vector.load %arg5[%c0_7, %c0_8] : memref<64x2xbf16, #tpu.memory_space<vmem>>, vector<64x2xbf16>
    tpu.vector_store %arg5[%c0_7, %c0_8], %6 {strides = array<i32>} : memref<64x2xbf16, #tpu.memory_space<vmem>>, vector<64x2xbf16>,
    return
  }
  func.func @transform_0(%arg0: i32) -> (i32, i32) {
    %c0_i32 = arith.constant 0 : i32
    %c0_i32_0 = arith.constant 0 : i32
    return %c0_i32, %arg0 : i32, i32
  }
  func.func @transform_1(%arg0: i32) -> (i32, i32) {
    %c0_i32 = arith.constant 0 : i32
    %c0_i32_0 = arith.constant 0 : i32
    return %c0_i32, %arg0 : i32, i32
  }
  func.func @transform_2(%arg0: i32) -> (i32, i32) {
    %c0_i32 = arith.constant 0 : i32
    %c0_i32_0 = arith.constant 0 : i32
    return %c0_i32, %arg0 : i32, i32
  }
  func.func @transform_3(%arg0: i32) -> (i32, i32) {
    %c0_i32 = arith.constant 0 : i32
    %c0_i32_0 = arith.constant 0 : i32
    return %c0_i32, %arg0 : i32, i32
  }
  func.func @transform_4(%arg0: i32) -> (i32, i32) {
    %c0_i32 = arith.constant 0 : i32
    %c0_i32_0 = arith.constant 0 : i32
    return %c0_i32, %arg0 : i32, i32
  }
}

module attributes {stable_mosaic.version = 11 : i64} {
  func.func @_matmul_bias_act_kernel(%arg0: i32, %arg1: memref<128x576xbf16, #tpu.memory_space<vmem>>, %arg2: memref<576x2xbf16, #tpu.memory_space<vmem>>, %arg3: memref<128x1xf32, #tpu.memory_space<vmem>>, %arg4: memref<128x2xbf16, #tpu.memory_space<vmem>>) attributes {dimension_semantics = [#tpu.dimension_semantics<parallel>], iteration_bounds = array<i64: 1>, scalar_prefetch = 0 : i64, scratch_operands = 0 : i64, tpu.core_type = #tpu.core_type<tc>, window_params = [{pipeline_mode = #tpu.pipeline_mode<synchronous>, transform_indices = @transform_0, window_bounds = array<i64: 128, 576>}, {transform_indices = @transform_1, window_bounds = array<i64: 576, 2>}, {pipeline_mode = #tpu.pipeline_mode<synchronous>, transform_indices = @transform_2, window_bounds = array<i64: 128, 1>}, {transform_indices = @transform_3, window_bounds = array<i64: 128, 2>}]} {
    %c0 = arith.constant 0 : index
    %c0_0 = arith.constant 0 : index
    %0 = vector.load %arg1[%c0, %c0_0] : memref<128x576xbf16, #tpu.memory_space<vmem>>, vector<128x576xbf16>
    %c0_1 = arith.constant 0 : index
    %c0_2 = arith.constant 0 : index
    %1 = vector.load %arg2[%c0_1, %c0_2] : memref<576x2xbf16, #tpu.memory_space<vmem>>, vector<576x2xbf16>
    %cst = arith.constant dense<0.000000e+00> : vector<128x2xf32>
    %2 = tpu.matmul %0, %1, %cst {dimension_numbers = #tpu.dot_dimension_numbers<[1], [0], [0], [1], [0, 0, 1, 1], [], []>} : vector<128x576xbf16>, vector<576x2xbf16>, vector<128x2xf32> -> vector<128x2xf32>
    %c0_3 = arith.constant 0 : index
    %c0_4 = arith.constant 0 : index
    %3 = vector.load %arg3[%c0_3, %c0_4] : memref<128x1xf32, #tpu.memory_space<vmem>>, vector<128x1xf32>
    %4 = vector.broadcast %3 : vector<128x1xf32> to vector<128x2xf32>
    %5 = arith.addf %2, %4 : vector<128x2xf32>
    %cst_5 = arith.constant 0.000000e+00 : f32
    %6 = vector.broadcast %cst_5 : f32 to vector<128x2xf32>
    %7 = arith.maximumf %5, %6 : vector<128x2xf32>
    %8 = arith.truncf %7 : vector<128x2xf32> to vector<128x2xbf16>
    %c0_6 = arith.constant 0 : index
    %c0_7 = arith.constant 0 : index
    %9 = vector.load %arg4[%c0_6, %c0_7] : memref<128x2xbf16, #tpu.memory_space<vmem>>, vector<128x2xbf16>
    tpu.vector_store %arg4[%c0_6, %c0_7], %8 {strides = array<i32>} : memref<128x2xbf16, #tpu.memory_space<vmem>>, vector<128x2xbf16>,
    return
  }
  func.func @transform_0(%arg0: i32) -> (i32, i32) {
    %c0_i32 = arith.constant 0 : i32
    %c0_i32_0 = arith.constant 0 : i32
    %c0_i32_1 = arith.constant 0 : i32
    return %c0_i32, %c0_i32_0 : i32, i32
  }
  func.func @transform_1(%arg0: i32) -> (i32, i32) {
    %c0_i32 = arith.constant 0 : i32
    %c0_i32_0 = arith.constant 0 : i32
    return %c0_i32, %arg0 : i32, i32
  }
  func.func @transform_2(%arg0: i32) -> (i32, i32) {
    %c0_i32 = arith.constant 0 : i32
    %c0_i32_0 = arith.constant 0 : i32
    %c0_i32_1 = arith.constant 0 : i32
    return %c0_i32, %c0_i32_0 : i32, i32
  }
  func.func @transform_3(%arg0: i32) -> (i32, i32) {
    %c0_i32 = arith.constant 0 : i32
    %c0_i32_0 = arith.constant 0 : i32
    return %c0_i32, %arg0 : i32, i32
  }
}

module attributes {stable_mosaic.version = 11 : i64} {
  func.func @_matmul_bias_act_kernel(%arg0: i32, %arg1: memref<128x1152xbf16, #tpu.memory_space<vmem>>, %arg2: memref<1152x2xbf16, #tpu.memory_space<vmem>>, %arg3: memref<128x1xf32, #tpu.memory_space<vmem>>, %arg4: memref<128x2xbf16, #tpu.memory_space<vmem>>) attributes {dimension_semantics = [#tpu.dimension_semantics<parallel>], iteration_bounds = array<i64: 1>, scalar_prefetch = 0 : i64, scratch_operands = 0 : i64, tpu.core_type = #tpu.core_type<tc>, window_params = [{pipeline_mode = #tpu.pipeline_mode<synchronous>, transform_indices = @transform_0, window_bounds = array<i64: 128, 1152>}, {transform_indices = @transform_1, window_bounds = array<i64: 1152, 2>}, {pipeline_mode = #tpu.pipeline_mode<synchronous>, transform_indices = @transform_2, window_bounds = array<i64: 128, 1>}, {transform_indices = @transform_3, window_bounds = array<i64: 128, 2>}]} {
    %c0 = arith.constant 0 : index
    %c0_0 = arith.constant 0 : index
    %0 = vector.load %arg1[%c0, %c0_0] : memref<128x1152xbf16, #tpu.memory_space<vmem>>, vector<128x1152xbf16>
    %c0_1 = arith.constant 0 : index
    %c0_2 = arith.constant 0 : index
    %1 = vector.load %arg2[%c0_1, %c0_2] : memref<1152x2xbf16, #tpu.memory_space<vmem>>, vector<1152x2xbf16>
    %cst = arith.constant dense<0.000000e+00> : vector<128x2xf32>
    %2 = tpu.matmul %0, %1, %cst {dimension_numbers = #tpu.dot_dimension_numbers<[1], [0], [0], [1], [0, 0, 1, 1], [], []>} : vector<128x1152xbf16>, vector<1152x2xbf16>, vector<128x2xf32> -> vector<128x2xf32>
    %c0_3 = arith.constant 0 : index
    %c0_4 = arith.constant 0 : index
    %3 = vector.load %arg3[%c0_3, %c0_4] : memref<128x1xf32, #tpu.memory_space<vmem>>, vector<128x1xf32>
    %4 = vector.broadcast %3 : vector<128x1xf32> to vector<128x2xf32>
    %5 = arith.addf %2, %4 : vector<128x2xf32>
    %cst_5 = arith.constant 0.000000e+00 : f32
    %6 = vector.broadcast %cst_5 : f32 to vector<128x2xf32>
    %7 = arith.maximumf %5, %6 : vector<128x2xf32>
    %8 = arith.truncf %7 : vector<128x2xf32> to vector<128x2xbf16>
    %c0_6 = arith.constant 0 : index
    %c0_7 = arith.constant 0 : index
    %9 = vector.load %arg4[%c0_6, %c0_7] : memref<128x2xbf16, #tpu.memory_space<vmem>>, vector<128x2xbf16>
    tpu.vector_store %arg4[%c0_6, %c0_7], %8 {strides = array<i32>} : memref<128x2xbf16, #tpu.memory_space<vmem>>, vector<128x2xbf16>,
    return
  }
  func.func @transform_0(%arg0: i32) -> (i32, i32) {
    %c0_i32 = arith.constant 0 : i32
    %c0_i32_0 = arith.constant 0 : i32
    %c0_i32_1 = arith.constant 0 : i32
    return %c0_i32, %c0_i32_0 : i32, i32
  }
  func.func @transform_1(%arg0: i32) -> (i32, i32) {
    %c0_i32 = arith.constant 0 : i32
    %c0_i32_0 = arith.constant 0 : i32
    return %c0_i32, %arg0 : i32, i32
  }
  func.func @transform_2(%arg0: i32) -> (i32, i32) {
    %c0_i32 = arith.constant 0 : i32
    %c0_i32_0 = arith.constant 0 : i32
    %c0_i32_1 = arith.constant 0 : i32
    return %c0_i32, %c0_i32_0 : i32, i32
  }
  func.func @transform_3(%arg0: i32) -> (i32, i32) {
    %c0_i32 = arith.constant 0 : i32
    %c0_i32_0 = arith.constant 0 : i32
    return %c0_i32, %arg0 : i32, i32
  }
}

module attributes {stable_mosaic.version = 11 : i64} {
  func.func @_matmul_bias_act_kernel(%arg0: i32, %arg1: memref<64x1728xbf16, #tpu.memory_space<vmem>>, %arg2: memref<1728x8xbf16, #tpu.memory_space<vmem>>, %arg3: memref<64x1xf32, #tpu.memory_space<vmem>>, %arg4: memref<64x8xbf16, #tpu.memory_space<vmem>>) attributes {dimension_semantics = [#tpu.dimension_semantics<parallel>], iteration_bounds = array<i64: 1>, scalar_prefetch = 0 : i64, scratch_operands = 0 : i64, tpu.core_type = #tpu.core_type<tc>, window_params = [{pipeline_mode = #tpu.pipeline_mode<synchronous>, transform_indices = @transform_0, window_bounds = array<i64: 64, 1728>}, {transform_indices = @transform_1, window_bounds = array<i64: 1728, 8>}, {pipeline_mode = #tpu.pipeline_mode<synchronous>, transform_indices = @transform_2, window_bounds = array<i64: 64, 1>}, {transform_indices = @transform_3, window_bounds = array<i64: 64, 8>}]} {
    %c0 = arith.constant 0 : index
    %c0_0 = arith.constant 0 : index
    %0 = vector.load %arg1[%c0, %c0_0] : memref<64x1728xbf16, #tpu.memory_space<vmem>>, vector<64x1728xbf16>
    %c0_1 = arith.constant 0 : index
    %c0_2 = arith.constant 0 : index
    %1 = vector.load %arg2[%c0_1, %c0_2] : memref<1728x8xbf16, #tpu.memory_space<vmem>>, vector<1728x8xbf16>
    %cst = arith.constant dense<0.000000e+00> : vector<64x8xf32>
    %2 = tpu.matmul %0, %1, %cst {dimension_numbers = #tpu.dot_dimension_numbers<[1], [0], [0], [1], [0, 0, 1, 1], [], []>} : vector<64x1728xbf16>, vector<1728x8xbf16>, vector<64x8xf32> -> vector<64x8xf32>
    %c0_3 = arith.constant 0 : index
    %c0_4 = arith.constant 0 : index
    %3 = vector.load %arg3[%c0_3, %c0_4] : memref<64x1xf32, #tpu.memory_space<vmem>>, vector<64x1xf32>
    %4 = vector.broadcast %3 : vector<64x1xf32> to vector<64x8xf32>
    %5 = arith.addf %2, %4 : vector<64x8xf32>
    %cst_5 = arith.constant 0.000000e+00 : f32
    %6 = vector.broadcast %cst_5 : f32 to vector<64x8xf32>
    %7 = arith.maximumf %5, %6 : vector<64x8xf32>
    %8 = arith.truncf %7 : vector<64x8xf32> to vector<64x8xbf16>
    %c0_6 = arith.constant 0 : index
    %c0_7 = arith.constant 0 : index
    %9 = vector.load %arg4[%c0_6, %c0_7] : memref<64x8xbf16, #tpu.memory_space<vmem>>, vector<64x8xbf16>
    tpu.vector_store %arg4[%c0_6, %c0_7], %8 {strides = array<i32>} : memref<64x8xbf16, #tpu.memory_space<vmem>>, vector<64x8xbf16>,
    return
  }
  func.func @transform_0(%arg0: i32) -> (i32, i32) {
    %c0_i32 = arith.constant 0 : i32
    %c0_i32_0 = arith.constant 0 : i32
    %c0_i32_1 = arith.constant 0 : i32
    return %c0_i32, %c0_i32_0 : i32, i32
  }
  func.func @transform_1(%arg0: i32) -> (i32, i32) {
    %c0_i32 = arith.constant 0 : i32
    %c0_i32_0 = arith.constant 0 : i32
    return %c0_i32, %arg0 : i32, i32
  }
  func.func @transform_2(%arg0: i32) -> (i32, i32) {
    %c0_i32 = arith.constant 0 : i32
    %c0_i32_0 = arith.constant 0 : i32
    %c0_i32_1 = arith.constant 0 : i32
    return %c0_i32, %c0_i32_0 : i32, i32
  }
  func.func @transform_3(%arg0: i32) -> (i32, i32) {
    %c0_i32 = arith.constant 0 : i32
    %c0_i32_0 = arith.constant 0 : i32
    return %c0_i32, %arg0 : i32, i32
  }
}

module attributes {stable_mosaic.version = 11 : i64} {
  func.func @_matmul_bias_act_kernel(%arg0: i32, %arg1: memref<32x1152xbf16, #tpu.memory_space<vmem>>, %arg2: memref<1152x32xbf16, #tpu.memory_space<vmem>>, %arg3: memref<32x1xf32, #tpu.memory_space<vmem>>, %arg4: memref<32x32xbf16, #tpu.memory_space<vmem>>) attributes {dimension_semantics = [#tpu.dimension_semantics<parallel>], iteration_bounds = array<i64: 1>, scalar_prefetch = 0 : i64, scratch_operands = 0 : i64, tpu.core_type = #tpu.core_type<tc>, window_params = [{pipeline_mode = #tpu.pipeline_mode<synchronous>, transform_indices = @transform_0, window_bounds = array<i64: 32, 1152>}, {transform_indices = @transform_1, window_bounds = array<i64: 1152, 32>}, {pipeline_mode = #tpu.pipeline_mode<synchronous>, transform_indices = @transform_2, window_bounds = array<i64: 32, 1>}, {transform_indices = @transform_3, window_bounds = array<i64: 32, 32>}]} {
    %c0 = arith.constant 0 : index
    %c0_0 = arith.constant 0 : index
    %0 = vector.load %arg1[%c0, %c0_0] : memref<32x1152xbf16, #tpu.memory_space<vmem>>, vector<32x1152xbf16>
    %c0_1 = arith.constant 0 : index
    %c0_2 = arith.constant 0 : index
    %1 = vector.load %arg2[%c0_1, %c0_2] : memref<1152x32xbf16, #tpu.memory_space<vmem>>, vector<1152x32xbf16>
    %cst = arith.constant dense<0.000000e+00> : vector<32x32xf32>
    %2 = tpu.matmul %0, %1, %cst {dimension_numbers = #tpu.dot_dimension_numbers<[1], [0], [0], [1], [0, 0, 1, 1], [], []>} : vector<32x1152xbf16>, vector<1152x32xbf16>, vector<32x32xf32> -> vector<32x32xf32>
    %c0_3 = arith.constant 0 : index
    %c0_4 = arith.constant 0 : index
    %3 = vector.load %arg3[%c0_3, %c0_4] : memref<32x1xf32, #tpu.memory_space<vmem>>, vector<32x1xf32>
    %4 = vector.broadcast %3 : vector<32x1xf32> to vector<32x32xf32>
    %5 = arith.addf %2, %4 : vector<32x32xf32>
    %cst_5 = arith.constant 0.000000e+00 : f32
    %6 = vector.broadcast %cst_5 : f32 to vector<32x32xf32>
    %7 = arith.maximumf %5, %6 : vector<32x32xf32>
    %8 = arith.truncf %7 : vector<32x32xf32> to vector<32x32xbf16>
    %c0_6 = arith.constant 0 : index
    %c0_7 = arith.constant 0 : index
    %9 = vector.load %arg4[%c0_6, %c0_7] : memref<32x32xbf16, #tpu.memory_space<vmem>>, vector<32x32xbf16>
    tpu.vector_store %arg4[%c0_6, %c0_7], %8 {strides = array<i32>} : memref<32x32xbf16, #tpu.memory_space<vmem>>, vector<32x32xbf16>,
    return
  }
  func.func @transform_0(%arg0: i32) -> (i32, i32) {
    %c0_i32 = arith.constant 0 : i32
    %c0_i32_0 = arith.constant 0 : i32
    %c0_i32_1 = arith.constant 0 : i32
    return %c0_i32, %c0_i32_0 : i32, i32
  }
  func.func @transform_1(%arg0: i32) -> (i32, i32) {
    %c0_i32 = arith.constant 0 : i32
    %c0_i32_0 = arith.constant 0 : i32
    return %c0_i32, %arg0 : i32, i32
  }
  func.func @transform_2(%arg0: i32) -> (i32, i32) {
    %c0_i32 = arith.constant 0 : i32
    %c0_i32_0 = arith.constant 0 : i32
    %c0_i32_1 = arith.constant 0 : i32
    return %c0_i32, %c0_i32_0 : i32, i32
  }
  func.func @transform_3(%arg0: i32) -> (i32, i32) {
    %c0_i32 = arith.constant 0 : i32
    %c0_i32_0 = arith.constant 0 : i32
    return %c0_i32, %arg0 : i32, i32
  }
}

module attributes {stable_mosaic.version = 11 : i64} {
  func.func @_matmul_bias_act_kernel(%arg0: i32, %arg1: memref<16x720xbf16, #tpu.memory_space<vmem>>, %arg2: memref<720x128xbf16, #tpu.memory_space<vmem>>, %arg3: memref<16x1xf32, #tpu.memory_space<vmem>>, %arg4: memref<16x128xbf16, #tpu.memory_space<vmem>>) attributes {dimension_semantics = [#tpu.dimension_semantics<parallel>], iteration_bounds = array<i64: 1>, scalar_prefetch = 0 : i64, scratch_operands = 0 : i64, tpu.core_type = #tpu.core_type<tc>, window_params = [{pipeline_mode = #tpu.pipeline_mode<synchronous>, transform_indices = @transform_0, window_bounds = array<i64: 16, 720>}, {transform_indices = @transform_1, window_bounds = array<i64: 720, 128>}, {pipeline_mode = #tpu.pipeline_mode<synchronous>, transform_indices = @transform_2, window_bounds = array<i64: 16, 1>}, {transform_indices = @transform_3, window_bounds = array<i64: 16, 128>}]} {
    %c0 = arith.constant 0 : index
    %c0_0 = arith.constant 0 : index
    %0 = vector.load %arg1[%c0, %c0_0] : memref<16x720xbf16, #tpu.memory_space<vmem>>, vector<16x720xbf16>
    %c0_1 = arith.constant 0 : index
    %c0_2 = arith.constant 0 : index
    %1 = vector.load %arg2[%c0_1, %c0_2] : memref<720x128xbf16, #tpu.memory_space<vmem>>, vector<720x128xbf16>
    %cst = arith.constant dense<0.000000e+00> : vector<16x128xf32>
    %2 = tpu.matmul %0, %1, %cst {dimension_numbers = #tpu.dot_dimension_numbers<[1], [0], [0], [1], [0, 0, 1, 1], [], []>} : vector<16x720xbf16>, vector<720x128xbf16>, vector<16x128xf32> -> vector<16x128xf32>
    %c0_3 = arith.constant 0 : index
    %c0_4 = arith.constant 0 : index
    %3 = vector.load %arg3[%c0_3, %c0_4] : memref<16x1xf32, #tpu.memory_space<vmem>>, vector<16x1xf32>
    %4 = vector.broadcast %3 : vector<16x1xf32> to vector<16x128xf32>
    %5 = arith.addf %2, %4 : vector<16x128xf32>
    %cst_5 = arith.constant 0.000000e+00 : f32
    %6 = vector.broadcast %cst_5 : f32 to vector<16x128xf32>
    %7 = arith.maximumf %5, %6 : vector<16x128xf32>
    %8 = arith.truncf %7 : vector<16x128xf32> to vector<16x128xbf16>
    %c0_6 = arith.constant 0 : index
    %c0_7 = arith.constant 0 : index
    %9 = vector.load %arg4[%c0_6, %c0_7] : memref<16x128xbf16, #tpu.memory_space<vmem>>, vector<16x128xbf16>
    tpu.vector_store %arg4[%c0_6, %c0_7], %8 {strides = array<i32>} : memref<16x128xbf16, #tpu.memory_space<vmem>>, vector<16x128xbf16>,
    return
  }
  func.func @transform_0(%arg0: i32) -> (i32, i32) {
    %c0_i32 = arith.constant 0 : i32
    %c0_i32_0 = arith.constant 0 : i32
    %c0_i32_1 = arith.constant 0 : i32
    return %c0_i32, %c0_i32_0 : i32, i32
  }
  func.func @transform_1(%arg0: i32) -> (i32, i32) {
    %c0_i32 = arith.constant 0 : i32
    %c0_i32_0 = arith.constant 0 : i32
    return %c0_i32, %arg0 : i32, i32
  }
  func.func @transform_2(%arg0: i32) -> (i32, i32) {
    %c0_i32 = arith.constant 0 : i32
    %c0_i32_0 = arith.constant 0 : i32
    %c0_i32_1 = arith.constant 0 : i32
    return %c0_i32, %c0_i32_0 : i32, i32
  }
  func.func @transform_3(%arg0: i32) -> (i32, i32) {
    %c0_i32 = arith.constant 0 : i32
    %c0_i32_0 = arith.constant 0 : i32
    return %c0_i32, %arg0 : i32, i32
  }
}

module attributes {stable_mosaic.version = 11 : i64} {
  func.func @_matmul_bias_act_kernel(%arg0: i32, %arg1: memref<8x216xbf16, #tpu.memory_space<vmem>>, %arg2: memref<216x512xbf16, #tpu.memory_space<vmem>>, %arg3: memref<8x1xf32, #tpu.memory_space<vmem>>, %arg4: memref<8x512xbf16, #tpu.memory_space<vmem>>) attributes {dimension_semantics = [#tpu.dimension_semantics<parallel>], iteration_bounds = array<i64: 1>, scalar_prefetch = 0 : i64, scratch_operands = 0 : i64, tpu.core_type = #tpu.core_type<tc>, window_params = [{pipeline_mode = #tpu.pipeline_mode<synchronous>, transform_indices = @transform_0, window_bounds = array<i64: 8, 216>}, {transform_indices = @transform_1, window_bounds = array<i64: 216, 512>}, {pipeline_mode = #tpu.pipeline_mode<synchronous>, transform_indices = @transform_2, window_bounds = array<i64: 8, 1>}, {transform_indices = @transform_3, window_bounds = array<i64: 8, 512>}]} {
    %c0 = arith.constant 0 : index
    %c0_0 = arith.constant 0 : index
    %0 = vector.load %arg1[%c0, %c0_0] : memref<8x216xbf16, #tpu.memory_space<vmem>>, vector<8x216xbf16>
    %c0_1 = arith.constant 0 : index
    %c0_2 = arith.constant 0 : index
    %1 = vector.load %arg2[%c0_1, %c0_2] : memref<216x512xbf16, #tpu.memory_space<vmem>>, vector<216x512xbf16>
    %cst = arith.constant dense<0.000000e+00> : vector<8x512xf32>
    %2 = tpu.matmul %0, %1, %cst {dimension_numbers = #tpu.dot_dimension_numbers<[1], [0], [0], [1], [0, 0, 1, 1], [], []>} : vector<8x216xbf16>, vector<216x512xbf16>, vector<8x512xf32> -> vector<8x512xf32>
    %c0_3 = arith.constant 0 : index
    %c0_4 = arith.constant 0 : index
    %3 = vector.load %arg3[%c0_3, %c0_4] : memref<8x1xf32, #tpu.memory_space<vmem>>, vector<8x1xf32>
    %4 = vector.broadcast %3 : vector<8x1xf32> to vector<8x512xf32>
    %5 = arith.addf %2, %4 : vector<8x512xf32>
    %cst_5 = arith.constant 0.000000e+00 : f32
    %6 = vector.broadcast %cst_5 : f32 to vector<8x512xf32>
    %7 = arith.maximumf %5, %6 : vector<8x512xf32>
    %8 = arith.truncf %7 : vector<8x512xf32> to vector<8x512xbf16>
    %c0_6 = arith.constant 0 : index
    %c0_7 = arith.constant 0 : index
    %9 = vector.load %arg4[%c0_6, %c0_7] : memref<8x512xbf16, #tpu.memory_space<vmem>>, vector<8x512xbf16>
    tpu.vector_store %arg4[%c0_6, %c0_7], %8 {strides = array<i32>} : memref<8x512xbf16, #tpu.memory_space<vmem>>, vector<8x512xbf16>,
    return
  }
  func.func @transform_0(%arg0: i32) -> (i32, i32) {
    %c0_i32 = arith.constant 0 : i32
    %c0_i32_0 = arith.constant 0 : i32
    %c0_i32_1 = arith.constant 0 : i32
    return %c0_i32, %c0_i32_0 : i32, i32
  }
  func.func @transform_1(%arg0: i32) -> (i32, i32) {
    %c0_i32 = arith.constant 0 : i32
    %c0_i32_0 = arith.constant 0 : i32
    return %c0_i32, %arg0 : i32, i32
  }
  func.func @transform_2(%arg0: i32) -> (i32, i32) {
    %c0_i32 = arith.constant 0 : i32
    %c0_i32_0 = arith.constant 0 : i32
    %c0_i32_1 = arith.constant 0 : i32
    return %c0_i32, %c0_i32_0 : i32, i32
  }
  func.func @transform_3(%arg0: i32) -> (i32, i32) {
    %c0_i32 = arith.constant 0 : i32
    %c0_i32_0 = arith.constant 0 : i32
    return %c0_i32, %arg0 : i32, i32
  }
}

module attributes {stable_mosaic.version = 11 : i64} {
  func.func @_matmul_bias_act_kernel(%arg0: i32, %arg1: memref<8x288xbf16, #tpu.memory_space<vmem>>, %arg2: memref<288x512xbf16, #tpu.memory_space<vmem>>, %arg3: memref<8x1xf32, #tpu.memory_space<vmem>>, %arg4: memref<8x512xbf16, #tpu.memory_space<vmem>>) attributes {dimension_semantics = [#tpu.dimension_semantics<parallel>], iteration_bounds = array<i64: 1>, scalar_prefetch = 0 : i64, scratch_operands = 0 : i64, tpu.core_type = #tpu.core_type<tc>, window_params = [{pipeline_mode = #tpu.pipeline_mode<synchronous>, transform_indices = @transform_0, window_bounds = array<i64: 8, 288>}, {transform_indices = @transform_1, window_bounds = array<i64: 288, 512>}, {pipeline_mode = #tpu.pipeline_mode<synchronous>, transform_indices = @transform_2, window_bounds = array<i64: 8, 1>}, {transform_indices = @transform_3, window_bounds = array<i64: 8, 512>}]} {
    %c0 = arith.constant 0 : index
    %c0_0 = arith.constant 0 : index
    %0 = vector.load %arg1[%c0, %c0_0] : memref<8x288xbf16, #tpu.memory_space<vmem>>, vector<8x288xbf16>
    %c0_1 = arith.constant 0 : index
    %c0_2 = arith.constant 0 : index
    %1 = vector.load %arg2[%c0_1, %c0_2] : memref<288x512xbf16, #tpu.memory_space<vmem>>, vector<288x512xbf16>
    %cst = arith.constant dense<0.000000e+00> : vector<8x512xf32>
    %2 = tpu.matmul %0, %1, %cst {dimension_numbers = #tpu.dot_dimension_numbers<[1], [0], [0], [1], [0, 0, 1, 1], [], []>} : vector<8x288xbf16>, vector<288x512xbf16>, vector<8x512xf32> -> vector<8x512xf32>
    %c0_3 = arith.constant 0 : index
    %c0_4 = arith.constant 0 : index
    %3 = vector.load %arg3[%c0_3, %c0_4] : memref<8x1xf32, #tpu.memory_space<vmem>>, vector<8x1xf32>
    %4 = vector.broadcast %3 : vector<8x1xf32> to vector<8x512xf32>
    %5 = arith.addf %2, %4 : vector<8x512xf32>
    %cst_5 = arith.constant 0.000000e+00 : f32
    %6 = vector.broadcast %cst_5 : f32 to vector<8x512xf32>
    %7 = arith.maximumf %5, %6 : vector<8x512xf32>
    %8 = arith.truncf %7 : vector<8x512xf32> to vector<8x512xbf16>
    %c0_6 = arith.constant 0 : index
    %c0_7 = arith.constant 0 : index
    %9 = vector.load %arg4[%c0_6, %c0_7] : memref<8x512xbf16, #tpu.memory_space<vmem>>, vector<8x512xbf16>
    tpu.vector_store %arg4[%c0_6, %c0_7], %8 {strides = array<i32>} : memref<8x512xbf16, #tpu.memory_space<vmem>>, vector<8x512xbf16>,
    return
  }
  func.func @transform_0(%arg0: i32) -> (i32, i32) {
    %c0_i32 = arith.constant 0 : i32
    %c0_i32_0 = arith.constant 0 : i32
    %c0_i32_1 = arith.constant 0 : i32
    return %c0_i32, %c0_i32_0 : i32, i32
  }
  func.func @transform_1(%arg0: i32) -> (i32, i32) {
    %c0_i32 = arith.constant 0 : i32
    %c0_i32_0 = arith.constant 0 : i32
    return %c0_i32, %arg0 : i32, i32
  }
  func.func @transform_2(%arg0: i32) -> (i32, i32) {
    %c0_i32 = arith.constant 0 : i32
    %c0_i32_0 = arith.constant 0 : i32
    %c0_i32_1 = arith.constant 0 : i32
    return %c0_i32, %c0_i32_0 : i32, i32
  }
  func.func @transform_3(%arg0: i32) -> (i32, i32) {
    %c0_i32 = arith.constant 0 : i32
    %c0_i32_0 = arith.constant 0 : i32
    return %c0_i32, %arg0 : i32, i32
  }
}

module attributes {stable_mosaic.version = 11 : i64} {
  func.func @_matmul_bias_act_kernel(%arg0: i32, %arg1: memref<8x360xbf16, #tpu.memory_space<vmem>>, %arg2: memref<360x512xbf16, #tpu.memory_space<vmem>>, %arg3: memref<8x1xf32, #tpu.memory_space<vmem>>, %arg4: memref<8x512xbf16, #tpu.memory_space<vmem>>) attributes {dimension_semantics = [#tpu.dimension_semantics<parallel>], iteration_bounds = array<i64: 1>, scalar_prefetch = 0 : i64, scratch_operands = 0 : i64, tpu.core_type = #tpu.core_type<tc>, window_params = [{pipeline_mode = #tpu.pipeline_mode<synchronous>, transform_indices = @transform_0, window_bounds = array<i64: 8, 360>}, {transform_indices = @transform_1, window_bounds = array<i64: 360, 512>}, {pipeline_mode = #tpu.pipeline_mode<synchronous>, transform_indices = @transform_2, window_bounds = array<i64: 8, 1>}, {transform_indices = @transform_3, window_bounds = array<i64: 8, 512>}]} {
    %c0 = arith.constant 0 : index
    %c0_0 = arith.constant 0 : index
    %0 = vector.load %arg1[%c0, %c0_0] : memref<8x360xbf16, #tpu.memory_space<vmem>>, vector<8x360xbf16>
    %c0_1 = arith.constant 0 : index
    %c0_2 = arith.constant 0 : index
    %1 = vector.load %arg2[%c0_1, %c0_2] : memref<360x512xbf16, #tpu.memory_space<vmem>>, vector<360x512xbf16>
    %cst = arith.constant dense<0.000000e+00> : vector<8x512xf32>
    %2 = tpu.matmul %0, %1, %cst {dimension_numbers = #tpu.dot_dimension_numbers<[1], [0], [0], [1], [0, 0, 1, 1], [], []>} : vector<8x360xbf16>, vector<360x512xbf16>, vector<8x512xf32> -> vector<8x512xf32>
    %c0_3 = arith.constant 0 : index
    %c0_4 = arith.constant 0 : index
    %3 = vector.load %arg3[%c0_3, %c0_4] : memref<8x1xf32, #tpu.memory_space<vmem>>, vector<8x1xf32>
    %4 = vector.broadcast %3 : vector<8x1xf32> to vector<8x512xf32>
    %5 = arith.addf %2, %4 : vector<8x512xf32>
    %cst_5 = arith.constant 0.000000e+00 : f32
    %6 = vector.broadcast %cst_5 : f32 to vector<8x512xf32>
    %7 = arith.maximumf %5, %6 : vector<8x512xf32>
    %8 = arith.truncf %7 : vector<8x512xf32> to vector<8x512xbf16>
    %c0_6 = arith.constant 0 : index
    %c0_7 = arith.constant 0 : index
    %9 = vector.load %arg4[%c0_6, %c0_7] : memref<8x512xbf16, #tpu.memory_space<vmem>>, vector<8x512xbf16>
    tpu.vector_store %arg4[%c0_6, %c0_7], %8 {strides = array<i32>} : memref<8x512xbf16, #tpu.memory_space<vmem>>, vector<8x512xbf16>,
    return
  }
  func.func @transform_0(%arg0: i32) -> (i32, i32) {
    %c0_i32 = arith.constant 0 : i32
    %c0_i32_0 = arith.constant 0 : i32
    %c0_i32_1 = arith.constant 0 : i32
    return %c0_i32, %c0_i32_0 : i32, i32
  }
  func.func @transform_1(%arg0: i32) -> (i32, i32) {
    %c0_i32 = arith.constant 0 : i32
    %c0_i32_0 = arith.constant 0 : i32
    return %c0_i32, %arg0 : i32, i32
  }
  func.func @transform_2(%arg0: i32) -> (i32, i32) {
    %c0_i32 = arith.constant 0 : i32
    %c0_i32_0 = arith.constant 0 : i32
    %c0_i32_1 = arith.constant 0 : i32
    return %c0_i32, %c0_i32_0 : i32, i32
  }
  func.func @transform_3(%arg0: i32) -> (i32, i32) {
    %c0_i32 = arith.constant 0 : i32
    %c0_i32_0 = arith.constant 0 : i32
    return %c0_i32, %arg0 : i32, i32
  }
}

module attributes {stable_mosaic.version = 11 : i64} {
  func.func @_matmul_bias_act_kernel(%arg0: i32, %arg1: memref<8x432xbf16, #tpu.memory_space<vmem>>, %arg2: memref<432x512xbf16, #tpu.memory_space<vmem>>, %arg3: memref<8x1xf32, #tpu.memory_space<vmem>>, %arg4: memref<8x512xbf16, #tpu.memory_space<vmem>>) attributes {dimension_semantics = [#tpu.dimension_semantics<parallel>], iteration_bounds = array<i64: 1>, scalar_prefetch = 0 : i64, scratch_operands = 0 : i64, tpu.core_type = #tpu.core_type<tc>, window_params = [{pipeline_mode = #tpu.pipeline_mode<synchronous>, transform_indices = @transform_0, window_bounds = array<i64: 8, 432>}, {transform_indices = @transform_1, window_bounds = array<i64: 432, 512>}, {pipeline_mode = #tpu.pipeline_mode<synchronous>, transform_indices = @transform_2, window_bounds = array<i64: 8, 1>}, {transform_indices = @transform_3, window_bounds = array<i64: 8, 512>}]} {
    %c0 = arith.constant 0 : index
    %c0_0 = arith.constant 0 : index
    %0 = vector.load %arg1[%c0, %c0_0] : memref<8x432xbf16, #tpu.memory_space<vmem>>, vector<8x432xbf16>
    %c0_1 = arith.constant 0 : index
    %c0_2 = arith.constant 0 : index
    %1 = vector.load %arg2[%c0_1, %c0_2] : memref<432x512xbf16, #tpu.memory_space<vmem>>, vector<432x512xbf16>
    %cst = arith.constant dense<0.000000e+00> : vector<8x512xf32>
    %2 = tpu.matmul %0, %1, %cst {dimension_numbers = #tpu.dot_dimension_numbers<[1], [0], [0], [1], [0, 0, 1, 1], [], []>} : vector<8x432xbf16>, vector<432x512xbf16>, vector<8x512xf32> -> vector<8x512xf32>
    %c0_3 = arith.constant 0 : index
    %c0_4 = arith.constant 0 : index
    %3 = vector.load %arg3[%c0_3, %c0_4] : memref<8x1xf32, #tpu.memory_space<vmem>>, vector<8x1xf32>
    %4 = vector.broadcast %3 : vector<8x1xf32> to vector<8x512xf32>
    %5 = arith.addf %2, %4 : vector<8x512xf32>
    %cst_5 = arith.constant 0.000000e+00 : f32
    %6 = vector.broadcast %cst_5 : f32 to vector<8x512xf32>
    %7 = arith.maximumf %5, %6 : vector<8x512xf32>
    %8 = arith.truncf %7 : vector<8x512xf32> to vector<8x512xbf16>
    %c0_6 = arith.constant 0 : index
    %c0_7 = arith.constant 0 : index
    %9 = vector.load %arg4[%c0_6, %c0_7] : memref<8x512xbf16, #tpu.memory_space<vmem>>, vector<8x512xbf16>
    tpu.vector_store %arg4[%c0_6, %c0_7], %8 {strides = array<i32>} : memref<8x512xbf16, #tpu.memory_space<vmem>>, vector<8x512xbf16>,
    return
  }
  func.func @transform_0(%arg0: i32) -> (i32, i32) {
    %c0_i32 = arith.constant 0 : i32
    %c0_i32_0 = arith.constant 0 : i32
    %c0_i32_1 = arith.constant 0 : i32
    return %c0_i32, %c0_i32_0 : i32, i32
  }
  func.func @transform_1(%arg0: i32) -> (i32, i32) {
    %c0_i32 = arith.constant 0 : i32
    %c0_i32_0 = arith.constant 0 : i32
    return %c0_i32, %arg0 : i32, i32
  }
  func.func @transform_2(%arg0: i32) -> (i32, i32) {
    %c0_i32 = arith.constant 0 : i32
    %c0_i32_0 = arith.constant 0 : i32
    %c0_i32_1 = arith.constant 0 : i32
    return %c0_i32, %c0_i32_0 : i32, i32
  }
  func.func @transform_3(%arg0: i32) -> (i32, i32) {
    %c0_i32 = arith.constant 0 : i32
    %c0_i32_0 = arith.constant 0 : i32
    return %c0_i32, %arg0 : i32, i32
  }
}

module attributes {stable_mosaic.version = 11 : i64} {
  func.func @_matmul_bias_act_kernel(%arg0: i32, %arg1: memref<1x32xbf16, #tpu.memory_space<vmem>>, %arg2: memref<32x512xbf16, #tpu.memory_space<vmem>>, %arg3: memref<1x1xf32, #tpu.memory_space<vmem>>, %arg4: memref<1x512xf32, #tpu.memory_space<vmem>>) attributes {dimension_semantics = [#tpu.dimension_semantics<parallel>], iteration_bounds = array<i64: 1>, scalar_prefetch = 0 : i64, scratch_operands = 0 : i64, tpu.core_type = #tpu.core_type<tc>, window_params = [{pipeline_mode = #tpu.pipeline_mode<synchronous>, transform_indices = @transform_0, window_bounds = array<i64: 1, 32>}, {transform_indices = @transform_1, window_bounds = array<i64: 32, 512>}, {pipeline_mode = #tpu.pipeline_mode<synchronous>, transform_indices = @transform_2, window_bounds = array<i64: 1, 1>}, {transform_indices = @transform_3, window_bounds = array<i64: 1, 512>}]} {
    %c0 = arith.constant 0 : index
    %c0_0 = arith.constant 0 : index
    %0 = vector.load %arg1[%c0, %c0_0] : memref<1x32xbf16, #tpu.memory_space<vmem>>, vector<1x32xbf16>
    %c0_1 = arith.constant 0 : index
    %c0_2 = arith.constant 0 : index
    %1 = vector.load %arg2[%c0_1, %c0_2] : memref<32x512xbf16, #tpu.memory_space<vmem>>, vector<32x512xbf16>
    %cst = arith.constant dense<0.000000e+00> : vector<1x512xf32>
    %2 = tpu.matmul %0, %1, %cst {dimension_numbers = #tpu.dot_dimension_numbers<[1], [0], [0], [1], [0, 0, 1, 1], [], []>} : vector<1x32xbf16>, vector<32x512xbf16>, vector<1x512xf32> -> vector<1x512xf32>
    %c0_3 = arith.constant 0 : index
    %c0_4 = arith.constant 0 : index
    %3 = vector.load %arg3[%c0_3, %c0_4] : memref<1x1xf32, #tpu.memory_space<vmem>>, vector<1x1xf32>
    %4 = vector.broadcast %3 : vector<1x1xf32> to vector<1x512xf32>
    %5 = arith.addf %2, %4 : vector<1x512xf32>
    %c0_5 = arith.constant 0 : index
    %c0_6 = arith.constant 0 : index
    %6 = vector.load %arg4[%c0_5, %c0_6] : memref<1x512xf32, #tpu.memory_space<vmem>>, vector<1x512xf32>
    tpu.vector_store %arg4[%c0_5, %c0_6], %5 {strides = array<i32>} : memref<1x512xf32, #tpu.memory_space<vmem>>, vector<1x512xf32>,
    return
  }
  func.func @transform_0(%arg0: i32) -> (i32, i32) {
    %c0_i32 = arith.constant 0 : i32
    %c0_i32_0 = arith.constant 0 : i32
    %c0_i32_1 = arith.constant 0 : i32
    return %c0_i32, %c0_i32_0 : i32, i32
  }
  func.func @transform_1(%arg0: i32) -> (i32, i32) {
    %c0_i32 = arith.constant 0 : i32
    %c0_i32_0 = arith.constant 0 : i32
    return %c0_i32, %arg0 : i32, i32
  }
  func.func @transform_2(%arg0: i32) -> (i32, i32) {
    %c0_i32 = arith.constant 0 : i32
    %c0_i32_0 = arith.constant 0 : i32
    %c0_i32_1 = arith.constant 0 : i32
    return %c0_i32, %c0_i32_0 : i32, i32
  }
  func.func @transform_3(%arg0: i32) -> (i32, i32) {
    %c0_i32 = arith.constant 0 : i32
    %c0_i32_0 = arith.constant 0 : i32
    return %c0_i32, %arg0 : i32, i32
  }
}

</mosaic_0001>

<bundles_post_ra>
// kernel: unetpp_forward.35
= control target key start
LH: loop header
LB: loop body
LE: loop exit
PB: predicated region body
PF: predicated region fallthrough
CT: control target
= control target key end

     0   :  { %vm70_vm0 = vcmask 1044480   ;;  %vm71_vm1 = vcmask 1045504   ;;  %v223_v1 = vmov 65535   ;;  %v224_v3 = vmov 0   ;;  %s281_s1 = inlined_call_operand.vmem [shape: bf16[27,512], index: 1, kind: input, shape index: {}]   ;;  %s282_s2 = inlined_call_operand.vmem [shape: f32[8,1], index: 2, kind: input, shape index: {}]   ;;  %s283_s0 = inlined_call_operand.vmem [shape: bf16[8,27], index: 0, kind: input, shape index: {}]   ;;  %s284_s3 = inlined_call_operand.vmem [shape: bf16[8,512], index: 3, kind: output, shape index: {}]  }
   0x1   :  { %v211_v0 = vld [vmem:[%s281_s1 + $0x4] ss:$16 sps:$4 sm:$0xff]   ;;  %v72_v2 = vsel %vm70_vm0, 4294967295, %v223_v1  ;;  %118 = vmatprep.mubr.bf16.mxu0 %v224_v3  ;;  %159 = vmatprep.mubr.bf16.mxu1 %v224_v3  ;;  %v213_v4 = vld [vmem:[%s281_s1 + $0xc] ss:$16 sps:$4 sm:$0xff]   ;;  %vm66_vm2 = vcmask 220160  }
   0x2   :  { %210 = vset.pattern.permute.xlu0 %v224_v3  ;;  %86 = vmatprep.subr.bf16.mxu0 %v211_v0  ;;  %v215_v5 = vld [vmem:[%s281_s1] ss:$16 sps:$4 sm:$0xff]   ;;  %v216_v6 = vld [vmem:[%s281_s1 + $0x8] ss:$16 sps:$4 sm:$0xff]   ;;  %v73_v7 = vsel %vm71_vm1, %v72_v2, 0 }
   0x3   :  { %127 = vmatprep.subr.bf16.mxu1 %v213_v4  ;;  %v217_v8 = vld [vmem:[%s281_s1 + $0x24] ss:$16 sps:$4 sm:$0x3f]   ;;  %87 = vmatpush1.bf16.msra.mxu0 %v215_v5  ;;  %v219_v9 = vld [vmem:[%s281_s1 + $0x2c] ss:$16 sps:$4 sm:$0x3f]  }
   0x4   :  { %128 = vmatpush1.bf16.msra.mxu1 %v216_v6  ;;  %v24_v10 = vld [vmem:[%s282_s2] sm:$0xff]  ;;  %v78_v11 = vand.u32 %v217_v8, %v73_v7  ;;  %v222_v13 = vld [vmem:[%s281_s1 + $0x28] ss:$16 sps:$4 sm:$0x3f]   ;;  %v84_v14 = vand.u32 %v219_v9, %v73_v7 }
   0x5   :  { %v221_v12 = vld [vmem:[%s281_s1 + $0x20] ss:$16 sps:$4 sm:$0x3f]   ;;  %27 = vperm.xlu0 %210, %v24_v10   ;;  %v81_v16 = vand.u32 %v222_v13, %v73_v7 }
   0x6   :  { %88 = vmatprep.subr.bf16.mxu0 %v78_v11  ;;  %v75_v15 = vand.u32 %v221_v12, %v73_v7  ;;  %129 = vmatprep.subr.bf16.mxu1 %v84_v14  ;;  %v15_v17 = vld [vmem:[%s283_s0] sm:$0xf] }
   0x8   :  { %89 = vmatpush1.bf16.msra.mxu0 %v75_v15  ;;  %130 = vmatpush1.bf16.msra.mxu1 %v81_v16 }
   0xb   :  { %202 = vmatmul.mubr.msk.bf16.vlgmr.msra.gmra.mrb[0].mxu0 %vm66_vm2, %v15_v17  ;;  %203 = vmatmul.mubr.msk.bf16.vlgmr.msra.gmra.mrb[0].mxu1 %vm66_vm2, %v15_v17 }
  0x84   :  { %v28_v18 = vpop.permute.xlu0 %27 }
  0xde   :  { %v120_v19 = vpop.f32.mrb[0].mxu0  ;;  %v161_v20 = vpop.f32.mrb[0].mxu1 }
  0xdf   :  { %v121_v21 = vadd.f32 %v120_v19, %v28_v18  ;;  %v162_v22 = vadd.f32 %v161_v20, %v28_v18  ;;  %v122_v23 = vpop.f32.mrb[1].mxu0  ;;  %v163_v24 = vpop.f32.mrb[1].mxu1 }
  0xe0   :  { %v123_v25 = vadd.f32 %v122_v23, %v28_v18  ;;  %v164_v26 = vadd.f32 %v163_v24, %v28_v18  ;;  %v124_v27 = vpop.f32.mrb[2].mxu0  ;;  %v165_v28 = vpop.f32.mrb[2].mxu1 }
  0xe1   :  { %v168_v29 = vmax.f32 %v121_v21, 0.0  ;;  %v170_v30 = vmax.f32 %v162_v22, 0.0  ;;  %v125_v31 = vpop.f32.mrb[3].mxu0  ;;  %v166_v32 = vpop.f32.mrb[3].mxu1 }
  0xe2   :  { %v169_v33 = vmax.f32 %v123_v25, 0.0  ;;  %v171_v34 = vmax.f32 %v164_v26, 0.0 }
  0xe4   :  { %v206_v35 = vpack.c.bf16 %v169_v33, %v168_v29  ;;  %v207_v36 = vpack.c.bf16 %v171_v34, %v170_v30 }
  0xe6   :  { %188 = vst [vmem:[%s284_s3] sm:$0xff] %v206_v35  ;;  %189 = vst [vmem:[%s284_s3 + $0x8] sm:$0xff] %v207_v36 }

// kernel: unetpp_forward.36
= control target key start
LH: loop header
LB: loop body
LE: loop exit
PB: predicated region body
PF: predicated region fallthrough
CT: control target
= control target key end

     0   :  { %v313_v1 = vmov 0   ;;  %vm134_vm0 = vcmask 1043456   ;;  %vm130_vm1 = vcmask 588800   ;;  %s400_s1 = inlined_call_operand.vmem [shape: bf16[72,512], index: 1, kind: input, shape index: {}]   ;;  %s401_s2 = inlined_call_operand.vmem [shape: f32[8,1], index: 2, kind: input, shape index: {}]   ;;  %s402_s0 = inlined_call_operand.vmem [shape: bf16[8,72], index: 0, kind: input, shape index: {}]   ;;  %s403_s3 = inlined_call_operand.vmem [shape: bf16[8,512], index: 3, kind: output, shape index: {}]  }
   0x1   :  { %v285_v0 = vld [vmem:[%s400_s1 + $0x4] ss:$16 sps:$4 sm:$0xff]   ;;  %179 = vmatprep.mubr.bf16.mxu0 %v313_v1  ;;  %220 = vmatprep.mubr.bf16.mxu1 %v313_v1  ;;  %v287_v2 = vld [vmem:[%s400_s1 + $0xc] ss:$16 sps:$4 sm:$0xff]   ;;  %v289_v3 = vld [vmem:[%s400_s1] ss:$16 sps:$4 sm:$0xff]  }
   0x2   :  { %284 = vset.pattern.permute.xlu0 %v313_v1  ;;  %147 = vmatprep.subr.bf16.mxu0 %v285_v0  ;;  %v290_v4 = vld [vmem:[%s400_s1 + $0x8] ss:$16 sps:$4 sm:$0xff]   ;;  %v291_v5 = vld [vmem:[%s400_s1 + $0x24] ss:$16 sps:$4 sm:$0xff]   ;;  %v293_v6 = vld [vmem:[%s400_s1 + $0x2c] ss:$16 sps:$4 sm:$0xff]  }
   0x3   :  { %188 = vmatprep.subr.bf16.mxu1 %v287_v2  ;;  %148 = vmatpush1.bf16.msra.mxu0 %v289_v3  ;;  %v295_v7 = vld [vmem:[%s400_s1 + $0x20] ss:$16 sps:$4 sm:$0xff]   ;;  %v296_v8 = vld [vmem:[%s400_s1 + $0x28] ss:$16 sps:$4 sm:$0xff]   ;;  %v297_v9 = vld [vmem:[%s400_s1 + $0x44] ss:$16 sps:$4 sm:$0xff]  }
   0x4   :  { %189 = vmatpush1.bf16.msra.mxu1 %v290_v4  ;;  %149 = vmatprep.subr.bf16.mxu0 %v291_v5  ;;  %v299_v10 = vld [vmem:[%s400_s1 + $0x4c] ss:$16 sps:$4 sm:$0xff]   ;;  %v301_v11 = vld [vmem:[%s400_s1 + $0x40] ss:$16 sps:$4 sm:$0xff]   ;;  %v302_v12 = vld [vmem:[%s400_s1 + $0x48] ss:$16 sps:$4 sm:$0xff]  }
   0x5   :  { %190 = vmatprep.subr.bf16.mxu1 %v293_v6  ;;  %v303_v13 = vld [vmem:[%s400_s1 + $0x64] ss:$16 sps:$4 sm:$0xff]   ;;  %v305_v14 = vld [vmem:[%s400_s1 + $0x6c] ss:$16 sps:$4 sm:$0xff]   ;;  %v307_v18 = vld [vmem:[%s400_s1 + $0x60] ss:$16 sps:$4 sm:$0xff]  }
   0x6   :  { %v32_v15 = vld [vmem:[%s400_s1 + $0x80] sm:$0xff]  ;;  %v33_v16 = vld [vmem:[%s400_s1 + $0x88] sm:$0xff] }
   0x7   :  { %150 = vmatpush1.bf16.msra.mxu0 %v295_v7  ;;  %v34_v17 = vld [vmem:[%s401_s2] sm:$0xff]  ;;  %v308_v19 = vld [vmem:[%s400_s1 + $0x68] ss:$16 sps:$4 sm:$0xff]   ;;  %v272_v20 = vcombine.high %v32_v15, %v32_v15  ;;  %v274_v21 = vcombine.high %v33_v16, %v33_v16  ;;  %v271_v22 = vcombine.low %v32_v15, %v32_v15  ;;  %v273_v23 = vcombine.low %v33_v16, %v33_v16 }
   0x8   :  { %191 = vmatpush1.bf16.msra.mxu1 %v296_v8  ;;  %151 = vmatprep.subr.bf16.mxu0 %v297_v9  ;;  %v15_v26 = vld [vmem:[%s402_s0] sm:$0xf] }
   0x9   :  { %192 = vmatprep.subr.bf16.mxu1 %v299_v10  ;;  %37 = vperm.xlu0 %284, %v34_v17   ;;  %v136_v24 = vsel %vm134_vm0, %v271_v22, 0  ;;  %v142_v25 = vsel %vm134_vm0, %v273_v23, 0 }
   0xb   :  { %152 = vmatpush1.bf16.msra.mxu0 %v301_v11 }
   0xc   :  { %193 = vmatpush1.bf16.msra.mxu1 %v302_v12  ;;  %153 = vmatprep.subr.bf16.mxu0 %v303_v13 }
   0xd   :  { %194 = vmatprep.subr.bf16.mxu1 %v305_v14 }
   0xf   :  { %154 = vmatpush1.bf16.msra.mxu0 %v307_v18 }
  0x10   :  { %195 = vmatpush1.bf16.msra.mxu1 %v308_v19  ;;  %275 = vmatprep.subr.msk.bf16.mxu0 %vm134_vm0, %v272_v20 }
  0x11   :  { %277 = vmatprep.subr.msk.bf16.mxu1 %vm134_vm0, %v274_v21 }
  0x13   :  { %156 = vmatpush1.bf16.msra.mxu0 %v136_v24 }
  0x14   :  { %197 = vmatpush1.bf16.msra.mxu1 %v142_v25 }
  0x16   :  { %276 = vmatmul.mubr.msk.bf16.vlgmr.msra.gmra.mrb[0].mxu0 %vm130_vm1, %v15_v26 }
  0x17   :  { %278 = vmatmul.mubr.msk.bf16.vlgmr.msra.gmra.mrb[0].mxu1 %vm130_vm1, %v15_v26 }
  0x88   :  { %v38_v27 = vpop.permute.xlu0 %37 }
  0xe9   :  { %v181_v28 = vpop.f32.mrb[0].mxu0 }
  0xea   :  { %v222_v29 = vpop.f32.mrb[0].mxu1  ;;  %v182_v30 = vadd.f32 %v181_v28, %v38_v27  ;;  %v183_v32 = vpop.f32.mrb[1].mxu0 }
  0xeb   :  { %v223_v31 = vadd.f32 %v222_v29, %v38_v27  ;;  %v224_v33 = vpop.f32.mrb[1].mxu1  ;;  %v184_v34 = vadd.f32 %v183_v32, %v38_v27  ;;  %v185_v36 = vpop.f32.mrb[2].mxu0 }
  0xec   :  { %v225_v35 = vadd.f32 %v224_v33, %v38_v27  ;;  %v226_v37 = vpop.f32.mrb[2].mxu1  ;;  %v229_v38 = vmax.f32 %v182_v30, 0.0  ;;  %v186_v40 = vpop.f32.mrb[3].mxu0 }
  0xed   :  { %v231_v39 = vmax.f32 %v223_v31, 0.0  ;;  %v227_v41 = vpop.f32.mrb[3].mxu1  ;;  %v230_v42 = vmax.f32 %v184_v34, 0.0 }
  0xee   :  { %v232_v43 = vmax.f32 %v225_v35, 0.0 }
  0xef   :  { %v281_v44 = vpack.c.bf16 %v230_v42, %v229_v38 }
  0xf0   :  { %v282_v45 = vpack.c.bf16 %v232_v43, %v231_v39 }
  0xf1   :  { %249 = vst [vmem:[%s403_s3] sm:$0xff] %v281_v44 }
  0xf2   :  { %250 = vst [vmem:[%s403_s3 + $0x8] sm:$0xff] %v282_v45 }

// kernel: unetpp_forward.37
= control target key start
LH: loop header
LB: loop body
LE: loop exit
PB: predicated region body
PF: predicated region fallthrough
CT: control target
= control target key end

     0   :  { %s69_s0 = inlined_call_operand.vmem [shape: bf16[8,128], index: 0, kind: input, shape index: {}]   ;;  %s70_s1 = inlined_call_operand.vmem [shape: bf16[8,128], index: 1, kind: input, shape index: {}]   ;;  %s71_s2 = inlined_call_operand.vmem [shape: bf16[8,128], index: 2, kind: input, shape index: {}]   ;;  %s72_s3 = inlined_call_operand.vmem [shape: bf16[8,128], index: 3, kind: input, shape index: {}]   ;;  %s73_s4 = inlined_call_operand.vmem [shape: bf16[8,128], index: 4, kind: output, shape index: {}]  }
   0x1   :  { %v17_v0 = vld [vmem:[%s69_s0] sm:$0xf] }
   0x2   :  { %v18_v1 = vld [vmem:[%s70_s1] sm:$0xf] }
   0x3   :  { %v20_v2 = vld [vmem:[%s71_s2] sm:$0xf]  ;;  %v19_v3 = vmax.bf16 %v18_v1, %v17_v0 }
   0x4   :  { %v21_v4 = vld [vmem:[%s72_s3] sm:$0xf] }
   0x5   :  { %v22_v5 = vmax.bf16 %v21_v4, %v20_v2 }
   0x7   :  { %v23_v6 = vmax.bf16 %v22_v5, %v19_v3 }
   0x9   :  { %24 = vst [vmem:[%s73_s4] sm:$0xf] %v23_v6 }

// kernel: unetpp_forward.38
= control target key start
LH: loop header
LB: loop body
LE: loop exit
PB: predicated region body
PF: predicated region fallthrough
CT: control target
= control target key end

     0   :  { %v181_v0 = vmov 0.0   ;;  %vm182_vm0 = vmmov 0   ;;  %v183_v2 = vmov 0   ;;  %vm74_vm1 = vcmask 1043456   ;;  %s231_s1 = inlined_call_operand.vmem [shape: bf16[72,128], index: 1, kind: input, shape index: {}]   ;;  %s232_s2 = inlined_call_operand.vmem [shape: f32[16,1], index: 2, kind: input, shape index: {}]   ;;  %s233_s0 = inlined_call_operand.vmem [shape: bf16[16,72], index: 0, kind: input, shape index: {}]   ;;  %s234_s3 = inlined_call_operand.vmem [shape: bf16[16,128], index: 3, kind: output, shape index: {}]  }
   0x1   :  { %157 = vmatprep.subr.bf16.mxu0 %v181_v0  ;;  %v175_v1 = vld [vmem:[%s231_s1] sm:$0xff]   ;;  %167 = vmatprep.mubr.msk.bf16.mxu0 %vm182_vm0, %v181_v0  ;;  %v176_v3 = vld [vmem:[%s231_s1 + $0x8] sm:$0xff]   ;;  %v177_v5 = vld [vmem:[%s231_s1 + $0x10] sm:$0xff]   ;;  %vm70_vm2 = vcmask 588800  }
   0x2   :  { %174 = vset.pattern.permute.xlu0 %v183_v2  ;;  %158 = vmatpush3.bf16.msra.mxu0 %v175_v1  ;;  %v26_v4 = vld [vmem:[%s232_s2] sm:$0xff]  ;;  %v27_v6 = vld [vmem:[%s232_s2 + $0x8] sm:$0xff]  ;;  %v178_v7 = vld [vmem:[%s231_s1 + $0x18] sm:$0xff]  }
   0x3   :  { %159 = vmatprep.subr.bf16.mxu0 %v181_v0  ;;  %30 = vperm.xlu0 %174, %v26_v4   ;;  %v179_v8 = vld [vmem:[%s231_s1 + $0x20] ss:$0 sps:$4 sm:$0xff]  }
   0x4   :  { %v76_v9 = vsel %vm74_vm1, %v179_v8, 0  ;;  %v180_v10 = vld [vmem:[%s233_s0] sm:$0xff]  }
   0x6   :  { %160 = vmatpush3.bf16.msra.mxu0 %v176_v3 }
   0x7   :  { %161 = vmatprep.subr.bf16.mxu0 %v181_v0  ;;  %35 = vperm.xlu0 %174, %v27_v6  }
   0xa   :  { %162 = vmatpush3.bf16.msra.mxu0 %v177_v5 }
   0xb   :  { %163 = vmatprep.subr.bf16.mxu0 %v181_v0 }
   0xe   :  { %164 = vmatpush3.bf16.msra.mxu0 %v178_v7 }
   0xf   :  { %165 = vmatprep.subr.bf16.mxu0 %v181_v0 }
  0x12   :  { %166 = vmatpush3.bf16.msra.mxu0 %v76_v9 }
  0x15   :  { %168 = vmatmul.mubr.msk.bf16.vlgmr.msra.gmra.mrb[0].mxu0 %vm70_vm2, %v180_v10 }
  0x82   :  { %v31_v11 = vpop.permute.xlu0 %30 }
  0x86   :  { %v36_v15 = vpop.permute.xlu0 %35 }
  0xe8   :  { %v112_v12 = vpop.f32.mrb[0].mxu0 }
  0xe9   :  { %v113_v13 = vadd.f32 %v112_v12, %v31_v11  ;;  %v169_v14 = vpop.f32.mrb[1].mxu0 }
  0xea   :  { %v115_v16 = vpop.f32.mrb[2].mxu0 }
  0xeb   :  { %v116_v17 = vadd.f32 %v115_v16, %v36_v15  ;;  %v170_v18 = vpop.f32.mrb[3].mxu0  ;;  %v119_v19 = vmax.f32 %v113_v13, 0.0 }
  0xed   :  { %v120_v20 = vmax.f32 %v116_v17, 0.0 }
  0xef   :  { %v149_v21 = vpack.c.bf16 %v120_v20, %v119_v19 }
  0xf1   :  { %150 = vst [vmem:[%s234_s3] sm:$0xff] %v149_v21  }

// kernel: unetpp_forward.39
= control target key start
LH: loop header
LB: loop body
LE: loop exit
PB: predicated region body
PF: predicated region fallthrough
CT: control target
= control target key end

     0   :  { %v206_v0 = vmov 0   ;;  %vm110_vm0 = vcmask 130048   ;;  %s269_s1 = inlined_call_operand.vmem [shape: bf16[144,128], index: 1, kind: input, shape index: {}]   ;;  %s270_s0 = inlined_call_operand.vmem [shape: bf16[16,144], index: 0, kind: input, shape index: {}]   ;;  %s271_s2 = inlined_call_operand.vmem [shape: f32[16,1], index: 2, kind: input, shape index: {}]   ;;  %s272_s3 = inlined_call_operand.vmem [shape: bf16[16,128], index: 3, kind: output, shape index: {}]  }
   0x1   :  { %114 = vmatprep.subr.bf16.mxu0 %v206_v0  ;;  %v194_v1 = vld [vmem:[%s269_s1] sm:$0xff]   ;;  %193 = vset.pattern.permute.xlu0 %v206_v0  ;;  %v195_v2 = vld [vmem:[%s269_s1 + $0x8] sm:$0xff]   ;;  %v196_v3 = vld [vmem:[%s269_s1 + $0x10] sm:$0xff]  }
   0x2   :  { %115 = vmatpush1.bf16.msra.mxu0 %v194_v1  ;;  %v197_v4 = vld [vmem:[%s269_s1 + $0x18] sm:$0xff]   ;;  %v205_v5 = vld [vmem:[%s270_s0 + $0x4] ss:$8 sps:$4 sm:$0xff]   ;;  %v200_v10 = vld [vmem:[%s269_s1 + $0x30] sm:$0xff]  }
   0x3   :  { %116 = vmatprep.subr.bf16.mxu0 %v206_v0  ;;  %v35_v6 = vld [vmem:[%s271_s2] sm:$0xff]  ;;  %182 = vmatprep.mubr.msk.bf16.mxu0 %vm110_vm0, %v205_v5  ;;  %v36_v7 = vld [vmem:[%s271_s2 + $0x8] sm:$0xff]  ;;  %v201_v11 = vld [vmem:[%s269_s1 + $0x38] sm:$0xff]  }
   0x4   :  { %39 = vperm.xlu0 %193, %v35_v6   ;;  %v198_v8 = vld [vmem:[%s269_s1 + $0x20] sm:$0xff]   ;;  %v199_v9 = vld [vmem:[%s269_s1 + $0x28] sm:$0xff]  }
   0x5   :  { %v202_v12 = vld [vmem:[%s269_s1 + $0x40] sm:$0xff]  }
   0x6   :  { %117 = vmatpush1.bf16.msra.mxu0 %v195_v2  ;;  %v203_v13 = vld [vmem:[%s270_s0] ss:$8 sps:$4 sm:$0xff]  }
   0x7   :  { %118 = vmatprep.subr.bf16.mxu0 %v206_v0 }
   0x8   :  { %44 = vperm.xlu0 %193, %v36_v7  }
   0xa   :  { %119 = vmatpush1.bf16.msra.mxu0 %v196_v3 }
   0xb   :  { %120 = vmatprep.subr.bf16.mxu0 %v206_v0 }
   0xe   :  { %121 = vmatpush1.bf16.msra.mxu0 %v197_v4 }
   0xf   :  { %122 = vmatprep.subr.bf16.mxu0 %v206_v0 }
  0x12   :  { %123 = vmatpush1.bf16.msra.mxu0 %v198_v8 }
  0x13   :  { %124 = vmatprep.subr.bf16.mxu0 %v206_v0 }
  0x16   :  { %125 = vmatpush1.bf16.msra.mxu0 %v199_v9 }
  0x17   :  { %126 = vmatprep.subr.bf16.mxu0 %v206_v0 }
  0x1a   :  { %127 = vmatpush1.bf16.msra.mxu0 %v200_v10 }
  0x1b   :  { %128 = vmatprep.subr.bf16.mxu0 %v206_v0 }
  0x1e   :  { %129 = vmatpush1.bf16.msra.mxu0 %v201_v11 }
  0x1f   :  { %130 = vmatprep.subr.bf16.mxu0 %v206_v0 }
  0x22   :  { %131 = vmatpush1.bf16.msra.mxu0 %v202_v12 }
  0x25   :  { %147 = vmatmul.mubr.bf16.vlgmr.msra.gmra.mrb[0].mxu0 %v203_v13 }
  0x83   :  { %v40_v14 = vpop.permute.xlu0 %39 }
  0x87   :  { %v45_v18 = vpop.permute.xlu0 %44 }
  0xf8   :  { %v148_v15 = vpop.f32.mrb[0].mxu0 }
  0xf9   :  { %v149_v16 = vadd.f32 %v148_v15, %v40_v14  ;;  %v150_v17 = vpop.f32.mrb[1].mxu0 }
  0xfa   :  { %v151_v19 = vpop.f32.mrb[2].mxu0 }
  0xfb   :  { %v152_v20 = vadd.f32 %v151_v19, %v45_v18  ;;  %v153_v21 = vpop.f32.mrb[3].mxu0  ;;  %v155_v22 = vmax.f32 %v149_v16, 0.0 }
  0xfd   :  { %v156_v23 = vmax.f32 %v152_v20, 0.0 }
  0xff   :  { %v190_v24 = vpack.c.bf16 %v156_v23, %v155_v22 }
 0x101   :  { %191 = vst [vmem:[%s272_s3] sm:$0xff] %v190_v24  }

// kernel: unetpp_forward.42
= control target key start
LH: loop header
LB: loop body
LE: loop exit
PB: predicated region body
PF: predicated region fallthrough
CT: control target
= control target key end

     0   :  { %vm31_vm0 = vcmask 257024   ;;  %s93_s0 = inlined_call_operand.vmem [shape: bf16[16,32], index: 0, kind: input, shape index: {}]   ;;  %s94_s1 = inlined_call_operand.vmem [shape: bf16[16,32], index: 1, kind: input, shape index: {}]   ;;  %s95_s2 = inlined_call_operand.vmem [shape: bf16[16,32], index: 2, kind: input, shape index: {}]   ;;  %s96_s3 = inlined_call_operand.vmem [shape: bf16[16,32], index: 3, kind: input, shape index: {}]   ;;  %s97_s4 = inlined_call_operand.vmem [shape: bf16[16,32], index: 4, kind: output, shape index: {}]  }
   0x1   :  { %v17_v0 = vld [vmem:[%s93_s0] sm:$0xf]  ;;  %v18_v5 = vld [vmem:[%s93_s0 + $0x4] sm:$0xf] }
   0x2   :  { %v19_v1 = vld [vmem:[%s94_s1] sm:$0xf]  ;;  %v20_v6 = vld [vmem:[%s94_s1 + $0x4] sm:$0xf] }
   0x3   :  { %v23_v2 = vld [vmem:[%s95_s2] sm:$0xf]  ;;  %v21_v3 = vmax.bf16 %v19_v1, %v17_v0  ;;  %v22_v8 = vmax.bf16 %v20_v6, %v18_v5  ;;  %v24_v9 = vld [vmem:[%s95_s2 + $0x4] sm:$0xf] }
   0x4   :  { %v25_v4 = vld [vmem:[%s96_s3] sm:$0xf]  ;;  %v26_v10 = vld [vmem:[%s96_s3 + $0x4] sm:$0xf] }
   0x5   :  { %v27_v7 = vmax.bf16 %v25_v4, %v23_v2  ;;  %v28_v11 = vmax.bf16 %v26_v10, %v24_v9 }
   0x7   :  { %v29_v12 = vmax.bf16 %v27_v7, %v21_v3  ;;  %v30_v13 = vmax.bf16 %v28_v11, %v22_v8 }
   0x9   :  { %32 = vst.msk [vmem:[%s97_s4] sm:$0xf] %vm31_vm0, %v29_v12  ;;  %33 = vst.msk [vmem:[%s97_s4 + $0x4] sm:$0xf] %vm31_vm0, %v30_v13 }

// kernel: unetpp_forward.43
= control target key start
LH: loop header
LB: loop body
LE: loop exit
PB: predicated region body
PF: predicated region fallthrough
CT: control target
= control target key end

     0   :  { %v277_v0 = vmov 0   ;;  %vm133_vm0 = vcmask 130048   ;;  %vm209_vm1 = vcmask 257024   ;;  %s361_s1 = inlined_call_operand.vmem [shape: bf16[144,32], index: 1, kind: input, shape index: {}]   ;;  %s362_s0 = inlined_call_operand.vmem [shape: bf16[32,144], index: 0, kind: input, shape index: {}]   ;;  %s363_s2 = inlined_call_operand.vmem [shape: f32[32,1], index: 2, kind: input, shape index: {}]   ;;  %s364_s3 = inlined_call_operand.vmem [shape: bf16[32,32], index: 3, kind: output, shape index: {}]  }
   0x1   :  { %140 = vmatprep.subr.bf16.mxu0 %v277_v0  ;;  %241 = vmatprep.subr.bf16.mxu1 %v277_v0  ;;  %v262_v1 = vld [vmem:[%s361_s1] sm:$0xff]   ;;  %v263_v2 = vld [vmem:[%s361_s1 + $0x8] sm:$0xff]   ;;  %v264_v3 = vld [vmem:[%s361_s1 + $0x10] sm:$0xff]  }
   0x2   :  { %261 = vset.pattern.permute.xlu1 %v277_v0  ;;  %260 = vset.pattern.permute.xlu0 %v277_v0  ;;  %v265_v4 = vld [vmem:[%s361_s1 + $0x18] sm:$0xff]   ;;  %v273_v5 = vld [vmem:[%s362_s0 + $0x4] ss:$8 sps:$4 sm:$0xff]   ;;  %v39_v7 = vld [vmem:[%s363_s2 + $0x10] sm:$0xff] }
   0x3   :  { %141 = vmatpush1.bf16.msra.mxu0 %v262_v1  ;;  %250 = vmatpush1.bf16.msra.mxu1 %v262_v1  ;;  %v276_v6 = vld [vmem:[%s362_s0 + $0x14] ss:$8 sps:$4 sm:$0xff]   ;;  %v37_v8 = vld [vmem:[%s363_s2] sm:$0xff]  ;;  %v38_v11 = vld [vmem:[%s363_s2 + $0x8] sm:$0xff] }
   0x4   :  { %142 = vmatprep.subr.bf16.mxu0 %v277_v0  ;;  %242 = vmatprep.subr.bf16.mxu1 %v277_v0  ;;  %v40_v9 = vld [vmem:[%s363_s2 + $0x18] sm:$0xff]  ;;  %v266_v10 = vld [vmem:[%s361_s1 + $0x20] sm:$0xff]   ;;  %v267_v12 = vld [vmem:[%s361_s1 + $0x28] sm:$0xff]  }
   0x5   :  { %231 = vmatprep.mubr.msk.bf16.mxu0 %vm133_vm0, %v273_v5  ;;  %53 = vperm.xlu1 %261, %v39_v7   ;;  %v268_v13 = vld [vmem:[%s361_s1 + $0x30] sm:$0xff]   ;;  %v269_v14 = vld [vmem:[%s361_s1 + $0x38] sm:$0xff]   ;;  %v270_v15 = vld [vmem:[%s361_s1 + $0x40] sm:$0xff]  }
   0x6   :  { %232 = vmatprep.mubr.msk.bf16.mxu1 %vm133_vm0, %v276_v6  ;;  %43 = vperm.xlu0 %260, %v37_v8   ;;  %v271_v16 = vld [vmem:[%s362_s0] ss:$8 sps:$4 sm:$0xff]   ;;  %v274_v17 = vld [vmem:[%s362_s0 + $0x10] ss:$8 sps:$4 sm:$0xff]  }
   0x7   :  { %143 = vmatpush1.bf16.msra.mxu0 %v263_v2  ;;  %251 = vmatpush1.bf16.msra.mxu1 %v263_v2 }
   0x8   :  { %144 = vmatprep.subr.bf16.mxu0 %v277_v0  ;;  %243 = vmatprep.subr.bf16.mxu1 %v277_v0 }
   0x9   :  { %58 = vperm.xlu1 %261, %v40_v9  }
   0xa   :  { %48 = vperm.xlu0 %260, %v38_v11  }
   0xb   :  { %145 = vmatpush1.bf16.msra.mxu0 %v264_v3  ;;  %252 = vmatpush1.bf16.msra.mxu1 %v264_v3 }
   0xc   :  { %146 = vmatprep.subr.bf16.mxu0 %v277_v0  ;;  %244 = vmatprep.subr.bf16.mxu1 %v277_v0 }
   0xf   :  { %147 = vmatpush1.bf16.msra.mxu0 %v265_v4  ;;  %253 = vmatpush1.bf16.msra.mxu1 %v265_v4 }
  0x10   :  { %148 = vmatprep.subr.bf16.mxu0 %v277_v0  ;;  %245 = vmatprep.subr.bf16.mxu1 %v277_v0 }
  0x13   :  { %149 = vmatpush1.bf16.msra.mxu0 %v266_v10  ;;  %254 = vmatpush1.bf16.msra.mxu1 %v266_v10 }
  0x14   :  { %150 = vmatprep.subr.bf16.mxu0 %v277_v0  ;;  %246 = vmatprep.subr.bf16.mxu1 %v277_v0 }
  0x17   :  { %151 = vmatpush1.bf16.msra.mxu0 %v267_v12  ;;  %255 = vmatpush1.bf16.msra.mxu1 %v267_v12 }
  0x18   :  { %152 = vmatprep.subr.bf16.mxu0 %v277_v0  ;;  %247 = vmatprep.subr.bf16.mxu1 %v277_v0 }
  0x1b   :  { %153 = vmatpush1.bf16.msra.mxu0 %v268_v13  ;;  %256 = vmatpush1.bf16.msra.mxu1 %v268_v13 }
  0x1c   :  { %154 = vmatprep.subr.bf16.mxu0 %v277_v0  ;;  %248 = vmatprep.subr.bf16.mxu1 %v277_v0 }
  0x1f   :  { %155 = vmatpush1.bf16.msra.mxu0 %v269_v14  ;;  %257 = vmatpush1.bf16.msra.mxu1 %v269_v14 }
  0x20   :  { %156 = vmatprep.subr.bf16.mxu0 %v277_v0  ;;  %249 = vmatprep.subr.bf16.mxu1 %v277_v0 }
  0x23   :  { %157 = vmatpush1.bf16.msra.mxu0 %v270_v15  ;;  %258 = vmatpush1.bf16.msra.mxu1 %v270_v15 }
  0x26   :  { %173 = vmatmul.mubr.bf16.vlgmr.msra.gmra.mrb[0].mxu0 %v271_v16  ;;  %181 = vmatmul.mubr.bf16.vlgmr.msra.gmra.mrb[0].mxu1 %v274_v17 }
  0x84   :  { %v54_v18 = vpop.permute.xlu1 %53 }
  0x85   :  { %v44_v19 = vpop.permute.xlu0 %43 }
  0x88   :  { %v59_v20 = vpop.permute.xlu1 %58 }
  0x89   :  { %v49_v21 = vpop.permute.xlu0 %48 }
  0xf9   :  { %v174_v22 = vpop.f32.mrb[0].mxu0  ;;  %v182_v23 = vpop.f32.mrb[0].mxu1 }
  0xfa   :  { %v175_v24 = vadd.f32 %v174_v22, %v44_v19  ;;  %v183_v25 = vadd.f32 %v182_v23, %v54_v18  ;;  %v176_v26 = vpop.f32.mrb[1].mxu0  ;;  %v184_v27 = vpop.f32.mrb[1].mxu1 }
  0xfb   :  { %v177_v28 = vpop.f32.mrb[2].mxu0  ;;  %v185_v29 = vpop.f32.mrb[2].mxu1 }
  0xfc   :  { %v189_v30 = vmax.f32 %v175_v24, 0.0  ;;  %v191_v31 = vmax.f32 %v183_v25, 0.0  ;;  %v178_v32 = vadd.f32 %v177_v28, %v49_v21  ;;  %v186_v33 = vadd.f32 %v185_v29, %v59_v20  ;;  %v179_v34 = vpop.f32.mrb[3].mxu0  ;;  %v187_v35 = vpop.f32.mrb[3].mxu1 }
  0xfe   :  { %v237_v36 = vpack.c.bf16 %v189_v30, %v189_v30  ;;  %v239_v37 = vpack.c.bf16 %v191_v31, %v191_v31  ;;  %v190_v38 = vmax.f32 %v178_v32, 0.0  ;;  %v192_v39 = vmax.f32 %v186_v33, 0.0 }
 0x100   :  { %210 = vst.msk [vmem:[%s364_s3] sm:$0xf] %vm209_vm1, %v237_v36  ;;  %212 = vst.msk [vmem:[%s364_s3 + $0x8] sm:$0xf] %vm209_vm1, %v239_v37  ;;  %v238_v40 = vpack.c.bf16 %v190_v38, %v190_v38  ;;  %v240_v41 = vpack.c.bf16 %v192_v39, %v192_v39 }
 0x102   :  { %211 = vst.msk [vmem:[%s364_s3 + $0x4] sm:$0xf] %vm209_vm1, %v238_v40  ;;  %213 = vst.msk [vmem:[%s364_s3 + $0xc] sm:$0xf] %vm209_vm1, %v240_v41 }

// kernel: unetpp_forward.44
= control target key start
LH: loop header
LB: loop body
LE: loop exit
PB: predicated region body
PF: predicated region fallthrough
CT: control target
= control target key end

     0   :  { %v458_v1 = vmov 0   ;;  %vm221_vm0 = vcmask 261120   ;;  %vm346_vm1 = vcmask 257024   ;;  %s581_s1 = inlined_call_operand.vmem [shape: bf16[288,32], index: 1, kind: input, shape index: {}]   ;;  %s582_s0 = inlined_call_operand.vmem [shape: bf16[32,288], index: 0, kind: input, shape index: {}]   ;;  %s583_s2 = inlined_call_operand.vmem [shape: f32[32,1], index: 2, kind: input, shape index: {}]   ;;  %s584_s3 = inlined_call_operand.vmem [shape: bf16[32,32], index: 3, kind: output, shape index: {}]  }
   0x1   :  { %v432_v0 = vld [vmem:[%s581_s1 + $0x40] sm:$0xff]   ;;  %430 = vset.pattern.permute.xlu0 %v458_v1  ;;  %431 = vset.pattern.permute.xlu1 %v458_v1  ;;  %v434_v3 = vld [vmem:[%s581_s1 + $0x48] sm:$0xff]   ;;  %v436_v5 = vld [vmem:[%s581_s1 + $0x50] sm:$0xff]  }
   0x2   :  { %v433_v2 = vld [vmem:[%s581_s1] sm:$0xff]   ;;  %389 = vmatprep.subr.bf16.mxu0 %v432_v0  ;;  %v435_v4 = vld [vmem:[%s581_s1 + $0x8] sm:$0xff]   ;;  %v437_v6 = vld [vmem:[%s581_s1 + $0x10] sm:$0xff]  }
   0x3   :  { %390 = vmatpush3.bf16.msra.mxu0 %v433_v2  ;;  %v438_v7 = vld [vmem:[%s581_s1 + $0x58] sm:$0xff]   ;;  %v440_v9 = vld [vmem:[%s581_s1 + $0x60] sm:$0xff]   ;;  %v442_v12 = vld [vmem:[%s581_s1 + $0x68] sm:$0xff]  }
   0x4   :  { %391 = vmatprep.subr.bf16.mxu0 %v434_v3  ;;  %v439_v8 = vld [vmem:[%s581_s1 + $0x18] sm:$0xff]   ;;  %v441_v10 = vld [vmem:[%s581_s1 + $0x20] sm:$0xff]   ;;  %v443_v13 = vld [vmem:[%s581_s1 + $0x28] sm:$0xff]  }
   0x5   :  { %v447_v11 = vld [vmem:[%s581_s1 + $0x80] sm:$0xff]   ;;  %v444_v14 = vld [vmem:[%s581_s1 + $0x70] sm:$0xff]   ;;  %v452_v16 = vld [vmem:[%s581_s1 + $0x88] sm:$0xff]  }
   0x6   :  { %421 = vmatprep.subr.bf16.mxu1 %v447_v11  ;;  %v451_v15 = vld [vmem:[%s582_s0 + $0x4] ss:$12 sps:$4 sm:$0xff]   ;;  %v453_v17 = vld [vmem:[%s582_s0 + $0x8] ss:$12 sps:$4 sm:$0xff]   ;;  %v454_v18 = vld [vmem:[%s582_s0 + $0x20] ss:$12 sps:$4 sm:$0xff]  }
   0x7   :  { %392 = vmatpush3.bf16.msra.mxu0 %v435_v4  ;;  %422 = vmatpush3.bf16.msra.mxu1 %v447_v11  ;;  %v59_v19 = vld [vmem:[%s583_s2] sm:$0xff]  ;;  %v445_v20 = vld [vmem:[%s581_s1 + $0x30] sm:$0xff]   ;;  %v446_v22 = vld [vmem:[%s581_s1 + $0x78] sm:$0xff]  }
   0x8   :  { %393 = vmatprep.subr.bf16.mxu0 %v436_v5  ;;  %260 = vmatprep.mubr.bf16.mxu0 %v451_v15  ;;  %v61_v21 = vld [vmem:[%s583_s2 + $0x10] sm:$0xff]  ;;  %v60_v23 = vld [vmem:[%s583_s2 + $0x8] sm:$0xff]  ;;  %v62_v24 = vld [vmem:[%s583_s2 + $0x18] sm:$0xff] }
   0x9   :  { %423 = vmatprep.subr.bf16.mxu1 %v452_v16  ;;  %425 = vmatprep.mubr.msk.bf16.mxu1 %vm221_vm0, %v453_v17  ;;  %v448_v25 = vld [vmem:[%s581_s1 + $0x38] sm:$0xff]   ;;  %v449_v26 = vld [vmem:[%s582_s0] ss:$12 sps:$4 sm:$0xff]  }
   0xa   :  { %65 = vperm.xlu0 %430, %v59_v19   ;;  %75 = vperm.xlu1 %431, %v61_v21   ;;  %v455_v27 = vld [vmem:[%s582_s0 + $0x1c] ss:$12 sps:$4 sm:$0xff]   ;;  %v457_v28 = vld [vmem:[%s582_s0 + $0x18] ss:$12 sps:$4 sm:$0xff]  }
   0xb   :  { %394 = vmatpush3.bf16.msra.mxu0 %v437_v6  ;;  %424 = vmatpush3.bf16.msra.mxu1 %v452_v16 }
   0xc   :  { %395 = vmatprep.subr.bf16.mxu0 %v438_v7 }
   0xe   :  { %426 = vmatmul.mubr.msk.bf16.vlgmr.msra.gmra.mrb[0].mxu1 %vm221_vm0, %v454_v18  ;;  %70 = vperm.xlu0 %430, %v60_v23  }
   0xf   :  { %396 = vmatpush3.bf16.msra.mxu0 %v439_v8  ;;  %80 = vperm.xlu1 %431, %v62_v24  }
  0x10   :  { %397 = vmatprep.subr.bf16.mxu0 %v440_v9 }
  0x13   :  { %398 = vmatpush3.bf16.msra.mxu0 %v441_v10 }
  0x14   :  { %399 = vmatprep.subr.bf16.mxu0 %v442_v12 }
  0x17   :  { %400 = vmatpush3.bf16.msra.mxu0 %v443_v13 }
  0x18   :  { %401 = vmatprep.subr.bf16.mxu0 %v444_v14 }
  0x1b   :  { %402 = vmatpush3.bf16.msra.mxu0 %v445_v20 }
  0x1c   :  { %403 = vmatprep.subr.bf16.mxu0 %v446_v22 }
  0x1f   :  { %404 = vmatpush3.bf16.msra.mxu0 %v448_v25 }
  0x22   :  { %261 = vmatmul.mubr.bf16.vlgmr.msra.gmra.mrb[0].mxu0 %v449_v26 }
  0x23   :  { %268 = vmatprep.mubr.bf16.mxu0 %v455_v27 }
  0x2a   :  { %269 = vmatmul.mubr.bf16.gmra.mrb[4].mxu0 %v457_v28 }
  0x89   :  { %v66_v33 = vpop.permute.xlu0 %65  ;;  %v76_v44 = vpop.permute.xlu1 %75 }
  0x8d   :  { %v71_v39 = vpop.permute.xlu0 %70 }
  0x8e   :  { %v81_v57 = vpop.permute.xlu1 %80 }
  0xe1   :  { %v427_v29 = vpop.f32.mrb[0].mxu1 }
  0xe2   :  { %v311_v30 = vpop.f32.mrb[1].mxu1 }
  0xe3   :  { %v428_v31 = vpop.f32.mrb[2].mxu1 }
  0xe4   :  { %v314_v32 = vpop.f32.mrb[3].mxu1 }
  0xf5   :  { %v405_v34 = vpop.f32.mrb[0].mxu0 }
  0xf6   :  { %v406_v35 = vpop.f32.mrb[1].mxu0 }
  0xf7   :  { %v407_v36 = vadd.f32 %v406_v35, %v405_v34  ;;  %v408_v37 = vpop.f32.mrb[2].mxu0 }
  0xf8   :  { %v409_v38 = vpop.f32.mrb[3].mxu0 }
  0xf9   :  { %v410_v40 = vadd.f32 %v409_v38, %v408_v37  ;;  %v263_v41 = vadd.f32 %v407_v36, %v66_v33 }
  0xfb   :  { %v266_v42 = vadd.f32 %v410_v40, %v71_v39  ;;  %v312_v43 = vadd.f32 %v311_v30, %v263_v41 }
  0xfd   :  { %v326_v45 = vmax.f32 %v312_v43, 0.0  ;;  %v315_v46 = vadd.f32 %v314_v32, %v266_v42  ;;  %v411_v47 = vpop.f32.mrb[4].mxu0 }
  0xfe   :  { %v412_v48 = vpop.f32.mrb[5].mxu0 }
  0xff   :  { %v385_v49 = vpack.c.bf16 %v326_v45, %v326_v45  ;;  %v327_v50 = vmax.f32 %v315_v46, 0.0  ;;  %v413_v51 = vadd.f32 %v412_v48, %v411_v47  ;;  %v414_v52 = vpop.f32.mrb[6].mxu0 }
 0x100   :  { %v415_v53 = vpop.f32.mrb[7].mxu0 }
 0x101   :  { %347 = vst.msk [vmem:[%s584_s3] sm:$0xf] %vm346_vm1, %v385_v49  ;;  %v386_v54 = vpack.c.bf16 %v327_v50, %v327_v50  ;;  %v271_v55 = vadd.f32 %v413_v51, %v76_v44  ;;  %v416_v56 = vadd.f32 %v415_v53, %v414_v52 }
 0x103   :  { %348 = vst.msk [vmem:[%s584_s3 + $0x4] sm:$0xf] %vm346_vm1, %v386_v54  ;;  %v320_v58 = vadd.f32 %v427_v29, %v271_v55  ;;  %v274_v59 = vadd.f32 %v416_v56, %v81_v57 }
 0x105   :  { %v328_v60 = vmax.f32 %v320_v58, 0.0  ;;  %v323_v61 = vadd.f32 %v428_v31, %v274_v59 }
 0x107   :  { %v387_v62 = vpack.c.bf16 %v328_v60, %v328_v60  ;;  %v329_v63 = vmax.f32 %v323_v61, 0.0 }
 0x109   :  { %349 = vst.msk [vmem:[%s584_s3 + $0x8] sm:$0xf] %vm346_vm1, %v387_v62  ;;  %v388_v0 = vpack.c.bf16 %v329_v63, %v329_v63 }
 0x10b   :  { %350 = vst.msk [vmem:[%s584_s3 + $0xc] sm:$0xf] %vm346_vm1, %v388_v0 }

// kernel: unetpp_forward.49
= control target key start
LH: loop header
LB: loop body
LE: loop exit
PB: predicated region body
PF: predicated region fallthrough
CT: control target
= control target key end

     0   :  { %vm45_vm0 = vcmask 60416   ;;  %s143_s0 = inlined_call_operand.vmem [shape: bf16[32,8], index: 0, kind: input, shape index: {}]   ;;  %s144_s1 = inlined_call_operand.vmem [shape: bf16[32,8], index: 1, kind: input, shape index: {}]   ;;  %s145_s2 = inlined_call_operand.vmem [shape: bf16[32,8], index: 2, kind: input, shape index: {}]   ;;  %s146_s3 = inlined_call_operand.vmem [shape: bf16[32,8], index: 3, kind: input, shape index: {}]   ;;  %s147_s4 = inlined_call_operand.vmem [shape: bf16[32,8], index: 4, kind: output, shape index: {}]  }
   0x1   :  { %v17_v0 = vld [vmem:[%s143_s0] sm:$0xf]  ;;  %v18_v5 = vld [vmem:[%s143_s0 + $0x4] sm:$0xf]  ;;  %v19_v11 = vld [vmem:[%s143_s0 + $0x8] sm:$0xf] }
   0x2   :  { %v21_v1 = vld [vmem:[%s144_s1] sm:$0xf]  ;;  %v22_v6 = vld [vmem:[%s144_s1 + $0x4] sm:$0xf]  ;;  %v23_v13 = vld [vmem:[%s144_s1 + $0x8] sm:$0xf] }
   0x3   :  { %v29_v2 = vld [vmem:[%s145_s2] sm:$0xf]  ;;  %v25_v3 = vmax.bf16 %v21_v1, %v17_v0  ;;  %v26_v8 = vmax.bf16 %v22_v6, %v18_v5  ;;  %v30_v9 = vld [vmem:[%s145_s2 + $0x4] sm:$0xf]  ;;  %v31_v14 = vld [vmem:[%s145_s2 + $0x8] sm:$0xf]  ;;  %v27_v17 = vmax.bf16 %v23_v13, %v19_v11 }
   0x4   :  { %v33_v4 = vld [vmem:[%s146_s3] sm:$0xf]  ;;  %v34_v10 = vld [vmem:[%s146_s3 + $0x4] sm:$0xf]  ;;  %v35_v15 = vld [vmem:[%s146_s3 + $0x8] sm:$0xf] }
   0x5   :  { %v37_v7 = vmax.bf16 %v33_v4, %v29_v2  ;;  %v38_v12 = vmax.bf16 %v34_v10, %v30_v9  ;;  %v39_v18 = vmax.bf16 %v35_v15, %v31_v14  ;;  %v20_v19 = vld [vmem:[%s143_s0 + $0xc] sm:$0xf] }
   0x6   :  { %v24_v20 = vld [vmem:[%s144_s1 + $0xc] sm:$0xf] }
   0x7   :  { %v41_v16 = vmax.bf16 %v37_v7, %v25_v3  ;;  %v32_v21 = vld [vmem:[%s145_s2 + $0xc] sm:$0xf]  ;;  %v42_v22 = vmax.bf16 %v38_v12, %v26_v8  ;;  %v28_v23 = vmax.bf16 %v24_v20, %v20_v19  ;;  %v43_v25 = vmax.bf16 %v39_v18, %v27_v17 }
   0x8   :  { %v36_v24 = vld [vmem:[%s146_s3 + $0xc] sm:$0xf] }
   0x9   :  { %46 = vst.msk [vmem:[%s147_s4] sm:$0xf] %vm45_vm0, %v41_v16  ;;  %v40_v26 = vmax.bf16 %v36_v24, %v32_v21  ;;  %47 = vst.msk [vmem:[%s147_s4 + $0x4] sm:$0xf] %vm45_vm0, %v42_v22 }
   0xa   :  { %48 = vst.msk [vmem:[%s147_s4 + $0x8] sm:$0xf] %vm45_vm0, %v43_v25 }
   0xb   :  { %v44_v27 = vmax.bf16 %v40_v26, %v28_v23 }
   0xd   :  { %49 = vst.msk [vmem:[%s147_s4 + $0xc] sm:$0xf] %vm45_vm0, %v44_v27 }

// kernel: unetpp_forward.45
= control target key start
LH: loop header
LB: loop body
LE: loop exit
PB: predicated region body
PF: predicated region fallthrough
CT: control target
= control target key end

     0   :  { %v466_v0 = vmov 0   ;;  %vm266_vm0 = vcmask 392192   ;;  %s601_s1 = inlined_call_operand.vmem [shape: bf16[432,128], index: 1, kind: input, shape index: {}]   ;;  %s602_s0 = inlined_call_operand.vmem [shape: bf16[16,432], index: 0, kind: input, shape index: {}]   ;;  %s603_s2 = inlined_call_operand.vmem [shape: f32[16,1], index: 2, kind: input, shape index: {}]   ;;  %s604_s3 = inlined_call_operand.vmem [shape: bf16[16,128], index: 3, kind: output, shape index: {}]  }
   0x1   :  { %311 = vmatprep.subr.bf16.mxu1 %v466_v0  ;;  %v433_v1 = vld [vmem:[%s601_s1 + $0x80] sm:$0xff]   ;;  %432 = vset.pattern.permute.xlu0 %v466_v0  ;;  %v436_v4 = vld [vmem:[%s601_s1 + $0x88] sm:$0xff]   ;;  %v439_v7 = vld [vmem:[%s601_s1 + $0x90] sm:$0xff]  }
   0x2   :  { %v434_v2 = vld [vmem:[%s601_s1 + $0x40] sm:$0xff]   ;;  %312 = vmatpush1.bf16.msra.mxu1 %v433_v1  ;;  %v437_v5 = vld [vmem:[%s601_s1 + $0x48] sm:$0xff]   ;;  %v440_v8 = vld [vmem:[%s601_s1 + $0x50] sm:$0xff]  }
   0x3   :  { %v435_v3 = vld [vmem:[%s601_s1] sm:$0xff]   ;;  %409 = vmatprep.subr.bf16.mxu0 %v434_v2  ;;  %313 = vmatprep.subr.bf16.mxu1 %v466_v0  ;;  %v438_v6 = vld [vmem:[%s601_s1 + $0x8] sm:$0xff]   ;;  %v441_v9 = vld [vmem:[%s601_s1 + $0x10] sm:$0xff]  }
   0x4   :  { %410 = vmatpush3.bf16.msra.mxu0 %v435_v3  ;;  %v442_v10 = vld [vmem:[%s601_s1 + $0x98] sm:$0xff]   ;;  %v446_v13 = vld [vmem:[%s601_s1 + $0x60] sm:$0xff]   ;;  %v449_v16 = vld [vmem:[%s601_s1 + $0x68] sm:$0xff]  }
   0x5   :  { %411 = vmatprep.subr.bf16.mxu0 %v437_v5  ;;  %v443_v11 = vld [vmem:[%s601_s1 + $0x58] sm:$0xff]   ;;  %v445_v14 = vld [vmem:[%s601_s1 + $0xa0] sm:$0xff]   ;;  %v448_v17 = vld [vmem:[%s601_s1 + $0xa8] sm:$0xff]  }
   0x6   :  { %314 = vmatpush1.bf16.msra.mxu1 %v436_v4  ;;  %v444_v12 = vld [vmem:[%s601_s1 + $0x18] sm:$0xff]   ;;  %v447_v15 = vld [vmem:[%s601_s1 + $0x20] sm:$0xff]   ;;  %v450_v18 = vld [vmem:[%s601_s1 + $0x28] sm:$0xff]  }
   0x7   :  { %315 = vmatprep.subr.bf16.mxu1 %v466_v0  ;;  %v452_v19 = vld [vmem:[%s601_s1 + $0x70] sm:$0xff]   ;;  %v454_v22 = vld [vmem:[%s601_s1 + $0xb8] sm:$0xff]   ;;  %v73_v27 = vld [vmem:[%s603_s2] sm:$0xff] }
   0x8   :  { %412 = vmatpush3.bf16.msra.mxu0 %v438_v6  ;;  %v451_v20 = vld [vmem:[%s601_s1 + $0xb0] sm:$0xff]   ;;  %v455_v23 = vld [vmem:[%s601_s1 + $0x78] sm:$0xff]   ;;  %v457_v28 = vld [vmem:[%s601_s1 + $0xc0] sm:$0xff]   ;;  %77 = vperm.xlu0 %432, %v73_v27  }
   0x9   :  { %413 = vmatprep.subr.bf16.mxu0 %v440_v8  ;;  %v453_v21 = vld [vmem:[%s601_s1 + $0x30] sm:$0xff]   ;;  %v456_v25 = vld [vmem:[%s601_s1 + $0x38] sm:$0xff]   ;;  %v74_v30 = vld [vmem:[%s603_s2 + $0x8] sm:$0xff] }
   0xa   :  { %316 = vmatpush1.bf16.msra.mxu1 %v439_v7  ;;  %v460_v24 = vld [vmem:[%s602_s0 + $0x4] ss:$16 sps:$4 sm:$0xff]   ;;  %v465_v26 = vld [vmem:[%s602_s0 + $0xc] ss:$16 sps:$4 sm:$0xff]   ;;  %v458_v29 = vld [vmem:[%s602_s0] ss:$16 sps:$4 sm:$0xff]  }
   0xb   :  { %317 = vmatprep.subr.bf16.mxu1 %v466_v0  ;;  %302 = vmatprep.mubr.bf16.mxu0 %v460_v24  ;;  %v461_v31 = vld [vmem:[%s601_s1 + $0xc8] sm:$0xff]   ;;  %v462_v32 = vld [vmem:[%s601_s1 + $0xd0] sm:$0xff]  }
   0xc   :  { %414 = vmatpush3.bf16.msra.mxu0 %v441_v9  ;;  %399 = vmatprep.mubr.msk.bf16.mxu1 %vm266_vm0, %v465_v26  ;;  %v463_v33 = vld [vmem:[%s602_s0 + $0x8] ss:$16 sps:$4 sm:$0xff]  }
   0xd   :  { %415 = vmatprep.subr.bf16.mxu0 %v443_v11  ;;  %82 = vperm.xlu0 %432, %v74_v30  }
   0xe   :  { %318 = vmatpush1.bf16.msra.mxu1 %v442_v10 }
   0xf   :  { %319 = vmatprep.subr.bf16.mxu1 %v466_v0 }
  0x10   :  { %416 = vmatpush3.bf16.msra.mxu0 %v444_v12 }
  0x11   :  { %417 = vmatprep.subr.bf16.mxu0 %v446_v13 }
  0x12   :  { %320 = vmatpush1.bf16.msra.mxu1 %v445_v14 }
  0x13   :  { %321 = vmatprep.subr.bf16.mxu1 %v466_v0 }
  0x14   :  { %418 = vmatpush3.bf16.msra.mxu0 %v447_v15 }
  0x15   :  { %419 = vmatprep.subr.bf16.mxu0 %v449_v16 }
  0x16   :  { %322 = vmatpush1.bf16.msra.mxu1 %v448_v17 }
  0x17   :  { %323 = vmatprep.subr.bf16.mxu1 %v466_v0 }
  0x18   :  { %420 = vmatpush3.bf16.msra.mxu0 %v450_v18 }
  0x19   :  { %421 = vmatprep.subr.bf16.mxu0 %v452_v19 }
  0x1a   :  { %324 = vmatpush1.bf16.msra.mxu1 %v451_v20 }
  0x1b   :  { %325 = vmatprep.subr.bf16.mxu1 %v466_v0 }
  0x1c   :  { %422 = vmatpush3.bf16.msra.mxu0 %v453_v21 }
  0x1d   :  { %423 = vmatprep.subr.bf16.mxu0 %v455_v23 }
  0x1e   :  { %326 = vmatpush1.bf16.msra.mxu1 %v454_v22 }
  0x1f   :  { %327 = vmatprep.subr.bf16.mxu1 %v466_v0 }
  0x20   :  { %424 = vmatpush3.bf16.msra.mxu0 %v456_v25 }
  0x22   :  { %328 = vmatpush1.bf16.msra.mxu1 %v457_v28 }
  0x23   :  { %303 = vmatmul.mubr.bf16.vlgmr.msra.gmra.mrb[0].mxu0 %v458_v29  ;;  %329 = vmatprep.subr.bf16.mxu1 %v466_v0 }
  0x26   :  { %330 = vmatpush1.bf16.msra.mxu1 %v461_v31 }
  0x27   :  { %331 = vmatprep.subr.bf16.mxu1 %v466_v0 }
  0x2a   :  { %332 = vmatpush1.bf16.msra.mxu1 %v462_v32 }
  0x2d   :  { %344 = vmatmul.mubr.bf16.vlgmr.msra.gmra.mrb[0].mxu1 %v463_v33 }
  0x87   :  { %v78_v36 = vpop.permute.xlu0 %77 }
  0x8c   :  { %v83_v41 = vpop.permute.xlu0 %82 }
  0xf6   :  { %v425_v34 = vpop.f32.mrb[0].mxu0 }
  0xf7   :  { %v426_v35 = vpop.f32.mrb[1].mxu0 }
  0xf8   :  { %v427_v37 = vadd.f32 %v426_v35, %v425_v34  ;;  %v428_v38 = vpop.f32.mrb[2].mxu0 }
  0xf9   :  { %v429_v39 = vpop.f32.mrb[3].mxu0 }
  0xfa   :  { %v430_v40 = vadd.f32 %v429_v39, %v428_v38  ;;  %v305_v42 = vadd.f32 %v427_v37, %v78_v36 }
  0xfc   :  { %v308_v44 = vadd.f32 %v430_v40, %v83_v41 }
 0x100   :  { %v345_v43 = vpop.f32.mrb[0].mxu1 }
 0x101   :  { %v346_v45 = vadd.f32 %v345_v43, %v305_v42  ;;  %v347_v46 = vpop.f32.mrb[1].mxu1 }
 0x102   :  { %v348_v47 = vpop.f32.mrb[2].mxu1 }
 0x103   :  { %v349_v48 = vadd.f32 %v348_v47, %v308_v44  ;;  %v350_v49 = vpop.f32.mrb[3].mxu1  ;;  %v352_v50 = vmax.f32 %v346_v45, 0.0 }
 0x105   :  { %v353_v51 = vmax.f32 %v349_v48, 0.0 }
 0x107   :  { %v407_v52 = vpack.c.bf16 %v353_v51, %v352_v50 }
 0x109   :  { %408 = vst [vmem:[%s604_s3] sm:$0xff] %v407_v52  }

// kernel: unetpp_forward.50
= control target key start
LH: loop header
LB: loop body
LE: loop exit
PB: predicated region body
PF: predicated region fallthrough
CT: control target
= control target key end

     0   :  { %v640_v1 = vmov 0   ;;  %vm283_vm0 = vcmask 261120   ;;  %vm466_vm1 = vcmask 60416   ;;  %s811_s1 = inlined_call_operand.vmem [shape: bf16[288,8], index: 1, kind: input, shape index: {}]   ;;  %s812_s0 = inlined_call_operand.vmem [shape: bf16[64,288], index: 0, kind: input, shape index: {}]   ;;  %s813_s2 = inlined_call_operand.vmem [shape: f32[64,1], index: 2, kind: input, shape index: {}]   ;;  %s814_s3 = inlined_call_operand.vmem [shape: bf16[64,8], index: 3, kind: output, shape index: {}]  }
   0x1   :  { %v606_v0 = vld [vmem:[%s811_s1 + $0x40] sm:$0xff]   ;;  %605 = vset.pattern.permute.xlu1 %v640_v1  ;;  %604 = vset.pattern.permute.xlu0 %v640_v1  ;;  %v608_v3 = vld [vmem:[%s811_s1 + $0x48] sm:$0xff]   ;;  %v610_v5 = vld [vmem:[%s811_s1 + $0x50] sm:$0xff]  }
   0x2   :  { %v607_v2 = vld [vmem:[%s811_s1] sm:$0xff]   ;;  %529 = vmatprep.subr.bf16.mxu0 %v606_v0  ;;  %587 = vmatprep.subr.bf16.mxu1 %v606_v0  ;;  %v609_v4 = vld [vmem:[%s811_s1 + $0x8] sm:$0xff]   ;;  %v611_v6 = vld [vmem:[%s811_s1 + $0x10] sm:$0xff]  }
   0x3   :  { %530 = vmatpush3.bf16.msra.mxu0 %v607_v2  ;;  %595 = vmatpush3.bf16.msra.mxu1 %v607_v2  ;;  %v612_v7 = vld [vmem:[%s811_s1 + $0x58] sm:$0xff]   ;;  %v614_v9 = vld [vmem:[%s811_s1 + $0x60] sm:$0xff]   ;;  %v616_v11 = vld [vmem:[%s811_s1 + $0x68] sm:$0xff]  }
   0x4   :  { %531 = vmatprep.subr.bf16.mxu0 %v608_v3  ;;  %588 = vmatprep.subr.bf16.mxu1 %v608_v3  ;;  %v613_v8 = vld [vmem:[%s811_s1 + $0x18] sm:$0xff]   ;;  %v615_v10 = vld [vmem:[%s811_s1 + $0x20] sm:$0xff]   ;;  %v617_v14 = vld [vmem:[%s811_s1 + $0x28] sm:$0xff]  }
   0x5   :  { %v624_v12 = vld [vmem:[%s812_s0 + $0x4] ss:$12 sps:$4 sm:$0xff]   ;;  %v627_v13 = vld [vmem:[%s812_s0 + $0x4c] ss:$12 sps:$4 sm:$0xff]   ;;  %v625_v23 = vld [vmem:[%s812_s0 + $0x48] ss:$12 sps:$4 sm:$0xff]  }
   0x6   :  { %v618_v15 = vld [vmem:[%s811_s1 + $0x70] sm:$0xff]   ;;  %328 = vmatprep.mubr.bf16.mxu0 %v624_v12  ;;  %352 = vmatprep.mubr.bf16.mxu1 %v627_v13  ;;  %v620_v17 = vld [vmem:[%s811_s1 + $0x78] sm:$0xff]   ;;  %v67_v20 = vld [vmem:[%s813_s2] sm:$0xff] }
   0x7   :  { %532 = vmatpush3.bf16.msra.mxu0 %v609_v4  ;;  %596 = vmatpush3.bf16.msra.mxu1 %v609_v4  ;;  %v619_v16 = vld [vmem:[%s811_s1 + $0x30] sm:$0xff]   ;;  %v621_v18 = vld [vmem:[%s811_s1 + $0x38] sm:$0xff]   ;;  %v628_v21 = vld [vmem:[%s811_s1 + $0x80] sm:$0xff]  }
   0x8   :  { %533 = vmatprep.subr.bf16.mxu0 %v610_v5  ;;  %589 = vmatprep.subr.bf16.mxu1 %v610_v5  ;;  %v69_v19 = vld [vmem:[%s813_s2 + $0x10] sm:$0xff]  ;;  %v622_v22 = vld [vmem:[%s812_s0] ss:$12 sps:$4 sm:$0xff]   ;;  %v70_v24 = vld [vmem:[%s813_s2 + $0x18] sm:$0xff] }
   0x9   :  { %87 = vperm.xlu1 %605, %v69_v19   ;;  %77 = vperm.xlu0 %604, %v67_v20   ;;  %v68_v25 = vld [vmem:[%s813_s2 + $0x8] sm:$0xff]  ;;  %v71_v30 = vld [vmem:[%s813_s2 + $0x20] sm:$0xff]  ;;  %v74_v33 = vld [vmem:[%s813_s2 + $0x38] sm:$0xff] }
   0xa   :  { %v630_v26 = vld [vmem:[%s812_s0 + $0x1c] ss:$12 sps:$4 sm:$0xff]   ;;  %v633_v31 = vld [vmem:[%s812_s0 + $0x18] ss:$12 sps:$4 sm:$0xff]   ;;  %v634_v32 = vld [vmem:[%s812_s0 + $0x20] ss:$12 sps:$4 sm:$0xff]  }
   0xb   :  { %534 = vmatpush3.bf16.msra.mxu0 %v611_v6  ;;  %597 = vmatpush3.bf16.msra.mxu1 %v611_v6  ;;  %v629_v27 = vld [vmem:[%s811_s1 + $0x88] sm:$0xff]   ;;  %v73_v34 = vld [vmem:[%s813_s2 + $0x30] sm:$0xff]  ;;  %v637_v36 = vld [vmem:[%s812_s0 + $0x38] ss:$12 sps:$4 sm:$0xff]  }
   0xc   :  { %535 = vmatprep.subr.bf16.mxu0 %v612_v7  ;;  %590 = vmatprep.subr.bf16.mxu1 %v612_v7  ;;  %v632_v28 = vld [vmem:[%s812_s0 + $0x8] ss:$12 sps:$4 sm:$0xff]   ;;  %v638_v37 = vld [vmem:[%s812_s0 + $0x30] ss:$12 sps:$4 sm:$0xff]  }
   0xd   :  { %92 = vperm.xlu1 %605, %v70_v24   ;;  %82 = vperm.xlu0 %604, %v68_v25   ;;  %v72_v29 = vld [vmem:[%s813_s2 + $0x28] sm:$0xff]  ;;  %v635_v35 = vld [vmem:[%s812_s0 + $0x34] ss:$12 sps:$4 sm:$0xff]   ;;  %v639_v38 = vld [vmem:[%s812_s0 + $0x50] ss:$12 sps:$4 sm:$0xff]  }
   0xf   :  { %536 = vmatpush3.bf16.msra.mxu0 %v613_v8  ;;  %598 = vmatpush3.bf16.msra.mxu1 %v613_v8 }
  0x10   :  { %537 = vmatprep.subr.bf16.mxu0 %v614_v9  ;;  %591 = vmatprep.subr.bf16.mxu1 %v614_v9 }
  0x11   :  { %102 = vperm.xlu1 %605, %v72_v29   ;;  %97 = vperm.xlu0 %604, %v71_v30  }
  0x13   :  { %538 = vmatpush3.bf16.msra.mxu0 %v615_v10  ;;  %599 = vmatpush3.bf16.msra.mxu1 %v615_v10 }
  0x14   :  { %539 = vmatprep.subr.bf16.mxu0 %v616_v11  ;;  %592 = vmatprep.subr.bf16.mxu1 %v616_v11 }
  0x15   :  { %112 = vperm.xlu1 %605, %v74_v33   ;;  %107 = vperm.xlu0 %604, %v73_v34  }
  0x17   :  { %540 = vmatpush3.bf16.msra.mxu0 %v617_v14  ;;  %600 = vmatpush3.bf16.msra.mxu1 %v617_v14 }
  0x18   :  { %541 = vmatprep.subr.bf16.mxu0 %v618_v15  ;;  %593 = vmatprep.subr.bf16.mxu1 %v618_v15 }
  0x1b   :  { %542 = vmatpush3.bf16.msra.mxu0 %v619_v16  ;;  %601 = vmatpush3.bf16.msra.mxu1 %v619_v16 }
  0x1c   :  { %543 = vmatprep.subr.bf16.mxu0 %v620_v17  ;;  %594 = vmatprep.subr.bf16.mxu1 %v620_v17 }
  0x1f   :  { %544 = vmatpush3.bf16.msra.mxu0 %v621_v18  ;;  %602 = vmatpush3.bf16.msra.mxu1 %v621_v18 }
  0x20   :  { %575 = vmatprep.subr.bf16.mxu1 %v628_v21 }
  0x22   :  { %329 = vmatmul.mubr.bf16.vlgmr.msra.gmra.mrb[0].mxu0 %v622_v22  ;;  %353 = vmatmul.mubr.bf16.vlgmr.msra.gmra.mrb[0].mxu1 %v625_v23 }
  0x23   :  { %576 = vmatpush3.bf16.msra.mxu1 %v628_v21  ;;  %336 = vmatprep.mubr.bf16.mxu0 %v630_v26 }
  0x24   :  { %577 = vmatprep.subr.bf16.mxu1 %v629_v27  ;;  %579 = vmatprep.mubr.msk.bf16.mxu1 %vm283_vm0, %v632_v28 }
  0x27   :  { %578 = vmatpush3.bf16.msra.mxu1 %v629_v27 }
  0x2a   :  { %337 = vmatmul.mubr.bf16.gmra.mrb[4].mxu0 %v633_v31  ;;  %580 = vmatmul.mubr.msk.bf16.vlgmr.msra.gmra.mrb[4].mxu1 %vm283_vm0, %v634_v32 }
  0x2b   :  { %344 = vmatprep.mubr.bf16.mxu0 %v635_v35  ;;  %583 = vmatprep.mubr.msk.bf16.mxu1 %vm283_vm0, %v637_v36 }
  0x32   :  { %345 = vmatmul.mubr.bf16.gmra.mrb[8].mxu0 %v638_v37  ;;  %584 = vmatmul.mubr.msk.bf16.gmra.mrb[8].mxu1 %vm283_vm0, %v639_v38 }
  0x88   :  { %v88_v39 = vpop.permute.xlu1 %87  ;;  %v78_v40 = vpop.permute.xlu0 %77 }
  0x8c   :  { %v93_v41 = vpop.permute.xlu1 %92  ;;  %v83_v42 = vpop.permute.xlu0 %82 }
  0x90   :  { %v98_v55 = vpop.permute.xlu0 %97  ;;  %v103_v56 = vpop.permute.xlu1 %102 }
  0x94   :  { %v108_v5 = vpop.permute.xlu0 %107  ;;  %v113_v10 = vpop.permute.xlu1 %112 }
  0xf5   :  { %v545_v43 = vpop.f32.mrb[0].mxu0  ;;  %v563_v44 = vpop.f32.mrb[0].mxu1 }
  0xf6   :  { %v546_v45 = vpop.f32.mrb[1].mxu0  ;;  %v564_v46 = vpop.f32.mrb[1].mxu1 }
  0xf7   :  { %v547_v47 = vadd.f32 %v546_v45, %v545_v43  ;;  %v548_v48 = vpop.f32.mrb[2].mxu0  ;;  %v565_v49 = vadd.f32 %v564_v46, %v563_v44  ;;  %v566_v50 = vpop.f32.mrb[2].mxu1 }
  0xf8   :  { %v549_v51 = vpop.f32.mrb[3].mxu0  ;;  %v567_v52 = vpop.f32.mrb[3].mxu1 }
  0xf9   :  { %v550_v53 = vadd.f32 %v549_v51, %v548_v48  ;;  %v568_v54 = vadd.f32 %v567_v52, %v566_v50  ;;  %v331_v59 = vadd.f32 %v547_v47, %v78_v40  ;;  %v355_v15 = vadd.f32 %v565_v49, %v108_v5 }
  0xfb   :  { %v334_v2 = vadd.f32 %v550_v53, %v83_v42  ;;  %v358_v21 = vadd.f32 %v568_v54, %v113_v10 }
  0xfd   :  { %v551_v57 = vpop.f32.mrb[4].mxu0  ;;  %v581_v58 = vpop.f32.mrb[4].mxu1 }
  0xfe   :  { %v552_v60 = vpop.f32.mrb[5].mxu0  ;;  %v395_v61 = vpop.f32.mrb[5].mxu1 }
  0xff   :  { %v553_v62 = vadd.f32 %v552_v60, %v551_v57  ;;  %v396_v63 = vadd.f32 %v395_v61, %v331_v59  ;;  %v554_v0 = vpop.f32.mrb[6].mxu0  ;;  %v582_v1 = vpop.f32.mrb[6].mxu1 }
 0x100   :  { %v555_v3 = vpop.f32.mrb[7].mxu0  ;;  %v398_v4 = vpop.f32.mrb[7].mxu1 }
 0x101   :  { %v339_v6 = vadd.f32 %v553_v62, %v88_v39  ;;  %v426_v7 = vmax.f32 %v396_v63, 0.0  ;;  %v556_v8 = vadd.f32 %v555_v3, %v554_v0  ;;  %v399_v9 = vadd.f32 %v398_v4, %v334_v2 }
 0x103   :  { %v404_v11 = vadd.f32 %v581_v58, %v339_v6  ;;  %v521_v12 = vpack.c.bf16 %v426_v7, %v426_v7  ;;  %v342_v13 = vadd.f32 %v556_v8, %v93_v41  ;;  %v427_v14 = vmax.f32 %v399_v9, 0.0 }
 0x105   :  { %v428_v16 = vmax.f32 %v404_v11, 0.0  ;;  %467 = vst.msk [vmem:[%s814_s3] sm:$0xf] %vm466_vm1, %v521_v12  ;;  %v407_v17 = vadd.f32 %v582_v1, %v342_v13  ;;  %v522_v18 = vpack.c.bf16 %v427_v14, %v427_v14  ;;  %v557_v19 = vpop.f32.mrb[8].mxu0  ;;  %v585_v20 = vpop.f32.mrb[8].mxu1 }
 0x106   :  { %v420_v22 = vadd.f32 %v585_v20, %v355_v15  ;;  %v558_v23 = vpop.f32.mrb[9].mxu0  ;;  %v411_v24 = vpop.f32.mrb[9].mxu1 }
 0x107   :  { %v523_v25 = vpack.c.bf16 %v428_v16, %v428_v16  ;;  %v429_v26 = vmax.f32 %v407_v17, 0.0  ;;  %468 = vst.msk [vmem:[%s814_s3 + $0x4] sm:$0xf] %vm466_vm1, %v522_v18  ;;  %v559_v27 = vadd.f32 %v558_v23, %v557_v19  ;;  %v560_v28 = vpop.f32.mrb[10].mxu0  ;;  %v586_v29 = vpop.f32.mrb[10].mxu1 }
 0x108   :  { %v432_v30 = vmax.f32 %v420_v22, 0.0  ;;  %v423_v31 = vadd.f32 %v586_v29, %v358_v21  ;;  %v561_v32 = vpop.f32.mrb[11].mxu0  ;;  %v414_v33 = vpop.f32.mrb[11].mxu1 }
 0x109   :  { %469 = vst.msk [vmem:[%s814_s3 + $0x8] sm:$0xf] %vm466_vm1, %v523_v25  ;;  %v524_v34 = vpack.c.bf16 %v429_v26, %v429_v26  ;;  %v347_v35 = vadd.f32 %v559_v27, %v98_v55  ;;  %v562_v36 = vadd.f32 %v561_v32, %v560_v28 }
 0x10a   :  { %v527_v37 = vpack.c.bf16 %v432_v30, %v432_v30  ;;  %v433_v38 = vmax.f32 %v423_v31, 0.0 }
 0x10b   :  { %470 = vst.msk [vmem:[%s814_s3 + $0xc] sm:$0xf] %vm466_vm1, %v524_v34  ;;  %v412_v39 = vadd.f32 %v411_v24, %v347_v35  ;;  %v350_v40 = vadd.f32 %v562_v36, %v103_v56 }
 0x10c   :  { %473 = vst.msk [vmem:[%s814_s3 + $0x18] sm:$0xf] %vm466_vm1, %v527_v37  ;;  %v528_v41 = vpack.c.bf16 %v433_v38, %v433_v38 }
 0x10d   :  { %v430_v42 = vmax.f32 %v412_v39, 0.0  ;;  %v415_v43 = vadd.f32 %v414_v33, %v350_v40 }
 0x10e   :  { %474 = vst.msk [vmem:[%s814_s3 + $0x1c] sm:$0xf] %vm466_vm1, %v528_v41 }
 0x10f   :  { %v525_v44 = vpack.c.bf16 %v430_v42, %v430_v42  ;;  %v431_v45 = vmax.f32 %v415_v43, 0.0 }
 0x111   :  { %471 = vst.msk [vmem:[%s814_s3 + $0x10] sm:$0xf] %vm466_vm1, %v525_v44  ;;  %v526_v46 = vpack.c.bf16 %v431_v45, %v431_v45 }
 0x113   :  { %472 = vst.msk [vmem:[%s814_s3 + $0x14] sm:$0xf] %vm466_vm1, %v526_v46 }

// kernel: unetpp_forward.51
= control target key start
LH: loop header
LB: loop body
LE: loop exit
PB: predicated region body
PF: predicated region fallthrough
CT: control target
= control target key end

     0   :  { %v991_v1 = vmov 0   ;;  %vm475_vm0 = vcmask 523264   ;;  %vm723_vm1 = vcmask 60416   ;;  %s1243_s1 = inlined_call_operand.vmem [shape: bf16[576,8], index: 1, kind: input, shape index: {}]   ;;  %s1244_s0 = inlined_call_operand.vmem [shape: bf16[64,576], index: 0, kind: input, shape index: {}]   ;;  %s1245_s2 = inlined_call_operand.vmem [shape: f32[64,1], index: 2, kind: input, shape index: {}]   ;;  %s1246_s3 = inlined_call_operand.vmem [shape: bf16[64,8], index: 3, kind: output, shape index: {}]  }
   0x1   :  { %v927_v0 = vld [vmem:[%s1243_s1 + $0x40] sm:$0xff]   ;;  %925 = vset.pattern.permute.xlu0 %v991_v1  ;;  %926 = vset.pattern.permute.xlu1 %v991_v1  ;;  %v931_v5 = vld [vmem:[%s1243_s1 + $0x48] sm:$0xff]   ;;  %v935_v9 = vld [vmem:[%s1243_s1 + $0x50] sm:$0xff]  }
   0x2   :  { %v928_v2 = vld [vmem:[%s1243_s1 + $0xc0] sm:$0xff]   ;;  %812 = vmatprep.subr.bf16.mxu0 %v927_v0  ;;  %v932_v6 = vld [vmem:[%s1243_s1 + $0xc8] sm:$0xff]   ;;  %v936_v10 = vld [vmem:[%s1243_s1 + $0xd0] sm:$0xff]  }
   0x3   :  { %v929_v3 = vld [vmem:[%s1243_s1] sm:$0xff]   ;;  %852 = vmatprep.subr.bf16.mxu1 %v928_v2  ;;  %v933_v7 = vld [vmem:[%s1243_s1 + $0x8] sm:$0xff]   ;;  %v937_v11 = vld [vmem:[%s1243_s1 + $0x10] sm:$0xff]  }
   0x4   :  { %v930_v4 = vld [vmem:[%s1243_s1 + $0x80] sm:$0xff]   ;;  %813 = vmatpush3.bf16.msra.mxu0 %v929_v3  ;;  %v934_v8 = vld [vmem:[%s1243_s1 + $0x88] sm:$0xff]   ;;  %v938_v12 = vld [vmem:[%s1243_s1 + $0x90] sm:$0xff]  }
   0x5   :  { %853 = vmatpush3.bf16.msra.mxu1 %v930_v4  ;;  %814 = vmatprep.subr.bf16.mxu0 %v931_v5  ;;  %v939_v13 = vld [vmem:[%s1243_s1 + $0x58] sm:$0xff]   ;;  %v943_v17 = vld [vmem:[%s1243_s1 + $0x60] sm:$0xff]   ;;  %v947_v21 = vld [vmem:[%s1243_s1 + $0x68] sm:$0xff]  }
   0x6   :  { %854 = vmatprep.subr.bf16.mxu1 %v932_v6  ;;  %v940_v14 = vld [vmem:[%s1243_s1 + $0xd8] sm:$0xff]   ;;  %v944_v18 = vld [vmem:[%s1243_s1 + $0xe0] sm:$0xff]   ;;  %v948_v22 = vld [vmem:[%s1243_s1 + $0xe8] sm:$0xff]  }
   0x7   :  { %v941_v15 = vld [vmem:[%s1243_s1 + $0x18] sm:$0xff]   ;;  %v945_v19 = vld [vmem:[%s1243_s1 + $0x20] sm:$0xff]   ;;  %v949_v23 = vld [vmem:[%s1243_s1 + $0x28] sm:$0xff]  }
   0x8   :  { %815 = vmatpush3.bf16.msra.mxu0 %v933_v7  ;;  %v942_v16 = vld [vmem:[%s1243_s1 + $0x98] sm:$0xff]   ;;  %v946_v20 = vld [vmem:[%s1243_s1 + $0xa0] sm:$0xff]   ;;  %v950_v24 = vld [vmem:[%s1243_s1 + $0xa8] sm:$0xff]  }
   0x9   :  { %855 = vmatpush3.bf16.msra.mxu1 %v934_v8  ;;  %816 = vmatprep.subr.bf16.mxu0 %v935_v9  ;;  %v951_v25 = vld [vmem:[%s1243_s1 + $0x70] sm:$0xff]   ;;  %v955_v29 = vld [vmem:[%s1243_s1 + $0x78] sm:$0xff]   ;;  %v964_v36 = vld [vmem:[%s1244_s0 + $0xc] ss:$20 sps:$4 sm:$0xff]  }
   0xa   :  { %856 = vmatprep.subr.bf16.mxu1 %v936_v10  ;;  %v952_v26 = vld [vmem:[%s1243_s1 + $0xf0] sm:$0xff]   ;;  %v956_v30 = vld [vmem:[%s1243_s1 + $0xf8] sm:$0xff]   ;;  %v965_v37 = vld [vmem:[%s1243_s1 + $0x100] sm:$0xff]   ;;  %585 = vmatprep.mubr.bf16.mxu1 %v964_v36 }
   0xb   :  { %v953_v27 = vld [vmem:[%s1243_s1 + $0x30] sm:$0xff]   ;;  %v957_v31 = vld [vmem:[%s1243_s1 + $0x38] sm:$0xff]   ;;  %v966_v38 = vld [vmem:[%s1244_s0 + $0x2c] ss:$20 sps:$4 sm:$0xff]  }
   0xc   :  { %817 = vmatpush3.bf16.msra.mxu0 %v937_v11  ;;  %v954_v28 = vld [vmem:[%s1243_s1 + $0xb0] sm:$0xff]   ;;  %v958_v32 = vld [vmem:[%s1243_s1 + $0xb8] sm:$0xff]   ;;  %v972_v40 = vld [vmem:[%s1243_s1 + $0x108] sm:$0xff]  }
   0xd   :  { %857 = vmatpush3.bf16.msra.mxu1 %v938_v12  ;;  %818 = vmatprep.subr.bf16.mxu0 %v939_v13  ;;  %v959_v33 = vld [vmem:[%s1244_s0] ss:$20 sps:$4 sm:$0xff]   ;;  %v961_v34 = vld [vmem:[%s1244_s0 + $0x4] ss:$20 sps:$4 sm:$0xff]   ;;  %v962_v35 = vld [vmem:[%s1244_s0 + $0x8] ss:$20 sps:$4 sm:$0xff]  }
   0xe   :  { %858 = vmatprep.subr.bf16.mxu1 %v940_v14  ;;  %520 = vmatprep.mubr.bf16.mxu0 %v961_v34  ;;  %v968_v39 = vld [vmem:[%s1244_s0 + $0x34] ss:$20 sps:$4 sm:$0xff]   ;;  %v971_v42 = vld [vmem:[%s1244_s0 + $0x30] ss:$20 sps:$4 sm:$0xff]   ;;  %v986_v46 = vld [vmem:[%s1243_s1 + $0x118] sm:$0xff]  }
   0xf   :  { %v970_v41 = vld [vmem:[%s1244_s0 + $0x28] ss:$20 sps:$4 sm:$0xff]   ;;  %v979_v45 = vld [vmem:[%s1243_s1 + $0x110] sm:$0xff]   ;;  %v978_v48 = vld [vmem:[%s1244_s0 + $0x58] ss:$20 sps:$4 sm:$0xff]  }
  0x10   :  { %819 = vmatpush3.bf16.msra.mxu0 %v941_v15  ;;  %v973_v43 = vld [vmem:[%s1244_s0 + $0x54] ss:$20 sps:$4 sm:$0xff]   ;;  %v975_v44 = vld [vmem:[%s1244_s0 + $0x5c] ss:$20 sps:$4 sm:$0xff]   ;;  %v982_v50 = vld [vmem:[%s1244_s0 + $0x84] ss:$20 sps:$4 sm:$0xff]  }
  0x11   :  { %859 = vmatpush3.bf16.msra.mxu1 %v942_v16  ;;  %820 = vmatprep.subr.bf16.mxu0 %v943_v17  ;;  %v977_v47 = vld [vmem:[%s1244_s0 + $0x50] ss:$20 sps:$4 sm:$0xff]   ;;  %v112_v53 = vld [vmem:[%s1245_s2 + $0x8] sm:$0xff]  ;;  %v114_v54 = vld [vmem:[%s1245_s2 + $0x18] sm:$0xff] }
  0x12   :  { %860 = vmatprep.subr.bf16.mxu1 %v944_v18  ;;  %v980_v49 = vld [vmem:[%s1244_s0 + $0x7c] ss:$20 sps:$4 sm:$0xff]   ;;  %v111_v51 = vld [vmem:[%s1245_s2] sm:$0xff]  ;;  %v984_v55 = vld [vmem:[%s1244_s0 + $0x78] ss:$20 sps:$4 sm:$0xff]  }
  0x13   :  { %v113_v52 = vld [vmem:[%s1245_s2 + $0x10] sm:$0xff]  ;;  %121 = vperm.xlu0 %925, %v111_v51   ;;  %v115_v58 = vld [vmem:[%s1245_s2 + $0x20] sm:$0xff]  ;;  %v116_v60 = vld [vmem:[%s1245_s2 + $0x28] sm:$0xff] }
  0x14   :  { %821 = vmatpush3.bf16.msra.mxu0 %v945_v19  ;;  %131 = vperm.xlu1 %926, %v113_v52   ;;  %v985_v56 = vld [vmem:[%s1244_s0 + $0x80] ss:$20 sps:$4 sm:$0xff]   ;;  %v987_v57 = vld [vmem:[%s1244_s0 + $0x10] ss:$20 sps:$4 sm:$0xff]   ;;  %v118_v62 = vld [vmem:[%s1245_s2 + $0x38] sm:$0xff] }
  0x15   :  { %861 = vmatpush3.bf16.msra.mxu1 %v946_v20  ;;  %822 = vmatprep.subr.bf16.mxu0 %v947_v21  ;;  %v988_v59 = vld [vmem:[%s1244_s0 + $0x60] ss:$20 sps:$4 sm:$0xff]   ;;  %v989_v63 = vld [vmem:[%s1244_s0 + $0x38] ss:$20 sps:$4 sm:$0xff]   ;;  %v990_v0 = vld [vmem:[%s1244_s0 + $0x88] ss:$20 sps:$4 sm:$0xff]  }
  0x16   :  { %862 = vmatprep.subr.bf16.mxu1 %v948_v22  ;;  %v117_v61 = vld [vmem:[%s1245_s2 + $0x30] sm:$0xff] }
  0x17   :  { %126 = vperm.xlu0 %925, %v112_v53  }
  0x18   :  { %823 = vmatpush3.bf16.msra.mxu0 %v949_v23  ;;  %136 = vperm.xlu1 %926, %v114_v54  }
  0x19   :  { %863 = vmatpush3.bf16.msra.mxu1 %v950_v24  ;;  %824 = vmatprep.subr.bf16.mxu0 %v951_v25 }
  0x1a   :  { %864 = vmatprep.subr.bf16.mxu1 %v952_v26 }
  0x1b   :  { %141 = vperm.xlu0 %925, %v115_v58  }
  0x1c   :  { %825 = vmatpush3.bf16.msra.mxu0 %v953_v27  ;;  %146 = vperm.xlu1 %926, %v116_v60  }
  0x1d   :  { %865 = vmatpush3.bf16.msra.mxu1 %v954_v28  ;;  %826 = vmatprep.subr.bf16.mxu0 %v955_v29 }
  0x1e   :  { %866 = vmatprep.subr.bf16.mxu1 %v956_v30 }
  0x1f   :  { %151 = vperm.xlu0 %925, %v117_v61  }
  0x20   :  { %827 = vmatpush3.bf16.msra.mxu0 %v957_v31  ;;  %156 = vperm.xlu1 %926, %v118_v62  }
  0x21   :  { %867 = vmatpush3.bf16.msra.mxu1 %v958_v32  ;;  %900 = vmatprep.subr.bf16.mxu0 %v965_v37 }
  0x22   :  { %916 = vmatprep.subr.bf16.mxu1 %v965_v37 }
  0x23   :  { %521 = vmatmul.mubr.bf16.vlgmr.msra.gmra.mrb[0].mxu0 %v959_v33 }
  0x24   :  { %586 = vmatmul.mubr.bf16.vlgmr.msra.gmra.mrb[0].mxu1 %v962_v35  ;;  %901 = vmatpush3.bf16.msra.mxu0 %v965_v37 }
  0x25   :  { %920 = vmatpush3.bf16.msra.mxu1 %v965_v37  ;;  %528 = vmatprep.mubr.bf16.mxu0 %v966_v38 }
  0x26   :  { %593 = vmatprep.mubr.bf16.mxu1 %v968_v39  ;;  %902 = vmatprep.subr.bf16.mxu0 %v972_v40 }
  0x27   :  { %917 = vmatprep.subr.bf16.mxu1 %v972_v40 }
  0x28   :  { %903 = vmatpush3.bf16.msra.mxu0 %v972_v40 }
  0x29   :  { %921 = vmatpush3.bf16.msra.mxu1 %v972_v40  ;;  %904 = vmatprep.subr.bf16.mxu0 %v979_v45 }
  0x2a   :  { %918 = vmatprep.subr.bf16.mxu1 %v979_v45 }
  0x2b   :  { %529 = vmatmul.mubr.bf16.gmra.mrb[4].mxu0 %v970_v41 }
  0x2c   :  { %594 = vmatmul.mubr.bf16.gmra.mrb[4].mxu1 %v971_v42  ;;  %536 = vmatprep.mubr.bf16.mxu0 %v973_v43 }
  0x2d   :  { %601 = vmatprep.mubr.bf16.mxu1 %v975_v44  ;;  %905 = vmatpush3.bf16.msra.mxu0 %v979_v45 }
  0x2e   :  { %922 = vmatpush3.bf16.msra.mxu1 %v979_v45  ;;  %906 = vmatprep.subr.bf16.mxu0 %v986_v46 }
  0x2f   :  { %919 = vmatprep.subr.bf16.mxu1 %v986_v46 }
  0x31   :  { %907 = vmatpush3.bf16.msra.mxu0 %v986_v46 }
  0x32   :  { %923 = vmatpush3.bf16.msra.mxu1 %v986_v46 }
  0x33   :  { %537 = vmatmul.mubr.bf16.gmra.mrb[8].mxu0 %v977_v47 }
  0x34   :  { %602 = vmatmul.mubr.bf16.gmra.mrb[8].mxu1 %v978_v48  ;;  %544 = vmatprep.mubr.bf16.mxu0 %v980_v49 }
  0x35   :  { %609 = vmatprep.mubr.bf16.mxu1 %v982_v50 }
  0x3b   :  { %545 = vmatmul.mubr.bf16.gmra.mrb[12].mxu0 %v984_v55 }
  0x3c   :  { %610 = vmatmul.mubr.bf16.gmra.mrb[12].mxu1 %v985_v56  ;;  %908 = vmatprep.mubr.msk.bf16.mxu0 %vm475_vm0, %v987_v57 }
  0x3d   :  { %912 = vmatprep.mubr.msk.bf16.mxu1 %vm475_vm0, %v988_v59 }
  0x43   :  { %909 = vmatmul.mubr.msk.bf16.vlgmr.msra.gmra.mrb[16].mxu0 %vm475_vm0, %v989_v63 }
  0x44   :  { %913 = vmatmul.mubr.msk.bf16.vlgmr.msra.gmra.mrb[16].mxu1 %vm475_vm0, %v990_v0 }
  0x92   :  { %v122_v1 = vpop.permute.xlu0 %121 }
  0x93   :  { %v132_v18 = vpop.permute.xlu1 %131 }
  0x96   :  { %v127_v3 = vpop.permute.xlu0 %126 }
  0x97   :  { %v137_v33 = vpop.permute.xlu1 %136 }
  0x9a   :  { %v142_v36 = vpop.permute.xlu0 %141 }
  0x9b   :  { %v147_v50 = vpop.permute.xlu1 %146 }
  0x9e   :  { %v152_v54 = vpop.permute.xlu0 %151 }
  0xf6   :  { %v828_v2 = vpop.f32.mrb[0].mxu0 }
  0xf7   :  { %v868_v4 = vpop.f32.mrb[0].mxu1  ;;  %v829_v5 = vpop.f32.mrb[1].mxu0 }
  0xf8   :  { %v830_v6 = vadd.f32 %v829_v5, %v828_v2  ;;  %v869_v7 = vpop.f32.mrb[1].mxu1  ;;  %v831_v8 = vpop.f32.mrb[2].mxu0 }
  0xf9   :  { %v870_v9 = vadd.f32 %v869_v7, %v868_v4  ;;  %v871_v10 = vpop.f32.mrb[2].mxu1  ;;  %v832_v11 = vpop.f32.mrb[3].mxu0 }
  0xfa   :  { %v523_v12 = vadd.f32 %v830_v6, %v122_v1  ;;  %v833_v13 = vadd.f32 %v832_v11, %v831_v8  ;;  %v872_v14 = vpop.f32.mrb[3].mxu1  ;;  %v157_v4 = vpop.permute.xlu1 %156 }
  0xfb   :  { %v873_v15 = vadd.f32 %v872_v14, %v871_v10 }
  0xfc   :  { %v526_v16 = vadd.f32 %v833_v13, %v127_v3  ;;  %v588_v17 = vadd.f32 %v870_v9, %v523_v12 }
  0xfe   :  { %v834_v19 = vpop.f32.mrb[4].mxu0  ;;  %v1208_v20 = vadd.f32 %v873_v15, %v526_v16 }
  0xff   :  { %v874_v21 = vpop.f32.mrb[4].mxu1  ;;  %v835_v22 = vpop.f32.mrb[5].mxu0 }
 0x100   :  { %v836_v23 = vadd.f32 %v835_v22, %v834_v19  ;;  %v875_v24 = vpop.f32.mrb[5].mxu1  ;;  %v837_v25 = vpop.f32.mrb[6].mxu0 }
 0x101   :  { %v876_v26 = vadd.f32 %v875_v24, %v874_v21  ;;  %v877_v27 = vpop.f32.mrb[6].mxu1  ;;  %v838_v28 = vpop.f32.mrb[7].mxu0 }
 0x102   :  { %v531_v29 = vadd.f32 %v836_v23, %v132_v18  ;;  %v839_v30 = vadd.f32 %v838_v28, %v837_v25  ;;  %v878_v31 = vpop.f32.mrb[7].mxu1 }
 0x103   :  { %v879_v32 = vadd.f32 %v878_v31, %v877_v27 }
 0x104   :  { %v534_v34 = vadd.f32 %v839_v30, %v137_v33  ;;  %v596_v35 = vadd.f32 %v876_v26, %v531_v29 }
 0x106   :  { %v840_v37 = vpop.f32.mrb[8].mxu0  ;;  %v599_v38 = vadd.f32 %v879_v32, %v534_v34 }
 0x107   :  { %v880_v39 = vpop.f32.mrb[8].mxu1  ;;  %v841_v40 = vpop.f32.mrb[9].mxu0 }
 0x108   :  { %v842_v41 = vadd.f32 %v841_v40, %v840_v37  ;;  %v881_v42 = vpop.f32.mrb[9].mxu1  ;;  %v843_v43 = vpop.f32.mrb[10].mxu0 }
 0x109   :  { %v882_v44 = vadd.f32 %v881_v42, %v880_v39  ;;  %v883_v45 = vpop.f32.mrb[10].mxu1  ;;  %v844_v46 = vpop.f32.mrb[11].mxu0 }
 0x10a   :  { %v539_v47 = vadd.f32 %v842_v41, %v142_v36  ;;  %v845_v48 = vadd.f32 %v844_v46, %v843_v43  ;;  %v884_v49 = vpop.f32.mrb[11].mxu1 }
 0x10b   :  { %v885_v51 = vadd.f32 %v884_v49, %v883_v45 }
 0x10c   :  { %v542_v52 = vadd.f32 %v845_v48, %v147_v50  ;;  %v604_v53 = vadd.f32 %v882_v44, %v539_v47 }
 0x10e   :  { %v846_v55 = vpop.f32.mrb[12].mxu0  ;;  %v607_v56 = vadd.f32 %v885_v51, %v542_v52 }
 0x10f   :  { %v886_v57 = vpop.f32.mrb[12].mxu1  ;;  %v847_v58 = vpop.f32.mrb[13].mxu0 }
 0x110   :  { %v848_v59 = vadd.f32 %v847_v58, %v846_v55  ;;  %v887_v60 = vpop.f32.mrb[13].mxu1  ;;  %v849_v61 = vpop.f32.mrb[14].mxu0 }
 0x111   :  { %v888_v62 = vadd.f32 %v887_v60, %v886_v57  ;;  %v889_v63 = vpop.f32.mrb[14].mxu1  ;;  %v850_v0 = vpop.f32.mrb[15].mxu0 }
 0x112   :  { %v547_v1 = vadd.f32 %v848_v59, %v152_v54  ;;  %v851_v2 = vadd.f32 %v850_v0, %v849_v61  ;;  %v890_v3 = vpop.f32.mrb[15].mxu1 }
 0x113   :  { %v891_v5 = vadd.f32 %v890_v3, %v889_v63 }
 0x114   :  { %v550_v6 = vadd.f32 %v851_v2, %v157_v4  ;;  %v612_v7 = vadd.f32 %v888_v62, %v547_v1 }
 0x116   :  { %v910_v8 = vpop.f32.mrb[16].mxu0  ;;  %v615_v9 = vadd.f32 %v891_v5, %v550_v6 }
 0x117   :  { %v661_v10 = vadd.f32 %v910_v8, %v596_v35  ;;  %v914_v11 = vpop.f32.mrb[16].mxu1  ;;  %v652_v12 = vpop.f32.mrb[17].mxu0 }
 0x118   :  { %v677_v13 = vadd.f32 %v914_v11, %v612_v7  ;;  %v653_v14 = vadd.f32 %v652_v12, %v588_v17  ;;  %v668_v15 = vpop.f32.mrb[17].mxu1  ;;  %v911_v16 = vpop.f32.mrb[18].mxu0 }
 0x119   :  { %v685_v18 = vmax.f32 %v661_v10, 0.0  ;;  %v669_v19 = vadd.f32 %v668_v15, %v604_v53  ;;  %v664_v21 = vadd.f32 %v911_v16, %v599_v38  ;;  %v915_v22 = vpop.f32.mrb[18].mxu1  ;;  %v655_v23 = vpop.f32.mrb[19].mxu0 }
 0x11a   :  { %v689_v24 = vmax.f32 %v677_v13, 0.0  ;;  %v683_v25 = vmax.f32 %v653_v14, 0.0  ;;  %v680_v26 = vadd.f32 %v915_v22, %v615_v9  ;;  %v656_v27 = vadd.f32 %v655_v23, %v1208_v20  ;;  %v671_v28 = vpop.f32.mrb[19].mxu1 }
 0x11b   :  { %v806_v29 = vpack.c.bf16 %v685_v18, %v685_v18  ;;  %v687_v30 = vmax.f32 %v669_v19, 0.0  ;;  %v686_v31 = vmax.f32 %v664_v21, 0.0  ;;  %v672_v32 = vadd.f32 %v671_v28, %v607_v56 }
 0x11c   :  { %v810_v33 = vpack.c.bf16 %v689_v24, %v689_v24  ;;  %v804_v17 = vpack.c.bf16 %v683_v25, %v683_v25  ;;  %v690_v34 = vmax.f32 %v680_v26, 0.0  ;;  %v684_v35 = vmax.f32 %v656_v27, 0.0 }
 0x11d   :  { %726 = vst.msk [vmem:[%s1246_s3 + $0x8] sm:$0xf] %vm723_vm1, %v806_v29  ;;  %v808_v36 = vpack.c.bf16 %v687_v30, %v687_v30  ;;  %v807_v37 = vpack.c.bf16 %v686_v31, %v686_v31  ;;  %v688_v38 = vmax.f32 %v672_v32, 0.0 }
 0x11e   :  { %730 = vst.msk [vmem:[%s1246_s3 + $0x18] sm:$0xf] %vm723_vm1, %v810_v33  ;;  %724 = vst.msk [vmem:[%s1246_s3] sm:$0xf] %vm723_vm1, %v804_v17  ;;  %v811_v20 = vpack.c.bf16 %v690_v34, %v690_v34  ;;  %v805_v39 = vpack.c.bf16 %v684_v35, %v684_v35 }
 0x11f   :  { %728 = vst.msk [vmem:[%s1246_s3 + $0x10] sm:$0xf] %vm723_vm1, %v808_v36  ;;  %727 = vst.msk [vmem:[%s1246_s3 + $0xc] sm:$0xf] %vm723_vm1, %v807_v37  ;;  %v809_v40 = vpack.c.bf16 %v688_v38, %v688_v38 }
 0x120   :  { %731 = vst.msk [vmem:[%s1246_s3 + $0x1c] sm:$0xf] %vm723_vm1, %v811_v20  ;;  %725 = vst.msk [vmem:[%s1246_s3 + $0x4] sm:$0xf] %vm723_vm1, %v805_v39 }
 0x121   :  { %729 = vst.msk [vmem:[%s1246_s3 + $0x14] sm:$0xf] %vm723_vm1, %v809_v40 }

// kernel: unetpp_forward.52
= control target key start
LH: loop header
LB: loop body
LE: loop exit
PB: predicated region body
PF: predicated region fallthrough
CT: control target
= control target key end

     0   :  { %v1052_v1 = vmov 0   ;;  %vm557_vm0 = vcmask 785408   ;;  %vm780_vm1 = vcmask 257024   ;;  %s1307_s1 = inlined_call_operand.vmem [shape: bf16[864,32], index: 1, kind: input, shape index: {}]   ;;  %s1308_s0 = inlined_call_operand.vmem [shape: bf16[32,864], index: 0, kind: input, shape index: {}]   ;;  %s1309_s2 = inlined_call_operand.vmem [shape: f32[32,1], index: 2, kind: input, shape index: {}]   ;;  %s1310_s3 = inlined_call_operand.vmem [shape: bf16[32,32], index: 3, kind: output, shape index: {}]  }
   0x1   :  { %v978_v0 = vld [vmem:[%s1307_s1 + $0x40] sm:$0xff]   ;;  %976 = vset.pattern.permute.xlu0 %v1052_v1  ;;  %977 = vset.pattern.permute.xlu1 %v1052_v1  ;;  %v982_v5 = vld [vmem:[%s1307_s1 + $0x48] sm:$0xff]   ;;  %v986_v9 = vld [vmem:[%s1307_s1 + $0x50] sm:$0xff]  }
   0x2   :  { %v979_v2 = vld [vmem:[%s1307_s1] sm:$0xff]   ;;  %867 = vmatprep.subr.bf16.mxu0 %v978_v0  ;;  %v983_v6 = vld [vmem:[%s1307_s1 + $0x8] sm:$0xff]   ;;  %v987_v10 = vld [vmem:[%s1307_s1 + $0x10] sm:$0xff]  }
   0x3   :  { %v980_v3 = vld [vmem:[%s1307_s1 + $0xc0] sm:$0xff]   ;;  %868 = vmatpush3.bf16.msra.mxu0 %v979_v2  ;;  %v984_v7 = vld [vmem:[%s1307_s1 + $0xc8] sm:$0xff]   ;;  %v988_v11 = vld [vmem:[%s1307_s1 + $0xd0] sm:$0xff]  }
   0x4   :  { %v981_v4 = vld [vmem:[%s1307_s1 + $0x80] sm:$0xff]   ;;  %895 = vmatprep.subr.bf16.mxu1 %v980_v3  ;;  %869 = vmatprep.subr.bf16.mxu0 %v982_v5  ;;  %v985_v8 = vld [vmem:[%s1307_s1 + $0x88] sm:$0xff]   ;;  %v989_v12 = vld [vmem:[%s1307_s1 + $0x90] sm:$0xff]  }
   0x5   :  { %896 = vmatpush3.bf16.msra.mxu1 %v981_v4  ;;  %v990_v13 = vld [vmem:[%s1307_s1 + $0x58] sm:$0xff]   ;;  %v994_v17 = vld [vmem:[%s1307_s1 + $0x60] sm:$0xff]   ;;  %v998_v21 = vld [vmem:[%s1307_s1 + $0x68] sm:$0xff]  }
   0x6   :  { %897 = vmatprep.subr.bf16.mxu1 %v984_v7  ;;  %v991_v14 = vld [vmem:[%s1307_s1 + $0x18] sm:$0xff]   ;;  %v995_v18 = vld [vmem:[%s1307_s1 + $0x20] sm:$0xff]   ;;  %v999_v22 = vld [vmem:[%s1307_s1 + $0x28] sm:$0xff]  }
   0x7   :  { %870 = vmatpush3.bf16.msra.mxu0 %v983_v6  ;;  %v992_v15 = vld [vmem:[%s1307_s1 + $0xd8] sm:$0xff]   ;;  %v996_v19 = vld [vmem:[%s1307_s1 + $0xe0] sm:$0xff]   ;;  %v1000_v23 = vld [vmem:[%s1307_s1 + $0xe8] sm:$0xff]  }
   0x8   :  { %871 = vmatprep.subr.bf16.mxu0 %v986_v9  ;;  %v993_v16 = vld [vmem:[%s1307_s1 + $0x98] sm:$0xff]   ;;  %v997_v20 = vld [vmem:[%s1307_s1 + $0xa0] sm:$0xff]   ;;  %v1001_v24 = vld [vmem:[%s1307_s1 + $0xa8] sm:$0xff]  }
   0x9   :  { %898 = vmatpush3.bf16.msra.mxu1 %v985_v8  ;;  %v1002_v25 = vld [vmem:[%s1307_s1 + $0x70] sm:$0xff]   ;;  %v1006_v29 = vld [vmem:[%s1307_s1 + $0x78] sm:$0xff]   ;;  %v1011_v33 = vld [vmem:[%s1308_s0 + $0x4] ss:$28 sps:$4 sm:$0xff]  }
   0xa   :  { %899 = vmatprep.subr.bf16.mxu1 %v988_v11  ;;  %v1003_v26 = vld [vmem:[%s1307_s1 + $0x30] sm:$0xff]   ;;  %v1007_v30 = vld [vmem:[%s1307_s1 + $0x38] sm:$0xff]   ;;  %596 = vmatprep.mubr.bf16.mxu0 %v1011_v33  ;;  %v1013_v35 = vld [vmem:[%s1307_s1 + $0x140] sm:$0xff]  }
   0xb   :  { %872 = vmatpush3.bf16.msra.mxu0 %v987_v10  ;;  %v1004_v27 = vld [vmem:[%s1307_s1 + $0xf0] sm:$0xff]   ;;  %v1008_v31 = vld [vmem:[%s1307_s1 + $0xf8] sm:$0xff]   ;;  %v1014_v36 = vld [vmem:[%s1308_s0 + $0x8] ss:$28 sps:$4 sm:$0xff]  }
   0xc   :  { %873 = vmatprep.subr.bf16.mxu0 %v990_v13  ;;  %v1005_v28 = vld [vmem:[%s1307_s1 + $0xb0] sm:$0xff]   ;;  %v1009_v32 = vld [vmem:[%s1308_s0] ss:$28 sps:$4 sm:$0xff]   ;;  %v1016_v37 = vld [vmem:[%s1308_s0 + $0xc] ss:$28 sps:$4 sm:$0xff]  }
   0xd   :  { %900 = vmatpush3.bf16.msra.mxu1 %v989_v12  ;;  %v1012_v34 = vld [vmem:[%s1307_s1 + $0xb8] sm:$0xff]   ;;  %v1017_v38 = vld [vmem:[%s1307_s1 + $0x100] sm:$0xff]   ;;  %645 = vmatprep.mubr.bf16.mxu1 %v1016_v37  ;;  %v1018_v39 = vld [vmem:[%s1307_s1 + $0x148] sm:$0xff]  }
   0xe   :  { %901 = vmatprep.subr.bf16.mxu1 %v992_v15  ;;  %v1019_v40 = vld [vmem:[%s1307_s1 + $0x108] sm:$0xff]   ;;  %v1020_v41 = vld [vmem:[%s1307_s1 + $0x150] sm:$0xff]   ;;  %v1023_v43 = vld [vmem:[%s1307_s1 + $0x180] sm:$0xff]  }
   0xf   :  { %874 = vmatpush3.bf16.msra.mxu0 %v991_v14  ;;  %v1021_v42 = vld [vmem:[%s1307_s1 + $0x110] sm:$0xff]   ;;  %v1022_v44 = vld [vmem:[%s1307_s1 + $0x158] sm:$0xff]   ;;  %v1026_v46 = vld [vmem:[%s1307_s1 + $0x188] sm:$0xff]  }
  0x10   :  { %875 = vmatprep.subr.bf16.mxu0 %v994_v17  ;;  %v1024_v45 = vld [vmem:[%s1307_s1 + $0x118] sm:$0xff]   ;;  %v1025_v47 = vld [vmem:[%s1307_s1 + $0x160] sm:$0xff]   ;;  %v1031_v50 = vld [vmem:[%s1307_s1 + $0x190] sm:$0xff]  }
  0x11   :  { %902 = vmatpush3.bf16.msra.mxu1 %v993_v16  ;;  %v1028_v48 = vld [vmem:[%s1308_s0 + $0x3c] ss:$28 sps:$4 sm:$0xff]   ;;  %v1027_v49 = vld [vmem:[%s1307_s1 + $0x120] sm:$0xff]   ;;  %v1030_v52 = vld [vmem:[%s1307_s1 + $0x168] sm:$0xff]  }
  0x12   :  { %903 = vmatprep.subr.bf16.mxu1 %v996_v19  ;;  %v1032_v51 = vld [vmem:[%s1308_s0 + $0x38] ss:$28 sps:$4 sm:$0xff]   ;;  %v1034_v53 = vld [vmem:[%s1308_s0 + $0x44] ss:$28 sps:$4 sm:$0xff]   ;;  %v1033_v55 = vld [vmem:[%s1307_s1 + $0x128] sm:$0xff]  }
  0x13   :  { %876 = vmatpush3.bf16.msra.mxu0 %v995_v18  ;;  %v1036_v54 = vld [vmem:[%s1308_s0 + $0x40] ss:$28 sps:$4 sm:$0xff]   ;;  %v1037_v57 = vld [vmem:[%s1307_s1 + $0x170] sm:$0xff]   ;;  %v1046_v62 = vld [vmem:[%s1307_s1 + $0x1a8] sm:$0xff]  }
  0x14   :  { %877 = vmatprep.subr.bf16.mxu0 %v998_v21  ;;  %v1038_v56 = vld [vmem:[%s1307_s1 + $0x198] sm:$0xff]   ;;  %v1041_v58 = vld [vmem:[%s1307_s1 + $0x1a0] sm:$0xff]   ;;  %v1039_v59 = vld [vmem:[%s1307_s1 + $0x130] sm:$0xff]  }
  0x15   :  { %904 = vmatpush3.bf16.msra.mxu1 %v997_v20  ;;  %v1040_v60 = vld [vmem:[%s1307_s1 + $0x178] sm:$0xff]   ;;  %v1045_v61 = vld [vmem:[%s1308_s0 + $0x14] ss:$28 sps:$4 sm:$0xff]   ;;  %v139_v2 = vld [vmem:[%s1309_s2] sm:$0xff] }
  0x16   :  { %905 = vmatprep.subr.bf16.mxu1 %v1000_v23  ;;  %v1047_v63 = vld [vmem:[%s1308_s0 + $0x18] ss:$28 sps:$4 sm:$0xff]   ;;  %v1048_v1 = vld [vmem:[%s1308_s0 + $0x50] ss:$28 sps:$4 sm:$0xff]   ;;  %145 = vperm.xlu0 %976, %v139_v2   ;;  %v1051_v8 = vld [vmem:[%s1308_s0 + $0x48] ss:$28 sps:$4 sm:$0xff]  }
  0x17   :  { %878 = vmatpush3.bf16.msra.mxu0 %v999_v22  ;;  %v1042_v0 = vld [vmem:[%s1307_s1 + $0x138] sm:$0xff]   ;;  %v141_v3 = vld [vmem:[%s1309_s2 + $0x10] sm:$0xff]  ;;  %v1049_v5 = vld [vmem:[%s1308_s0 + $0x4c] ss:$28 sps:$4 sm:$0xff]  }
  0x18   :  { %879 = vmatprep.subr.bf16.mxu0 %v1002_v25  ;;  %v1043_v4 = vld [vmem:[%s1308_s0 + $0x10] ss:$28 sps:$4 sm:$0xff]   ;;  %155 = vperm.xlu1 %977, %v141_v3   ;;  %v142_v7 = vld [vmem:[%s1309_s2 + $0x18] sm:$0xff] }
  0x19   :  { %906 = vmatpush3.bf16.msra.mxu1 %v1001_v24  ;;  %v140_v6 = vld [vmem:[%s1309_s2 + $0x8] sm:$0xff] }
  0x1a   :  { %907 = vmatprep.subr.bf16.mxu1 %v1004_v27  ;;  %150 = vperm.xlu0 %976, %v140_v6  }
  0x1b   :  { %880 = vmatpush3.bf16.msra.mxu0 %v1003_v26 }
  0x1c   :  { %881 = vmatprep.subr.bf16.mxu0 %v1006_v29  ;;  %160 = vperm.xlu1 %977, %v142_v7  }
  0x1d   :  { %908 = vmatpush3.bf16.msra.mxu1 %v1005_v28 }
  0x1e   :  { %909 = vmatprep.subr.bf16.mxu1 %v1008_v31 }
  0x1f   :  { %882 = vmatpush3.bf16.msra.mxu0 %v1007_v30 }
  0x20   :  { %923 = vmatprep.subr.bf16.mxu0 %v1013_v35 }
  0x21   :  { %910 = vmatpush3.bf16.msra.mxu1 %v1012_v34 }
  0x22   :  { %597 = vmatmul.mubr.bf16.vlgmr.msra.gmra.mrb[0].mxu0 %v1009_v32  ;;  %959 = vmatprep.subr.bf16.mxu1 %v1023_v43 }
  0x23   :  { %924 = vmatpush3.bf16.msra.mxu0 %v1017_v38  ;;  %604 = vmatprep.mubr.bf16.mxu0 %v1028_v48 }
  0x24   :  { %646 = vmatmul.mubr.bf16.vlgmr.msra.gmra.mrb[0].mxu1 %v1014_v36  ;;  %925 = vmatprep.subr.bf16.mxu0 %v1018_v39 }
  0x25   :  { %960 = vmatpush3.bf16.msra.mxu1 %v1023_v43  ;;  %653 = vmatprep.mubr.bf16.mxu1 %v1034_v53 }
  0x26   :  { %961 = vmatprep.subr.bf16.mxu1 %v1026_v46 }
  0x27   :  { %926 = vmatpush3.bf16.msra.mxu0 %v1019_v40 }
  0x28   :  { %927 = vmatprep.subr.bf16.mxu0 %v1020_v41 }
  0x29   :  { %962 = vmatpush3.bf16.msra.mxu1 %v1026_v46 }
  0x2a   :  { %963 = vmatprep.subr.bf16.mxu1 %v1031_v50  ;;  %605 = vmatmul.mubr.bf16.gmra.mrb[4].mxu0 %v1032_v51 }
  0x2b   :  { %928 = vmatpush3.bf16.msra.mxu0 %v1021_v42  ;;  %694 = vmatprep.mubr.bf16.mxu0 %v1045_v61 }
  0x2c   :  { %929 = vmatprep.subr.bf16.mxu0 %v1022_v44  ;;  %654 = vmatmul.mubr.bf16.gmra.mrb[4].mxu1 %v1036_v54 }
  0x2d   :  { %964 = vmatpush3.bf16.msra.mxu1 %v1031_v50  ;;  %971 = vmatprep.mubr.msk.bf16.mxu1 %vm557_vm0, %v1047_v63 }
  0x2e   :  { %965 = vmatprep.subr.bf16.mxu1 %v1038_v56 }
  0x2f   :  { %930 = vmatpush3.bf16.msra.mxu0 %v1024_v45 }
  0x30   :  { %931 = vmatprep.subr.bf16.mxu0 %v1025_v47 }
  0x31   :  { %966 = vmatpush3.bf16.msra.mxu1 %v1038_v56 }
  0x32   :  { %967 = vmatprep.subr.bf16.mxu1 %v1041_v58 }
  0x33   :  { %932 = vmatpush3.bf16.msra.mxu0 %v1027_v49 }
  0x34   :  { %933 = vmatprep.subr.bf16.mxu0 %v1030_v52 }
  0x35   :  { %968 = vmatpush3.bf16.msra.mxu1 %v1041_v58 }
  0x36   :  { %969 = vmatprep.subr.bf16.mxu1 %v1046_v62 }
  0x37   :  { %934 = vmatpush3.bf16.msra.mxu0 %v1033_v55 }
  0x38   :  { %935 = vmatprep.subr.bf16.mxu0 %v1037_v57 }
  0x39   :  { %970 = vmatpush3.bf16.msra.mxu1 %v1046_v62 }
  0x3b   :  { %936 = vmatpush3.bf16.msra.mxu0 %v1039_v59 }
  0x3c   :  { %937 = vmatprep.subr.bf16.mxu0 %v1040_v60  ;;  %972 = vmatmul.mubr.msk.bf16.vlgmr.msra.gmra.mrb[8].mxu1 %vm557_vm0, %v1048_v1 }
  0x3f   :  { %938 = vmatpush3.bf16.msra.mxu0 %v1042_v0 }
  0x42   :  { %695 = vmatmul.mubr.bf16.vlgmr.msra.gmra.mrb[8].mxu0 %v1043_v4 }
  0x43   :  { %702 = vmatprep.mubr.bf16.mxu0 %v1049_v5 }
  0x4a   :  { %703 = vmatmul.mubr.bf16.gmra.mrb[12].mxu0 %v1051_v8 }
  0x95   :  { %v146_v9 = vpop.permute.xlu0 %145 }
  0x97   :  { %v156_v27 = vpop.permute.xlu1 %155 }
  0x99   :  { %v151_v14 = vpop.permute.xlu0 %150 }
  0x9b   :  { %v161_v30 = vpop.permute.xlu1 %160 }
  0xf5   :  { %v883_v10 = vpop.f32.mrb[0].mxu0 }
  0xf6   :  { %v884_v11 = vpop.f32.mrb[1].mxu0 }
  0xf7   :  { %v885_v12 = vadd.f32 %v884_v11, %v883_v10  ;;  %v886_v13 = vpop.f32.mrb[2].mxu0  ;;  %v911_v15 = vpop.f32.mrb[0].mxu1 }
  0xf8   :  { %v887_v16 = vpop.f32.mrb[3].mxu0  ;;  %v912_v19 = vpop.f32.mrb[1].mxu1 }
  0xf9   :  { %v599_v17 = vadd.f32 %v885_v12, %v146_v9  ;;  %v888_v18 = vadd.f32 %v887_v16, %v886_v13  ;;  %v913_v20 = vadd.f32 %v912_v19, %v911_v15  ;;  %v914_v21 = vpop.f32.mrb[2].mxu1 }
  0xfa   :  { %v915_v23 = vpop.f32.mrb[3].mxu1 }
  0xfb   :  { %v602_v22 = vadd.f32 %v888_v18, %v151_v14  ;;  %v648_v24 = vadd.f32 %v913_v20, %v599_v17  ;;  %v916_v25 = vadd.f32 %v915_v23, %v914_v21 }
  0xfd   :  { %v651_v26 = vadd.f32 %v916_v25, %v602_v22  ;;  %v889_v28 = vpop.f32.mrb[4].mxu0 }
  0xfe   :  { %v890_v29 = vpop.f32.mrb[5].mxu0 }
  0xff   :  { %v891_v31 = vadd.f32 %v890_v29, %v889_v28  ;;  %v892_v32 = vpop.f32.mrb[6].mxu0  ;;  %v917_v33 = vpop.f32.mrb[4].mxu1 }
 0x100   :  { %v893_v34 = vpop.f32.mrb[7].mxu0  ;;  %v918_v35 = vpop.f32.mrb[5].mxu1 }
 0x101   :  { %v607_v36 = vadd.f32 %v891_v31, %v156_v27  ;;  %v894_v37 = vadd.f32 %v893_v34, %v892_v32  ;;  %v919_v38 = vadd.f32 %v918_v35, %v917_v33  ;;  %v920_v39 = vpop.f32.mrb[6].mxu1 }
 0x102   :  { %v921_v40 = vpop.f32.mrb[7].mxu1 }
 0x103   :  { %v656_v41 = vadd.f32 %v919_v38, %v607_v36  ;;  %v610_v42 = vadd.f32 %v894_v37, %v161_v30  ;;  %v922_v43 = vadd.f32 %v921_v40, %v920_v39 }
 0x105   :  { %v659_v44 = vadd.f32 %v922_v43, %v610_v42 }
 0x10f   :  { %v973_v45 = vpop.f32.mrb[8].mxu1 }
 0x110   :  { %v745_v47 = vpop.f32.mrb[9].mxu1 }
 0x111   :  { %v974_v49 = vpop.f32.mrb[10].mxu1 }
 0x112   :  { %v748_v52 = vpop.f32.mrb[11].mxu1 }
 0x115   :  { %v939_v46 = vpop.f32.mrb[8].mxu0 }
 0x116   :  { %v940_v48 = vpop.f32.mrb[9].mxu0 }
 0x117   :  { %v941_v50 = vadd.f32 %v940_v48, %v939_v46  ;;  %v942_v51 = vpop.f32.mrb[10].mxu0 }
 0x118   :  { %v943_v53 = vpop.f32.mrb[11].mxu0 }
 0x119   :  { %v944_v54 = vadd.f32 %v943_v53, %v942_v51  ;;  %v697_v55 = vadd.f32 %v941_v50, %v648_v24 }
 0x11b   :  { %v746_v56 = vadd.f32 %v745_v47, %v697_v55  ;;  %v700_v57 = vadd.f32 %v944_v54, %v651_v26 }
 0x11d   :  { %v760_v58 = vmax.f32 %v746_v56, 0.0  ;;  %v749_v59 = vadd.f32 %v748_v52, %v700_v57  ;;  %v945_v60 = vpop.f32.mrb[12].mxu0 }
 0x11e   :  { %v946_v61 = vpop.f32.mrb[13].mxu0 }
 0x11f   :  { %v863_v62 = vpack.c.bf16 %v760_v58, %v760_v58  ;;  %v761_v63 = vmax.f32 %v749_v59, 0.0  ;;  %v947_v0 = vadd.f32 %v946_v61, %v945_v60  ;;  %v948_v1 = vpop.f32.mrb[14].mxu0 }
 0x120   :  { %v949_v2 = vpop.f32.mrb[15].mxu0 }
 0x121   :  { %781 = vst.msk [vmem:[%s1310_s3] sm:$0xf] %vm780_vm1, %v863_v62  ;;  %v864_v3 = vpack.c.bf16 %v761_v63, %v761_v63  ;;  %v705_v4 = vadd.f32 %v947_v0, %v656_v41  ;;  %v950_v5 = vadd.f32 %v949_v2, %v948_v1 }
 0x123   :  { %782 = vst.msk [vmem:[%s1310_s3 + $0x4] sm:$0xf] %vm780_vm1, %v864_v3  ;;  %v754_v6 = vadd.f32 %v973_v45, %v705_v4  ;;  %v708_v7 = vadd.f32 %v950_v5, %v659_v44 }
 0x125   :  { %v762_v8 = vmax.f32 %v754_v6, 0.0  ;;  %v757_v9 = vadd.f32 %v974_v49, %v708_v7 }
 0x127   :  { %v865_v10 = vpack.c.bf16 %v762_v8, %v762_v8  ;;  %v763_v11 = vmax.f32 %v757_v9, 0.0 }
 0x129   :  { %783 = vst.msk [vmem:[%s1310_s3 + $0x8] sm:$0xf] %vm780_vm1, %v865_v10  ;;  %v866_v12 = vpack.c.bf16 %v763_v11, %v763_v11 }
 0x12b   :  { %784 = vst.msk [vmem:[%s1310_s3 + $0xc] sm:$0xf] %vm780_vm1, %v866_v12 }

// kernel: unetpp_forward.58
= control target key start
LH: loop header
LB: loop body
LE: loop exit
PB: predicated region body
PF: predicated region fallthrough
CT: control target
= control target key end

     0   :  { %vm73_vm0 = vcmask 11264   ;;  %s239_s0 = inlined_call_operand.vmem [shape: bf16[64,2], index: 0, kind: input, shape index: {}]   ;;  %s240_s1 = inlined_call_operand.vmem [shape: bf16[64,2], index: 1, kind: input, shape index: {}]   ;;  %s241_s2 = inlined_call_operand.vmem [shape: bf16[64,2], index: 2, kind: input, shape index: {}]   ;;  %s242_s3 = inlined_call_operand.vmem [shape: bf16[64,2], index: 3, kind: input, shape index: {}]   ;;  %s243_s4 = inlined_call_operand.vmem [shape: bf16[64,2], index: 4, kind: output, shape index: {}]  }
   0x1   :  { %v17_v0 = vld [vmem:[%s239_s0] sm:$0xf]  ;;  %v18_v5 = vld [vmem:[%s239_s0 + $0x4] sm:$0xf]  ;;  %v19_v11 = vld [vmem:[%s239_s0 + $0x8] sm:$0xf] }
   0x2   :  { %v25_v1 = vld [vmem:[%s240_s1] sm:$0xf]  ;;  %v26_v6 = vld [vmem:[%s240_s1 + $0x4] sm:$0xf]  ;;  %v27_v13 = vld [vmem:[%s240_s1 + $0x8] sm:$0xf] }
   0x3   :  { %v41_v2 = vld [vmem:[%s241_s2] sm:$0xf]  ;;  %v33_v3 = vmax.bf16 %v25_v1, %v17_v0  ;;  %v34_v8 = vmax.bf16 %v26_v6, %v18_v5  ;;  %v42_v9 = vld [vmem:[%s241_s2 + $0x4] sm:$0xf]  ;;  %v43_v14 = vld [vmem:[%s241_s2 + $0x8] sm:$0xf]  ;;  %v35_v17 = vmax.bf16 %v27_v13, %v19_v11 }
   0x4   :  { %v49_v4 = vld [vmem:[%s242_s3] sm:$0xf]  ;;  %v50_v10 = vld [vmem:[%s242_s3 + $0x4] sm:$0xf]  ;;  %v51_v15 = vld [vmem:[%s242_s3 + $0x8] sm:$0xf] }
   0x5   :  { %v57_v7 = vmax.bf16 %v49_v4, %v41_v2  ;;  %v58_v12 = vmax.bf16 %v50_v10, %v42_v9  ;;  %v59_v18 = vmax.bf16 %v51_v15, %v43_v14  ;;  %v20_v19 = vld [vmem:[%s239_s0 + $0xc] sm:$0xf]  ;;  %v21_v25 = vld [vmem:[%s239_s0 + $0x10] sm:$0xf]  ;;  %v22_v32 = vld [vmem:[%s239_s0 + $0x14] sm:$0xf] }
   0x6   :  { %v28_v20 = vld [vmem:[%s240_s1 + $0xc] sm:$0xf]  ;;  %v29_v26 = vld [vmem:[%s240_s1 + $0x10] sm:$0xf]  ;;  %v30_v34 = vld [vmem:[%s240_s1 + $0x14] sm:$0xf] }
   0x7   :  { %v65_v16 = vmax.bf16 %v57_v7, %v33_v3  ;;  %v44_v21 = vld [vmem:[%s241_s2 + $0xc] sm:$0xf]  ;;  %v66_v22 = vmax.bf16 %v58_v12, %v34_v8  ;;  %v36_v23 = vmax.bf16 %v28_v20, %v20_v19  ;;  %v67_v27 = vmax.bf16 %v59_v18, %v35_v17  ;;  %v45_v30 = vld [vmem:[%s241_s2 + $0x10] sm:$0xf]  ;;  %v46_v35 = vld [vmem:[%s241_s2 + $0x14] sm:$0xf] }
   0x8   :  { %v52_v24 = vld [vmem:[%s242_s3 + $0xc] sm:$0xf]  ;;  %v37_v29 = vmax.bf16 %v29_v26, %v21_v25  ;;  %v53_v31 = vld [vmem:[%s242_s3 + $0x10] sm:$0xf]  ;;  %v54_v36 = vld [vmem:[%s242_s3 + $0x14] sm:$0xf]  ;;  %v38_v38 = vmax.bf16 %v30_v34, %v22_v32 }
   0x9   :  { %74 = vst.msk [vmem:[%s243_s4] sm:$0xf] %vm73_vm0, %v65_v16  ;;  %v60_v28 = vmax.bf16 %v52_v24, %v44_v21  ;;  %75 = vst.msk [vmem:[%s243_s4 + $0x4] sm:$0xf] %vm73_vm0, %v66_v22  ;;  %v61_v33 = vmax.bf16 %v53_v31, %v45_v30  ;;  %v62_v39 = vmax.bf16 %v54_v36, %v46_v35  ;;  %v23_v40 = vld [vmem:[%s239_s0 + $0x18] sm:$0xf] }
   0xa   :  { %76 = vst.msk [vmem:[%s243_s4 + $0x8] sm:$0xf] %vm73_vm0, %v67_v27  ;;  %v31_v41 = vld [vmem:[%s240_s1 + $0x18] sm:$0xf]  ;;  %v24_v46 = vld [vmem:[%s239_s0 + $0x1c] sm:$0xf] }
   0xb   :  { %v68_v37 = vmax.bf16 %v60_v28, %v36_v23  ;;  %v47_v42 = vld [vmem:[%s241_s2 + $0x18] sm:$0xf]  ;;  %v69_v43 = vmax.bf16 %v61_v33, %v37_v29  ;;  %v39_v44 = vmax.bf16 %v31_v41, %v23_v40  ;;  %v32_v47 = vld [vmem:[%s240_s1 + $0x1c] sm:$0xf]  ;;  %v70_v48 = vmax.bf16 %v62_v39, %v38_v38 }
   0xc   :  { %v55_v45 = vld [vmem:[%s242_s3 + $0x18] sm:$0xf]  ;;  %v40_v50 = vmax.bf16 %v32_v47, %v24_v46  ;;  %v48_v51 = vld [vmem:[%s241_s2 + $0x1c] sm:$0xf] }
   0xd   :  { %77 = vst.msk [vmem:[%s243_s4 + $0xc] sm:$0xf] %vm73_vm0, %v68_v37  ;;  %v63_v49 = vmax.bf16 %v55_v45, %v47_v42  ;;  %v56_v52 = vld [vmem:[%s242_s3 + $0x1c] sm:$0xf]  ;;  %78 = vst.msk [vmem:[%s243_s4 + $0x10] sm:$0xf] %vm73_vm0, %v69_v43 }
   0xe   :  { %v64_v53 = vmax.bf16 %v56_v52, %v48_v51  ;;  %79 = vst.msk [vmem:[%s243_s4 + $0x14] sm:$0xf] %vm73_vm0, %v70_v48 }
   0xf   :  { %v71_v54 = vmax.bf16 %v63_v49, %v39_v44 }
  0x10   :  { %v72_v55 = vmax.bf16 %v64_v53, %v40_v50 }
  0x11   :  { %80 = vst.msk [vmem:[%s243_s4 + $0x18] sm:$0xf] %vm73_vm0, %v71_v54 }
  0x12   :  { %81 = vst.msk [vmem:[%s243_s4 + $0x1c] sm:$0xf] %vm73_vm0, %v72_v55 }

// kernel: unetpp_forward.54
= control target key start
LH: loop header
LB: loop body
LE: loop exit
PB: predicated region body
PF: predicated region fallthrough
CT: control target
= control target key end

     0   :  { %v648_v1 = vmov 0   ;;  %v649_v34 = vmov 0.0   ;;  %vm650_vm0 = vmmov 0   ;;  %vm346_vm1 = vcmask 523264   ;;  %s803_s1 = inlined_call_operand.vmem [shape: bf16[576,128], index: 1, kind: input, shape index: {}]   ;;  %s804_s0 = inlined_call_operand.vmem [shape: bf16[16,576], index: 0, kind: input, shape index: {}]   ;;  %s805_s2 = inlined_call_operand.vmem [shape: f32[16,1], index: 2, kind: input, shape index: {}]   ;;  %s806_s3 = inlined_call_operand.vmem [shape: bf16[16,128], index: 3, kind: output, shape index: {}]  }
   0x1   :  { %v605_v0 = vld [vmem:[%s803_s1 + $0x40] sm:$0xff]   ;;  %604 = vset.pattern.permute.xlu0 %v648_v1  ;;  %v609_v5 = vld [vmem:[%s803_s1 + $0x48] sm:$0xff]   ;;  %v613_v9 = vld [vmem:[%s803_s1 + $0x50] sm:$0xff]  }
   0x2   :  { %v606_v2 = vld [vmem:[%s803_s1] sm:$0xff]   ;;  %540 = vmatprep.subr.bf16.mxu0 %v605_v0  ;;  %v610_v6 = vld [vmem:[%s803_s1 + $0x8] sm:$0xff]   ;;  %v614_v10 = vld [vmem:[%s803_s1 + $0x10] sm:$0xff]  }
   0x3   :  { %v607_v3 = vld [vmem:[%s803_s1 + $0xc0] sm:$0xff]   ;;  %541 = vmatpush3.bf16.msra.mxu0 %v606_v2  ;;  %v611_v7 = vld [vmem:[%s803_s1 + $0xc8] sm:$0xff]   ;;  %v615_v11 = vld [vmem:[%s803_s1 + $0xd0] sm:$0xff]  }
   0x4   :  { %v608_v4 = vld [vmem:[%s803_s1 + $0x80] sm:$0xff]   ;;  %562 = vmatprep.subr.bf16.mxu1 %v607_v3  ;;  %542 = vmatprep.subr.bf16.mxu0 %v609_v5  ;;  %v612_v8 = vld [vmem:[%s803_s1 + $0x88] sm:$0xff]   ;;  %v616_v12 = vld [vmem:[%s803_s1 + $0x90] sm:$0xff]  }
   0x5   :  { %563 = vmatpush3.bf16.msra.mxu1 %v608_v4  ;;  %v617_v13 = vld [vmem:[%s803_s1 + $0x58] sm:$0xff]   ;;  %v621_v17 = vld [vmem:[%s803_s1 + $0x60] sm:$0xff]   ;;  %v625_v21 = vld [vmem:[%s803_s1 + $0x68] sm:$0xff]  }
   0x6   :  { %564 = vmatprep.subr.bf16.mxu1 %v611_v7  ;;  %v618_v14 = vld [vmem:[%s803_s1 + $0x18] sm:$0xff]   ;;  %v622_v18 = vld [vmem:[%s803_s1 + $0x20] sm:$0xff]   ;;  %v626_v22 = vld [vmem:[%s803_s1 + $0x28] sm:$0xff]  }
   0x7   :  { %543 = vmatpush3.bf16.msra.mxu0 %v610_v6  ;;  %v619_v15 = vld [vmem:[%s803_s1 + $0xd8] sm:$0xff]   ;;  %v623_v19 = vld [vmem:[%s803_s1 + $0xe0] sm:$0xff]   ;;  %v627_v23 = vld [vmem:[%s803_s1 + $0xe8] sm:$0xff]  }
   0x8   :  { %544 = vmatprep.subr.bf16.mxu0 %v613_v9  ;;  %v620_v16 = vld [vmem:[%s803_s1 + $0x98] sm:$0xff]   ;;  %v624_v20 = vld [vmem:[%s803_s1 + $0xa0] sm:$0xff]   ;;  %v628_v24 = vld [vmem:[%s803_s1 + $0xa8] sm:$0xff]  }
   0x9   :  { %565 = vmatpush3.bf16.msra.mxu1 %v612_v8  ;;  %v629_v25 = vld [vmem:[%s803_s1 + $0x70] sm:$0xff]   ;;  %v633_v29 = vld [vmem:[%s803_s1 + $0x78] sm:$0xff]   ;;  %v642_v37 = vld [vmem:[%s804_s0 + $0xc] ss:$20 sps:$4 sm:$0xff]  }
   0xa   :  { %566 = vmatprep.subr.bf16.mxu1 %v615_v11  ;;  %v630_v26 = vld [vmem:[%s803_s1 + $0x30] sm:$0xff]   ;;  %v634_v30 = vld [vmem:[%s803_s1 + $0x38] sm:$0xff]   ;;  %v643_v38 = vld [vmem:[%s803_s1 + $0x100] sm:$0xff]   ;;  %423 = vmatprep.mubr.bf16.mxu1 %v642_v37 }
   0xb   :  { %545 = vmatpush3.bf16.msra.mxu0 %v614_v10  ;;  %v631_v27 = vld [vmem:[%s803_s1 + $0xf0] sm:$0xff]   ;;  %v635_v31 = vld [vmem:[%s803_s1 + $0xf8] sm:$0xff]   ;;  %v644_v39 = vld [vmem:[%s803_s1 + $0x108] sm:$0xff]  }
   0xc   :  { %546 = vmatprep.subr.bf16.mxu0 %v617_v13  ;;  %v632_v28 = vld [vmem:[%s803_s1 + $0xb0] sm:$0xff]   ;;  %v638_v33 = vld [vmem:[%s804_s0 + $0x4] ss:$20 sps:$4 sm:$0xff]   ;;  %v640_v36 = vld [vmem:[%s804_s0 + $0x8] ss:$20 sps:$4 sm:$0xff]  }
   0xd   :  { %567 = vmatpush3.bf16.msra.mxu1 %v616_v12  ;;  %v636_v32 = vld [vmem:[%s804_s0] ss:$20 sps:$4 sm:$0xff]   ;;  %v639_v35 = vld [vmem:[%s803_s1 + $0xb8] sm:$0xff]   ;;  %382 = vmatprep.mubr.bf16.mxu0 %v638_v33  ;;  %v94_v42 = vld [vmem:[%s805_s2 + $0x8] sm:$0xff] }
   0xe   :  { %568 = vmatprep.subr.bf16.mxu1 %v619_v15  ;;  %v93_v40 = vld [vmem:[%s805_s2] sm:$0xff]  ;;  %v645_v41 = vld [vmem:[%s803_s1 + $0x110] sm:$0xff]   ;;  %v646_v43 = vld [vmem:[%s803_s1 + $0x118] sm:$0xff]  }
   0xf   :  { %547 = vmatpush3.bf16.msra.mxu0 %v618_v14  ;;  %97 = vperm.xlu0 %604, %v93_v40   ;;  %v647_v44 = vld [vmem:[%s804_s0 + $0x10] ss:$20 sps:$4 sm:$0xff]  }
  0x10   :  { %548 = vmatprep.subr.bf16.mxu0 %v621_v17 }
  0x11   :  { %569 = vmatpush3.bf16.msra.mxu1 %v620_v16 }
  0x12   :  { %570 = vmatprep.subr.bf16.mxu1 %v623_v19 }
  0x13   :  { %549 = vmatpush3.bf16.msra.mxu0 %v622_v18  ;;  %102 = vperm.xlu0 %604, %v94_v42  }
  0x14   :  { %550 = vmatprep.subr.bf16.mxu0 %v625_v21 }
  0x15   :  { %571 = vmatpush3.bf16.msra.mxu1 %v624_v20 }
  0x16   :  { %572 = vmatprep.subr.bf16.mxu1 %v627_v23 }
  0x17   :  { %551 = vmatpush3.bf16.msra.mxu0 %v626_v22 }
  0x18   :  { %552 = vmatprep.subr.bf16.mxu0 %v629_v25 }
  0x19   :  { %573 = vmatpush3.bf16.msra.mxu1 %v628_v24 }
  0x1a   :  { %574 = vmatprep.subr.bf16.mxu1 %v631_v27 }
  0x1b   :  { %553 = vmatpush3.bf16.msra.mxu0 %v630_v26 }
  0x1c   :  { %554 = vmatprep.subr.bf16.mxu0 %v633_v29 }
  0x1d   :  { %575 = vmatpush3.bf16.msra.mxu1 %v632_v28 }
  0x1e   :  { %576 = vmatprep.subr.bf16.mxu1 %v635_v31 }
  0x1f   :  { %555 = vmatpush3.bf16.msra.mxu0 %v634_v30 }
  0x20   :  { %589 = vmatprep.subr.bf16.mxu0 %v649_v34 }
  0x21   :  { %577 = vmatpush3.bf16.msra.mxu1 %v639_v35 }
  0x22   :  { %383 = vmatmul.mubr.bf16.vlgmr.msra.gmra.mrb[0].mxu0 %v636_v32 }
  0x23   :  { %597 = vmatprep.mubr.msk.bf16.mxu0 %vm650_vm0, %v649_v34  ;;  %590 = vmatpush3.bf16.msra.mxu0 %v643_v38 }
  0x24   :  { %424 = vmatmul.mubr.bf16.vlgmr.msra.gmra.mrb[0].mxu1 %v640_v36  ;;  %591 = vmatprep.subr.bf16.mxu0 %v649_v34 }
  0x27   :  { %592 = vmatpush3.bf16.msra.mxu0 %v644_v39 }
  0x28   :  { %593 = vmatprep.subr.bf16.mxu0 %v649_v34 }
  0x2b   :  { %594 = vmatpush3.bf16.msra.mxu0 %v645_v41 }
  0x2c   :  { %595 = vmatprep.subr.bf16.mxu0 %v649_v34 }
  0x2f   :  { %596 = vmatpush3.bf16.msra.mxu0 %v646_v43 }
  0x32   :  { %598 = vmatmul.mubr.msk.bf16.vlgmr.msra.gmra.mrb[4].mxu0 %vm346_vm1, %v647_v44 }
  0x8e   :  { %v98_v45 = vpop.permute.xlu0 %97 }
  0x92   :  { %v103_v50 = vpop.permute.xlu0 %102 }
  0xf5   :  { %v556_v46 = vpop.f32.mrb[0].mxu0 }
  0xf6   :  { %v557_v47 = vpop.f32.mrb[1].mxu0 }
  0xf7   :  { %v558_v48 = vadd.f32 %v557_v47, %v556_v46  ;;  %v559_v49 = vpop.f32.mrb[2].mxu0  ;;  %v578_v51 = vpop.f32.mrb[0].mxu1 }
  0xf8   :  { %v560_v52 = vpop.f32.mrb[3].mxu0  ;;  %v579_v55 = vpop.f32.mrb[1].mxu1 }
  0xf9   :  { %v385_v53 = vadd.f32 %v558_v48, %v98_v45  ;;  %v561_v54 = vadd.f32 %v560_v52, %v559_v49  ;;  %v580_v56 = vadd.f32 %v579_v55, %v578_v51  ;;  %v581_v57 = vpop.f32.mrb[2].mxu1 }
  0xfa   :  { %v582_v59 = vpop.f32.mrb[3].mxu1 }
  0xfb   :  { %v388_v58 = vadd.f32 %v561_v54, %v103_v50  ;;  %v583_v60 = vadd.f32 %v582_v59, %v581_v57  ;;  %v426_v61 = vadd.f32 %v580_v56, %v385_v53 }
  0xfd   :  { %v429_v62 = vadd.f32 %v583_v60, %v388_v58 }
 0x105   :  { %v466_v63 = vpop.f32.mrb[4].mxu0 }
 0x106   :  { %v467_v0 = vadd.f32 %v466_v63, %v426_v61  ;;  %v599_v1 = vpop.f32.mrb[5].mxu0 }
 0x107   :  { %v469_v2 = vpop.f32.mrb[6].mxu0 }
 0x108   :  { %v470_v3 = vadd.f32 %v469_v2, %v429_v62  ;;  %v600_v4 = vpop.f32.mrb[7].mxu0  ;;  %v473_v5 = vmax.f32 %v467_v0, 0.0 }
 0x10a   :  { %v474_v6 = vmax.f32 %v470_v3, 0.0 }
 0x10c   :  { %v538_v7 = vpack.c.bf16 %v474_v6, %v473_v5 }
 0x10e   :  { %539 = vst [vmem:[%s806_s3] sm:$0xff] %v538_v7  }

// kernel: unetpp_forward.59
= control target key start
LH: loop header
LB: loop body
LE: loop exit
PB: predicated region body
PF: predicated region fallthrough
CT: control target
= control target key end

     0   :  { %v1447_v1 = vmov 0   ;;  %vm647_vm0 = vcmask 523264   ;;  %vm1043_vm1 = vcmask 11264   ;;  %s1852_s1 = inlined_call_operand.vmem [shape: bf16[576,2], index: 1, kind: input, shape index: {}]   ;;  %s1853_s0 = inlined_call_operand.vmem [shape: bf16[128,576], index: 0, kind: input, shape index: {}]   ;;  %s1854_s2 = inlined_call_operand.vmem [shape: f32[128,1], index: 2, kind: input, shape index: {}]   ;;  %s1855_s3 = inlined_call_operand.vmem [shape: bf16[128,2], index: 3, kind: output, shape index: {}]  }
   0x1   :  { %v1355_v0 = vld [vmem:[%s1852_s1 + $0x40] sm:$0xff]   ;;  %1353 = vset.pattern.permute.xlu0 %v1447_v1  ;;  %1354 = vset.pattern.permute.xlu1 %v1447_v1  ;;  %v1359_v5 = vld [vmem:[%s1852_s1 + $0x48] sm:$0xff]   ;;  %v1363_v9 = vld [vmem:[%s1852_s1 + $0x50] sm:$0xff]  }
   0x2   :  { %v1356_v2 = vld [vmem:[%s1852_s1 + $0xc0] sm:$0xff]   ;;  %1180 = vmatprep.subr.bf16.mxu0 %v1355_v0  ;;  %v1360_v6 = vld [vmem:[%s1852_s1 + $0xc8] sm:$0xff]   ;;  %v1364_v10 = vld [vmem:[%s1852_s1 + $0xd0] sm:$0xff]  }
   0x3   :  { %v1357_v3 = vld [vmem:[%s1852_s1] sm:$0xff]   ;;  %1244 = vmatprep.subr.bf16.mxu1 %v1356_v2  ;;  %v1361_v7 = vld [vmem:[%s1852_s1 + $0x8] sm:$0xff]   ;;  %v1365_v11 = vld [vmem:[%s1852_s1 + $0x10] sm:$0xff]  }
   0x4   :  { %v1358_v4 = vld [vmem:[%s1852_s1 + $0x80] sm:$0xff]   ;;  %1181 = vmatpush3.bf16.msra.mxu0 %v1357_v3  ;;  %v1362_v8 = vld [vmem:[%s1852_s1 + $0x88] sm:$0xff]   ;;  %v1366_v12 = vld [vmem:[%s1852_s1 + $0x90] sm:$0xff]  }
   0x5   :  { %1245 = vmatpush3.bf16.msra.mxu1 %v1358_v4  ;;  %1182 = vmatprep.subr.bf16.mxu0 %v1359_v5  ;;  %v1367_v13 = vld [vmem:[%s1852_s1 + $0x58] sm:$0xff]   ;;  %v1371_v17 = vld [vmem:[%s1852_s1 + $0x60] sm:$0xff]   ;;  %v1375_v21 = vld [vmem:[%s1852_s1 + $0x68] sm:$0xff]  }
   0x6   :  { %1246 = vmatprep.subr.bf16.mxu1 %v1360_v6  ;;  %v1368_v14 = vld [vmem:[%s1852_s1 + $0xd8] sm:$0xff]   ;;  %v1372_v18 = vld [vmem:[%s1852_s1 + $0xe0] sm:$0xff]   ;;  %v1376_v22 = vld [vmem:[%s1852_s1 + $0xe8] sm:$0xff]  }
   0x7   :  { %v1369_v15 = vld [vmem:[%s1852_s1 + $0x18] sm:$0xff]   ;;  %v1373_v19 = vld [vmem:[%s1852_s1 + $0x20] sm:$0xff]   ;;  %v1377_v23 = vld [vmem:[%s1852_s1 + $0x28] sm:$0xff]  }
   0x8   :  { %1183 = vmatpush3.bf16.msra.mxu0 %v1361_v7  ;;  %v1370_v16 = vld [vmem:[%s1852_s1 + $0x98] sm:$0xff]   ;;  %v1374_v20 = vld [vmem:[%s1852_s1 + $0xa0] sm:$0xff]   ;;  %v1378_v24 = vld [vmem:[%s1852_s1 + $0xa8] sm:$0xff]  }
   0x9   :  { %1247 = vmatpush3.bf16.msra.mxu1 %v1362_v8  ;;  %1184 = vmatprep.subr.bf16.mxu0 %v1363_v9  ;;  %v1379_v25 = vld [vmem:[%s1852_s1 + $0x70] sm:$0xff]   ;;  %v1383_v29 = vld [vmem:[%s1852_s1 + $0x78] sm:$0xff]   ;;  %v1392_v36 = vld [vmem:[%s1853_s0 + $0xc] ss:$20 sps:$4 sm:$0xff]  }
   0xa   :  { %1248 = vmatprep.subr.bf16.mxu1 %v1364_v10  ;;  %v1380_v26 = vld [vmem:[%s1852_s1 + $0xf0] sm:$0xff]   ;;  %v1384_v30 = vld [vmem:[%s1852_s1 + $0xf8] sm:$0xff]   ;;  %v1393_v37 = vld [vmem:[%s1852_s1 + $0x100] sm:$0xff]   ;;  %801 = vmatprep.mubr.bf16.mxu1 %v1392_v36 }
   0xb   :  { %v1381_v27 = vld [vmem:[%s1852_s1 + $0x30] sm:$0xff]   ;;  %v1385_v31 = vld [vmem:[%s1852_s1 + $0x38] sm:$0xff]   ;;  %v1394_v38 = vld [vmem:[%s1853_s0 + $0x2c] ss:$20 sps:$4 sm:$0xff]  }
   0xc   :  { %1185 = vmatpush3.bf16.msra.mxu0 %v1365_v11  ;;  %v1382_v28 = vld [vmem:[%s1852_s1 + $0xb0] sm:$0xff]   ;;  %v1386_v32 = vld [vmem:[%s1852_s1 + $0xb8] sm:$0xff]   ;;  %v1406_v43 = vld [vmem:[%s1852_s1 + $0x108] sm:$0xff]  }
   0xd   :  { %1249 = vmatpush3.bf16.msra.mxu1 %v1366_v12  ;;  %1186 = vmatprep.subr.bf16.mxu0 %v1367_v13  ;;  %v1387_v33 = vld [vmem:[%s1853_s0] ss:$20 sps:$4 sm:$0xff]   ;;  %v1389_v34 = vld [vmem:[%s1853_s0 + $0x4] ss:$20 sps:$4 sm:$0xff]   ;;  %v1390_v35 = vld [vmem:[%s1853_s0 + $0x8] ss:$20 sps:$4 sm:$0xff]  }
   0xe   :  { %1250 = vmatprep.subr.bf16.mxu1 %v1368_v14  ;;  %704 = vmatprep.mubr.bf16.mxu0 %v1389_v34  ;;  %v1396_v39 = vld [vmem:[%s1853_s0 + $0x34] ss:$20 sps:$4 sm:$0xff]   ;;  %v1399_v41 = vld [vmem:[%s1853_s0 + $0x30] ss:$20 sps:$4 sm:$0xff]   ;;  %v1405_v46 = vld [vmem:[%s1853_s0 + $0x58] ss:$20 sps:$4 sm:$0xff]  }
   0xf   :  { %v1398_v40 = vld [vmem:[%s1853_s0 + $0x28] ss:$20 sps:$4 sm:$0xff]   ;;  %v1404_v45 = vld [vmem:[%s1853_s0 + $0x50] ss:$20 sps:$4 sm:$0xff]   ;;  %v1411_v51 = vld [vmem:[%s1853_s0 + $0x78] ss:$20 sps:$4 sm:$0xff]  }
  0x10   :  { %1187 = vmatpush3.bf16.msra.mxu0 %v1369_v15  ;;  %v1400_v42 = vld [vmem:[%s1853_s0 + $0x54] ss:$20 sps:$4 sm:$0xff]   ;;  %v1402_v44 = vld [vmem:[%s1853_s0 + $0x5c] ss:$20 sps:$4 sm:$0xff]   ;;  %v1409_v49 = vld [vmem:[%s1853_s0 + $0x84] ss:$20 sps:$4 sm:$0xff]  }
  0x11   :  { %1251 = vmatpush3.bf16.msra.mxu1 %v1370_v16  ;;  %1188 = vmatprep.subr.bf16.mxu0 %v1371_v17  ;;  %v1419_v47 = vld [vmem:[%s1852_s1 + $0x110] sm:$0xff]   ;;  %v1432_v50 = vld [vmem:[%s1852_s1 + $0x118] sm:$0xff]   ;;  %v1415_v54 = vld [vmem:[%s1853_s0 + $0xac] ss:$20 sps:$4 sm:$0xff]  }
  0x12   :  { %1252 = vmatprep.subr.bf16.mxu1 %v1372_v18  ;;  %v1407_v48 = vld [vmem:[%s1853_s0 + $0x7c] ss:$20 sps:$4 sm:$0xff]   ;;  %v1412_v52 = vld [vmem:[%s1853_s0 + $0x80] ss:$20 sps:$4 sm:$0xff]   ;;  %v1413_v53 = vld [vmem:[%s1853_s0 + $0xa4] ss:$20 sps:$4 sm:$0xff]  }
  0x13   :  { %v1417_v55 = vld [vmem:[%s1853_s0 + $0xa0] ss:$20 sps:$4 sm:$0xff]   ;;  %v1418_v56 = vld [vmem:[%s1853_s0 + $0xa8] ss:$20 sps:$4 sm:$0xff]   ;;  %v1425_v2 = vld [vmem:[%s1853_s0 + $0xd0] ss:$20 sps:$4 sm:$0xff]  }
  0x14   :  { %1189 = vmatpush3.bf16.msra.mxu0 %v1373_v19  ;;  %v1420_v57 = vld [vmem:[%s1853_s0 + $0xcc] ss:$20 sps:$4 sm:$0xff]   ;;  %v1422_v59 = vld [vmem:[%s1853_s0 + $0xd4] ss:$20 sps:$4 sm:$0xff]   ;;  %v138_v62 = vld [vmem:[%s1854_s2 + $0x18] sm:$0xff] }
  0x15   :  { %1253 = vmatpush3.bf16.msra.mxu1 %v1374_v20  ;;  %1190 = vmatprep.subr.bf16.mxu0 %v1375_v21  ;;  %v135_v58 = vld [vmem:[%s1854_s2] sm:$0xff]  ;;  %v137_v60 = vld [vmem:[%s1854_s2 + $0x10] sm:$0xff]  ;;  %v136_v61 = vld [vmem:[%s1854_s2 + $0x8] sm:$0xff] }
  0x16   :  { %1254 = vmatprep.subr.bf16.mxu1 %v1376_v22  ;;  %153 = vperm.xlu0 %1353, %v135_v58   ;;  %v139_v63 = vld [vmem:[%s1854_s2 + $0x20] sm:$0xff]  ;;  %v1424_v0 = vld [vmem:[%s1853_s0 + $0xc8] ss:$20 sps:$4 sm:$0xff]   ;;  %v141_v5 = vld [vmem:[%s1854_s2 + $0x30] sm:$0xff] }
  0x17   :  { %163 = vperm.xlu1 %1354, %v137_v60   ;;  %v140_v1 = vld [vmem:[%s1854_s2 + $0x28] sm:$0xff]  ;;  %v1428_v4 = vld [vmem:[%s1853_s0 + $0xfc] ss:$20 sps:$4 sm:$0xff]   ;;  %v143_v7 = vld [vmem:[%s1854_s2 + $0x40] sm:$0xff] }
  0x18   :  { %1191 = vmatpush3.bf16.msra.mxu0 %v1377_v23  ;;  %v1426_v3 = vld [vmem:[%s1853_s0 + $0xf4] ss:$20 sps:$4 sm:$0xff]   ;;  %v142_v6 = vld [vmem:[%s1854_s2 + $0x38] sm:$0xff]  ;;  %v1430_v8 = vld [vmem:[%s1853_s0 + $0xf0] ss:$20 sps:$4 sm:$0xff]  }
  0x19   :  { %1255 = vmatpush3.bf16.msra.mxu1 %v1378_v24  ;;  %1192 = vmatprep.subr.bf16.mxu0 %v1379_v25  ;;  %v144_v9 = vld [vmem:[%s1854_s2 + $0x48] sm:$0xff]  ;;  %v1433_v11 = vld [vmem:[%s1853_s0 + $0x11c] ss:$20 sps:$4 sm:$0xff]   ;;  %v1435_v12 = vld [vmem:[%s1853_s0 + $0x124] ss:$20 sps:$4 sm:$0xff]  }
  0x1a   :  { %1256 = vmatprep.subr.bf16.mxu1 %v1380_v26  ;;  %158 = vperm.xlu0 %1353, %v136_v61   ;;  %v1431_v10 = vld [vmem:[%s1853_s0 + $0xf8] ss:$20 sps:$4 sm:$0xff]   ;;  %v145_v13 = vld [vmem:[%s1854_s2 + $0x50] sm:$0xff]  ;;  %v147_v15 = vld [vmem:[%s1854_s2 + $0x60] sm:$0xff] }
  0x1b   :  { %168 = vperm.xlu1 %1354, %v138_v62   ;;  %v146_v14 = vld [vmem:[%s1854_s2 + $0x58] sm:$0xff]  ;;  %v148_v17 = vld [vmem:[%s1854_s2 + $0x68] sm:$0xff]  ;;  %v1438_v18 = vld [vmem:[%s1853_s0 + $0x120] ss:$20 sps:$4 sm:$0xff]  }
  0x1c   :  { %1193 = vmatpush3.bf16.msra.mxu0 %v1381_v27  ;;  %v1437_v16 = vld [vmem:[%s1853_s0 + $0x118] ss:$20 sps:$4 sm:$0xff]   ;;  %v1439_v19 = vld [vmem:[%s1853_s0 + $0x10] ss:$20 sps:$4 sm:$0xff]   ;;  %v1443_v25 = vld [vmem:[%s1853_s0 + $0x60] ss:$20 sps:$4 sm:$0xff]  }
  0x1d   :  { %1257 = vmatpush3.bf16.msra.mxu1 %v1382_v28  ;;  %1194 = vmatprep.subr.bf16.mxu0 %v1383_v29  ;;  %v1440_v20 = vld [vmem:[%s1853_s0 + $0xb0] ss:$20 sps:$4 sm:$0xff]   ;;  %v150_v22 = vld [vmem:[%s1854_s2 + $0x78] sm:$0xff]  ;;  %v1444_v26 = vld [vmem:[%s1853_s0 + $0x100] ss:$20 sps:$4 sm:$0xff]  }
  0x1e   :  { %1258 = vmatprep.subr.bf16.mxu1 %v1384_v30  ;;  %173 = vperm.xlu0 %1353, %v139_v63   ;;  %v149_v21 = vld [vmem:[%s1854_s2 + $0x70] sm:$0xff]  ;;  %v1441_v23 = vld [vmem:[%s1853_s0 + $0x38] ss:$20 sps:$4 sm:$0xff]   ;;  %v1445_v27 = vld [vmem:[%s1853_s0 + $0x88] ss:$20 sps:$4 sm:$0xff]  }
  0x1f   :  { %178 = vperm.xlu1 %1354, %v140_v1   ;;  %v1442_v24 = vld [vmem:[%s1853_s0 + $0xd8] ss:$20 sps:$4 sm:$0xff]   ;;  %v1446_v28 = vld [vmem:[%s1853_s0 + $0x128] ss:$20 sps:$4 sm:$0xff]  }
  0x20   :  { %1195 = vmatpush3.bf16.msra.mxu0 %v1385_v31 }
  0x21   :  { %1259 = vmatpush3.bf16.msra.mxu1 %v1386_v32  ;;  %1320 = vmatprep.subr.bf16.mxu0 %v1393_v37 }
  0x22   :  { %1344 = vmatprep.subr.bf16.mxu1 %v1393_v37  ;;  %183 = vperm.xlu0 %1353, %v141_v5  }
  0x23   :  { %705 = vmatmul.mubr.bf16.vlgmr.msra.gmra.mrb[0].mxu0 %v1387_v33  ;;  %188 = vperm.xlu1 %1354, %v142_v6  }
  0x24   :  { %802 = vmatmul.mubr.bf16.vlgmr.msra.gmra.mrb[0].mxu1 %v1390_v35  ;;  %1321 = vmatpush3.bf16.msra.mxu0 %v1393_v37 }
  0x25   :  { %1348 = vmatpush3.bf16.msra.mxu1 %v1393_v37  ;;  %712 = vmatprep.mubr.bf16.mxu0 %v1394_v38 }
  0x26   :  { %809 = vmatprep.mubr.bf16.mxu1 %v1396_v39  ;;  %1322 = vmatprep.subr.bf16.mxu0 %v1406_v43 }
  0x27   :  { %1345 = vmatprep.subr.bf16.mxu1 %v1406_v43  ;;  %193 = vperm.xlu0 %1353, %v143_v7  }
  0x28   :  { %1323 = vmatpush3.bf16.msra.mxu0 %v1406_v43  ;;  %198 = vperm.xlu1 %1354, %v144_v9  }
  0x29   :  { %1349 = vmatpush3.bf16.msra.mxu1 %v1406_v43  ;;  %1324 = vmatprep.subr.bf16.mxu0 %v1419_v47 }
  0x2a   :  { %1346 = vmatprep.subr.bf16.mxu1 %v1419_v47 }
  0x2b   :  { %713 = vmatmul.mubr.bf16.gmra.mrb[4].mxu0 %v1398_v40  ;;  %203 = vperm.xlu0 %1353, %v145_v13  }
  0x2c   :  { %810 = vmatmul.mubr.bf16.gmra.mrb[4].mxu1 %v1399_v41  ;;  %720 = vmatprep.mubr.bf16.mxu0 %v1400_v42 }
  0x2d   :  { %817 = vmatprep.mubr.bf16.mxu1 %v1402_v44  ;;  %1325 = vmatpush3.bf16.msra.mxu0 %v1419_v47 }
  0x2e   :  { %1350 = vmatpush3.bf16.msra.mxu1 %v1419_v47  ;;  %1326 = vmatprep.subr.bf16.mxu0 %v1432_v50 }
  0x2f   :  { %1347 = vmatprep.subr.bf16.mxu1 %v1432_v50  ;;  %208 = vperm.xlu1 %1354, %v146_v14  }
  0x30   :  { %213 = vperm.xlu0 %1353, %v147_v15  }
  0x31   :  { %1327 = vmatpush3.bf16.msra.mxu0 %v1432_v50 }
  0x32   :  { %1351 = vmatpush3.bf16.msra.mxu1 %v1432_v50 }
  0x33   :  { %721 = vmatmul.mubr.bf16.gmra.mrb[8].mxu0 %v1404_v45  ;;  %218 = vperm.xlu1 %1354, %v148_v17  }
  0x34   :  { %818 = vmatmul.mubr.bf16.gmra.mrb[8].mxu1 %v1405_v46  ;;  %728 = vmatprep.mubr.bf16.mxu0 %v1407_v48 }
  0x35   :  { %825 = vmatprep.mubr.bf16.mxu1 %v1409_v49  ;;  %223 = vperm.xlu0 %1353, %v149_v21  }
  0x37   :  { %228 = vperm.xlu1 %1354, %v150_v22  }
  0x3b   :  { %729 = vmatmul.mubr.bf16.gmra.mrb[12].mxu0 %v1411_v51 }
  0x3c   :  { %826 = vmatmul.mubr.bf16.gmra.mrb[12].mxu1 %v1412_v52  ;;  %736 = vmatprep.mubr.bf16.mxu0 %v1413_v53 }
  0x3d   :  { %833 = vmatprep.mubr.bf16.mxu1 %v1415_v54 }
  0x43   :  { %737 = vmatmul.mubr.bf16.gmra.mrb[16].mxu0 %v1417_v55 }
  0x44   :  { %834 = vmatmul.mubr.bf16.gmra.mrb[16].mxu1 %v1418_v56  ;;  %744 = vmatprep.mubr.bf16.mxu0 %v1420_v57 }
  0x45   :  { %841 = vmatprep.mubr.bf16.mxu1 %v1422_v59 }
  0x4b   :  { %745 = vmatmul.mubr.bf16.gmra.mrb[20].mxu0 %v1424_v0 }
  0x4c   :  { %842 = vmatmul.mubr.bf16.gmra.mrb[20].mxu1 %v1425_v2  ;;  %752 = vmatprep.mubr.bf16.mxu0 %v1426_v3 }
  0x4d   :  { %849 = vmatprep.mubr.bf16.mxu1 %v1428_v4 }
  0x53   :  { %753 = vmatmul.mubr.bf16.gmra.mrb[24].mxu0 %v1430_v8 }
  0x54   :  { %850 = vmatmul.mubr.bf16.gmra.mrb[24].mxu1 %v1431_v10  ;;  %760 = vmatprep.mubr.bf16.mxu0 %v1433_v11 }
  0x55   :  { %857 = vmatprep.mubr.bf16.mxu1 %v1435_v12 }
  0x5b   :  { %761 = vmatmul.mubr.bf16.gmra.mrb[28].mxu0 %v1437_v16 }
  0x5c   :  { %858 = vmatmul.mubr.bf16.gmra.mrb[28].mxu1 %v1438_v18  ;;  %1328 = vmatprep.mubr.msk.bf16.mxu0 %vm647_vm0, %v1439_v19 }
  0x5d   :  { %1336 = vmatprep.mubr.msk.bf16.mxu1 %vm647_vm0, %v1440_v20 }
  0x63   :  { %1329 = vmatmul.mubr.msk.bf16.vlgmr.msra.gmra.mrb[32].mxu0 %vm647_vm0, %v1441_v23 }
  0x64   :  { %1337 = vmatmul.mubr.msk.bf16.vlgmr.msra.gmra.mrb[32].mxu1 %vm647_vm0, %v1442_v24  ;;  %1332 = vmatprep.mubr.msk.bf16.mxu0 %vm647_vm0, %v1443_v25 }
  0x65   :  { %1340 = vmatprep.mubr.msk.bf16.mxu1 %vm647_vm0, %v1444_v26 }
  0x6b   :  { %1333 = vmatmul.mubr.msk.bf16.gmra.mrb[36].mxu0 %vm647_vm0, %v1445_v27 }
  0x6c   :  { %1341 = vmatmul.mubr.msk.bf16.gmra.mrb[36].mxu1 %vm647_vm0, %v1446_v28 }
  0x95   :  { %v154_v29 = vpop.permute.xlu0 %153 }
  0x96   :  { %v164_v30 = vpop.permute.xlu1 %163 }
  0x99   :  { %v159_v32 = vpop.permute.xlu0 %158 }
  0x9a   :  { %v169_v48 = vpop.permute.xlu1 %168 }
  0x9d   :  { %v174_v0 = vpop.permute.xlu0 %173 }
  0x9e   :  { %v179_v2 = vpop.permute.xlu1 %178 }
  0xa1   :  { %v184_v19 = vpop.permute.xlu0 %183 }
  0xf6   :  { %v1196_v31 = vpop.f32.mrb[0].mxu0 }
  0xf7   :  { %v1260_v33 = vpop.f32.mrb[0].mxu1  ;;  %v1197_v34 = vpop.f32.mrb[1].mxu0 }
  0xf8   :  { %v1198_v35 = vadd.f32 %v1197_v34, %v1196_v31  ;;  %v1261_v36 = vpop.f32.mrb[1].mxu1  ;;  %v1199_v37 = vpop.f32.mrb[2].mxu0 }
  0xf9   :  { %v1262_v38 = vadd.f32 %v1261_v36, %v1260_v33  ;;  %v1263_v39 = vpop.f32.mrb[2].mxu1  ;;  %v1200_v40 = vpop.f32.mrb[3].mxu0 }
  0xfa   :  { %v707_v41 = vadd.f32 %v1198_v35, %v154_v29  ;;  %v1201_v42 = vadd.f32 %v1200_v40, %v1199_v37  ;;  %v1264_v43 = vpop.f32.mrb[3].mxu1  ;;  %v189_v33 = vpop.permute.xlu1 %188 }
  0xfb   :  { %v1265_v44 = vadd.f32 %v1264_v43, %v1263_v39  ;;  %v194_v36 = vpop.permute.xlu0 %193 }
  0xfc   :  { %v710_v45 = vadd.f32 %v1201_v42, %v159_v32  ;;  %v1752_v46 = vadd.f32 %v1262_v38, %v707_v41 }
  0xfe   :  { %v1202_v47 = vpop.f32.mrb[4].mxu0  ;;  %v1754_v49 = vadd.f32 %v1265_v44, %v710_v45 }
  0xff   :  { %v1266_v50 = vpop.f32.mrb[4].mxu1  ;;  %v1203_v51 = vpop.f32.mrb[5].mxu0 }
 0x100   :  { %v1204_v52 = vadd.f32 %v1203_v51, %v1202_v47  ;;  %v1267_v53 = vpop.f32.mrb[5].mxu1  ;;  %v1205_v54 = vpop.f32.mrb[6].mxu0 }
 0x101   :  { %v1268_v55 = vadd.f32 %v1267_v53, %v1266_v50  ;;  %v1269_v56 = vpop.f32.mrb[6].mxu1  ;;  %v1206_v57 = vpop.f32.mrb[7].mxu0 }
 0x102   :  { %v715_v58 = vadd.f32 %v1204_v52, %v164_v30  ;;  %v1207_v59 = vadd.f32 %v1206_v57, %v1205_v54  ;;  %v1270_v60 = vpop.f32.mrb[7].mxu1  ;;  %v199_v52 = vpop.permute.xlu1 %198 }
 0x103   :  { %v1271_v61 = vadd.f32 %v1270_v60, %v1269_v56  ;;  %v204_v56 = vpop.permute.xlu0 %203 }
 0x104   :  { %v718_v62 = vadd.f32 %v1207_v59, %v169_v48  ;;  %v1756_v63 = vadd.f32 %v1268_v55, %v715_v58 }
 0x106   :  { %v1208_v1 = vpop.f32.mrb[8].mxu0  ;;  %v1758_v3 = vadd.f32 %v1271_v61, %v718_v62 }
 0x107   :  { %v1272_v4 = vpop.f32.mrb[8].mxu1  ;;  %v1209_v5 = vpop.f32.mrb[9].mxu0 }
 0x108   :  { %v1210_v6 = vadd.f32 %v1209_v5, %v1208_v1  ;;  %v1273_v7 = vpop.f32.mrb[9].mxu1  ;;  %v1211_v8 = vpop.f32.mrb[10].mxu0 }
 0x109   :  { %v1274_v9 = vadd.f32 %v1273_v7, %v1272_v4  ;;  %v1275_v10 = vpop.f32.mrb[10].mxu1  ;;  %v1212_v11 = vpop.f32.mrb[11].mxu0 }
 0x10a   :  { %v723_v12 = vadd.f32 %v1210_v6, %v174_v0  ;;  %v1213_v13 = vadd.f32 %v1212_v11, %v1211_v8  ;;  %v1276_v14 = vpop.f32.mrb[11].mxu1  ;;  %v209_v8 = vpop.permute.xlu1 %208 }
 0x10b   :  { %v1277_v15 = vadd.f32 %v1276_v14, %v1275_v10 }
 0x10c   :  { %v726_v16 = vadd.f32 %v1213_v13, %v179_v2  ;;  %v1760_v17 = vadd.f32 %v1274_v9, %v723_v12  ;;  %v214_v12 = vpop.permute.xlu0 %213 }
 0x10e   :  { %v1214_v18 = vpop.f32.mrb[12].mxu0  ;;  %v1762_v20 = vadd.f32 %v1277_v15, %v726_v16 }
 0x10f   :  { %v1278_v21 = vpop.f32.mrb[12].mxu1  ;;  %v1215_v22 = vpop.f32.mrb[13].mxu0 }
 0x110   :  { %v1216_v23 = vadd.f32 %v1215_v22, %v1214_v18  ;;  %v1279_v24 = vpop.f32.mrb[13].mxu1  ;;  %v1217_v25 = vpop.f32.mrb[14].mxu0 }
 0x111   :  { %v1280_v26 = vadd.f32 %v1279_v24, %v1278_v21  ;;  %v1281_v27 = vpop.f32.mrb[14].mxu1  ;;  %v1218_v28 = vpop.f32.mrb[15].mxu0 }
 0x112   :  { %v731_v29 = vadd.f32 %v1216_v23, %v184_v19  ;;  %v1219_v30 = vadd.f32 %v1218_v28, %v1217_v25  ;;  %v1282_v31 = vpop.f32.mrb[15].mxu1  ;;  %v219_v28 = vpop.permute.xlu1 %218 }
 0x113   :  { %v1283_v32 = vadd.f32 %v1282_v31, %v1281_v27 }
 0x114   :  { %v734_v34 = vadd.f32 %v1219_v30, %v189_v33  ;;  %v1764_v35 = vadd.f32 %v1280_v26, %v731_v29 }
 0x116   :  { %v1220_v37 = vpop.f32.mrb[16].mxu0  ;;  %v1766_v38 = vadd.f32 %v1283_v32, %v734_v34  ;;  %v224_v32 = vpop.permute.xlu0 %223 }
 0x117   :  { %v1284_v39 = vpop.f32.mrb[16].mxu1  ;;  %v1221_v40 = vpop.f32.mrb[17].mxu0 }
 0x118   :  { %v1222_v41 = vadd.f32 %v1221_v40, %v1220_v37  ;;  %v1285_v42 = vpop.f32.mrb[17].mxu1  ;;  %v1223_v43 = vpop.f32.mrb[18].mxu0 }
 0x119   :  { %v1286_v44 = vadd.f32 %v1285_v42, %v1284_v39  ;;  %v1287_v45 = vpop.f32.mrb[18].mxu1  ;;  %v1224_v47 = vpop.f32.mrb[19].mxu0 }
 0x11a   :  { %v739_v48 = vadd.f32 %v1222_v41, %v194_v36  ;;  %v1225_v50 = vadd.f32 %v1224_v47, %v1223_v43  ;;  %v1288_v51 = vpop.f32.mrb[19].mxu1 }
 0x11b   :  { %v1289_v53 = vadd.f32 %v1288_v51, %v1287_v45 }
 0x11c   :  { %v742_v54 = vadd.f32 %v1225_v50, %v199_v52  ;;  %v1768_v55 = vadd.f32 %v1286_v44, %v739_v48  ;;  %v229_v50 = vpop.permute.xlu1 %228 }
 0x11e   :  { %v1226_v57 = vpop.f32.mrb[20].mxu0  ;;  %v1770_v58 = vadd.f32 %v1289_v53, %v742_v54 }
 0x11f   :  { %v1290_v59 = vpop.f32.mrb[20].mxu1  ;;  %v1227_v60 = vpop.f32.mrb[21].mxu0 }
 0x120   :  { %v1228_v61 = vadd.f32 %v1227_v60, %v1226_v57  ;;  %v1291_v62 = vpop.f32.mrb[21].mxu1  ;;  %v1229_v0 = vpop.f32.mrb[22].mxu0 }
 0x121   :  { %v1292_v1 = vadd.f32 %v1291_v62, %v1290_v59  ;;  %v1293_v2 = vpop.f32.mrb[22].mxu1  ;;  %v1230_v4 = vpop.f32.mrb[23].mxu0 }
 0x122   :  { %v747_v5 = vadd.f32 %v1228_v61, %v204_v56  ;;  %v1231_v6 = vadd.f32 %v1230_v4, %v1229_v0  ;;  %v1294_v7 = vpop.f32.mrb[23].mxu1 }
 0x123   :  { %v1295_v9 = vadd.f32 %v1294_v7, %v1293_v2 }
 0x124   :  { %v750_v10 = vadd.f32 %v1231_v6, %v209_v8  ;;  %v844_v11 = vadd.f32 %v1292_v1, %v747_v5 }
 0x126   :  { %v1232_v13 = vpop.f32.mrb[24].mxu0  ;;  %v847_v14 = vadd.f32 %v1295_v9, %v750_v10 }
 0x127   :  { %v1296_v15 = vpop.f32.mrb[24].mxu1  ;;  %v1233_v16 = vpop.f32.mrb[25].mxu0 }
 0x128   :  { %v1234_v18 = vadd.f32 %v1233_v16, %v1232_v13  ;;  %v1297_v19 = vpop.f32.mrb[25].mxu1  ;;  %v1235_v21 = vpop.f32.mrb[26].mxu0 }
 0x129   :  { %v1298_v22 = vadd.f32 %v1297_v19, %v1296_v15  ;;  %v1299_v23 = vpop.f32.mrb[26].mxu1  ;;  %v1236_v24 = vpop.f32.mrb[27].mxu0 }
 0x12a   :  { %v755_v25 = vadd.f32 %v1234_v18, %v214_v12  ;;  %v1237_v26 = vadd.f32 %v1236_v24, %v1235_v21  ;;  %v1300_v27 = vpop.f32.mrb[27].mxu1 }
 0x12b   :  { %v1301_v29 = vadd.f32 %v1300_v27, %v1299_v23 }
 0x12c   :  { %v758_v30 = vadd.f32 %v1237_v26, %v219_v28  ;;  %v1772_v31 = vadd.f32 %v1298_v22, %v755_v25 }
 0x12e   :  { %v1238_v33 = vpop.f32.mrb[28].mxu0  ;;  %v1774_v34 = vadd.f32 %v1301_v29, %v758_v30 }
 0x12f   :  { %v1302_v36 = vpop.f32.mrb[28].mxu1  ;;  %v1239_v37 = vpop.f32.mrb[29].mxu0 }
 0x130   :  { %v1240_v39 = vadd.f32 %v1239_v37, %v1238_v33  ;;  %v1303_v40 = vpop.f32.mrb[29].mxu1  ;;  %v1241_v41 = vpop.f32.mrb[30].mxu0 }
 0x131   :  { %v1304_v42 = vadd.f32 %v1303_v40, %v1302_v36  ;;  %v1305_v43 = vpop.f32.mrb[30].mxu1  ;;  %v1242_v44 = vpop.f32.mrb[31].mxu0 }
 0x132   :  { %v763_v45 = vadd.f32 %v1240_v39, %v224_v32  ;;  %v1243_v47 = vadd.f32 %v1242_v44, %v1241_v41  ;;  %v1306_v48 = vpop.f32.mrb[31].mxu1 }
 0x133   :  { %v1307_v51 = vadd.f32 %v1306_v48, %v1305_v43 }
 0x134   :  { %v766_v52 = vadd.f32 %v1243_v47, %v229_v50  ;;  %v860_v53 = vadd.f32 %v1304_v42, %v763_v45 }
 0x136   :  { %v1330_v54 = vpop.f32.mrb[32].mxu0  ;;  %v863_v56 = vadd.f32 %v1307_v51, %v766_v52 }
 0x137   :  { %v909_v57 = vadd.f32 %v1330_v54, %v1756_v63  ;;  %v1338_v59 = vpop.f32.mrb[32].mxu1  ;;  %v900_v60 = vpop.f32.mrb[33].mxu0 }
 0x138   :  { %v941_v61 = vadd.f32 %v1338_v59, %v844_v11  ;;  %v901_v62 = vadd.f32 %v900_v60, %v1752_v46  ;;  %v932_v0 = vpop.f32.mrb[33].mxu1  ;;  %v1331_v1 = vpop.f32.mrb[34].mxu0 }
 0x139   :  { %v965_v2 = vmax.f32 %v909_v57, 0.0  ;;  %v933_v4 = vadd.f32 %v932_v0, %v1768_v55  ;;  %v912_v5 = vadd.f32 %v1331_v1, %v1758_v3  ;;  %v1339_v6 = vpop.f32.mrb[34].mxu1  ;;  %v903_v7 = vpop.f32.mrb[35].mxu0 }
 0x13a   :  { %v973_v8 = vmax.f32 %v941_v61, 0.0  ;;  %v963_v9 = vmax.f32 %v901_v62, 0.0  ;;  %v944_v10 = vadd.f32 %v1339_v6, %v847_v14  ;;  %v904_v63 = vadd.f32 %v903_v7, %v1754_v49  ;;  %v935_v12 = vpop.f32.mrb[35].mxu1 }
 0x13b   :  { %v1166_v13 = vpack.c.bf16 %v965_v2, %v965_v2  ;;  %v971_v11 = vmax.f32 %v933_v4, 0.0  ;;  %v966_v15 = vmax.f32 %v912_v5, 0.0  ;;  %v936_v46 = vadd.f32 %v935_v12, %v1770_v58 }
 0x13c   :  { %v1174_v16 = vpack.c.bf16 %v973_v8, %v973_v8  ;;  %v1164_v18 = vpack.c.bf16 %v963_v9, %v963_v9  ;;  %v974_v19 = vmax.f32 %v944_v10, 0.0  ;;  %v964_v21 = vmax.f32 %v904_v63, 0.0 }
 0x13d   :  { %1046 = vst.msk [vmem:[%s1855_s3 + $0x8] sm:$0xf] %vm1043_vm1, %v1166_v13  ;;  %v1172_v3 = vpack.c.bf16 %v971_v11, %v971_v11  ;;  %v1167_v55 = vpack.c.bf16 %v966_v15, %v966_v15  ;;  %v972_v14 = vmax.f32 %v936_v46, 0.0 }
 0x13e   :  { %1054 = vst.msk [vmem:[%s1855_s3 + $0x28] sm:$0xf] %vm1043_vm1, %v1174_v16  ;;  %1044 = vst.msk [vmem:[%s1855_s3] sm:$0xf] %vm1043_vm1, %v1164_v18  ;;  %v1175_v49 = vpack.c.bf16 %v974_v19, %v974_v19  ;;  %v1165_v58 = vpack.c.bf16 %v964_v21, %v964_v21  ;;  %v1334_v22 = vpop.f32.mrb[36].mxu0 }
 0x13f   :  { %1052 = vst.msk [vmem:[%s1855_s3 + $0x20] sm:$0xf] %vm1043_vm1, %v1172_v3  ;;  %1047 = vst.msk [vmem:[%s1855_s3 + $0xc] sm:$0xf] %vm1043_vm1, %v1167_v55  ;;  %v1173_v23 = vpack.c.bf16 %v972_v14, %v972_v14  ;;  %v925_v24 = vadd.f32 %v1334_v22, %v1764_v35  ;;  %v1342_v25 = vpop.f32.mrb[36].mxu1  ;;  %v916_v26 = vpop.f32.mrb[37].mxu0 }
 0x140   :  { %1055 = vst.msk [vmem:[%s1855_s3 + $0x2c] sm:$0xf] %vm1043_vm1, %v1175_v49  ;;  %1045 = vst.msk [vmem:[%s1855_s3 + $0x4] sm:$0xf] %vm1043_vm1, %v1165_v58  ;;  %v957_v27 = vadd.f32 %v1342_v25, %v860_v53  ;;  %v917_v28 = vadd.f32 %v916_v26, %v1760_v17  ;;  %v948_v29 = vpop.f32.mrb[37].mxu1  ;;  %v1335_v30 = vpop.f32.mrb[38].mxu0 }
 0x141   :  { %1053 = vst.msk [vmem:[%s1855_s3 + $0x24] sm:$0xf] %vm1043_vm1, %v1173_v23  ;;  %v969_v35 = vmax.f32 %v925_v24, 0.0  ;;  %v949_v32 = vadd.f32 %v948_v29, %v1772_v31  ;;  %v928_v33 = vadd.f32 %v1335_v30, %v1766_v38  ;;  %v1343_v36 = vpop.f32.mrb[38].mxu1  ;;  %v919_v37 = vpop.f32.mrb[39].mxu0 }
 0x142   :  { %v977_v39 = vmax.f32 %v957_v27, 0.0  ;;  %v967_v40 = vmax.f32 %v917_v28, 0.0  ;;  %v960_v41 = vadd.f32 %v1343_v36, %v863_v56  ;;  %v920_v42 = vadd.f32 %v919_v37, %v1762_v20  ;;  %v951_v17 = vpop.f32.mrb[39].mxu1 }
 0x143   :  { %v1170_v43 = vpack.c.bf16 %v969_v35, %v969_v35  ;;  %v975_v44 = vmax.f32 %v949_v32, 0.0  ;;  %v970_v45 = vmax.f32 %v928_v33, 0.0  ;;  %v952_v47 = vadd.f32 %v951_v17, %v1774_v34 }
 0x144   :  { %v1178_v48 = vpack.c.bf16 %v977_v39, %v977_v39  ;;  %v1168_v50 = vpack.c.bf16 %v967_v40, %v967_v40  ;;  %v978_v51 = vmax.f32 %v960_v41, 0.0  ;;  %v968_v52 = vmax.f32 %v920_v42, 0.0 }
 0x145   :  { %1050 = vst.msk [vmem:[%s1855_s3 + $0x18] sm:$0xf] %vm1043_vm1, %v1170_v43  ;;  %v1176_v38 = vpack.c.bf16 %v975_v44, %v975_v44  ;;  %v1171_v31 = vpack.c.bf16 %v970_v45, %v970_v45  ;;  %v976_v53 = vmax.f32 %v952_v47, 0.0 }
 0x146   :  { %1058 = vst.msk [vmem:[%s1855_s3 + $0x38] sm:$0xf] %vm1043_vm1, %v1178_v48  ;;  %1048 = vst.msk [vmem:[%s1855_s3 + $0x10] sm:$0xf] %vm1043_vm1, %v1168_v50  ;;  %v1179_v20 = vpack.c.bf16 %v978_v51, %v978_v51  ;;  %v1169_v34 = vpack.c.bf16 %v968_v52, %v968_v52 }
 0x147   :  { %1056 = vst.msk [vmem:[%s1855_s3 + $0x30] sm:$0xf] %vm1043_vm1, %v1176_v38  ;;  %1051 = vst.msk [vmem:[%s1855_s3 + $0x1c] sm:$0xf] %vm1043_vm1, %v1171_v31  ;;  %v1177_v54 = vpack.c.bf16 %v976_v53, %v976_v53 }
 0x148   :  { %1059 = vst.msk [vmem:[%s1855_s3 + $0x3c] sm:$0xf] %vm1043_vm1, %v1179_v20  ;;  %1049 = vst.msk [vmem:[%s1855_s3 + $0x14] sm:$0xf] %vm1043_vm1, %v1169_v34 }
 0x149   :  { %1057 = vst.msk [vmem:[%s1855_s3 + $0x34] sm:$0xf] %vm1043_vm1, %v1177_v54 }

// kernel: unetpp_forward.60
= control target key start
LH: loop header
LB: loop body
LE: loop exit
PB: predicated region body
PF: predicated region fallthrough
CT: control target
= control target key end

     0   :  { %v2396_v1 = vmov 0   ;;  %vm1700_vm0 = vcmask 11264   ;;  %s3042_s1 = inlined_call_operand.vmem [shape: bf16[1152,2], index: 1, kind: input, shape index: {}]   ;;  %s3043_s0 = inlined_call_operand.vmem [shape: bf16[128,1152], index: 0, kind: input, shape index: {}]   ;;  %s3044_s2 = inlined_call_operand.vmem [shape: f32[128,1], index: 2, kind: input, shape index: {}]   ;;  %s3045_s3 = inlined_call_operand.vmem [shape: bf16[128,2], index: 3, kind: output, shape index: {}]  }
   0x1   :  { %v2220_v0 = vld [vmem:[%s3042_s1 + $0x40] sm:$0xff]   ;;  %2218 = vset.pattern.permute.xlu0 %v2396_v1  ;;  %2219 = vset.pattern.permute.xlu1 %v2396_v1  ;;  %v2224_v5 = vld [vmem:[%s3042_s1 + $0x48] sm:$0xff]   ;;  %v2228_v9 = vld [vmem:[%s3042_s1 + $0x50] sm:$0xff]  }
   0x2   :  { %v2221_v2 = vld [vmem:[%s3042_s1 + $0xc0] sm:$0xff]   ;;  %1897 = vmatprep.subr.bf16.mxu0 %v2220_v0  ;;  %v2225_v6 = vld [vmem:[%s3042_s1 + $0xc8] sm:$0xff]   ;;  %v2229_v10 = vld [vmem:[%s3042_s1 + $0xd0] sm:$0xff]  }
   0x3   :  { %v2222_v3 = vld [vmem:[%s3042_s1] sm:$0xff]   ;;  %1961 = vmatprep.subr.bf16.mxu1 %v2221_v2  ;;  %v2226_v7 = vld [vmem:[%s3042_s1 + $0x8] sm:$0xff]   ;;  %v2230_v11 = vld [vmem:[%s3042_s1 + $0x10] sm:$0xff]  }
   0x4   :  { %v2223_v4 = vld [vmem:[%s3042_s1 + $0x80] sm:$0xff]   ;;  %1898 = vmatpush3.bf16.msra.mxu0 %v2222_v3  ;;  %v2227_v8 = vld [vmem:[%s3042_s1 + $0x88] sm:$0xff]   ;;  %v2231_v12 = vld [vmem:[%s3042_s1 + $0x90] sm:$0xff]  }
   0x5   :  { %1962 = vmatpush3.bf16.msra.mxu1 %v2223_v4  ;;  %1899 = vmatprep.subr.bf16.mxu0 %v2224_v5  ;;  %v2232_v13 = vld [vmem:[%s3042_s1 + $0x58] sm:$0xff]   ;;  %v2236_v17 = vld [vmem:[%s3042_s1 + $0x60] sm:$0xff]   ;;  %v2240_v21 = vld [vmem:[%s3042_s1 + $0x68] sm:$0xff]  }
   0x6   :  { %1963 = vmatprep.subr.bf16.mxu1 %v2225_v6  ;;  %v2233_v14 = vld [vmem:[%s3042_s1 + $0xd8] sm:$0xff]   ;;  %v2237_v18 = vld [vmem:[%s3042_s1 + $0xe0] sm:$0xff]   ;;  %v2241_v22 = vld [vmem:[%s3042_s1 + $0xe8] sm:$0xff]  }
   0x7   :  { %v2234_v15 = vld [vmem:[%s3042_s1 + $0x18] sm:$0xff]   ;;  %v2238_v19 = vld [vmem:[%s3042_s1 + $0x20] sm:$0xff]   ;;  %v2242_v23 = vld [vmem:[%s3042_s1 + $0x28] sm:$0xff]  }
   0x8   :  { %1900 = vmatpush3.bf16.msra.mxu0 %v2226_v7  ;;  %v2235_v16 = vld [vmem:[%s3042_s1 + $0x98] sm:$0xff]   ;;  %v2239_v20 = vld [vmem:[%s3042_s1 + $0xa0] sm:$0xff]   ;;  %v2243_v24 = vld [vmem:[%s3042_s1 + $0xa8] sm:$0xff]  }
   0x9   :  { %1964 = vmatpush3.bf16.msra.mxu1 %v2227_v8  ;;  %1901 = vmatprep.subr.bf16.mxu0 %v2228_v9  ;;  %v2244_v25 = vld [vmem:[%s3042_s1 + $0x70] sm:$0xff]   ;;  %v2248_v29 = vld [vmem:[%s3042_s1 + $0x78] sm:$0xff]   ;;  %v2252_v33 = vld [vmem:[%s3043_s0] ss:$36 sps:$4 sm:$0xff]  }
   0xa   :  { %1965 = vmatprep.subr.bf16.mxu1 %v2229_v10  ;;  %v2245_v26 = vld [vmem:[%s3042_s1 + $0xf0] sm:$0xff]   ;;  %v2249_v30 = vld [vmem:[%s3042_s1 + $0xf8] sm:$0xff]   ;;  %v2254_v34 = vld [vmem:[%s3043_s0 + $0x4] ss:$36 sps:$4 sm:$0xff]  }
   0xb   :  { %v2246_v27 = vld [vmem:[%s3042_s1 + $0x30] sm:$0xff]   ;;  %v2250_v31 = vld [vmem:[%s3042_s1 + $0x38] sm:$0xff]   ;;  %v2255_v35 = vld [vmem:[%s3043_s0 + $0x8] ss:$36 sps:$4 sm:$0xff]   ;;  %1167 = vmatprep.mubr.bf16.mxu0 %v2254_v34 }
   0xc   :  { %1902 = vmatpush3.bf16.msra.mxu0 %v2230_v11  ;;  %v2247_v28 = vld [vmem:[%s3042_s1 + $0xb0] sm:$0xff]   ;;  %v2251_v32 = vld [vmem:[%s3042_s1 + $0xb8] sm:$0xff]   ;;  %v2258_v37 = vld [vmem:[%s3042_s1 + $0x140] sm:$0xff]  }
   0xd   :  { %1966 = vmatpush3.bf16.msra.mxu1 %v2231_v12  ;;  %1903 = vmatprep.subr.bf16.mxu0 %v2232_v13  ;;  %v2257_v36 = vld [vmem:[%s3043_s0 + $0xc] ss:$36 sps:$4 sm:$0xff]   ;;  %v2259_v38 = vld [vmem:[%s3042_s1 + $0x1c0] sm:$0xff]   ;;  %v2264_v42 = vld [vmem:[%s3043_s0 + $0x54] ss:$36 sps:$4 sm:$0xff]  }
   0xe   :  { %1967 = vmatprep.subr.bf16.mxu1 %v2233_v14  ;;  %1264 = vmatprep.mubr.bf16.mxu1 %v2257_v36  ;;  %v2260_v39 = vld [vmem:[%s3042_s1 + $0x100] sm:$0xff]   ;;  %v2262_v41 = vld [vmem:[%s3043_s0 + $0x4c] ss:$36 sps:$4 sm:$0xff]   ;;  %v2272_v49 = vld [vmem:[%s3043_s0 + $0x94] ss:$36 sps:$4 sm:$0xff]  }
   0xf   :  { %v2261_v40 = vld [vmem:[%s3042_s1 + $0x180] sm:$0xff]   ;;  %v2266_v43 = vld [vmem:[%s3043_s0 + $0x48] ss:$36 sps:$4 sm:$0xff]   ;;  %v2267_v44 = vld [vmem:[%s3043_s0 + $0x50] ss:$36 sps:$4 sm:$0xff]  }
  0x10   :  { %1904 = vmatpush3.bf16.msra.mxu0 %v2234_v15  ;;  %v2268_v45 = vld [vmem:[%s3042_s1 + $0x148] sm:$0xff]   ;;  %v2274_v50 = vld [vmem:[%s3043_s0 + $0x9c] ss:$36 sps:$4 sm:$0xff]   ;;  %v2276_v51 = vld [vmem:[%s3043_s0 + $0x90] ss:$36 sps:$4 sm:$0xff]  }
  0x11   :  { %1968 = vmatpush3.bf16.msra.mxu1 %v2235_v16  ;;  %1905 = vmatprep.subr.bf16.mxu0 %v2236_v17  ;;  %v2269_v46 = vld [vmem:[%s3042_s1 + $0x1c8] sm:$0xff]   ;;  %v2277_v52 = vld [vmem:[%s3043_s0 + $0x98] ss:$36 sps:$4 sm:$0xff]   ;;  %v2278_v53 = vld [vmem:[%s3042_s1 + $0x150] sm:$0xff]  }
  0x12   :  { %1969 = vmatprep.subr.bf16.mxu1 %v2237_v18  ;;  %v2270_v47 = vld [vmem:[%s3042_s1 + $0x108] sm:$0xff]   ;;  %v2279_v54 = vld [vmem:[%s3042_s1 + $0x1d0] sm:$0xff]   ;;  %v2282_v57 = vld [vmem:[%s3043_s0 + $0xdc] ss:$36 sps:$4 sm:$0xff]  }
  0x13   :  { %v2271_v48 = vld [vmem:[%s3042_s1 + $0x188] sm:$0xff]   ;;  %v2280_v55 = vld [vmem:[%s3042_s1 + $0x110] sm:$0xff]   ;;  %v2286_v59 = vld [vmem:[%s3043_s0 + $0xd8] ss:$36 sps:$4 sm:$0xff]  }
  0x14   :  { %1906 = vmatpush3.bf16.msra.mxu0 %v2238_v19  ;;  %v2281_v56 = vld [vmem:[%s3042_s1 + $0x190] sm:$0xff]   ;;  %v2284_v58 = vld [vmem:[%s3043_s0 + $0xe4] ss:$36 sps:$4 sm:$0xff]   ;;  %v2288_v61 = vld [vmem:[%s3042_s1 + $0x158] sm:$0xff]  }
  0x15   :  { %1970 = vmatpush3.bf16.msra.mxu1 %v2239_v20  ;;  %1907 = vmatprep.subr.bf16.mxu0 %v2240_v21  ;;  %v2287_v60 = vld [vmem:[%s3043_s0 + $0xe0] ss:$36 sps:$4 sm:$0xff]   ;;  %v2289_v62 = vld [vmem:[%s3042_s1 + $0x1d8] sm:$0xff]   ;;  %v2294_v2 = vld [vmem:[%s3043_s0 + $0x12c] ss:$36 sps:$4 sm:$0xff]  }
  0x16   :  { %1971 = vmatprep.subr.bf16.mxu1 %v2241_v22  ;;  %v2290_v63 = vld [vmem:[%s3042_s1 + $0x118] sm:$0xff]   ;;  %v2292_v1 = vld [vmem:[%s3043_s0 + $0x124] ss:$36 sps:$4 sm:$0xff]   ;;  %v2302_v9 = vld [vmem:[%s3043_s0 + $0x16c] ss:$36 sps:$4 sm:$0xff]  }
  0x17   :  { %v2291_v0 = vld [vmem:[%s3042_s1 + $0x198] sm:$0xff]   ;;  %v2296_v3 = vld [vmem:[%s3043_s0 + $0x120] ss:$36 sps:$4 sm:$0xff]   ;;  %v2297_v5 = vld [vmem:[%s3043_s0 + $0x128] ss:$36 sps:$4 sm:$0xff]  }
  0x18   :  { %1908 = vmatpush3.bf16.msra.mxu0 %v2242_v23  ;;  %v2298_v4 = vld [vmem:[%s3042_s1 + $0x160] sm:$0xff]   ;;  %v2304_v10 = vld [vmem:[%s3043_s0 + $0x174] ss:$36 sps:$4 sm:$0xff]   ;;  %v2308_v11 = vld [vmem:[%s3042_s1 + $0x168] sm:$0xff]  }
  0x19   :  { %1972 = vmatpush3.bf16.msra.mxu1 %v2243_v24  ;;  %1909 = vmatprep.subr.bf16.mxu0 %v2244_v25  ;;  %v2299_v6 = vld [vmem:[%s3042_s1 + $0x1e0] sm:$0xff]   ;;  %v2309_v12 = vld [vmem:[%s3042_s1 + $0x1e8] sm:$0xff]   ;;  %v2307_v16 = vld [vmem:[%s3043_s0 + $0x170] ss:$36 sps:$4 sm:$0xff]  }
  0x1a   :  { %1973 = vmatprep.subr.bf16.mxu1 %v2245_v26  ;;  %v2300_v7 = vld [vmem:[%s3042_s1 + $0x120] sm:$0xff]   ;;  %v2306_v13 = vld [vmem:[%s3043_s0 + $0x168] ss:$36 sps:$4 sm:$0xff]   ;;  %v2312_v17 = vld [vmem:[%s3043_s0 + $0x1b4] ss:$36 sps:$4 sm:$0xff]  }
  0x1b   :  { %v2301_v8 = vld [vmem:[%s3042_s1 + $0x1a0] sm:$0xff]   ;;  %v2310_v14 = vld [vmem:[%s3042_s1 + $0x128] sm:$0xff]   ;;  %v2318_v19 = vld [vmem:[%s3042_s1 + $0x170] sm:$0xff]  }
  0x1c   :  { %1910 = vmatpush3.bf16.msra.mxu0 %v2246_v27  ;;  %v2311_v15 = vld [vmem:[%s3042_s1 + $0x1a8] sm:$0xff]   ;;  %v2314_v18 = vld [vmem:[%s3043_s0 + $0x1bc] ss:$36 sps:$4 sm:$0xff]   ;;  %v2319_v20 = vld [vmem:[%s3042_s1 + $0x1f0] sm:$0xff]  }
  0x1d   :  { %1974 = vmatpush3.bf16.msra.mxu1 %v2247_v28  ;;  %1911 = vmatprep.subr.bf16.mxu0 %v2248_v29  ;;  %v2320_v21 = vld [vmem:[%s3042_s1 + $0x130] sm:$0xff]   ;;  %v2317_v24 = vld [vmem:[%s3043_s0 + $0x1b8] ss:$36 sps:$4 sm:$0xff]   ;;  %v2324_v26 = vld [vmem:[%s3043_s0 + $0x204] ss:$36 sps:$4 sm:$0xff]  }
  0x1e   :  { %1975 = vmatprep.subr.bf16.mxu1 %v2249_v30  ;;  %v2321_v22 = vld [vmem:[%s3042_s1 + $0x1b0] sm:$0xff]   ;;  %v2322_v25 = vld [vmem:[%s3043_s0 + $0x1fc] ss:$36 sps:$4 sm:$0xff]  }
  0x1f   :  { %v2316_v23 = vld [vmem:[%s3043_s0 + $0x1b0] ss:$36 sps:$4 sm:$0xff]   ;;  %v2328_v27 = vld [vmem:[%s3042_s1 + $0x178] sm:$0xff]  }
  0x20   :  { %1912 = vmatpush3.bf16.msra.mxu0 %v2250_v31  ;;  %v2329_v28 = vld [vmem:[%s3042_s1 + $0x1f8] sm:$0xff]   ;;  %v2332_v36 = vld [vmem:[%s3043_s0 + $0x10] ss:$36 sps:$4 sm:$0xff]  }
  0x21   :  { %1976 = vmatpush3.bf16.msra.mxu1 %v2251_v32  ;;  %2025 = vmatprep.subr.bf16.mxu0 %v2258_v37  ;;  %v2330_v29 = vld [vmem:[%s3042_s1 + $0x138] sm:$0xff]   ;;  %v2327_v32 = vld [vmem:[%s3043_s0 + $0x200] ss:$36 sps:$4 sm:$0xff]  }
  0x22   :  { %2089 = vmatprep.subr.bf16.mxu1 %v2259_v38  ;;  %v2331_v30 = vld [vmem:[%s3042_s1 + $0x1b8] sm:$0xff]   ;;  %v239_v37 = vld [vmem:[%s3044_s2] sm:$0xff] }
  0x23   :  { %1168 = vmatmul.mubr.bf16.vlgmr.msra.gmra.mrb[0].mxu0 %v2252_v33  ;;  %v2326_v31 = vld [vmem:[%s3043_s0 + $0x1f8] ss:$36 sps:$4 sm:$0xff]   ;;  %v2338_v33 = vld [vmem:[%s3042_s1 + $0x200] sm:$0xff]   ;;  %257 = vperm.xlu0 %2218, %v239_v37  }
  0x24   :  { %1265 = vmatmul.mubr.bf16.vlgmr.msra.gmra.mrb[0].mxu1 %v2255_v35  ;;  %2026 = vmatpush3.bf16.msra.mxu0 %v2260_v39  ;;  %v2334_v34 = vld [vmem:[%s3043_s0 + $0x14] ss:$36 sps:$4 sm:$0xff]   ;;  %v2337_v35 = vld [vmem:[%s3043_s0 + $0x1c] ss:$36 sps:$4 sm:$0xff]  }
  0x25   :  { %2090 = vmatpush3.bf16.msra.mxu1 %v2261_v40  ;;  %1175 = vmatprep.mubr.bf16.mxu0 %v2262_v41  ;;  %v2335_v38 = vld [vmem:[%s3043_s0 + $0x18] ss:$36 sps:$4 sm:$0xff]   ;;  %v2341_v40 = vld [vmem:[%s3043_s0 + $0x64] ss:$36 sps:$4 sm:$0xff]  }
  0x26   :  { %1272 = vmatprep.mubr.bf16.mxu1 %v2264_v42  ;;  %2027 = vmatprep.subr.bf16.mxu0 %v2268_v45  ;;  %v2339_v39 = vld [vmem:[%s3043_s0 + $0x5c] ss:$36 sps:$4 sm:$0xff]   ;;  %v2345_v41 = vld [vmem:[%s3042_s1 + $0x208] sm:$0xff]   ;;  %v2352_v42 = vld [vmem:[%s3042_s1 + $0x210] sm:$0xff]  }
  0x27   :  { %2091 = vmatprep.subr.bf16.mxu1 %v2269_v46  ;;  %v2343_v45 = vld [vmem:[%s3043_s0 + $0x58] ss:$36 sps:$4 sm:$0xff]   ;;  %v2344_v46 = vld [vmem:[%s3043_s0 + $0x60] ss:$36 sps:$4 sm:$0xff]  }
  0x28   :  { %2028 = vmatpush3.bf16.msra.mxu0 %v2270_v47  ;;  %v2346_v47 = vld [vmem:[%s3043_s0 + $0xa4] ss:$36 sps:$4 sm:$0xff]  }
  0x29   :  { %2092 = vmatpush3.bf16.msra.mxu1 %v2271_v48  ;;  %2029 = vmatprep.subr.bf16.mxu0 %v2278_v53  ;;  %v243_v48 = vld [vmem:[%s3044_s2 + $0x20] sm:$0xff] }
  0x2a   :  { %2093 = vmatprep.subr.bf16.mxu1 %v2279_v54  ;;  %v2366_v53 = vld [vmem:[%s3042_s1 + $0x220] sm:$0xff]  }
  0x2b   :  { %1176 = vmatmul.mubr.bf16.gmra.mrb[4].mxu0 %v2266_v43  ;;  %v240_v43 = vld [vmem:[%s3044_s2 + $0x8] sm:$0xff]  ;;  %v2350_v54 = vld [vmem:[%s3043_s0 + $0xa0] ss:$36 sps:$4 sm:$0xff]  }
  0x2c   :  { %1273 = vmatmul.mubr.bf16.gmra.mrb[4].mxu1 %v2267_v44  ;;  %1183 = vmatprep.mubr.bf16.mxu0 %v2272_v49  ;;  %v241_v44 = vld [vmem:[%s3044_s2 + $0x10] sm:$0xff] }
  0x2d   :  { %1280 = vmatprep.mubr.bf16.mxu1 %v2274_v50  ;;  %2030 = vmatpush3.bf16.msra.mxu0 %v2280_v55  ;;  %v2348_v49 = vld [vmem:[%s3043_s0 + $0xac] ss:$36 sps:$4 sm:$0xff]   ;;  %v2359_v50 = vld [vmem:[%s3042_s1 + $0x218] sm:$0xff]  }
  0x2e   :  { %2094 = vmatpush3.bf16.msra.mxu1 %v2281_v56  ;;  %2031 = vmatprep.subr.bf16.mxu0 %v2288_v61  ;;  %v2351_v55 = vld [vmem:[%s3043_s0 + $0xa8] ss:$36 sps:$4 sm:$0xff]   ;;  %v247_v61 = vld [vmem:[%s3044_s2 + $0x40] sm:$0xff] }
  0x2f   :  { %2095 = vmatprep.subr.bf16.mxu1 %v2289_v62  ;;  %262 = vperm.xlu0 %2218, %v240_v43   ;;  %v2353_v56 = vld [vmem:[%s3043_s0 + $0xec] ss:$36 sps:$4 sm:$0xff]  }
  0x30   :  { %267 = vperm.xlu1 %2219, %v241_v44   ;;  %v2380_v62 = vld [vmem:[%s3042_s1 + $0x230] sm:$0xff]  }
  0x31   :  { %2032 = vmatpush3.bf16.msra.mxu0 %v2290_v63  ;;  %v2358_v63 = vld [vmem:[%s3043_s0 + $0xf0] ss:$36 sps:$4 sm:$0xff]  }
  0x32   :  { %2096 = vmatpush3.bf16.msra.mxu1 %v2291_v0  ;;  %2033 = vmatprep.subr.bf16.mxu0 %v2298_v4  ;;  %v2360_v0 = vld [vmem:[%s3043_s0 + $0x134] ss:$36 sps:$4 sm:$0xff]  }
  0x33   :  { %1184 = vmatmul.mubr.bf16.gmra.mrb[8].mxu0 %v2276_v51  ;;  %2097 = vmatprep.subr.bf16.mxu1 %v2299_v6  ;;  %v242_v51 = vld [vmem:[%s3044_s2 + $0x18] sm:$0xff]  ;;  %v249_v4 = vld [vmem:[%s3044_s2 + $0x50] sm:$0xff] }
  0x34   :  { %1281 = vmatmul.mubr.bf16.gmra.mrb[8].mxu1 %v2277_v52  ;;  %1191 = vmatprep.mubr.bf16.mxu0 %v2282_v57  ;;  %v245_v52 = vld [vmem:[%s3044_s2 + $0x30] sm:$0xff] }
  0x35   :  { %1288 = vmatprep.mubr.bf16.mxu1 %v2284_v58  ;;  %2034 = vmatpush3.bf16.msra.mxu0 %v2300_v7  ;;  %v2355_v57 = vld [vmem:[%s3043_s0 + $0xf4] ss:$36 sps:$4 sm:$0xff]   ;;  %v2373_v58 = vld [vmem:[%s3042_s1 + $0x228] sm:$0xff]  }
  0x36   :  { %2098 = vmatpush3.bf16.msra.mxu1 %v2301_v8  ;;  %2035 = vmatprep.subr.bf16.mxu0 %v2308_v11  ;;  %v2364_v6 = vld [vmem:[%s3043_s0 + $0x130] ss:$36 sps:$4 sm:$0xff]   ;;  %v2365_v7 = vld [vmem:[%s3043_s0 + $0x138] ss:$36 sps:$4 sm:$0xff]   ;;  %v251_v11 = vld [vmem:[%s3044_s2 + $0x60] sm:$0xff] }
  0x37   :  { %2099 = vmatprep.subr.bf16.mxu1 %v2309_v12  ;;  %277 = vperm.xlu0 %2218, %v243_v48   ;;  %v2367_v8 = vld [vmem:[%s3043_s0 + $0x17c] ss:$36 sps:$4 sm:$0xff]   ;;  %v252_v12 = vld [vmem:[%s3044_s2 + $0x68] sm:$0xff] }
  0x38   :  { %272 = vperm.xlu1 %2219, %v242_v51  }
  0x39   :  { %2036 = vmatpush3.bf16.msra.mxu0 %v2310_v14  ;;  %v253_v14 = vld [vmem:[%s3044_s2 + $0x70] sm:$0xff] }
  0x3a   :  { %2100 = vmatpush3.bf16.msra.mxu1 %v2311_v15  ;;  %2037 = vmatprep.subr.bf16.mxu0 %v2318_v19  ;;  %v2372_v15 = vld [vmem:[%s3043_s0 + $0x180] ss:$36 sps:$4 sm:$0xff]  }
  0x3b   :  { %1192 = vmatmul.mubr.bf16.gmra.mrb[12].mxu0 %v2286_v59  ;;  %2101 = vmatprep.subr.bf16.mxu1 %v2319_v20  ;;  %v244_v59 = vld [vmem:[%s3044_s2 + $0x28] sm:$0xff]  ;;  %v2378_v19 = vld [vmem:[%s3043_s0 + $0x1c0] ss:$36 sps:$4 sm:$0xff]  }
  0x3c   :  { %1289 = vmatmul.mubr.bf16.gmra.mrb[12].mxu1 %v2287_v60  ;;  %1199 = vmatprep.mubr.bf16.mxu0 %v2292_v1  ;;  %v2357_v60 = vld [vmem:[%s3043_s0 + $0xe8] ss:$36 sps:$4 sm:$0xff]   ;;  %v2362_v1 = vld [vmem:[%s3043_s0 + $0x13c] ss:$36 sps:$4 sm:$0xff]  }
  0x3d   :  { %1296 = vmatprep.mubr.bf16.mxu1 %v2294_v2  ;;  %2038 = vmatpush3.bf16.msra.mxu0 %v2320_v21  ;;  %v246_v2 = vld [vmem:[%s3044_s2 + $0x38] sm:$0xff]  ;;  %v2379_v20 = vld [vmem:[%s3043_s0 + $0x1c8] ss:$36 sps:$4 sm:$0xff]  }
  0x3e   :  { %2102 = vmatpush3.bf16.msra.mxu1 %v2321_v22  ;;  %2039 = vmatprep.subr.bf16.mxu0 %v2328_v27  ;;  %v2381_v21 = vld [vmem:[%s3043_s0 + $0x20c] ss:$36 sps:$4 sm:$0xff]   ;;  %v2383_v22 = vld [vmem:[%s3043_s0 + $0x214] ss:$36 sps:$4 sm:$0xff]  }
  0x3f   :  { %2103 = vmatprep.subr.bf16.mxu1 %v2329_v28  ;;  %287 = vperm.xlu0 %2218, %v245_v52   ;;  %v2390_v27 = vld [vmem:[%s3043_s0 + $0x68] ss:$36 sps:$4 sm:$0xff]  }
  0x40   :  { %282 = vperm.xlu1 %2219, %v244_v59   ;;  %v2391_v28 = vld [vmem:[%s3043_s0 + $0x188] ss:$36 sps:$4 sm:$0xff]  }
  0x41   :  { %2040 = vmatpush3.bf16.msra.mxu0 %v2330_v29  ;;  %v2392_v29 = vld [vmem:[%s3043_s0 + $0xb0] ss:$36 sps:$4 sm:$0xff]  }
  0x42   :  { %2104 = vmatpush3.bf16.msra.mxu1 %v2331_v30  ;;  %2169 = vmatprep.subr.bf16.mxu0 %v2338_v33  ;;  %v2393_v30 = vld [vmem:[%s3043_s0 + $0x1d0] ss:$36 sps:$4 sm:$0xff]  }
  0x43   :  { %1200 = vmatmul.mubr.bf16.gmra.mrb[16].mxu0 %v2296_v3  ;;  %2201 = vmatprep.subr.bf16.mxu1 %v2338_v33  ;;  %v2387_v3 = vld [vmem:[%s3042_s1 + $0x238] sm:$0xff]  }
  0x44   :  { %1297 = vmatmul.mubr.bf16.gmra.mrb[16].mxu1 %v2297_v5  ;;  %1207 = vmatprep.mubr.bf16.mxu0 %v2302_v9  ;;  %v248_v5 = vld [vmem:[%s3044_s2 + $0x48] sm:$0xff] }
  0x45   :  { %1304 = vmatprep.mubr.bf16.mxu1 %v2304_v10  ;;  %297 = vperm.xlu0 %2218, %v247_v61   ;;  %v2369_v9 = vld [vmem:[%s3043_s0 + $0x184] ss:$36 sps:$4 sm:$0xff]   ;;  %v250_v10 = vld [vmem:[%s3044_s2 + $0x58] sm:$0xff] }
  0x46   :  { %292 = vperm.xlu1 %2219, %v246_v2  }
  0x49   :  { %307 = vperm.xlu0 %2218, %v249_v4  }
  0x4a   :  { %302 = vperm.xlu1 %2219, %v248_v5  }
  0x4b   :  { %1208 = vmatmul.mubr.bf16.gmra.mrb[20].mxu0 %v2306_v13  ;;  %v2371_v13 = vld [vmem:[%s3043_s0 + $0x178] ss:$36 sps:$4 sm:$0xff]  }
  0x4c   :  { %1305 = vmatmul.mubr.bf16.gmra.mrb[20].mxu1 %v2307_v16  ;;  %1215 = vmatprep.mubr.bf16.mxu0 %v2312_v17  ;;  %v2374_v16 = vld [vmem:[%s3043_s0 + $0x1c4] ss:$36 sps:$4 sm:$0xff]   ;;  %v2376_v17 = vld [vmem:[%s3043_s0 + $0x1cc] ss:$36 sps:$4 sm:$0xff]  }
  0x4d   :  { %1312 = vmatprep.mubr.bf16.mxu1 %v2314_v18  ;;  %317 = vperm.xlu0 %2218, %v251_v11   ;;  %v254_v18 = vld [vmem:[%s3044_s2 + $0x78] sm:$0xff] }
  0x4e   :  { %312 = vperm.xlu1 %2219, %v250_v10  }
  0x51   :  { %327 = vperm.xlu0 %2218, %v253_v14  }
  0x52   :  { %322 = vperm.xlu1 %2219, %v252_v12  }
  0x53   :  { %1216 = vmatmul.mubr.bf16.gmra.mrb[24].mxu0 %v2316_v23  ;;  %v2385_v23 = vld [vmem:[%s3043_s0 + $0x208] ss:$36 sps:$4 sm:$0xff]  }
  0x54   :  { %1313 = vmatmul.mubr.bf16.gmra.mrb[24].mxu1 %v2317_v24  ;;  %1223 = vmatprep.mubr.bf16.mxu0 %v2322_v25  ;;  %v2386_v24 = vld [vmem:[%s3043_s0 + $0x210] ss:$36 sps:$4 sm:$0xff]   ;;  %v2388_v25 = vld [vmem:[%s3043_s0 + $0x20] ss:$36 sps:$4 sm:$0xff]  }
  0x55   :  { %1320 = vmatprep.mubr.bf16.mxu1 %v2324_v26  ;;  %v2389_v26 = vld [vmem:[%s3043_s0 + $0x140] ss:$36 sps:$4 sm:$0xff]  }
  0x56   :  { %332 = vperm.xlu1 %2219, %v254_v18  }
  0x5b   :  { %1224 = vmatmul.mubr.bf16.gmra.mrb[28].mxu0 %v2326_v31  ;;  %v2394_v31 = vld [vmem:[%s3043_s0 + $0xf8] ss:$36 sps:$4 sm:$0xff]  }
  0x5c   :  { %1321 = vmatmul.mubr.bf16.gmra.mrb[28].mxu1 %v2327_v32  ;;  %1361 = vmatprep.mubr.bf16.mxu0 %v2334_v34  ;;  %v2395_v32 = vld [vmem:[%s3043_s0 + $0x218] ss:$36 sps:$4 sm:$0xff]  }
  0x5d   :  { %1458 = vmatprep.mubr.bf16.mxu1 %v2337_v35 }
  0x63   :  { %1362 = vmatmul.mubr.bf16.vlgmr.msra.gmra.mrb[32].mxu0 %v2332_v36 }
  0x64   :  { %1459 = vmatmul.mubr.bf16.vlgmr.msra.gmra.mrb[32].mxu1 %v2335_v38  ;;  %2170 = vmatpush3.bf16.msra.mxu0 %v2338_v33 }
  0x65   :  { %2209 = vmatpush3.bf16.msra.mxu1 %v2338_v33  ;;  %1369 = vmatprep.mubr.bf16.mxu0 %v2339_v39 }
  0x66   :  { %1466 = vmatprep.mubr.bf16.mxu1 %v2341_v40  ;;  %2171 = vmatprep.subr.bf16.mxu0 %v2345_v41 }
  0x67   :  { %2202 = vmatprep.subr.bf16.mxu1 %v2345_v41 }
  0x68   :  { %2172 = vmatpush3.bf16.msra.mxu0 %v2345_v41 }
  0x69   :  { %2210 = vmatpush3.bf16.msra.mxu1 %v2345_v41  ;;  %2173 = vmatprep.subr.bf16.mxu0 %v2352_v42 }
  0x6a   :  { %2203 = vmatprep.subr.bf16.mxu1 %v2352_v42 }
  0x6b   :  { %1370 = vmatmul.mubr.bf16.gmra.mrb[36].mxu0 %v2343_v45 }
  0x6c   :  { %1467 = vmatmul.mubr.bf16.gmra.mrb[36].mxu1 %v2344_v46  ;;  %1377 = vmatprep.mubr.bf16.mxu0 %v2346_v47 }
  0x6d   :  { %1474 = vmatprep.mubr.bf16.mxu1 %v2348_v49  ;;  %2174 = vmatpush3.bf16.msra.mxu0 %v2352_v42 }
  0x6e   :  { %2211 = vmatpush3.bf16.msra.mxu1 %v2352_v42  ;;  %2175 = vmatprep.subr.bf16.mxu0 %v2359_v50 }
  0x6f   :  { %2204 = vmatprep.subr.bf16.mxu1 %v2359_v50 }
  0x71   :  { %2176 = vmatpush3.bf16.msra.mxu0 %v2359_v50 }
  0x72   :  { %2212 = vmatpush3.bf16.msra.mxu1 %v2359_v50  ;;  %2177 = vmatprep.subr.bf16.mxu0 %v2366_v53 }
  0x73   :  { %1378 = vmatmul.mubr.bf16.gmra.mrb[40].mxu0 %v2350_v54  ;;  %2205 = vmatprep.subr.bf16.mxu1 %v2366_v53 }
  0x74   :  { %1475 = vmatmul.mubr.bf16.gmra.mrb[40].mxu1 %v2351_v55  ;;  %1385 = vmatprep.mubr.bf16.mxu0 %v2353_v56 }
  0x75   :  { %1482 = vmatprep.mubr.bf16.mxu1 %v2355_v57  ;;  %2178 = vmatpush3.bf16.msra.mxu0 %v2366_v53 }
  0x76   :  { %2213 = vmatpush3.bf16.msra.mxu1 %v2366_v53  ;;  %2179 = vmatprep.subr.bf16.mxu0 %v2373_v58 }
  0x77   :  { %2206 = vmatprep.subr.bf16.mxu1 %v2373_v58 }
  0x79   :  { %2180 = vmatpush3.bf16.msra.mxu0 %v2373_v58 }
  0x7a   :  { %2214 = vmatpush3.bf16.msra.mxu1 %v2373_v58  ;;  %2181 = vmatprep.subr.bf16.mxu0 %v2380_v62 }
  0x7b   :  { %1386 = vmatmul.mubr.bf16.gmra.mrb[44].mxu0 %v2357_v60  ;;  %2207 = vmatprep.subr.bf16.mxu1 %v2380_v62 }
  0x7c   :  { %1483 = vmatmul.mubr.bf16.gmra.mrb[44].mxu1 %v2358_v63  ;;  %1393 = vmatprep.mubr.bf16.mxu0 %v2360_v0 }
  0x7d   :  { %1490 = vmatprep.mubr.bf16.mxu1 %v2362_v1  ;;  %2182 = vmatpush3.bf16.msra.mxu0 %v2380_v62 }
  0x7e   :  { %2215 = vmatpush3.bf16.msra.mxu1 %v2380_v62  ;;  %2183 = vmatprep.subr.bf16.mxu0 %v2387_v3 }
  0x7f   :  { %2208 = vmatprep.subr.bf16.mxu1 %v2387_v3 }
  0x81   :  { %2184 = vmatpush3.bf16.msra.mxu0 %v2387_v3 }
  0x82   :  { %2216 = vmatpush3.bf16.msra.mxu1 %v2387_v3 }
  0x83   :  { %1394 = vmatmul.mubr.bf16.gmra.mrb[48].mxu0 %v2364_v6 }
  0x84   :  { %1491 = vmatmul.mubr.bf16.gmra.mrb[48].mxu1 %v2365_v7  ;;  %1401 = vmatprep.mubr.bf16.mxu0 %v2367_v8 }
  0x85   :  { %1498 = vmatprep.mubr.bf16.mxu1 %v2369_v9 }
  0x8b   :  { %1402 = vmatmul.mubr.bf16.gmra.mrb[52].mxu0 %v2371_v13 }
  0x8c   :  { %1499 = vmatmul.mubr.bf16.gmra.mrb[52].mxu1 %v2372_v15  ;;  %1409 = vmatprep.mubr.bf16.mxu0 %v2374_v16 }
  0x8d   :  { %1506 = vmatprep.mubr.bf16.mxu1 %v2376_v17 }
  0x93   :  { %1410 = vmatmul.mubr.bf16.gmra.mrb[56].mxu0 %v2378_v19 }
  0x94   :  { %1507 = vmatmul.mubr.bf16.gmra.mrb[56].mxu1 %v2379_v20  ;;  %1417 = vmatprep.mubr.bf16.mxu0 %v2381_v21 }
  0x95   :  { %1514 = vmatprep.mubr.bf16.mxu1 %v2383_v22 }
  0x9b   :  { %1418 = vmatmul.mubr.bf16.gmra.mrb[60].mxu0 %v2385_v23 }
  0x9c   :  { %1515 = vmatmul.mubr.bf16.gmra.mrb[60].mxu1 %v2386_v24  ;;  %2185 = vmatprep.mubr.bf16.mxu0 %v2388_v25 }
  0x9d   :  { %2193 = vmatprep.mubr.bf16.mxu1 %v2389_v26 }
  0xa2   :  { %v258_v33 = vpop.permute.xlu0 %257 }
  0xa3   :  { %2186 = vmatmul.mubr.bf16.vlgmr.msra.gmra.mrb[64].mxu0 %v2390_v27 }
  0xa4   :  { %2194 = vmatmul.mubr.bf16.vlgmr.msra.gmra.mrb[64].mxu1 %v2391_v28  ;;  %2189 = vmatprep.mubr.bf16.mxu0 %v2392_v29 }
  0xa5   :  { %2197 = vmatprep.mubr.bf16.mxu1 %v2393_v30 }
  0xab   :  { %2190 = vmatmul.mubr.bf16.gmra.mrb[68].mxu0 %v2394_v31 }
  0xac   :  { %2198 = vmatmul.mubr.bf16.gmra.mrb[68].mxu1 %v2395_v32 }
  0xae   :  { %v263_v34 = vpop.permute.xlu0 %262 }
  0xaf   :  { %v268_v36 = vpop.permute.xlu1 %267 }
  0xb6   :  { %v278_v4 = vpop.permute.xlu0 %277 }
  0xb7   :  { %v273_v53 = vpop.permute.xlu1 %272 }
  0xbe   :  { %v288_v22 = vpop.permute.xlu0 %287 }
  0xbf   :  { %v283_v7 = vpop.permute.xlu1 %282 }
  0xc5   :  { %v293_v25 = vpop.permute.xlu1 %292 }
  0xf6   :  { %v1913_v35 = vpop.f32.mrb[0].mxu0 }
  0xf7   :  { %v1977_v37 = vpop.f32.mrb[0].mxu1  ;;  %v1914_v38 = vpop.f32.mrb[1].mxu0 }
  0xf8   :  { %v1915_v39 = vadd.f32 %v1914_v38, %v1913_v35  ;;  %v1978_v40 = vpop.f32.mrb[1].mxu1  ;;  %v1916_v41 = vpop.f32.mrb[2].mxu0 }
  0xf9   :  { %v1979_v42 = vadd.f32 %v1978_v40, %v1977_v37  ;;  %v1980_v43 = vpop.f32.mrb[2].mxu1  ;;  %v1917_v44 = vpop.f32.mrb[3].mxu0 }
  0xfa   :  { %v1170_v45 = vadd.f32 %v1915_v39, %v258_v33  ;;  %v1918_v46 = vadd.f32 %v1917_v44, %v1916_v41  ;;  %v1981_v47 = vpop.f32.mrb[3].mxu1  ;;  %v298_v40 = vpop.permute.xlu0 %297 }
  0xfb   :  { %v1982_v48 = vadd.f32 %v1981_v47, %v1980_v43  ;;  %v303_v43 = vpop.permute.xlu1 %302 }
  0xfc   :  { %v2897_v49 = vadd.f32 %v1979_v42, %v1170_v45  ;;  %v1173_v50 = vadd.f32 %v1918_v46, %v263_v34 }
  0xfe   :  { %v2899_v51 = vadd.f32 %v1982_v48, %v1173_v50  ;;  %v1919_v52 = vpop.f32.mrb[4].mxu0 }
  0xff   :  { %v1983_v54 = vpop.f32.mrb[4].mxu1  ;;  %v1920_v55 = vpop.f32.mrb[5].mxu0 }
 0x100   :  { %v1921_v56 = vadd.f32 %v1920_v55, %v1919_v52  ;;  %v1984_v57 = vpop.f32.mrb[5].mxu1  ;;  %v1922_v58 = vpop.f32.mrb[6].mxu0 }
 0x101   :  { %v1985_v59 = vadd.f32 %v1984_v57, %v1983_v54  ;;  %v1986_v60 = vpop.f32.mrb[6].mxu1  ;;  %v1923_v61 = vpop.f32.mrb[7].mxu0 }
 0x102   :  { %v1178_v62 = vadd.f32 %v1921_v56, %v268_v36  ;;  %v1924_v63 = vadd.f32 %v1923_v61, %v1922_v58  ;;  %v1987_v0 = vpop.f32.mrb[7].mxu1 }
 0x103   :  { %v1988_v1 = vadd.f32 %v1987_v0, %v1986_v60  ;;  %v308_v60 = vpop.permute.xlu0 %307 }
 0x104   :  { %v2901_v2 = vadd.f32 %v1985_v59, %v1178_v62  ;;  %v1181_v3 = vadd.f32 %v1924_v63, %v273_v53  ;;  %v313_v63 = vpop.permute.xlu1 %312 }
 0x106   :  { %v2903_v5 = vadd.f32 %v1988_v1, %v1181_v3  ;;  %v1925_v6 = vpop.f32.mrb[8].mxu0 }
 0x107   :  { %v1989_v8 = vpop.f32.mrb[8].mxu1  ;;  %v1926_v9 = vpop.f32.mrb[9].mxu0 }
 0x108   :  { %v1927_v10 = vadd.f32 %v1926_v9, %v1925_v6  ;;  %v1990_v11 = vpop.f32.mrb[9].mxu1  ;;  %v1928_v12 = vpop.f32.mrb[10].mxu0 }
 0x109   :  { %v1991_v13 = vadd.f32 %v1990_v11, %v1989_v8  ;;  %v1992_v14 = vpop.f32.mrb[10].mxu1  ;;  %v1929_v15 = vpop.f32.mrb[11].mxu0 }
 0x10a   :  { %v1186_v16 = vadd.f32 %v1927_v10, %v278_v4  ;;  %v1930_v17 = vadd.f32 %v1929_v15, %v1928_v12  ;;  %v1993_v18 = vpop.f32.mrb[11].mxu1 }
 0x10b   :  { %v1994_v19 = vadd.f32 %v1993_v18, %v1992_v14 }
 0x10c   :  { %v2905_v20 = vadd.f32 %v1991_v13, %v1186_v16  ;;  %v1189_v21 = vadd.f32 %v1930_v17, %v283_v7  ;;  %v318_v16 = vpop.permute.xlu0 %317 }
 0x10e   :  { %v2907_v23 = vadd.f32 %v1994_v19, %v1189_v21  ;;  %v1931_v24 = vpop.f32.mrb[12].mxu0  ;;  %v323_v19 = vpop.permute.xlu1 %322 }
 0x10f   :  { %v1995_v26 = vpop.f32.mrb[12].mxu1  ;;  %v1932_v27 = vpop.f32.mrb[13].mxu0 }
 0x110   :  { %v1933_v28 = vadd.f32 %v1932_v27, %v1931_v24  ;;  %v1996_v29 = vpop.f32.mrb[13].mxu1  ;;  %v1934_v30 = vpop.f32.mrb[14].mxu0 }
 0x111   :  { %v1997_v31 = vadd.f32 %v1996_v29, %v1995_v26  ;;  %v1998_v32 = vpop.f32.mrb[14].mxu1  ;;  %v1935_v33 = vpop.f32.mrb[15].mxu0 }
 0x112   :  { %v1194_v34 = vadd.f32 %v1933_v28, %v288_v22  ;;  %v1936_v35 = vadd.f32 %v1935_v33, %v1934_v30  ;;  %v1999_v36 = vpop.f32.mrb[15].mxu1 }
 0x113   :  { %v2000_v37 = vadd.f32 %v1999_v36, %v1998_v32  ;;  %v328_v36 = vpop.permute.xlu0 %327 }
 0x114   :  { %v2909_v38 = vadd.f32 %v1997_v31, %v1194_v34  ;;  %v1197_v39 = vadd.f32 %v1936_v35, %v293_v25 }
 0x116   :  { %v2911_v41 = vadd.f32 %v2000_v37, %v1197_v39  ;;  %v1937_v42 = vpop.f32.mrb[16].mxu0 }
 0x117   :  { %v2001_v44 = vpop.f32.mrb[16].mxu1  ;;  %v1938_v45 = vpop.f32.mrb[17].mxu0 }
 0x118   :  { %v1939_v46 = vadd.f32 %v1938_v45, %v1937_v42  ;;  %v2002_v47 = vpop.f32.mrb[17].mxu1  ;;  %v1940_v48 = vpop.f32.mrb[18].mxu0 }
 0x119   :  { %v2003_v50 = vadd.f32 %v2002_v47, %v2001_v44  ;;  %v2004_v52 = vpop.f32.mrb[18].mxu1  ;;  %v1941_v53 = vpop.f32.mrb[19].mxu0 }
 0x11a   :  { %v1202_v54 = vadd.f32 %v1939_v46, %v298_v40  ;;  %v1942_v55 = vadd.f32 %v1941_v53, %v1940_v48  ;;  %v2005_v56 = vpop.f32.mrb[19].mxu1  ;;  %v333_v40 = vpop.permute.xlu1 %332 }
 0x11b   :  { %v2006_v57 = vadd.f32 %v2005_v56, %v2004_v52 }
 0x11c   :  { %v2913_v58 = vadd.f32 %v2003_v50, %v1202_v54  ;;  %v1205_v59 = vadd.f32 %v1942_v55, %v303_v43 }
 0x11e   :  { %v2915_v61 = vadd.f32 %v2006_v57, %v1205_v59  ;;  %v1943_v62 = vpop.f32.mrb[20].mxu0 }
 0x11f   :  { %v2007_v0 = vpop.f32.mrb[20].mxu1  ;;  %v1944_v1 = vpop.f32.mrb[21].mxu0 }
 0x120   :  { %v1945_v3 = vadd.f32 %v1944_v1, %v1943_v62  ;;  %v2008_v4 = vpop.f32.mrb[21].mxu1  ;;  %v1946_v6 = vpop.f32.mrb[22].mxu0 }
 0x121   :  { %v2009_v7 = vadd.f32 %v2008_v4, %v2007_v0  ;;  %v2010_v8 = vpop.f32.mrb[22].mxu1  ;;  %v1947_v9 = vpop.f32.mrb[23].mxu0 }
 0x122   :  { %v1210_v10 = vadd.f32 %v1945_v3, %v308_v60  ;;  %v1948_v11 = vadd.f32 %v1947_v9, %v1946_v6  ;;  %v2011_v12 = vpop.f32.mrb[23].mxu1 }
 0x123   :  { %v2012_v13 = vadd.f32 %v2011_v12, %v2010_v8 }
 0x124   :  { %v2917_v14 = vadd.f32 %v2009_v7, %v1210_v10  ;;  %v1213_v15 = vadd.f32 %v1948_v11, %v313_v63 }
 0x126   :  { %v2919_v17 = vadd.f32 %v2012_v13, %v1213_v15  ;;  %v1949_v18 = vpop.f32.mrb[24].mxu0 }
 0x127   :  { %v2013_v21 = vpop.f32.mrb[24].mxu1  ;;  %v1950_v22 = vpop.f32.mrb[25].mxu0 }
 0x128   :  { %v1951_v24 = vadd.f32 %v1950_v22, %v1949_v18  ;;  %v2014_v25 = vpop.f32.mrb[25].mxu1  ;;  %v1952_v26 = vpop.f32.mrb[26].mxu0 }
 0x129   :  { %v2015_v27 = vadd.f32 %v2014_v25, %v2013_v21  ;;  %v2016_v28 = vpop.f32.mrb[26].mxu1  ;;  %v1953_v29 = vpop.f32.mrb[27].mxu0 }
 0x12a   :  { %v1218_v30 = vadd.f32 %v1951_v24, %v318_v16  ;;  %v1954_v31 = vadd.f32 %v1953_v29, %v1952_v26  ;;  %v2017_v32 = vpop.f32.mrb[27].mxu1 }
 0x12b   :  { %v2018_v33 = vadd.f32 %v2017_v32, %v2016_v28 }
 0x12c   :  { %v2921_v34 = vadd.f32 %v2015_v27, %v1218_v30  ;;  %v1221_v35 = vadd.f32 %v1954_v31, %v323_v19 }
 0x12e   :  { %v2923_v37 = vadd.f32 %v2018_v33, %v1221_v35  ;;  %v1955_v39 = vpop.f32.mrb[28].mxu0 }
 0x12f   :  { %v2019_v42 = vpop.f32.mrb[28].mxu1  ;;  %v1956_v43 = vpop.f32.mrb[29].mxu0 }
 0x130   :  { %v1957_v44 = vadd.f32 %v1956_v43, %v1955_v39  ;;  %v2020_v45 = vpop.f32.mrb[29].mxu1  ;;  %v1958_v46 = vpop.f32.mrb[30].mxu0 }
 0x131   :  { %v2021_v47 = vadd.f32 %v2020_v45, %v2019_v42  ;;  %v2022_v48 = vpop.f32.mrb[30].mxu1  ;;  %v1959_v50 = vpop.f32.mrb[31].mxu0 }
 0x132   :  { %v1226_v52 = vadd.f32 %v1957_v44, %v328_v36  ;;  %v1960_v53 = vadd.f32 %v1959_v50, %v1958_v46  ;;  %v2023_v54 = vpop.f32.mrb[31].mxu1 }
 0x133   :  { %v2024_v55 = vadd.f32 %v2023_v54, %v2022_v48 }
 0x134   :  { %v2925_v56 = vadd.f32 %v2021_v47, %v1226_v52  ;;  %v1229_v57 = vadd.f32 %v1960_v53, %v333_v40 }
 0x136   :  { %v2927_v59 = vadd.f32 %v2024_v55, %v1229_v57  ;;  %v2041_v60 = vpop.f32.mrb[32].mxu0 }
 0x137   :  { %v2105_v62 = vpop.f32.mrb[32].mxu1  ;;  %v2042_v63 = vpop.f32.mrb[33].mxu0 }
 0x138   :  { %v2043_v0 = vadd.f32 %v2042_v63, %v2041_v60  ;;  %v2106_v1 = vpop.f32.mrb[33].mxu1  ;;  %v2044_v3 = vpop.f32.mrb[34].mxu0 }
 0x139   :  { %v2107_v4 = vadd.f32 %v2106_v1, %v2105_v62  ;;  %v2108_v6 = vpop.f32.mrb[34].mxu1  ;;  %v2045_v7 = vpop.f32.mrb[35].mxu0 }
 0x13a   :  { %v1364_v8 = vadd.f32 %v2043_v0, %v2897_v49  ;;  %v2046_v9 = vadd.f32 %v2045_v7, %v2044_v3  ;;  %v2109_v10 = vpop.f32.mrb[35].mxu1 }
 0x13b   :  { %v2110_v11 = vadd.f32 %v2109_v10, %v2108_v6 }
 0x13c   :  { %v1367_v12 = vadd.f32 %v2046_v9, %v2899_v51  ;;  %v2931_v13 = vadd.f32 %v2107_v4, %v1364_v8 }
 0x13e   :  { %v2047_v15 = vpop.f32.mrb[36].mxu0  ;;  %v2933_v16 = vadd.f32 %v2110_v11, %v1367_v12 }
 0x13f   :  { %v2111_v18 = vpop.f32.mrb[36].mxu1  ;;  %v2048_v19 = vpop.f32.mrb[37].mxu0 }
 0x140   :  { %v2049_v21 = vadd.f32 %v2048_v19, %v2047_v15  ;;  %v2112_v22 = vpop.f32.mrb[37].mxu1  ;;  %v2050_v24 = vpop.f32.mrb[38].mxu0 }
 0x141   :  { %v2113_v25 = vadd.f32 %v2112_v22, %v2111_v18  ;;  %v2114_v26 = vpop.f32.mrb[38].mxu1  ;;  %v2051_v27 = vpop.f32.mrb[39].mxu0 }
 0x142   :  { %v1372_v49 = vadd.f32 %v2049_v21, %v2901_v2  ;;  %v2052_v28 = vadd.f32 %v2051_v27, %v2050_v24  ;;  %v2115_v29 = vpop.f32.mrb[39].mxu1 }
 0x143   :  { %v2116_v30 = vadd.f32 %v2115_v29, %v2114_v26 }
 0x144   :  { %v1375_v51 = vadd.f32 %v2052_v28, %v2903_v5  ;;  %v2937_v31 = vadd.f32 %v2113_v25, %v1372_v49 }
 0x146   :  { %v2053_v32 = vpop.f32.mrb[40].mxu0  ;;  %v2939_v33 = vadd.f32 %v2116_v30, %v1375_v51 }
 0x147   :  { %v2117_v35 = vpop.f32.mrb[40].mxu1  ;;  %v2054_v36 = vpop.f32.mrb[41].mxu0 }
 0x148   :  { %v2055_v39 = vadd.f32 %v2054_v36, %v2053_v32  ;;  %v2118_v40 = vpop.f32.mrb[41].mxu1  ;;  %v2056_v42 = vpop.f32.mrb[42].mxu0 }
 0x149   :  { %v2119_v43 = vadd.f32 %v2118_v40, %v2117_v35  ;;  %v2120_v44 = vpop.f32.mrb[42].mxu1  ;;  %v2057_v45 = vpop.f32.mrb[43].mxu0 }
 0x14a   :  { %v1380_v2 = vadd.f32 %v2055_v39, %v2905_v20  ;;  %v2058_v46 = vadd.f32 %v2057_v45, %v2056_v42  ;;  %v2121_v47 = vpop.f32.mrb[43].mxu1 }
 0x14b   :  { %v2122_v48 = vadd.f32 %v2121_v47, %v2120_v44 }
 0x14c   :  { %v1383_v5 = vadd.f32 %v2058_v46, %v2907_v23  ;;  %v2943_v50 = vadd.f32 %v2119_v43, %v1380_v2 }
 0x14e   :  { %v2059_v52 = vpop.f32.mrb[44].mxu0  ;;  %v2945_v53 = vadd.f32 %v2122_v48, %v1383_v5 }
 0x14f   :  { %v2123_v54 = vpop.f32.mrb[44].mxu1  ;;  %v2060_v55 = vpop.f32.mrb[45].mxu0 }
 0x150   :  { %v2061_v57 = vadd.f32 %v2060_v55, %v2059_v52  ;;  %v2124_v60 = vpop.f32.mrb[45].mxu1  ;;  %v2062_v62 = vpop.f32.mrb[46].mxu0 }
 0x151   :  { %v2125_v63 = vadd.f32 %v2124_v60, %v2123_v54  ;;  %v2126_v0 = vpop.f32.mrb[46].mxu1  ;;  %v2063_v1 = vpop.f32.mrb[47].mxu0 }
 0x152   :  { %v1388_v20 = vadd.f32 %v2061_v57, %v2909_v38  ;;  %v2064_v3 = vadd.f32 %v2063_v1, %v2062_v62  ;;  %v2127_v4 = vpop.f32.mrb[47].mxu1 }
 0x153   :  { %v2128_v6 = vadd.f32 %v2127_v4, %v2126_v0 }
 0x154   :  { %v1391_v23 = vadd.f32 %v2064_v3, %v2911_v41  ;;  %v2949_v7 = vadd.f32 %v2125_v63, %v1388_v20 }
 0x156   :  { %v2065_v8 = vpop.f32.mrb[48].mxu0  ;;  %v2951_v9 = vadd.f32 %v2128_v6, %v1391_v23 }
 0x157   :  { %v2129_v10 = vpop.f32.mrb[48].mxu1  ;;  %v2066_v11 = vpop.f32.mrb[49].mxu0 }
 0x158   :  { %v2067_v12 = vadd.f32 %v2066_v11, %v2065_v8  ;;  %v2130_v15 = vpop.f32.mrb[49].mxu1  ;;  %v2068_v18 = vpop.f32.mrb[50].mxu0 }
 0x159   :  { %v2131_v19 = vadd.f32 %v2130_v15, %v2129_v10  ;;  %v2132_v21 = vpop.f32.mrb[50].mxu1  ;;  %v2069_v22 = vpop.f32.mrb[51].mxu0 }
 0x15a   :  { %v1396_v38 = vadd.f32 %v2067_v12, %v2913_v58  ;;  %v2070_v24 = vadd.f32 %v2069_v22, %v2068_v18  ;;  %v2133_v25 = vpop.f32.mrb[51].mxu1 }
 0x15b   :  { %v2134_v26 = vadd.f32 %v2133_v25, %v2132_v21 }
 0x15c   :  { %v1399_v41 = vadd.f32 %v2070_v24, %v2915_v61  ;;  %v1493_v27 = vadd.f32 %v2131_v19, %v1396_v38 }
 0x15e   :  { %v2071_v49 = vpop.f32.mrb[52].mxu0  ;;  %v2955_v28 = vadd.f32 %v2134_v26, %v1399_v41 }
 0x15f   :  { %v2135_v29 = vpop.f32.mrb[52].mxu1  ;;  %v2072_v30 = vpop.f32.mrb[53].mxu0 }
 0x160   :  { %v2073_v51 = vadd.f32 %v2072_v30, %v2071_v49  ;;  %v2136_v32 = vpop.f32.mrb[53].mxu1  ;;  %v2074_v35 = vpop.f32.mrb[54].mxu0 }
 0x161   :  { %v2137_v36 = vadd.f32 %v2136_v32, %v2135_v29  ;;  %v2138_v39 = vpop.f32.mrb[54].mxu1  ;;  %v2075_v40 = vpop.f32.mrb[55].mxu0 }
 0x162   :  { %v1404_v42 = vadd.f32 %v2073_v51, %v2917_v14  ;;  %v2076_v58 = vadd.f32 %v2075_v40, %v2074_v35  ;;  %v2139_v43 = vpop.f32.mrb[55].mxu1 }
 0x163   :  { %v2140_v44 = vadd.f32 %v2139_v43, %v2138_v39 }
 0x164   :  { %v1407_v45 = vadd.f32 %v2076_v58, %v2919_v17  ;;  %v1501_v61 = vadd.f32 %v2137_v36, %v1404_v42 }
 0x166   :  { %v2077_v2 = vpop.f32.mrb[56].mxu0  ;;  %v1504_v46 = vadd.f32 %v2140_v44, %v1407_v45 }
 0x167   :  { %v2141_v47 = vpop.f32.mrb[56].mxu1  ;;  %v2078_v48 = vpop.f32.mrb[57].mxu0 }
 0x168   :  { %v2079_v5 = vadd.f32 %v2078_v48, %v2077_v2  ;;  %v2142_v52 = vpop.f32.mrb[57].mxu1  ;;  %v2080_v54 = vpop.f32.mrb[58].mxu0 }
 0x169   :  { %v2143_v55 = vadd.f32 %v2142_v52, %v2141_v47  ;;  %v2144_v57 = vpop.f32.mrb[58].mxu1  ;;  %v2081_v60 = vpop.f32.mrb[59].mxu0 }
 0x16a   :  { %v1412_v62 = vadd.f32 %v2079_v5, %v2921_v34  ;;  %v2082_v63 = vadd.f32 %v2081_v60, %v2080_v54  ;;  %v2145_v14 = vpop.f32.mrb[59].mxu1 }
 0x16b   :  { %v2146_v0 = vadd.f32 %v2145_v14, %v2144_v57 }
 0x16c   :  { %v1415_v1 = vadd.f32 %v2082_v63, %v2923_v37  ;;  %v2961_v20 = vadd.f32 %v2143_v55, %v1412_v62 }
 0x16e   :  { %v2083_v17 = vpop.f32.mrb[60].mxu0  ;;  %v2963_v3 = vadd.f32 %v2146_v0, %v1415_v1 }
 0x16f   :  { %v2147_v4 = vpop.f32.mrb[60].mxu1  ;;  %v2084_v6 = vpop.f32.mrb[61].mxu0 }
 0x170   :  { %v2085_v23 = vadd.f32 %v2084_v6, %v2083_v17  ;;  %v2148_v8 = vpop.f32.mrb[61].mxu1  ;;  %v2086_v10 = vpop.f32.mrb[62].mxu0 }
 0x171   :  { %v2149_v11 = vadd.f32 %v2148_v8, %v2147_v4  ;;  %v2150_v12 = vpop.f32.mrb[62].mxu1  ;;  %v2087_v15 = vpop.f32.mrb[63].mxu0 }
 0x172   :  { %v1420_v34 = vadd.f32 %v2085_v23, %v2925_v56  ;;  %v2088_v18 = vadd.f32 %v2087_v15, %v2086_v10  ;;  %v2151_v19 = vpop.f32.mrb[63].mxu1 }
 0x173   :  { %v2152_v21 = vadd.f32 %v2151_v19, %v2150_v12 }
 0x174   :  { %v1423_v37 = vadd.f32 %v2088_v18, %v2927_v59  ;;  %v1517_v22 = vadd.f32 %v2149_v11, %v1420_v34 }
 0x176   :  { %v2187_v38 = vpop.f32.mrb[64].mxu0  ;;  %v1520_v24 = vadd.f32 %v2152_v21, %v1423_v37 }
 0x177   :  { %v1566_v25 = vadd.f32 %v2187_v38, %v2937_v31  ;;  %v2195_v26 = vpop.f32.mrb[64].mxu1  ;;  %v1557_v41 = vpop.f32.mrb[65].mxu0 }
 0x178   :  { %v1598_v49 = vadd.f32 %v2195_v26, %v1501_v61  ;;  %v1558_v29 = vadd.f32 %v1557_v41, %v2931_v13  ;;  %v1589_v30 = vpop.f32.mrb[65].mxu1  ;;  %v2188_v51 = vpop.f32.mrb[66].mxu0 }
 0x179   :  { %v1622_v32 = vmax.f32 %v1566_v25, 0.0  ;;  %v1590_v56 = vadd.f32 %v1589_v30, %v1493_v27  ;;  %v1569_v35 = vadd.f32 %v2188_v51, %v2939_v33  ;;  %v2196_v36 = vpop.f32.mrb[66].mxu1  ;;  %v1560_v39 = vpop.f32.mrb[67].mxu0 }
 0x17a   :  { %v1630_v59 = vmax.f32 %v1598_v49, 0.0  ;;  %v1620_v40 = vmax.f32 %v1558_v29, 0.0  ;;  %v1601_v42 = vadd.f32 %v2196_v36, %v1504_v46  ;;  %v1561_v58 = vadd.f32 %v1560_v39, %v2933_v16  ;;  %v1592_v31 = vpop.f32.mrb[67].mxu1 }
 0x17b   :  { %v1883_v43 = vpack.c.bf16 %v1622_v32, %v1622_v32  ;;  %v1628_v44 = vmax.f32 %v1590_v56, 0.0  ;;  %v1623_v45 = vmax.f32 %v1569_v35, 0.0  ;;  %v1593_v13 = vadd.f32 %v1592_v31, %v2955_v28 }
 0x17c   :  { %v1891_v61 = vpack.c.bf16 %v1630_v59, %v1630_v59  ;;  %v1881_v2 = vpack.c.bf16 %v1620_v40, %v1620_v40  ;;  %v1631_v47 = vmax.f32 %v1601_v42, 0.0  ;;  %v1621_v48 = vmax.f32 %v1561_v58, 0.0 }
 0x17d   :  { %1703 = vst.msk [vmem:[%s3045_s3 + $0x8] sm:$0xf] %vm1700_vm0, %v1883_v43  ;;  %v1889_v33 = vpack.c.bf16 %v1628_v44, %v1628_v44  ;;  %v1884_v27 = vpack.c.bf16 %v1623_v45, %v1623_v45  ;;  %v1629_v46 = vmax.f32 %v1593_v13, 0.0 }
 0x17e   :  { %1711 = vst.msk [vmem:[%s3045_s3 + $0x28] sm:$0xf] %vm1700_vm0, %v1891_v61  ;;  %1701 = vst.msk [vmem:[%s3045_s3] sm:$0xf] %vm1700_vm0, %v1881_v2  ;;  %v1892_v16 = vpack.c.bf16 %v1631_v47, %v1631_v47  ;;  %v1882_v28 = vpack.c.bf16 %v1621_v48, %v1621_v48  ;;  %v2191_v5 = vpop.f32.mrb[68].mxu0 }
 0x17f   :  { %1709 = vst.msk [vmem:[%s3045_s3 + $0x20] sm:$0xf] %vm1700_vm0, %v1889_v33  ;;  %1704 = vst.msk [vmem:[%s3045_s3 + $0xc] sm:$0xf] %vm1700_vm0, %v1884_v27  ;;  %v1890_v52 = vpack.c.bf16 %v1629_v46, %v1629_v46  ;;  %v1582_v54 = vadd.f32 %v2191_v5, %v2949_v7  ;;  %v2199_v55 = vpop.f32.mrb[68].mxu1  ;;  %v1573_v57 = vpop.f32.mrb[69].mxu0 }
 0x180   :  { %1712 = vst.msk [vmem:[%s3045_s3 + $0x2c] sm:$0xf] %vm1700_vm0, %v1892_v16  ;;  %1702 = vst.msk [vmem:[%s3045_s3 + $0x4] sm:$0xf] %vm1700_vm0, %v1882_v28  ;;  %v1614_v60 = vadd.f32 %v2199_v55, %v1517_v22  ;;  %v1574_v62 = vadd.f32 %v1573_v57, %v2943_v50  ;;  %v1605_v63 = vpop.f32.mrb[69].mxu1  ;;  %v2192_v14 = vpop.f32.mrb[70].mxu0 }
 0x181   :  { %1710 = vst.msk [vmem:[%s3045_s3 + $0x24] sm:$0xf] %vm1700_vm0, %v1890_v52  ;;  %v1626_v7 = vmax.f32 %v1582_v54, 0.0  ;;  %v1606_v0 = vadd.f32 %v1605_v63, %v2961_v20  ;;  %v1585_v1 = vadd.f32 %v2192_v14, %v2951_v9  ;;  %v2200_v17 = vpop.f32.mrb[70].mxu1  ;;  %v1576_v4 = vpop.f32.mrb[71].mxu0 }
 0x182   :  { %v1634_v6 = vmax.f32 %v1614_v60, 0.0  ;;  %v1624_v23 = vmax.f32 %v1574_v62, 0.0  ;;  %v1617_v8 = vadd.f32 %v2200_v17, %v1520_v24  ;;  %v1577_v10 = vadd.f32 %v1576_v4, %v2945_v53  ;;  %v1608_v50 = vpop.f32.mrb[71].mxu1 }
 0x183   :  { %v1887_v11 = vpack.c.bf16 %v1626_v7, %v1626_v7  ;;  %v1632_v12 = vmax.f32 %v1606_v0, 0.0  ;;  %v1627_v15 = vmax.f32 %v1585_v1, 0.0  ;;  %v1609_v34 = vadd.f32 %v1608_v50, %v2963_v3 }
 0x184   :  { %v1895_v18 = vpack.c.bf16 %v1634_v6, %v1634_v6  ;;  %v1885_v19 = vpack.c.bf16 %v1624_v23, %v1624_v23  ;;  %v1635_v21 = vmax.f32 %v1617_v8, 0.0  ;;  %v1625_v37 = vmax.f32 %v1577_v10, 0.0 }
 0x185   :  { %1707 = vst.msk [vmem:[%s3045_s3 + $0x18] sm:$0xf] %vm1700_vm0, %v1887_v11  ;;  %v1893_v9 = vpack.c.bf16 %v1632_v12, %v1632_v12  ;;  %v1888_v20 = vpack.c.bf16 %v1627_v15, %v1627_v15  ;;  %v1633_v22 = vmax.f32 %v1609_v34, 0.0 }
 0x186   :  { %1715 = vst.msk [vmem:[%s3045_s3 + $0x38] sm:$0xf] %vm1700_vm0, %v1895_v18  ;;  %1705 = vst.msk [vmem:[%s3045_s3 + $0x10] sm:$0xf] %vm1700_vm0, %v1885_v19  ;;  %v1896_v53 = vpack.c.bf16 %v1635_v21, %v1635_v21  ;;  %v1886_v3 = vpack.c.bf16 %v1625_v37, %v1625_v37 }
 0x187   :  { %1713 = vst.msk [vmem:[%s3045_s3 + $0x30] sm:$0xf] %vm1700_vm0, %v1893_v9  ;;  %1708 = vst.msk [vmem:[%s3045_s3 + $0x1c] sm:$0xf] %vm1700_vm0, %v1888_v20  ;;  %v1894_v38 = vpack.c.bf16 %v1633_v22, %v1633_v22 }
 0x188   :  { %1716 = vst.msk [vmem:[%s3045_s3 + $0x3c] sm:$0xf] %vm1700_vm0, %v1896_v53  ;;  %1706 = vst.msk [vmem:[%s3045_s3 + $0x14] sm:$0xf] %vm1700_vm0, %v1886_v3 }
 0x189   :  { %1714 = vst.msk [vmem:[%s3045_s3 + $0x34] sm:$0xf] %vm1700_vm0, %v1894_v38 }

// kernel: unetpp_forward.61
= control target key start
LH: loop header
LB: loop body
LE: loop exit
PB: predicated region body
PF: predicated region fallthrough
CT: control target
= control target key end

     0   :  { %v2399_v1 = vmov 0   ;;  %vm1259_vm0 = vcmask 523264   ;;  %vm1767_vm1 = vcmask 60416   ;;  %s3016_s1 = inlined_call_operand.vmem [shape: bf16[1728,8], index: 1, kind: input, shape index: {}]   ;;  %s3017_s0 = inlined_call_operand.vmem [shape: bf16[64,1728], index: 0, kind: input, shape index: {}]   ;;  %s3018_s2 = inlined_call_operand.vmem [shape: f32[64,1], index: 2, kind: input, shape index: {}]   ;;  %s3019_s3 = inlined_call_operand.vmem [shape: bf16[64,8], index: 3, kind: output, shape index: {}]  }
   0x1   :  { %v2207_v0 = vld [vmem:[%s3016_s1 + $0x40] sm:$0xff]   ;;  %2205 = vset.pattern.permute.xlu0 %v2399_v1  ;;  %2206 = vset.pattern.permute.xlu1 %v2399_v1  ;;  %v2209_v3 = vld [vmem:[%s3016_s1 + $0x48] sm:$0xff]   ;;  %v2211_v5 = vld [vmem:[%s3016_s1 + $0x50] sm:$0xff]  }
   0x2   :  { %v2208_v2 = vld [vmem:[%s3016_s1] sm:$0xff]   ;;  %1964 = vmatprep.subr.bf16.mxu1 %v2207_v0  ;;  %v2210_v4 = vld [vmem:[%s3016_s1 + $0x8] sm:$0xff]   ;;  %v2212_v6 = vld [vmem:[%s3016_s1 + $0x10] sm:$0xff]  }
   0x3   :  { %1965 = vmatpush3.bf16.msra.mxu1 %v2208_v2  ;;  %v2213_v7 = vld [vmem:[%s3016_s1 + $0x58] sm:$0xff]   ;;  %v2217_v9 = vld [vmem:[%s3016_s1 + $0x140] sm:$0xff]   ;;  %v2221_v13 = vld [vmem:[%s3016_s1 + $0x148] sm:$0xff]  }
   0x4   :  { %1966 = vmatprep.subr.bf16.mxu1 %v2209_v3  ;;  %v2214_v8 = vld [vmem:[%s3016_s1 + $0x18] sm:$0xff]   ;;  %v2215_v10 = vld [vmem:[%s3016_s1 + $0x60] sm:$0xff]   ;;  %2044 = vmatprep.subr.bf16.mxu0 %v2217_v9  ;;  %v2218_v14 = vld [vmem:[%s3016_s1 + $0x68] sm:$0xff]  }
   0x5   :  { %v2219_v11 = vld [vmem:[%s3016_s1 + $0x100] sm:$0xff]   ;;  %v2223_v15 = vld [vmem:[%s3016_s1 + $0x108] sm:$0xff]   ;;  %v2225_v17 = vld [vmem:[%s3016_s1 + $0x150] sm:$0xff]  }
   0x6   :  { %v2216_v12 = vld [vmem:[%s3016_s1 + $0x20] sm:$0xff]   ;;  %2045 = vmatpush3.bf16.msra.mxu0 %v2219_v11  ;;  %v2220_v16 = vld [vmem:[%s3016_s1 + $0x28] sm:$0xff]   ;;  %v2222_v18 = vld [vmem:[%s3016_s1 + $0x70] sm:$0xff]  }
   0x7   :  { %1967 = vmatpush3.bf16.msra.mxu1 %v2210_v4  ;;  %2046 = vmatprep.subr.bf16.mxu0 %v2221_v13  ;;  %v2227_v19 = vld [vmem:[%s3016_s1 + $0x110] sm:$0xff]   ;;  %v2226_v21 = vld [vmem:[%s3016_s1 + $0x78] sm:$0xff]   ;;  %v2233_v26 = vld [vmem:[%s3016_s1 + $0xc0] sm:$0xff]  }
   0x8   :  { %1968 = vmatprep.subr.bf16.mxu1 %v2211_v5  ;;  %v2224_v20 = vld [vmem:[%s3016_s1 + $0x30] sm:$0xff]   ;;  %v2231_v22 = vld [vmem:[%s3017_s0 + $0x4] ss:$56 sps:$4 sm:$0xff]   ;;  %v2229_v27 = vld [vmem:[%s3017_s0] ss:$56 sps:$4 sm:$0xff]  }
   0x9   :  { %v2232_v23 = vld [vmem:[%s3016_s1 + $0x158] sm:$0xff]   ;;  %1304 = vmatprep.mubr.bf16.mxu1 %v2231_v22  ;;  %v2236_v28 = vld [vmem:[%s3016_s1 + $0x160] sm:$0xff]   ;;  %v2237_v31 = vld [vmem:[%s3016_s1 + $0xc8] sm:$0xff]  }
   0xa   :  { %2047 = vmatpush3.bf16.msra.mxu0 %v2223_v15  ;;  %v2228_v24 = vld [vmem:[%s3016_s1 + $0x38] sm:$0xff]   ;;  %v2235_v29 = vld [vmem:[%s3016_s1 + $0x80] sm:$0xff]   ;;  %v2240_v32 = vld [vmem:[%s3017_s0 + $0x74] ss:$56 sps:$4 sm:$0xff]  }
   0xb   :  { %1969 = vmatpush3.bf16.msra.mxu1 %v2212_v6  ;;  %2048 = vmatprep.subr.bf16.mxu0 %v2225_v17  ;;  %v2234_v25 = vld [vmem:[%s3016_s1 + $0x118] sm:$0xff]   ;;  %v2238_v30 = vld [vmem:[%s3016_s1 + $0x120] sm:$0xff]   ;;  %v2242_v33 = vld [vmem:[%s3016_s1 + $0x168] sm:$0xff]  }
   0xc   :  { %1970 = vmatprep.subr.bf16.mxu1 %v2213_v7  ;;  %v2239_v34 = vld [vmem:[%s3016_s1 + $0x88] sm:$0xff]   ;;  %v2244_v37 = vld [vmem:[%s3016_s1 + $0xd0] sm:$0xff]   ;;  %v2248_v41 = vld [vmem:[%s3016_s1 + $0xd8] sm:$0xff]  }
   0xd   :  { %v2245_v35 = vld [vmem:[%s3016_s1 + $0x128] sm:$0xff]   ;;  %v2247_v38 = vld [vmem:[%s3016_s1 + $0x170] sm:$0xff]   ;;  %v2251_v42 = vld [vmem:[%s3017_s0 + $0xe4] ss:$56 sps:$4 sm:$0xff]  }
   0xe   :  { %2049 = vmatpush3.bf16.msra.mxu0 %v2227_v19  ;;  %v2243_v36 = vld [vmem:[%s3017_s0 + $0x70] ss:$56 sps:$4 sm:$0xff]   ;;  %v2250_v43 = vld [vmem:[%s3016_s1 + $0x98] sm:$0xff]   ;;  %v2255_v45 = vld [vmem:[%s3016_s1 + $0xe0] sm:$0xff]  }
   0xf   :  { %1971 = vmatpush3.bf16.msra.mxu1 %v2214_v8  ;;  %2050 = vmatprep.subr.bf16.mxu0 %v2232_v23  ;;  %v2246_v39 = vld [vmem:[%s3016_s1 + $0x90] sm:$0xff]   ;;  %v2253_v44 = vld [vmem:[%s3016_s1 + $0x178] sm:$0xff]   ;;  %v2257_v48 = vld [vmem:[%s3016_s1 + $0xa0] sm:$0xff]  }
  0x10   :  { %1972 = vmatprep.subr.bf16.mxu1 %v2215_v10  ;;  %v2249_v40 = vld [vmem:[%s3016_s1 + $0x130] sm:$0xff]   ;;  %v2254_v46 = vld [vmem:[%s3017_s0 + $0xe0] ss:$56 sps:$4 sm:$0xff]   ;;  %v2262_v52 = vld [vmem:[%s3016_s1 + $0xe8] sm:$0xff]  }
  0x11   :  { %v2256_v47 = vld [vmem:[%s3016_s1 + $0x138] sm:$0xff]   ;;  %v2258_v49 = vld [vmem:[%s3017_s0 + $0x10] ss:$56 sps:$4 sm:$0xff]   ;;  %v2260_v50 = vld [vmem:[%s3017_s0 + $0x14] ss:$56 sps:$4 sm:$0xff]  }
  0x12   :  { %2051 = vmatpush3.bf16.msra.mxu0 %v2234_v25  ;;  %v2261_v51 = vld [vmem:[%s3016_s1 + $0x240] sm:$0xff]   ;;  %1434 = vmatprep.mubr.bf16.mxu0 %v2260_v50  ;;  %v2264_v54 = vld [vmem:[%s3016_s1 + $0xa8] sm:$0xff]   ;;  %v2269_v58 = vld [vmem:[%s3016_s1 + $0xf0] sm:$0xff]  }
  0x13   :  { %1973 = vmatpush3.bf16.msra.mxu1 %v2216_v12  ;;  %2052 = vmatprep.subr.bf16.mxu0 %v2236_v28  ;;  %v2263_v53 = vld [vmem:[%s3016_s1 + $0x200] sm:$0xff]   ;;  %v2265_v55 = vld [vmem:[%s3017_s0 + $0x154] ss:$56 sps:$4 sm:$0xff]   ;;  %v2268_v57 = vld [vmem:[%s3017_s0 + $0x150] ss:$56 sps:$4 sm:$0xff]  }
  0x14   :  { %1974 = vmatprep.subr.bf16.mxu1 %v2218_v14  ;;  %v2267_v56 = vld [vmem:[%s3016_s1 + $0x248] sm:$0xff]   ;;  %v2271_v60 = vld [vmem:[%s3016_s1 + $0xb0] sm:$0xff]   ;;  %v2272_v61 = vld [vmem:[%s3017_s0 + $0x84] ss:$56 sps:$4 sm:$0xff]  }
  0x15   :  { %v2270_v59 = vld [vmem:[%s3016_s1 + $0x208] sm:$0xff]   ;;  %v2274_v62 = vld [vmem:[%s3016_s1 + $0x250] sm:$0xff]   ;;  %v2275_v63 = vld [vmem:[%s3016_s1 + $0xf8] sm:$0xff]  }
  0x16   :  { %2053 = vmatpush3.bf16.msra.mxu0 %v2238_v30  ;;  %v2276_v0 = vld [vmem:[%s3017_s0 + $0x80] ss:$56 sps:$4 sm:$0xff]   ;;  %v2277_v2 = vld [vmem:[%s3016_s1 + $0x210] sm:$0xff]   ;;  %v2281_v5 = vld [vmem:[%s3017_s0 + $0xc] ss:$56 sps:$4 sm:$0xff]  }
  0x17   :  { %1975 = vmatpush3.bf16.msra.mxu1 %v2220_v16  ;;  %2054 = vmatprep.subr.bf16.mxu0 %v2242_v33  ;;  %v2278_v3 = vld [vmem:[%s3016_s1 + $0xb8] sm:$0xff]   ;;  %v2279_v4 = vld [vmem:[%s3017_s0 + $0x8] ss:$56 sps:$4 sm:$0xff]   ;;  %v2286_v10 = vld [vmem:[%s3017_s0 + $0xf4] ss:$56 sps:$4 sm:$0xff]  }
  0x18   :  { %1976 = vmatprep.subr.bf16.mxu1 %v2222_v18  ;;  %v2282_v6 = vld [vmem:[%s3016_s1 + $0x258] sm:$0xff]   ;;  %v2283_v7 = vld [vmem:[%s3016_s1 + $0x1c0] sm:$0xff]   ;;  %v2289_v12 = vld [vmem:[%s3017_s0 + $0xf0] ss:$56 sps:$4 sm:$0xff]  }
  0x19   :  { %v2284_v8 = vld [vmem:[%s3016_s1 + $0x218] sm:$0xff]   ;;  %v2285_v9 = vld [vmem:[%s3016_s1 + $0x180] sm:$0xff]   ;;  %v2290_v13 = vld [vmem:[%s3016_s1 + $0x1c8] sm:$0xff]  }
  0x1a   :  { %2055 = vmatpush3.bf16.msra.mxu0 %v2245_v35  ;;  %v2288_v11 = vld [vmem:[%s3016_s1 + $0x260] sm:$0xff]   ;;  %v2292_v15 = vld [vmem:[%s3016_s1 + $0x188] sm:$0xff]   ;;  %v2293_v16 = vld [vmem:[%s3017_s0 + $0x7c] ss:$56 sps:$4 sm:$0xff]  }
  0x1b   :  { %1977 = vmatpush3.bf16.msra.mxu1 %v2224_v20  ;;  %2056 = vmatprep.subr.bf16.mxu0 %v2247_v38  ;;  %v2291_v14 = vld [vmem:[%s3016_s1 + $0x220] sm:$0xff]   ;;  %v2295_v17 = vld [vmem:[%s3016_s1 + $0x268] sm:$0xff]   ;;  %v2296_v18 = vld [vmem:[%s3017_s0 + $0x78] ss:$56 sps:$4 sm:$0xff]  }
  0x1c   :  { %1978 = vmatprep.subr.bf16.mxu1 %v2226_v21  ;;  %v2297_v19 = vld [vmem:[%s3016_s1 + $0x1d0] sm:$0xff]   ;;  %v2298_v20 = vld [vmem:[%s3016_s1 + $0x228] sm:$0xff]   ;;  %v2300_v22 = vld [vmem:[%s3017_s0 + $0x164] ss:$56 sps:$4 sm:$0xff]  }
  0x1d   :  { %v2299_v21 = vld [vmem:[%s3016_s1 + $0x190] sm:$0xff]   ;;  %v2304_v25 = vld [vmem:[%s3016_s1 + $0x1d8] sm:$0xff]   ;;  %v2307_v28 = vld [vmem:[%s3017_s0 + $0xec] ss:$56 sps:$4 sm:$0xff]  }
  0x1e   :  { %2057 = vmatpush3.bf16.msra.mxu0 %v2249_v40  ;;  %v2302_v23 = vld [vmem:[%s3016_s1 + $0x270] sm:$0xff]   ;;  %v2310_v30 = vld [vmem:[%s3017_s0 + $0xe8] ss:$56 sps:$4 sm:$0xff]   ;;  %v2316_v35 = vld [vmem:[%s3017_s0 + $0x24] ss:$56 sps:$4 sm:$0xff]  }
  0x1f   :  { %1979 = vmatpush3.bf16.msra.mxu1 %v2228_v24  ;;  %2058 = vmatprep.subr.bf16.mxu0 %v2253_v44  ;;  %v2303_v24 = vld [vmem:[%s3017_s0 + $0x160] ss:$56 sps:$4 sm:$0xff]   ;;  %v2319_v38 = vld [vmem:[%s3016_s1 + $0x1a8] sm:$0xff]  }
  0x20   :  { %2004 = vmatprep.subr.bf16.mxu1 %v2233_v26  ;;  %v2305_v26 = vld [vmem:[%s3016_s1 + $0x230] sm:$0xff]   ;;  %v2313_v33 = vld [vmem:[%s3016_s1 + $0x1a0] sm:$0xff]   ;;  %v2326_v44 = vld [vmem:[%s3016_s1 + $0x1f8] sm:$0xff]  }
  0x21   :  { %v2322_v40 = vld [vmem:[%s3017_s0 + $0x158] ss:$56 sps:$4 sm:$0xff]  }
  0x22   :  { %1305 = vmatmul.mubr.bf16.vlgmr.msra.gmra.mrb[0].mxu1 %v2229_v27  ;;  %2059 = vmatpush3.bf16.msra.mxu0 %v2256_v47  ;;  %v2306_v27 = vld [vmem:[%s3016_s1 + $0x198] sm:$0xff]  }
  0x23   :  { %2005 = vmatpush3.bf16.msra.mxu1 %v2235_v29  ;;  %1312 = vmatprep.mubr.bf16.mxu1 %v2240_v32  ;;  %v2309_v29 = vld [vmem:[%s3016_s1 + $0x278] sm:$0xff]  }
  0x24   :  { %2006 = vmatprep.subr.bf16.mxu1 %v2237_v31  ;;  %2124 = vmatprep.subr.bf16.mxu0 %v2261_v51  ;;  %v2311_v31 = vld [vmem:[%s3016_s1 + $0x1e0] sm:$0xff]   ;;  %v2312_v32 = vld [vmem:[%s3016_s1 + $0x238] sm:$0xff]  }
  0x25   :  { %1435 = vmatmul.mubr.bf16.vlgmr.msra.gmra.mrb[0].mxu0 %v2258_v49  ;;  %v2329_v47 = vld [vmem:[%s3017_s0 + $0x18] ss:$56 sps:$4 sm:$0xff]   ;;  %v2332_v49 = vld [vmem:[%s3016_s1 + $0x2c0] sm:$0xff]  }
  0x26   :  { %2125 = vmatpush3.bf16.msra.mxu0 %v2263_v53  ;;  %1442 = vmatprep.mubr.bf16.mxu0 %v2272_v61  ;;  %v2333_v50 = vld [vmem:[%s3016_s1 + $0x318] sm:$0xff]   ;;  %v2334_v51 = vld [vmem:[%s3016_s1 + $0x280] sm:$0xff]   ;;  %v2346_v61 = vld [vmem:[%s3017_s0 + $0x90] ss:$56 sps:$4 sm:$0xff]  }
  0x27   :  { %2007 = vmatpush3.bf16.msra.mxu1 %v2239_v34  ;;  %2126 = vmatprep.subr.bf16.mxu0 %v2267_v56  ;;  %v2314_v34 = vld [vmem:[%s3017_s0 + $0x20] ss:$56 sps:$4 sm:$0xff]  }
  0x28   :  { %2008 = vmatprep.subr.bf16.mxu1 %v2244_v37  ;;  %v2318_v37 = vld [vmem:[%s3016_s1 + $0x300] sm:$0xff]  }
  0x29   :  { %v2336_v53 = vld [vmem:[%s3016_s1 + $0x320] sm:$0xff]  }
  0x2a   :  { %1313 = vmatmul.mubr.bf16.gmra.mrb[4].mxu1 %v2243_v36  ;;  %2127 = vmatpush3.bf16.msra.mxu0 %v2270_v59  ;;  %v2317_v36 = vld [vmem:[%s3016_s1 + $0x1e8] sm:$0xff]  }
  0x2b   :  { %2009 = vmatpush3.bf16.msra.mxu1 %v2246_v39  ;;  %1320 = vmatprep.mubr.bf16.mxu1 %v2251_v42  ;;  %v2320_v39 = vld [vmem:[%s3017_s0 + $0x15c] ss:$56 sps:$4 sm:$0xff]   ;;  %v2324_v42 = vld [vmem:[%s3016_s1 + $0x308] sm:$0xff]  }
  0x2c   :  { %2010 = vmatprep.subr.bf16.mxu1 %v2248_v41  ;;  %2128 = vmatprep.subr.bf16.mxu0 %v2274_v62  ;;  %v2323_v41 = vld [vmem:[%s3016_s1 + $0x1f0] sm:$0xff]   ;;  %v2340_v56 = vld [vmem:[%s3017_s0 + $0x88] ss:$56 sps:$4 sm:$0xff]   ;;  %v2347_v62 = vld [vmem:[%s3016_s1 + $0x2d8] sm:$0xff]  }
  0x2d   :  { %1443 = vmatmul.mubr.bf16.gmra.mrb[4].mxu0 %v2276_v0  ;;  %v2343_v59 = vld [vmem:[%s3017_s0 + $0x94] ss:$56 sps:$4 sm:$0xff]   ;;  %v2349_v0 = vld [vmem:[%s3016_s1 + $0x298] sm:$0xff]  }
  0x2e   :  { %2129 = vmatpush3.bf16.msra.mxu0 %v2277_v2  ;;  %1450 = vmatprep.mubr.bf16.mxu0 %v2286_v10  ;;  %v2350_v2 = vld [vmem:[%s3017_s0 + $0xfc] ss:$56 sps:$4 sm:$0xff]   ;;  %v2360_v10 = vld [vmem:[%s3016_s1 + $0x340] sm:$0xff]  }
  0x2f   :  { %2011 = vmatpush3.bf16.msra.mxu1 %v2250_v43  ;;  %2130 = vmatprep.subr.bf16.mxu0 %v2282_v6  ;;  %v2325_v43 = vld [vmem:[%s3016_s1 + $0x1b0] sm:$0xff]   ;;  %v2355_v6 = vld [vmem:[%s3017_s0 + $0x104] ss:$56 sps:$4 sm:$0xff]  }
  0x30   :  { %2012 = vmatprep.subr.bf16.mxu1 %v2255_v45  ;;  %v2327_v45 = vld [vmem:[%s3016_s1 + $0x310] sm:$0xff]  }
  0x32   :  { %1321 = vmatmul.mubr.bf16.gmra.mrb[8].mxu1 %v2254_v46  ;;  %2131 = vmatpush3.bf16.msra.mxu0 %v2284_v8  ;;  %v2328_v46 = vld [vmem:[%s3016_s1 + $0x1b8] sm:$0xff]  }
  0x33   :  { %2013 = vmatpush3.bf16.msra.mxu1 %v2257_v48  ;;  %1328 = vmatprep.mubr.bf16.mxu1 %v2265_v55  ;;  %v2331_v48 = vld [vmem:[%s3017_s0 + $0x1c] ss:$56 sps:$4 sm:$0xff]   ;;  %v2338_v55 = vld [vmem:[%s3017_s0 + $0x8c] ss:$56 sps:$4 sm:$0xff]   ;;  %v2358_v8 = vld [vmem:[%s3017_s0 + $0x100] ss:$56 sps:$4 sm:$0xff]  }
  0x34   :  { %2014 = vmatprep.subr.bf16.mxu1 %v2262_v52  ;;  %2132 = vmatprep.subr.bf16.mxu0 %v2288_v11  ;;  %v2335_v52 = vld [vmem:[%s3016_s1 + $0x2c8] sm:$0xff]   ;;  %v287_v11 = vld [vmem:[%s3018_s2] sm:$0xff] }
  0x35   :  { %1451 = vmatmul.mubr.bf16.gmra.mrb[8].mxu0 %v2289_v12  ;;  %297 = vperm.xlu0 %2205, %v287_v11   ;;  %v2361_v12 = vld [vmem:[%s3016_s1 + $0x2a8] sm:$0xff]  }
  0x36   :  { %2133 = vmatpush3.bf16.msra.mxu0 %v2291_v14  ;;  %1458 = vmatprep.mubr.bf16.mxu0 %v2300_v22  ;;  %v2364_v14 = vld [vmem:[%s3017_s0 + $0x168] ss:$56 sps:$4 sm:$0xff]   ;;  %v2372_v22 = vld [vmem:[%s3016_s1 + $0x350] sm:$0xff]  }
  0x37   :  { %2015 = vmatpush3.bf16.msra.mxu1 %v2264_v54  ;;  %2134 = vmatprep.subr.bf16.mxu0 %v2295_v17  ;;  %v2337_v54 = vld [vmem:[%s3016_s1 + $0x288] sm:$0xff]  }
  0x38   :  { %2016 = vmatprep.subr.bf16.mxu1 %v2269_v58  ;;  %v2342_v58 = vld [vmem:[%s3016_s1 + $0x328] sm:$0xff]  }
  0x39   :  { %v288_v17 = vld [vmem:[%s3018_s2 + $0x8] sm:$0xff] }
  0x3a   :  { %1329 = vmatmul.mubr.bf16.gmra.mrb[12].mxu1 %v2268_v57  ;;  %2135 = vmatpush3.bf16.msra.mxu0 %v2298_v20  ;;  %v2341_v57 = vld [vmem:[%s3016_s1 + $0x2d0] sm:$0xff]  }
  0x3b   :  { %2017 = vmatpush3.bf16.msra.mxu1 %v2271_v60  ;;  %1369 = vmatprep.mubr.bf16.mxu1 %v2281_v5  ;;  %v2345_v60 = vld [vmem:[%s3016_s1 + $0x290] sm:$0xff]   ;;  %v2354_v5 = vld [vmem:[%s3016_s1 + $0x338] sm:$0xff]  }
  0x3c   :  { %2018 = vmatprep.subr.bf16.mxu1 %v2275_v63  ;;  %2136 = vmatprep.subr.bf16.mxu0 %v2302_v23  ;;  %v2348_v63 = vld [vmem:[%s3016_s1 + $0x330] sm:$0xff]  }
  0x3d   :  { %1459 = vmatmul.mubr.bf16.gmra.mrb[12].mxu0 %v2303_v24  ;;  %302 = vperm.xlu0 %2205, %v288_v17   ;;  %v2370_v20 = vld [vmem:[%s3017_s0 + $0x170] ss:$56 sps:$4 sm:$0xff]   ;;  %v2373_v24 = vld [vmem:[%s3016_s1 + $0x2b8] sm:$0xff]  }
  0x3e   :  { %2137 = vmatpush3.bf16.msra.mxu0 %v2305_v26  ;;  %1564 = vmatprep.mubr.bf16.mxu0 %v2316_v35  ;;  %v289_v23 = vld [vmem:[%s3018_s2 + $0x10] sm:$0xff]  ;;  %v2376_v26 = vld [vmem:[%s3017_s0 + $0x2c] ss:$56 sps:$4 sm:$0xff]  }
  0x3f   :  { %2019 = vmatpush3.bf16.msra.mxu1 %v2278_v3  ;;  %2138 = vmatprep.subr.bf16.mxu0 %v2309_v29  ;;  %v2352_v3 = vld [vmem:[%s3017_s0 + $0xf8] ss:$56 sps:$4 sm:$0xff]  }
  0x40   :  { %2084 = vmatprep.subr.bf16.mxu1 %v2283_v7  ;;  %v2357_v7 = vld [vmem:[%s3016_s1 + $0x2a0] sm:$0xff]   ;;  %307 = vperm.xlu1 %2206, %v289_v23   ;;  %v2378_v29 = vld [vmem:[%s3017_s0 + $0x30] ss:$56 sps:$4 sm:$0xff]  }
  0x41   :  { %v2383_v35 = vld [vmem:[%s3017_s0 + $0x98] ss:$56 sps:$4 sm:$0xff]  }
  0x42   :  { %1370 = vmatmul.mubr.bf16.vlgmr.msra.gmra.mrb[16].mxu1 %v2279_v4  ;;  %2139 = vmatpush3.bf16.msra.mxu0 %v2312_v32  ;;  %v2353_v4 = vld [vmem:[%s3016_s1 + $0x2e0] sm:$0xff]   ;;  %v292_v32 = vld [vmem:[%s3018_s2 + $0x28] sm:$0xff] }
  0x43   :  { %2085 = vmatpush3.bf16.msra.mxu1 %v2285_v9  ;;  %1377 = vmatprep.mubr.bf16.mxu1 %v2293_v16  ;;  %v2359_v9 = vld [vmem:[%s3016_s1 + $0x2e8] sm:$0xff]  }
  0x44   :  { %2086 = vmatprep.subr.bf16.mxu1 %v2290_v13  ;;  %1662 = vmatprep.subr.bf16.mxu0 %v2399_v1  ;;  %v2362_v13 = vld [vmem:[%s3017_s0 + $0x16c] ss:$56 sps:$4 sm:$0xff]  }
  0x45   :  { %1565 = vmatmul.mubr.bf16.vlgmr.msra.gmra.mrb[16].mxu0 %v2314_v34  ;;  %v2366_v16 = vld [vmem:[%s3016_s1 + $0x348] sm:$0xff]   ;;  %v293_v34 = vld [vmem:[%s3018_s2 + $0x30] sm:$0xff] }
  0x46   :  { %1663 = vmatpush1.bf16.msra.mxu0 %v2318_v37  ;;  %1572 = vmatprep.mubr.bf16.mxu0 %v2343_v59  ;;  %v2387_v37 = vld [vmem:[%s3017_s0 + $0x10c] ss:$56 sps:$4 sm:$0xff]  }
  0x47   :  { %2087 = vmatpush3.bf16.msra.mxu1 %v2292_v15  ;;  %1664 = vmatprep.subr.bf16.mxu0 %v2399_v1  ;;  %v2365_v15 = vld [vmem:[%s3016_s1 + $0x2f0] sm:$0xff]  }
  0x48   :  { %2088 = vmatprep.subr.bf16.mxu1 %v2297_v19  ;;  %v2369_v19 = vld [vmem:[%s3016_s1 + $0x2b0] sm:$0xff]  }
  0x4a   :  { %1378 = vmatmul.mubr.bf16.gmra.mrb[20].mxu1 %v2296_v18  ;;  %1665 = vmatpush1.bf16.msra.mxu0 %v2324_v42  ;;  %v2367_v18 = vld [vmem:[%s3017_s0 + $0x174] ss:$56 sps:$4 sm:$0xff]   ;;  %v2392_v42 = vld [vmem:[%s3017_s0 + $0x110] ss:$56 sps:$4 sm:$0xff]  }
  0x4b   :  { %2089 = vmatpush3.bf16.msra.mxu1 %v2299_v21  ;;  %1385 = vmatprep.mubr.bf16.mxu1 %v2307_v28  ;;  %v2371_v21 = vld [vmem:[%s3016_s1 + $0x2f8] sm:$0xff]  }
  0x4c   :  { %2090 = vmatprep.subr.bf16.mxu1 %v2304_v25  ;;  %1666 = vmatprep.subr.bf16.mxu0 %v2399_v1  ;;  %v2374_v25 = vld [vmem:[%s3017_s0 + $0x28] ss:$56 sps:$4 sm:$0xff]   ;;  %v290_v28 = vld [vmem:[%s3018_s2 + $0x18] sm:$0xff] }
  0x4d   :  { %1573 = vmatmul.mubr.bf16.gmra.mrb[20].mxu0 %v2346_v61  ;;  %312 = vperm.xlu1 %2206, %v290_v28  }
  0x4e   :  { %1667 = vmatpush1.bf16.msra.mxu0 %v2327_v45  ;;  %1580 = vmatprep.mubr.bf16.mxu0 %v2355_v6  ;;  %v2398_v45 = vld [vmem:[%s3017_s0 + $0x180] ss:$56 sps:$4 sm:$0xff]  }
  0x4f   :  { %2091 = vmatpush3.bf16.msra.mxu1 %v2306_v27  ;;  %1668 = vmatprep.subr.bf16.mxu0 %v2399_v1  ;;  %v2377_v27 = vld [vmem:[%s3016_s1 + $0x358] sm:$0xff]  }
  0x50   :  { %2092 = vmatprep.subr.bf16.mxu1 %v2311_v31  ;;  %v2381_v31 = vld [vmem:[%s3017_s0 + $0x9c] ss:$56 sps:$4 sm:$0xff]  }
  0x51   :  { %322 = vperm.xlu1 %2206, %v292_v32  }
  0x52   :  { %1386 = vmatmul.mubr.bf16.gmra.mrb[24].mxu1 %v2310_v30  ;;  %1669 = vmatpush1.bf16.msra.mxu0 %v2333_v50  ;;  %v2380_v30 = vld [vmem:[%s3017_s0 + $0x34] ss:$56 sps:$4 sm:$0xff]  }
  0x53   :  { %2093 = vmatpush3.bf16.msra.mxu1 %v2313_v33  ;;  %1393 = vmatprep.mubr.bf16.mxu1 %v2320_v39  ;;  %v2384_v33 = vld [vmem:[%s3017_s0 + $0xa4] ss:$56 sps:$4 sm:$0xff]   ;;  %v2390_v39 = vld [vmem:[%s3017_s0 + $0x114] ss:$56 sps:$4 sm:$0xff]  }
  0x54   :  { %2094 = vmatprep.subr.bf16.mxu1 %v2317_v36  ;;  %1670 = vmatprep.subr.bf16.mxu0 %v2399_v1  ;;  %v294_v36 = vld [vmem:[%s3018_s2 + $0x38] sm:$0xff] }
  0x55   :  { %1581 = vmatmul.mubr.bf16.gmra.mrb[24].mxu0 %v2358_v8  ;;  %332 = vperm.xlu1 %2206, %v294_v36  }
  0x56   :  { %1671 = vmatpush1.bf16.msra.mxu0 %v2336_v53  ;;  %1588 = vmatprep.mubr.bf16.mxu0 %v2367_v18 }
  0x57   :  { %2095 = vmatpush3.bf16.msra.mxu1 %v2319_v38  ;;  %1672 = vmatprep.subr.bf16.mxu0 %v2399_v1  ;;  %v2386_v38 = vld [vmem:[%s3017_s0 + $0xa0] ss:$56 sps:$4 sm:$0xff]  }
  0x58   :  { %2096 = vmatprep.subr.bf16.mxu1 %v2323_v41  ;;  %v2393_v41 = vld [vmem:[%s3017_s0 + $0x17c] ss:$56 sps:$4 sm:$0xff]  }
  0x5a   :  { %1394 = vmatmul.mubr.bf16.gmra.mrb[28].mxu1 %v2322_v40  ;;  %1673 = vmatpush1.bf16.msra.mxu0 %v2342_v58  ;;  %v2389_v40 = vld [vmem:[%s3017_s0 + $0x108] ss:$56 sps:$4 sm:$0xff]  }
  0x5b   :  { %2097 = vmatpush3.bf16.msra.mxu1 %v2325_v43  ;;  %1499 = vmatprep.mubr.bf16.mxu1 %v2331_v48  ;;  %v2396_v43 = vld [vmem:[%s3017_s0 + $0x184] ss:$56 sps:$4 sm:$0xff]  }
  0x5c   :  { %2098 = vmatprep.subr.bf16.mxu1 %v2326_v44  ;;  %1674 = vmatprep.subr.bf16.mxu0 %v2399_v1  ;;  %v2395_v44 = vld [vmem:[%s3017_s0 + $0x178] ss:$56 sps:$4 sm:$0xff]  }
  0x5d   :  { %1589 = vmatmul.mubr.bf16.gmra.mrb[28].mxu0 %v2370_v20 }
  0x5e   :  { %1675 = vmatpush1.bf16.msra.mxu0 %v2348_v63  ;;  %1944 = vmatprep.mubr.msk.bf16.mxu0 %vm1259_vm0, %v2380_v30 }
  0x5f   :  { %2099 = vmatpush3.bf16.msra.mxu1 %v2328_v46  ;;  %1676 = vmatprep.subr.bf16.mxu0 %v2399_v1 }
  0x60   :  { %2164 = vmatprep.subr.bf16.mxu1 %v2332_v49 }
  0x62   :  { %1500 = vmatmul.mubr.bf16.vlgmr.msra.gmra.mrb[32].mxu1 %v2329_v47  ;;  %1677 = vmatpush1.bf16.msra.mxu0 %v2354_v5 }
  0x63   :  { %2165 = vmatpush3.bf16.msra.mxu1 %v2334_v51  ;;  %1507 = vmatprep.mubr.bf16.mxu1 %v2338_v55 }
  0x64   :  { %2166 = vmatprep.subr.bf16.mxu1 %v2335_v52  ;;  %1678 = vmatprep.subr.bf16.mxu0 %v2399_v1 }
  0x66   :  { %1679 = vmatpush1.bf16.msra.mxu0 %v2360_v10 }
  0x67   :  { %2167 = vmatpush3.bf16.msra.mxu1 %v2337_v54  ;;  %1680 = vmatprep.subr.bf16.mxu0 %v2399_v1 }
  0x68   :  { %2168 = vmatprep.subr.bf16.mxu1 %v2341_v57 }
  0x6a   :  { %1508 = vmatmul.mubr.bf16.gmra.mrb[36].mxu1 %v2340_v56  ;;  %1681 = vmatpush1.bf16.msra.mxu0 %v2366_v16 }
  0x6b   :  { %2169 = vmatpush3.bf16.msra.mxu1 %v2345_v60  ;;  %1515 = vmatprep.mubr.bf16.mxu1 %v2350_v2 }
  0x6c   :  { %2170 = vmatprep.subr.bf16.mxu1 %v2347_v62  ;;  %1682 = vmatprep.subr.bf16.mxu0 %v2399_v1 }
  0x6e   :  { %1683 = vmatpush1.bf16.msra.mxu0 %v2372_v22 }
  0x6f   :  { %2171 = vmatpush3.bf16.msra.mxu1 %v2349_v0  ;;  %1684 = vmatprep.subr.bf16.mxu0 %v2399_v1  ;;  %v291_v1 = vld [vmem:[%s3018_s2 + $0x20] sm:$0xff] }
  0x70   :  { %2172 = vmatprep.subr.bf16.mxu1 %v2353_v4  ;;  %317 = vperm.xlu0 %2205, %v291_v1  }
  0x72   :  { %1516 = vmatmul.mubr.bf16.gmra.mrb[40].mxu1 %v2352_v3  ;;  %1685 = vmatpush1.bf16.msra.mxu0 %v2377_v27 }
  0x73   :  { %2173 = vmatpush3.bf16.msra.mxu1 %v2357_v7  ;;  %1523 = vmatprep.mubr.bf16.mxu1 %v2362_v13 }
  0x74   :  { %2174 = vmatprep.subr.bf16.mxu1 %v2359_v9  ;;  %327 = vperm.xlu0 %2205, %v293_v34  }
  0x75   :  { %1695 = vmatmul.mubr.bf16.vlgmr.msra.gmra.mrb[32].mxu0 %v2378_v29 }
  0x76   :  { %1945 = vmatprep.mubr.msk.bf16.mxu0 %vm1259_vm0, %v2384_v33 }
  0x77   :  { %2175 = vmatpush3.bf16.msra.mxu1 %v2361_v12 }
  0x78   :  { %2176 = vmatprep.subr.bf16.mxu1 %v2365_v15 }
  0x7a   :  { %1524 = vmatmul.mubr.bf16.gmra.mrb[44].mxu1 %v2364_v14 }
  0x7b   :  { %2177 = vmatpush3.bf16.msra.mxu1 %v2369_v19  ;;  %1629 = vmatprep.mubr.bf16.mxu1 %v2376_v26 }
  0x7c   :  { %2178 = vmatprep.subr.bf16.mxu1 %v2371_v21 }
  0x7d   :  { %1703 = vmatmul.mubr.bf16.gmra.mrb[36].mxu0 %v2386_v38 }
  0x7e   :  { %1946 = vmatprep.mubr.msk.bf16.mxu0 %vm1259_vm0, %v2390_v39 }
  0x7f   :  { %2179 = vmatpush3.bf16.msra.mxu1 %v2373_v24 }
  0x82   :  { %1630 = vmatmul.mubr.bf16.vlgmr.msra.gmra.mrb[48].mxu1 %v2374_v25 }
  0x83   :  { %1637 = vmatprep.mubr.bf16.mxu1 %v2381_v31 }
  0x85   :  { %1711 = vmatmul.mubr.bf16.gmra.mrb[40].mxu0 %v2392_v42 }
  0x86   :  { %1947 = vmatprep.mubr.msk.bf16.mxu0 %vm1259_vm0, %v2396_v43 }
  0x8a   :  { %1638 = vmatmul.mubr.bf16.gmra.mrb[52].mxu1 %v2383_v35 }
  0x8b   :  { %1645 = vmatprep.mubr.bf16.mxu1 %v2387_v37 }
  0x8d   :  { %1719 = vmatmul.mubr.bf16.gmra.mrb[44].mxu0 %v2398_v45 }
  0x92   :  { %1646 = vmatmul.mubr.bf16.gmra.mrb[56].mxu1 %v2389_v40 }
  0x93   :  { %1653 = vmatprep.mubr.bf16.mxu1 %v2393_v41 }
  0x9a   :  { %1654 = vmatmul.mubr.bf16.gmra.mrb[60].mxu1 %v2395_v44 }
  0xb4   :  { %v298_v9 = vpop.permute.xlu0 %297 }
  0xbc   :  { %v303_v21 = vpop.permute.xlu0 %302 }
  0xbf   :  { %v308_v30 = vpop.permute.xlu1 %307 }
  0xcc   :  { %v313_v40 = vpop.permute.xlu1 %312 }
  0xf5   :  { %v1980_v46 = vpop.f32.mrb[0].mxu1 }
  0xf6   :  { %v1981_v47 = vpop.f32.mrb[1].mxu1 }
  0xf7   :  { %v1982_v48 = vadd.f32 %v1981_v47, %v1980_v46  ;;  %v1983_v49 = vpop.f32.mrb[2].mxu1 }
  0xf8   :  { %v1984_v50 = vpop.f32.mrb[3].mxu1  ;;  %v2060_v60 = vpop.f32.mrb[0].mxu0 }
  0xf9   :  { %v1985_v51 = vadd.f32 %v1984_v50, %v1983_v49  ;;  %v2061_v63 = vpop.f32.mrb[1].mxu0  ;;  %v1307_v23 = vadd.f32 %v1982_v48, %v298_v9 }
  0xfa   :  { %v2062_v2 = vadd.f32 %v2061_v63, %v2060_v60  ;;  %v2063_v3 = vpop.f32.mrb[2].mxu0  ;;  %v323_v63 = vpop.permute.xlu1 %322 }
  0xfb   :  { %v2064_v5 = vpop.f32.mrb[3].mxu0  ;;  %v1310_v27 = vadd.f32 %v1985_v51, %v303_v21 }
  0xfc   :  { %v2065_v6 = vadd.f32 %v2064_v5, %v2063_v3 }
  0xfd   :  { %v1986_v52 = vpop.f32.mrb[4].mxu1 }
  0xfe   :  { %v1987_v53 = vpop.f32.mrb[5].mxu1  ;;  %v333_v21 = vpop.permute.xlu1 %332 }
  0xff   :  { %v1988_v54 = vadd.f32 %v1987_v53, %v1986_v52  ;;  %v1989_v55 = vpop.f32.mrb[6].mxu1 }
 0x100   :  { %v1990_v56 = vpop.f32.mrb[7].mxu1  ;;  %v2066_v13 = vpop.f32.mrb[4].mxu0 }
 0x101   :  { %v1991_v57 = vadd.f32 %v1990_v56, %v1989_v55  ;;  %v2067_v15 = vpop.f32.mrb[5].mxu0  ;;  %v1315_v42 = vadd.f32 %v1988_v54, %v308_v30 }
 0x102   :  { %v2068_v16 = vadd.f32 %v2067_v15, %v2066_v13  ;;  %v2069_v17 = vpop.f32.mrb[6].mxu0 }
 0x103   :  { %v2070_v18 = vpop.f32.mrb[7].mxu0  ;;  %v1318_v46 = vadd.f32 %v1991_v57, %v313_v40 }
 0x104   :  { %v2071_v19 = vadd.f32 %v2070_v18, %v2069_v17 }
 0x105   :  { %v1992_v58 = vpop.f32.mrb[8].mxu1 }
 0x106   :  { %v1993_v59 = vpop.f32.mrb[9].mxu1 }
 0x107   :  { %v2954_v61 = vadd.f32 %v1993_v59, %v1992_v58  ;;  %v1995_v62 = vpop.f32.mrb[10].mxu1  ;;  %v318_v59 = vpop.permute.xlu0 %317 }
 0x108   :  { %v1996_v0 = vpop.f32.mrb[11].mxu1  ;;  %v2072_v1 = vpop.f32.mrb[8].mxu0 }
 0x109   :  { %v2956_v4 = vadd.f32 %v1996_v0, %v1995_v62  ;;  %v2073_v32 = vpop.f32.mrb[9].mxu0  ;;  %v1323_v54 = vadd.f32 %v2954_v61, %v318_v59 }
 0x10a   :  { %v2074_v34 = vadd.f32 %v2073_v32, %v2072_v1  ;;  %v2075_v35 = vpop.f32.mrb[10].mxu0 }
 0x10b   :  { %v2076_v36 = vpop.f32.mrb[11].mxu0  ;;  %v1326_v5 = vadd.f32 %v2956_v4, %v323_v63 }
 0x10c   :  { %v2077_v38 = vadd.f32 %v2076_v36, %v2075_v35 }
 0x10d   :  { %v1998_v7 = vpop.f32.mrb[12].mxu1 }
 0x10e   :  { %v1999_v8 = vpop.f32.mrb[13].mxu1 }
 0x10f   :  { %v2958_v10 = vadd.f32 %v1999_v8, %v1998_v7  ;;  %v2001_v11 = vpop.f32.mrb[14].mxu1 }
 0x110   :  { %v2002_v12 = vpop.f32.mrb[15].mxu1  ;;  %v2078_v50 = vpop.f32.mrb[12].mxu0 }
 0x111   :  { %v2960_v14 = vadd.f32 %v2002_v12, %v2001_v11  ;;  %v2079_v52 = vpop.f32.mrb[13].mxu0 }
 0x112   :  { %v2080_v53 = vadd.f32 %v2079_v52, %v2078_v50  ;;  %v2081_v55 = vpop.f32.mrb[14].mxu0 }
 0x113   :  { %v2082_v58 = vpop.f32.mrb[15].mxu0 }
 0x114   :  { %v2083_v60 = vadd.f32 %v2082_v58, %v2081_v55 }
 0x115   :  { %v2020_v20 = vpop.f32.mrb[16].mxu1 }
 0x116   :  { %v2021_v22 = vpop.f32.mrb[17].mxu1 }
 0x117   :  { %v2022_v24 = vadd.f32 %v2021_v22, %v2020_v20  ;;  %v2023_v25 = vpop.f32.mrb[18].mxu1 }
 0x118   :  { %v2024_v26 = vpop.f32.mrb[19].mxu1  ;;  %v2140_v8 = vpop.f32.mrb[16].mxu0 }
 0x119   :  { %v1372_v28 = vadd.f32 %v2022_v24, %v1307_v23  ;;  %v2025_v29 = vadd.f32 %v2024_v26, %v2023_v25  ;;  %v2141_v11 = vpop.f32.mrb[17].mxu0  ;;  %v1334_v25 = vadd.f32 %v2960_v14, %v333_v21 }
 0x11a   :  { %v2142_v13 = vadd.f32 %v2141_v11, %v2140_v8  ;;  %v2143_v15 = vpop.f32.mrb[18].mxu0 }
 0x11b   :  { %v1375_v31 = vadd.f32 %v2025_v29, %v1310_v27  ;;  %v2962_v33 = vadd.f32 %v2062_v2, %v1372_v28  ;;  %v2144_v17 = vpop.f32.mrb[19].mxu0 }
 0x11d   :  { %v1440_v37 = vadd.f32 %v2065_v6, %v1375_v31  ;;  %v2026_v39 = vpop.f32.mrb[20].mxu1 }
 0x11e   :  { %v2027_v41 = vpop.f32.mrb[21].mxu1 }
 0x11f   :  { %v2028_v43 = vadd.f32 %v2027_v41, %v2026_v39  ;;  %v2029_v44 = vpop.f32.mrb[22].mxu1 }
 0x120   :  { %v2030_v45 = vpop.f32.mrb[23].mxu1 }
 0x121   :  { %v1380_v47 = vadd.f32 %v2028_v43, %v1315_v42  ;;  %v2031_v48 = vadd.f32 %v2030_v45, %v2029_v44  ;;  %v2146_v43 = vpop.f32.mrb[20].mxu0 }
 0x122   :  { %v2147_v45 = vpop.f32.mrb[21].mxu0 }
 0x123   :  { %v1383_v49 = vadd.f32 %v2031_v48, %v1318_v46  ;;  %v1445_v51 = vadd.f32 %v2068_v16, %v1380_v47  ;;  %v328_v16 = vpop.permute.xlu0 %327  ;;  %v2148_v47 = vadd.f32 %v2147_v45, %v2146_v43  ;;  %v2149_v48 = vpop.f32.mrb[22].mxu0 }
 0x124   :  { %v1331_v22 = vadd.f32 %v2958_v10, %v328_v16  ;;  %v2150_v52 = vpop.f32.mrb[23].mxu0 }
 0x125   :  { %v1448_v56 = vadd.f32 %v2071_v19, %v1383_v49  ;;  %v2032_v62 = vpop.f32.mrb[24].mxu1  ;;  %v2145_v19 = vadd.f32 %v2144_v17, %v2143_v15 }
 0x126   :  { %v2033_v0 = vpop.f32.mrb[25].mxu1 }
 0x127   :  { %v2034_v2 = vadd.f32 %v2033_v0, %v2032_v62  ;;  %v2035_v3 = vpop.f32.mrb[26].mxu1 }
 0x128   :  { %v2036_v57 = vpop.f32.mrb[27].mxu1  ;;  %v2152_v63 = vpop.f32.mrb[24].mxu0 }
 0x129   :  { %v1388_v6 = vadd.f32 %v2034_v2, %v1323_v54  ;;  %v2037_v7 = vadd.f32 %v2036_v57, %v2035_v3  ;;  %v2153_v54 = vpop.f32.mrb[25].mxu0 }
 0x12a   :  { %v2154_v57 = vadd.f32 %v2153_v54, %v2152_v63 }
 0x12b   :  { %v1391_v9 = vadd.f32 %v2037_v7, %v1326_v5  ;;  %v1453_v12 = vadd.f32 %v2074_v34, %v1388_v6  ;;  %v2155_v5 = vpop.f32.mrb[26].mxu0 }
 0x12c   :  { %v2156_v6 = vpop.f32.mrb[27].mxu0 }
 0x12d   :  { %v1456_v18 = vadd.f32 %v2077_v38, %v1391_v9  ;;  %v2038_v20 = vpop.f32.mrb[28].mxu1  ;;  %v2157_v8 = vadd.f32 %v2156_v6, %v2155_v5 }
 0x12e   :  { %v2039_v61 = vpop.f32.mrb[29].mxu1 }
 0x12f   :  { %v2040_v23 = vadd.f32 %v2039_v61, %v2038_v20  ;;  %v2041_v24 = vpop.f32.mrb[30].mxu1 }
 0x130   :  { %v2042_v4 = vpop.f32.mrb[31].mxu1  ;;  %v2158_v16 = vpop.f32.mrb[28].mxu0 }
 0x131   :  { %v1396_v26 = vadd.f32 %v2040_v23, %v1331_v22  ;;  %v2043_v27 = vadd.f32 %v2042_v4, %v2041_v24  ;;  %v2159_v21 = vpop.f32.mrb[29].mxu0 }
 0x132   :  { %v2161_v61 = vpop.f32.mrb[30].mxu0 }
 0x133   :  { %v1399_v28 = vadd.f32 %v2043_v27, %v1334_v25  ;;  %v1461_v29 = vadd.f32 %v2080_v53, %v1396_v26  ;;  %v2151_v53 = vadd.f32 %v2150_v52, %v2149_v48  ;;  %v2162_v23 = vpop.f32.mrb[31].mxu0 }
 0x135   :  { %v1464_v30 = vadd.f32 %v2083_v60, %v1399_v28  ;;  %v2100_v1 = vpop.f32.mrb[32].mxu1 }
 0x136   :  { %v2101_v31 = vpop.f32.mrb[33].mxu1 }
 0x137   :  { %v2102_v32 = vadd.f32 %v2101_v31, %v2100_v1  ;;  %v2103_v34 = vpop.f32.mrb[34].mxu1 }
 0x138   :  { %v2104_v35 = vpop.f32.mrb[35].mxu1 }
 0x139   :  { %v1502_v36 = vadd.f32 %v2102_v32, %v2962_v33  ;;  %v2105_v38 = vadd.f32 %v2104_v35, %v2103_v34 }
 0x13b   :  { %v1505_v39 = vadd.f32 %v2105_v38, %v1440_v37  ;;  %v1567_v10 = vadd.f32 %v2142_v13, %v1502_v36 }
 0x13d   :  { %v2106_v40 = vpop.f32.mrb[36].mxu1  ;;  %v1570_v41 = vadd.f32 %v2145_v19, %v1505_v39 }
 0x13e   :  { %v2107_v42 = vpop.f32.mrb[37].mxu1 }
 0x13f   :  { %v2108_v14 = vadd.f32 %v2107_v42, %v2106_v40  ;;  %v2109_v44 = vpop.f32.mrb[38].mxu1 }
 0x140   :  { %v2110_v46 = vpop.f32.mrb[39].mxu1 }
 0x141   :  { %v1510_v49 = vadd.f32 %v2108_v14, %v1445_v51  ;;  %v2111_v50 = vadd.f32 %v2110_v46, %v2109_v44 }
 0x143   :  { %v1513_v55 = vadd.f32 %v2111_v50, %v1448_v56  ;;  %v1575_v58 = vadd.f32 %v2148_v47, %v1510_v49 }
 0x145   :  { %v2969_v33 = vadd.f32 %v2151_v53, %v1513_v55  ;;  %v2112_v37 = vpop.f32.mrb[40].mxu1 }
 0x146   :  { %v2113_v59 = vpop.f32.mrb[41].mxu1 }
 0x147   :  { %v2114_v60 = vadd.f32 %v2113_v59, %v2112_v37  ;;  %v2115_v62 = vpop.f32.mrb[42].mxu1 }
 0x148   :  { %v2116_v0 = vpop.f32.mrb[43].mxu1  ;;  %v1696_v31 = vpop.f32.mrb[32].mxu0 }
 0x149   :  { %v1518_v2 = vadd.f32 %v2114_v60, %v1453_v12  ;;  %v2117_v3 = vadd.f32 %v2116_v0, %v2115_v62  ;;  %v2160_v12 = vadd.f32 %v2159_v21, %v2158_v16 }
 0x14b   :  { %v1521_v51 = vadd.f32 %v2117_v3, %v1456_v18  ;;  %v2971_v7 = vadd.f32 %v2154_v57, %v1518_v2  ;;  %v2163_v18 = vadd.f32 %v2162_v23, %v2161_v61 }
 0x14d   :  { %v2973_v56 = vadd.f32 %v2157_v8, %v1521_v51  ;;  %v2118_v9 = vpop.f32.mrb[44].mxu1 }
 0x14e   :  { %v2119_v11 = vpop.f32.mrb[45].mxu1 }
 0x14f   :  { %v2120_v13 = vadd.f32 %v2119_v11, %v2118_v9  ;;  %v2121_v15 = vpop.f32.mrb[46].mxu1 }
 0x150   :  { %v2122_v17 = vpop.f32.mrb[47].mxu1 }
 0x151   :  { %v1526_v19 = vadd.f32 %v2120_v13, %v1461_v29  ;;  %v2123_v20 = vadd.f32 %v2122_v17, %v2121_v15  ;;  %v1698_v29 = vpop.f32.mrb[33].mxu0 }
 0x152   :  { %v1699_v35 = vpop.f32.mrb[34].mxu0 }
 0x153   :  { %v1529_v22 = vadd.f32 %v2123_v20, %v1464_v30  ;;  %v2975_v24 = vadd.f32 %v2160_v12, %v1526_v19  ;;  %v1701_v39 = vpop.f32.mrb[35].mxu0 }
 0x154   :  { %v1704_v48 = vpop.f32.mrb[36].mxu0 }
 0x155   :  { %v2977_v4 = vadd.f32 %v2163_v18, %v1529_v22  ;;  %v2180_v25 = vpop.f32.mrb[48].mxu1  ;;  %v1706_v50 = vpop.f32.mrb[37].mxu0 }
 0x156   :  { %v2181_v26 = vpop.f32.mrb[49].mxu1  ;;  %v1707_v52 = vpop.f32.mrb[38].mxu0 }
 0x157   :  { %v2182_v27 = vadd.f32 %v2181_v26, %v2180_v25  ;;  %v2183_v28 = vpop.f32.mrb[50].mxu1  ;;  %v1709_v37 = vpop.f32.mrb[39].mxu0 }
 0x158   :  { %v2184_v1 = vpop.f32.mrb[51].mxu1  ;;  %v1712_v57 = vpop.f32.mrb[40].mxu0 }
 0x159   :  { %v2185_v32 = vadd.f32 %v2184_v1, %v2183_v28  ;;  %v1632_v34 = vadd.f32 %v2182_v27, %v1567_v10  ;;  %v1714_v51 = vpop.f32.mrb[41].mxu0 }
 0x15a   :  { %v1715_v8 = vpop.f32.mrb[42].mxu0 }
 0x15b   :  { %v1697_v36 = vadd.f32 %v1696_v31, %v1632_v34  ;;  %v1635_v38 = vadd.f32 %v2185_v32, %v1570_v41  ;;  %v1717_v13 = vpop.f32.mrb[43].mxu0 }
 0x15d   :  { %v1727_v30 = vmax.f32 %v1697_v36, 0.0  ;;  %v1700_v40 = vadd.f32 %v1699_v35, %v1635_v38  ;;  %v2186_v42 = vpop.f32.mrb[52].mxu1 }
 0x15e   :  { %v2187_v43 = vpop.f32.mrb[53].mxu1 }
 0x15f   :  { %v1956_v14 = vpack.c.bf16 %v1727_v30, %v1727_v30  ;;  %v1728_v44 = vmax.f32 %v1700_v40, 0.0  ;;  %v2188_v45 = vadd.f32 %v2187_v43, %v2186_v42  ;;  %v2189_v46 = vpop.f32.mrb[54].mxu1 }
 0x160   :  { %v2190_v47 = vpop.f32.mrb[55].mxu1  ;;  %v1720_v22 = vpop.f32.mrb[44].mxu0 }
 0x161   :  { %1768 = vst.msk [vmem:[%s3019_s3] sm:$0xf] %vm1767_vm1, %v1956_v14  ;;  %v1957_v10 = vpack.c.bf16 %v1728_v44, %v1728_v44  ;;  %v2191_v49 = vadd.f32 %v2190_v47, %v2189_v46  ;;  %v1640_v41 = vadd.f32 %v2188_v45, %v1575_v58  ;;  %v1722_v25 = vpop.f32.mrb[45].mxu0 }
 0x162   :  { %v1723_v26 = vpop.f32.mrb[46].mxu0 }
 0x163   :  { %1769 = vst.msk [vmem:[%s3019_s3 + $0x4] sm:$0xf] %vm1767_vm1, %v1957_v10  ;;  %v1705_v53 = vadd.f32 %v1704_v48, %v1640_v41  ;;  %v1643_v55 = vadd.f32 %v2191_v49, %v2969_v33  ;;  %v1725_v1 = vpop.f32.mrb[47].mxu0 }
 0x165   :  { %v1729_v59 = vmax.f32 %v1705_v53, 0.0  ;;  %v1708_v60 = vadd.f32 %v1707_v52, %v1643_v55  ;;  %v2192_v62 = vpop.f32.mrb[56].mxu1 }
 0x166   :  { %v2193_v63 = vpop.f32.mrb[57].mxu1 }
 0x167   :  { %v1958_v0 = vpack.c.bf16 %v1729_v59, %v1729_v59  ;;  %v1730_v54 = vmax.f32 %v1708_v60, 0.0  ;;  %v2194_v2 = vadd.f32 %v2193_v63, %v2192_v62  ;;  %v2195_v3 = vpop.f32.mrb[58].mxu1 }
 0x168   :  { %v2196_v58 = vpop.f32.mrb[59].mxu1 }
 0x169   :  { %1770 = vst.msk [vmem:[%s3019_s3 + $0x8] sm:$0xf] %vm1767_vm1, %v1958_v0  ;;  %v1959_v5 = vpack.c.bf16 %v1730_v54, %v1730_v54  ;;  %v2197_v6 = vadd.f32 %v2196_v58, %v2195_v3  ;;  %v1648_v33 = vadd.f32 %v2194_v2, %v2971_v7 }
 0x16b   :  { %1771 = vst.msk [vmem:[%s3019_s3 + $0xc] sm:$0xf] %vm1767_vm1, %v1959_v5  ;;  %v1713_v9 = vadd.f32 %v1712_v57, %v1648_v33  ;;  %v1651_v11 = vadd.f32 %v2197_v6, %v2973_v56 }
 0x16d   :  { %v1731_v15 = vmax.f32 %v1713_v9, 0.0  ;;  %v1716_v16 = vadd.f32 %v1715_v8, %v1651_v11  ;;  %v2198_v17 = vpop.f32.mrb[60].mxu1 }
 0x16e   :  { %v2199_v19 = vpop.f32.mrb[61].mxu1 }
 0x16f   :  { %v1960_v20 = vpack.c.bf16 %v1731_v15, %v1731_v15  ;;  %v1732_v21 = vmax.f32 %v1716_v16, 0.0  ;;  %v2200_v12 = vadd.f32 %v2199_v19, %v2198_v17  ;;  %v2201_v61 = vpop.f32.mrb[62].mxu1 }
 0x170   :  { %v2202_v7 = vpop.f32.mrb[63].mxu1 }
 0x171   :  { %1772 = vst.msk [vmem:[%s3019_s3 + $0x10] sm:$0xf] %vm1767_vm1, %v1960_v20  ;;  %v1961_v23 = vpack.c.bf16 %v1732_v21, %v1732_v21  ;;  %v2203_v18 = vadd.f32 %v2202_v7, %v2201_v61  ;;  %v1656_v56 = vadd.f32 %v2200_v12, %v2975_v24 }
 0x173   :  { %1773 = vst.msk [vmem:[%s3019_s3 + $0x14] sm:$0xf] %vm1767_vm1, %v1961_v23  ;;  %v1721_v27 = vadd.f32 %v1720_v22, %v1656_v56  ;;  %v1659_v28 = vadd.f32 %v2203_v18, %v2977_v4 }
 0x175   :  { %v1733_v31 = vmax.f32 %v1721_v27, 0.0  ;;  %v1724_v32 = vadd.f32 %v1723_v26, %v1659_v28 }
 0x177   :  { %v1962_v34 = vpack.c.bf16 %v1733_v31, %v1733_v31  ;;  %v1734_v29 = vmax.f32 %v1724_v32, 0.0 }
 0x179   :  { %1774 = vst.msk [vmem:[%s3019_s3 + $0x18] sm:$0xf] %vm1767_vm1, %v1962_v34  ;;  %v1963_v24 = vpack.c.bf16 %v1734_v29, %v1734_v29 }
 0x17b   :  { %1775 = vst.msk [vmem:[%s3019_s3 + $0x1c] sm:$0xf] %vm1767_vm1, %v1963_v24 }

// kernel: unetpp_forward.63
= control target key start
LH: loop header
LB: loop body
LE: loop exit
PB: predicated region body
PF: predicated region fallthrough
CT: control target
= control target key end

     0   :  { %v1342_v1 = vmov 0   ;;  %vm992_vm0 = vcmask 257024   ;;  %s1657_s1 = inlined_call_operand.vmem [shape: bf16[1152,32], index: 1, kind: input, shape index: {}]   ;;  %s1658_s0 = inlined_call_operand.vmem [shape: bf16[32,1152], index: 0, kind: input, shape index: {}]   ;;  %s1659_s2 = inlined_call_operand.vmem [shape: f32[32,1], index: 2, kind: input, shape index: {}]   ;;  %s1660_s3 = inlined_call_operand.vmem [shape: bf16[32,32], index: 3, kind: output, shape index: {}]  }
   0x1   :  { %v1244_v0 = vld [vmem:[%s1657_s1 + $0x40] sm:$0xff]   ;;  %1242 = vset.pattern.permute.xlu0 %v1342_v1  ;;  %1243 = vset.pattern.permute.xlu1 %v1342_v1  ;;  %v1248_v5 = vld [vmem:[%s1657_s1 + $0x48] sm:$0xff]   ;;  %v1252_v9 = vld [vmem:[%s1657_s1 + $0x50] sm:$0xff]  }
   0x2   :  { %v1245_v2 = vld [vmem:[%s1657_s1] sm:$0xff]   ;;  %1099 = vmatprep.subr.bf16.mxu0 %v1244_v0  ;;  %v1249_v6 = vld [vmem:[%s1657_s1 + $0x8] sm:$0xff]   ;;  %v1253_v10 = vld [vmem:[%s1657_s1 + $0x10] sm:$0xff]  }
   0x3   :  { %v1246_v3 = vld [vmem:[%s1657_s1 + $0xc0] sm:$0xff]   ;;  %1100 = vmatpush3.bf16.msra.mxu0 %v1245_v2  ;;  %v1250_v7 = vld [vmem:[%s1657_s1 + $0xc8] sm:$0xff]   ;;  %v1254_v11 = vld [vmem:[%s1657_s1 + $0xd0] sm:$0xff]  }
   0x4   :  { %v1247_v4 = vld [vmem:[%s1657_s1 + $0x80] sm:$0xff]   ;;  %1127 = vmatprep.subr.bf16.mxu1 %v1246_v3  ;;  %1101 = vmatprep.subr.bf16.mxu0 %v1248_v5  ;;  %v1251_v8 = vld [vmem:[%s1657_s1 + $0x88] sm:$0xff]   ;;  %v1255_v12 = vld [vmem:[%s1657_s1 + $0x90] sm:$0xff]  }
   0x5   :  { %1128 = vmatpush3.bf16.msra.mxu1 %v1247_v4  ;;  %v1256_v13 = vld [vmem:[%s1657_s1 + $0x58] sm:$0xff]   ;;  %v1260_v17 = vld [vmem:[%s1657_s1 + $0x60] sm:$0xff]   ;;  %v1264_v21 = vld [vmem:[%s1657_s1 + $0x68] sm:$0xff]  }
   0x6   :  { %1129 = vmatprep.subr.bf16.mxu1 %v1250_v7  ;;  %v1257_v14 = vld [vmem:[%s1657_s1 + $0x18] sm:$0xff]   ;;  %v1261_v18 = vld [vmem:[%s1657_s1 + $0x20] sm:$0xff]   ;;  %v1265_v22 = vld [vmem:[%s1657_s1 + $0x28] sm:$0xff]  }
   0x7   :  { %1102 = vmatpush3.bf16.msra.mxu0 %v1249_v6  ;;  %v1258_v15 = vld [vmem:[%s1657_s1 + $0xd8] sm:$0xff]   ;;  %v1262_v19 = vld [vmem:[%s1657_s1 + $0xe0] sm:$0xff]   ;;  %v1266_v23 = vld [vmem:[%s1657_s1 + $0xe8] sm:$0xff]  }
   0x8   :  { %1103 = vmatprep.subr.bf16.mxu0 %v1252_v9  ;;  %v1259_v16 = vld [vmem:[%s1657_s1 + $0x98] sm:$0xff]   ;;  %v1263_v20 = vld [vmem:[%s1657_s1 + $0xa0] sm:$0xff]   ;;  %v1267_v24 = vld [vmem:[%s1657_s1 + $0xa8] sm:$0xff]  }
   0x9   :  { %1130 = vmatpush3.bf16.msra.mxu1 %v1251_v8  ;;  %v1268_v25 = vld [vmem:[%s1657_s1 + $0x70] sm:$0xff]   ;;  %v1272_v29 = vld [vmem:[%s1657_s1 + $0x78] sm:$0xff]   ;;  %v1275_v32 = vld [vmem:[%s1658_s0] ss:$36 sps:$4 sm:$0xff]  }
   0xa   :  { %1131 = vmatprep.subr.bf16.mxu1 %v1254_v11  ;;  %v1269_v26 = vld [vmem:[%s1657_s1 + $0x30] sm:$0xff]   ;;  %v1273_v30 = vld [vmem:[%s1657_s1 + $0x38] sm:$0xff]   ;;  %v1277_v33 = vld [vmem:[%s1658_s0 + $0x4] ss:$36 sps:$4 sm:$0xff]  }
   0xb   :  { %1104 = vmatpush3.bf16.msra.mxu0 %v1253_v10  ;;  %v1270_v27 = vld [vmem:[%s1657_s1 + $0xf0] sm:$0xff]   ;;  %v1274_v31 = vld [vmem:[%s1657_s1 + $0xf8] sm:$0xff]   ;;  %759 = vmatprep.mubr.bf16.mxu0 %v1277_v33  ;;  %v1279_v35 = vld [vmem:[%s1657_s1 + $0x140] sm:$0xff]  }
   0xc   :  { %1105 = vmatprep.subr.bf16.mxu0 %v1256_v13  ;;  %v1271_v28 = vld [vmem:[%s1657_s1 + $0xb0] sm:$0xff]   ;;  %v1278_v34 = vld [vmem:[%s1657_s1 + $0xb8] sm:$0xff]   ;;  %v1280_v36 = vld [vmem:[%s1658_s0 + $0x8] ss:$36 sps:$4 sm:$0xff]  }
   0xd   :  { %1132 = vmatpush3.bf16.msra.mxu1 %v1255_v12  ;;  %v1282_v37 = vld [vmem:[%s1658_s0 + $0xc] ss:$36 sps:$4 sm:$0xff]   ;;  %v1283_v38 = vld [vmem:[%s1657_s1 + $0x100] sm:$0xff]   ;;  %v1294_v49 = vld [vmem:[%s1657_s1 + $0x158] sm:$0xff]  }
   0xe   :  { %1133 = vmatprep.subr.bf16.mxu1 %v1258_v15  ;;  %808 = vmatprep.mubr.bf16.mxu1 %v1282_v37  ;;  %v1284_v39 = vld [vmem:[%s1657_s1 + $0x1c0] sm:$0xff]   ;;  %v1286_v41 = vld [vmem:[%s1657_s1 + $0x148] sm:$0xff]   ;;  %v1290_v45 = vld [vmem:[%s1657_s1 + $0x150] sm:$0xff]  }
   0xf   :  { %1106 = vmatpush3.bf16.msra.mxu0 %v1257_v14  ;;  %v1285_v40 = vld [vmem:[%s1657_s1 + $0x180] sm:$0xff]   ;;  %v1287_v42 = vld [vmem:[%s1657_s1 + $0x108] sm:$0xff]   ;;  %v1291_v46 = vld [vmem:[%s1657_s1 + $0x110] sm:$0xff]  }
  0x10   :  { %1107 = vmatprep.subr.bf16.mxu0 %v1260_v17  ;;  %v1288_v43 = vld [vmem:[%s1657_s1 + $0x1c8] sm:$0xff]   ;;  %v1292_v47 = vld [vmem:[%s1657_s1 + $0x1d0] sm:$0xff]   ;;  %v1295_v50 = vld [vmem:[%s1657_s1 + $0x118] sm:$0xff]  }
  0x11   :  { %1134 = vmatpush3.bf16.msra.mxu1 %v1259_v16  ;;  %v1289_v44 = vld [vmem:[%s1657_s1 + $0x188] sm:$0xff]   ;;  %v1293_v48 = vld [vmem:[%s1657_s1 + $0x190] sm:$0xff]   ;;  %v1296_v51 = vld [vmem:[%s1657_s1 + $0x1d8] sm:$0xff]  }
  0x12   :  { %1135 = vmatprep.subr.bf16.mxu1 %v1262_v19  ;;  %v1297_v52 = vld [vmem:[%s1657_s1 + $0x198] sm:$0xff]   ;;  %v1298_v53 = vld [vmem:[%s1657_s1 + $0x160] sm:$0xff]   ;;  %v1302_v57 = vld [vmem:[%s1657_s1 + $0x168] sm:$0xff]  }
  0x13   :  { %1108 = vmatpush3.bf16.msra.mxu0 %v1261_v18  ;;  %v1299_v54 = vld [vmem:[%s1657_s1 + $0x120] sm:$0xff]   ;;  %v1303_v58 = vld [vmem:[%s1658_s0 + $0x4c] ss:$36 sps:$4 sm:$0xff]   ;;  %v1308_v62 = vld [vmem:[%s1658_s0 + $0x54] ss:$36 sps:$4 sm:$0xff]  }
  0x14   :  { %1109 = vmatprep.subr.bf16.mxu0 %v1264_v21  ;;  %v1300_v55 = vld [vmem:[%s1657_s1 + $0x1e0] sm:$0xff]   ;;  %v1305_v59 = vld [vmem:[%s1657_s1 + $0x128] sm:$0xff]   ;;  %v1311_v0 = vld [vmem:[%s1658_s0 + $0x50] ss:$36 sps:$4 sm:$0xff]  }
  0x15   :  { %1136 = vmatpush3.bf16.msra.mxu1 %v1263_v20  ;;  %v1301_v56 = vld [vmem:[%s1657_s1 + $0x1a0] sm:$0xff]   ;;  %v1306_v60 = vld [vmem:[%s1658_s0 + $0x48] ss:$36 sps:$4 sm:$0xff]   ;;  %v1312_v1 = vld [vmem:[%s1657_s1 + $0x170] sm:$0xff]  }
  0x16   :  { %1137 = vmatprep.subr.bf16.mxu1 %v1266_v23  ;;  %v1307_v61 = vld [vmem:[%s1657_s1 + $0x1e8] sm:$0xff]   ;;  %v1313_v2 = vld [vmem:[%s1657_s1 + $0x130] sm:$0xff]   ;;  %v1316_v5 = vld [vmem:[%s1657_s1 + $0x178] sm:$0xff]  }
  0x17   :  { %1110 = vmatpush3.bf16.msra.mxu0 %v1265_v22  ;;  %v1310_v63 = vld [vmem:[%s1657_s1 + $0x1a8] sm:$0xff]   ;;  %v1314_v3 = vld [vmem:[%s1657_s1 + $0x1f0] sm:$0xff]   ;;  %v1317_v6 = vld [vmem:[%s1657_s1 + $0x138] sm:$0xff]  }
  0x18   :  { %1111 = vmatprep.subr.bf16.mxu0 %v1268_v25  ;;  %v1315_v4 = vld [vmem:[%s1657_s1 + $0x1b0] sm:$0xff]   ;;  %v1318_v7 = vld [vmem:[%s1657_s1 + $0x1f8] sm:$0xff]   ;;  %v1323_v11 = vld [vmem:[%s1657_s1 + $0x200] sm:$0xff]  }
  0x19   :  { %1138 = vmatpush3.bf16.msra.mxu1 %v1267_v24  ;;  %v1319_v8 = vld [vmem:[%s1658_s0 + $0x10] ss:$36 sps:$4 sm:$0xff]   ;;  %v1322_v10 = vld [vmem:[%s1657_s1 + $0x1b8] sm:$0xff]   ;;  %v1327_v14 = vld [vmem:[%s1657_s1 + $0x208] sm:$0xff]  }
  0x1a   :  { %1139 = vmatprep.subr.bf16.mxu1 %v1270_v27  ;;  %v1321_v9 = vld [vmem:[%s1658_s0 + $0x14] ss:$36 sps:$4 sm:$0xff]   ;;  %v1326_v13 = vld [vmem:[%s1658_s0 + $0x1c] ss:$36 sps:$4 sm:$0xff]   ;;  %v1332_v18 = vld [vmem:[%s1658_s0 + $0x64] ss:$36 sps:$4 sm:$0xff]  }
  0x1b   :  { %1112 = vmatpush3.bf16.msra.mxu0 %v1269_v26  ;;  %v1324_v12 = vld [vmem:[%s1658_s0 + $0x18] ss:$36 sps:$4 sm:$0xff]   ;;  %v1331_v17 = vld [vmem:[%s1657_s1 + $0x210] sm:$0xff]   ;;  %v1334_v19 = vld [vmem:[%s1658_s0 + $0x60] ss:$36 sps:$4 sm:$0xff]  }
  0x1c   :  { %1113 = vmatprep.subr.bf16.mxu0 %v1272_v29  ;;  %v1328_v15 = vld [vmem:[%s1658_s0 + $0x5c] ss:$36 sps:$4 sm:$0xff]   ;;  %v181_v24 = vld [vmem:[%s1659_s2 + $0x10] sm:$0xff]  ;;  %v180_v25 = vld [vmem:[%s1659_s2 + $0x8] sm:$0xff] }
  0x1d   :  { %1140 = vmatpush3.bf16.msra.mxu1 %v1271_v28  ;;  %v1330_v16 = vld [vmem:[%s1658_s0 + $0x58] ss:$36 sps:$4 sm:$0xff]   ;;  %v1336_v21 = vld [vmem:[%s1657_s1 + $0x220] sm:$0xff]   ;;  %195 = vperm.xlu1 %1243, %v181_v24   ;;  %v1337_v26 = vld [vmem:[%s1657_s1 + $0x228] sm:$0xff]  }
  0x1e   :  { %1141 = vmatprep.subr.bf16.mxu1 %v1274_v31  ;;  %v1335_v20 = vld [vmem:[%s1657_s1 + $0x218] sm:$0xff]   ;;  %v1340_v22 = vld [vmem:[%s1658_s0 + $0x20] ss:$36 sps:$4 sm:$0xff]   ;;  %v1338_v28 = vld [vmem:[%s1657_s1 + $0x230] sm:$0xff]  }
  0x1f   :  { %1114 = vmatpush3.bf16.msra.mxu0 %v1273_v30  ;;  %v179_v23 = vld [vmem:[%s1659_s2] sm:$0xff]  ;;  %v182_v27 = vld [vmem:[%s1659_s2 + $0x18] sm:$0xff]  ;;  %v1341_v30 = vld [vmem:[%s1658_s0 + $0x68] ss:$36 sps:$4 sm:$0xff]  }
  0x20   :  { %1155 = vmatprep.subr.bf16.mxu0 %v1279_v35  ;;  %185 = vperm.xlu0 %1242, %v179_v23   ;;  %v1339_v29 = vld [vmem:[%s1657_s1 + $0x238] sm:$0xff]  }
  0x21   :  { %1142 = vmatpush3.bf16.msra.mxu1 %v1278_v34  ;;  %200 = vperm.xlu1 %1243, %v182_v27  }
  0x22   :  { %760 = vmatmul.mubr.bf16.vlgmr.msra.gmra.mrb[0].mxu0 %v1275_v32  ;;  %1183 = vmatprep.subr.bf16.mxu1 %v1284_v39 }
  0x23   :  { %1156 = vmatpush3.bf16.msra.mxu0 %v1283_v38  ;;  %767 = vmatprep.mubr.bf16.mxu0 %v1303_v58 }
  0x24   :  { %809 = vmatmul.mubr.bf16.vlgmr.msra.gmra.mrb[0].mxu1 %v1280_v36  ;;  %1157 = vmatprep.subr.bf16.mxu0 %v1286_v41 }
  0x25   :  { %1184 = vmatpush3.bf16.msra.mxu1 %v1285_v40  ;;  %816 = vmatprep.mubr.bf16.mxu1 %v1308_v62 }
  0x26   :  { %1185 = vmatprep.subr.bf16.mxu1 %v1288_v43  ;;  %190 = vperm.xlu0 %1242, %v180_v25  }
  0x27   :  { %1158 = vmatpush3.bf16.msra.mxu0 %v1287_v42 }
  0x28   :  { %1159 = vmatprep.subr.bf16.mxu0 %v1290_v45 }
  0x29   :  { %1186 = vmatpush3.bf16.msra.mxu1 %v1289_v44 }
  0x2a   :  { %1187 = vmatprep.subr.bf16.mxu1 %v1292_v47  ;;  %768 = vmatmul.mubr.bf16.gmra.mrb[4].mxu0 %v1306_v60 }
  0x2b   :  { %1160 = vmatpush3.bf16.msra.mxu0 %v1291_v46  ;;  %857 = vmatprep.mubr.bf16.mxu0 %v1321_v9 }
  0x2c   :  { %1161 = vmatprep.subr.bf16.mxu0 %v1294_v49  ;;  %817 = vmatmul.mubr.bf16.gmra.mrb[4].mxu1 %v1311_v0 }
  0x2d   :  { %1188 = vmatpush3.bf16.msra.mxu1 %v1293_v48  ;;  %906 = vmatprep.mubr.bf16.mxu1 %v1326_v13 }
  0x2e   :  { %1189 = vmatprep.subr.bf16.mxu1 %v1296_v51 }
  0x2f   :  { %1162 = vmatpush3.bf16.msra.mxu0 %v1295_v50 }
  0x30   :  { %1163 = vmatprep.subr.bf16.mxu0 %v1298_v53 }
  0x31   :  { %1190 = vmatpush3.bf16.msra.mxu1 %v1297_v52 }
  0x32   :  { %1191 = vmatprep.subr.bf16.mxu1 %v1300_v55 }
  0x33   :  { %1164 = vmatpush3.bf16.msra.mxu0 %v1299_v54 }
  0x34   :  { %1165 = vmatprep.subr.bf16.mxu0 %v1302_v57 }
  0x35   :  { %1192 = vmatpush3.bf16.msra.mxu1 %v1301_v56 }
  0x36   :  { %1193 = vmatprep.subr.bf16.mxu1 %v1307_v61 }
  0x37   :  { %1166 = vmatpush3.bf16.msra.mxu0 %v1305_v59 }
  0x38   :  { %1167 = vmatprep.subr.bf16.mxu0 %v1312_v1 }
  0x39   :  { %1194 = vmatpush3.bf16.msra.mxu1 %v1310_v63 }
  0x3a   :  { %1195 = vmatprep.subr.bf16.mxu1 %v1314_v3 }
  0x3b   :  { %1168 = vmatpush3.bf16.msra.mxu0 %v1313_v2 }
  0x3c   :  { %1169 = vmatprep.subr.bf16.mxu0 %v1316_v5 }
  0x3d   :  { %1196 = vmatpush3.bf16.msra.mxu1 %v1315_v4 }
  0x3e   :  { %1197 = vmatprep.subr.bf16.mxu1 %v1318_v7 }
  0x3f   :  { %1170 = vmatpush3.bf16.msra.mxu0 %v1317_v6 }
  0x40   :  { %1221 = vmatprep.subr.bf16.mxu0 %v1323_v11 }
  0x41   :  { %1198 = vmatpush3.bf16.msra.mxu1 %v1322_v10 }
  0x42   :  { %858 = vmatmul.mubr.bf16.vlgmr.msra.gmra.mrb[8].mxu0 %v1319_v8 }
  0x43   :  { %1222 = vmatpush3.bf16.msra.mxu0 %v1323_v11  ;;  %865 = vmatprep.mubr.bf16.mxu0 %v1328_v15 }
  0x44   :  { %907 = vmatmul.mubr.bf16.vlgmr.msra.gmra.mrb[8].mxu1 %v1324_v12  ;;  %1223 = vmatprep.subr.bf16.mxu0 %v1327_v14 }
  0x45   :  { %914 = vmatprep.mubr.bf16.mxu1 %v1332_v18 }
  0x47   :  { %1224 = vmatpush3.bf16.msra.mxu0 %v1327_v14 }
  0x48   :  { %1225 = vmatprep.subr.bf16.mxu0 %v1331_v17 }
  0x4a   :  { %866 = vmatmul.mubr.bf16.gmra.mrb[12].mxu0 %v1330_v16 }
  0x4b   :  { %1226 = vmatpush3.bf16.msra.mxu0 %v1331_v17  ;;  %1237 = vmatprep.mubr.bf16.mxu0 %v1340_v22 }
  0x4c   :  { %915 = vmatmul.mubr.bf16.gmra.mrb[12].mxu1 %v1334_v19  ;;  %1227 = vmatprep.subr.bf16.mxu0 %v1335_v20 }
  0x4f   :  { %1228 = vmatpush3.bf16.msra.mxu0 %v1335_v20 }
  0x50   :  { %1229 = vmatprep.subr.bf16.mxu0 %v1336_v21 }
  0x53   :  { %1230 = vmatpush3.bf16.msra.mxu0 %v1336_v21 }
  0x54   :  { %1231 = vmatprep.subr.bf16.mxu0 %v1337_v26 }
  0x57   :  { %1232 = vmatpush3.bf16.msra.mxu0 %v1337_v26 }
  0x58   :  { %1233 = vmatprep.subr.bf16.mxu0 %v1338_v28 }
  0x5b   :  { %1234 = vmatpush3.bf16.msra.mxu0 %v1338_v28 }
  0x5c   :  { %1235 = vmatprep.subr.bf16.mxu0 %v1339_v29 }
  0x5f   :  { %1236 = vmatpush3.bf16.msra.mxu0 %v1339_v29 }
  0x62   :  { %1238 = vmatmul.mubr.bf16.vlgmr.msra.gmra.mrb[16].mxu0 %v1341_v30 }
  0x9c   :  { %v196_v49 = vpop.permute.xlu1 %195 }
  0x9f   :  { %v186_v31 = vpop.permute.xlu0 %185 }
  0xa0   :  { %v201_v54 = vpop.permute.xlu1 %200 }
  0xa5   :  { %v191_v36 = vpop.permute.xlu0 %190 }
  0xf5   :  { %v1115_v32 = vpop.f32.mrb[0].mxu0 }
  0xf6   :  { %v1116_v33 = vpop.f32.mrb[1].mxu0 }
  0xf7   :  { %v1117_v34 = vadd.f32 %v1116_v33, %v1115_v32  ;;  %v1118_v35 = vpop.f32.mrb[2].mxu0  ;;  %v1143_v37 = vpop.f32.mrb[0].mxu1 }
  0xf8   :  { %v1119_v38 = vpop.f32.mrb[3].mxu0  ;;  %v1144_v41 = vpop.f32.mrb[1].mxu1 }
  0xf9   :  { %v762_v39 = vadd.f32 %v1117_v34, %v186_v31  ;;  %v1120_v40 = vadd.f32 %v1119_v38, %v1118_v35  ;;  %v1145_v42 = vadd.f32 %v1144_v41, %v1143_v37  ;;  %v1146_v43 = vpop.f32.mrb[2].mxu1 }
  0xfa   :  { %v1147_v45 = vpop.f32.mrb[3].mxu1 }
  0xfb   :  { %v765_v44 = vadd.f32 %v1120_v40, %v191_v36  ;;  %v811_v46 = vadd.f32 %v1145_v42, %v762_v39  ;;  %v1148_v47 = vadd.f32 %v1147_v45, %v1146_v43 }
  0xfd   :  { %v814_v48 = vadd.f32 %v1148_v47, %v765_v44  ;;  %v1121_v50 = vpop.f32.mrb[4].mxu0 }
  0xfe   :  { %v1122_v51 = vpop.f32.mrb[5].mxu0 }
  0xff   :  { %v1123_v52 = vadd.f32 %v1122_v51, %v1121_v50  ;;  %v1124_v53 = vpop.f32.mrb[6].mxu0  ;;  %v1149_v55 = vpop.f32.mrb[4].mxu1 }
 0x100   :  { %v1125_v56 = vpop.f32.mrb[7].mxu0  ;;  %v1150_v59 = vpop.f32.mrb[5].mxu1 }
 0x101   :  { %v770_v57 = vadd.f32 %v1123_v52, %v196_v49  ;;  %v1126_v58 = vadd.f32 %v1125_v56, %v1124_v53  ;;  %v1151_v60 = vadd.f32 %v1150_v59, %v1149_v55  ;;  %v1152_v61 = vpop.f32.mrb[6].mxu1 }
 0x102   :  { %v1153_v63 = vpop.f32.mrb[7].mxu1 }
 0x103   :  { %v773_v62 = vadd.f32 %v1126_v58, %v201_v54  ;;  %v819_v0 = vadd.f32 %v1151_v60, %v770_v57  ;;  %v1154_v1 = vadd.f32 %v1153_v63, %v1152_v61 }
 0x105   :  { %v822_v2 = vadd.f32 %v1154_v1, %v773_v62 }
 0x115   :  { %v1171_v3 = vpop.f32.mrb[8].mxu0 }
 0x116   :  { %v1172_v4 = vpop.f32.mrb[9].mxu0 }
 0x117   :  { %v1173_v5 = vadd.f32 %v1172_v4, %v1171_v3  ;;  %v1174_v6 = vpop.f32.mrb[10].mxu0  ;;  %v1199_v7 = vpop.f32.mrb[8].mxu1 }
 0x118   :  { %v1175_v8 = vpop.f32.mrb[11].mxu0  ;;  %v1200_v11 = vpop.f32.mrb[9].mxu1 }
 0x119   :  { %v860_v9 = vadd.f32 %v1173_v5, %v811_v46  ;;  %v1176_v10 = vadd.f32 %v1175_v8, %v1174_v6  ;;  %v1201_v12 = vadd.f32 %v1200_v11, %v1199_v7  ;;  %v1202_v13 = vpop.f32.mrb[10].mxu1 }
 0x11a   :  { %v1203_v15 = vpop.f32.mrb[11].mxu1 }
 0x11b   :  { %v863_v14 = vadd.f32 %v1176_v10, %v814_v48  ;;  %v1204_v16 = vadd.f32 %v1203_v15, %v1202_v13  ;;  %v909_v17 = vadd.f32 %v1201_v12, %v860_v9 }
 0x11d   :  { %v1177_v18 = vpop.f32.mrb[12].mxu0  ;;  %v912_v20 = vadd.f32 %v1204_v16, %v863_v14 }
 0x11e   :  { %v1178_v19 = vpop.f32.mrb[13].mxu0 }
 0x11f   :  { %v1179_v21 = vadd.f32 %v1178_v19, %v1177_v18  ;;  %v1180_v22 = vpop.f32.mrb[14].mxu0  ;;  %v1205_v23 = vpop.f32.mrb[12].mxu1 }
 0x120   :  { %v1181_v24 = vpop.f32.mrb[15].mxu0  ;;  %v1206_v27 = vpop.f32.mrb[13].mxu1 }
 0x121   :  { %v868_v25 = vadd.f32 %v1179_v21, %v819_v0  ;;  %v1182_v26 = vadd.f32 %v1181_v24, %v1180_v22  ;;  %v1207_v28 = vadd.f32 %v1206_v27, %v1205_v23  ;;  %v1208_v29 = vpop.f32.mrb[14].mxu1 }
 0x122   :  { %v1209_v31 = vpop.f32.mrb[15].mxu1 }
 0x123   :  { %v871_v30 = vadd.f32 %v1182_v26, %v822_v2  ;;  %v1210_v32 = vadd.f32 %v1209_v31, %v1208_v29  ;;  %v917_v33 = vadd.f32 %v1207_v28, %v868_v25 }
 0x125   :  { %v920_v34 = vadd.f32 %v1210_v32, %v871_v30 }
 0x135   :  { %v1239_v35 = vpop.f32.mrb[16].mxu0 }
 0x136   :  { %v966_v36 = vadd.f32 %v1239_v35, %v917_v33  ;;  %v957_v37 = vpop.f32.mrb[17].mxu0 }
 0x137   :  { %v958_v38 = vadd.f32 %v957_v37, %v909_v17  ;;  %v1240_v39 = vpop.f32.mrb[18].mxu0 }
 0x138   :  { %v974_v40 = vmax.f32 %v966_v36, 0.0  ;;  %v969_v41 = vadd.f32 %v1240_v39, %v920_v34  ;;  %v960_v42 = vpop.f32.mrb[19].mxu0 }
 0x139   :  { %v972_v43 = vmax.f32 %v958_v38, 0.0  ;;  %v961_v44 = vadd.f32 %v960_v42, %v912_v20 }
 0x13a   :  { %v1097_v45 = vpack.c.bf16 %v974_v40, %v974_v40  ;;  %v975_v46 = vmax.f32 %v969_v41, 0.0 }
 0x13b   :  { %v1095_v47 = vpack.c.bf16 %v972_v43, %v972_v43  ;;  %v973_v48 = vmax.f32 %v961_v44, 0.0 }
 0x13c   :  { %995 = vst.msk [vmem:[%s1660_s3 + $0x8] sm:$0xf] %vm992_vm0, %v1097_v45  ;;  %v1098_v49 = vpack.c.bf16 %v975_v46, %v975_v46 }
 0x13d   :  { %993 = vst.msk [vmem:[%s1660_s3] sm:$0xf] %vm992_vm0, %v1095_v47  ;;  %v1096_v50 = vpack.c.bf16 %v973_v48, %v973_v48 }
 0x13e   :  { %996 = vst.msk [vmem:[%s1660_s3 + $0xc] sm:$0xf] %vm992_vm0, %v1098_v49 }
 0x13f   :  { %994 = vst.msk [vmem:[%s1660_s3 + $0x4] sm:$0xf] %vm992_vm0, %v1096_v50 }

// kernel: unetpp_forward.65
= control target key start
LH: loop header
LB: loop body
LE: loop exit
PB: predicated region body
PF: predicated region fallthrough
CT: control target
= control target key end

     0   :  { %v726_v1 = vmov 0   ;;  %vm422_vm0 = vcmask 654336   ;;  %s923_s1 = inlined_call_operand.vmem [shape: bf16[720,128], index: 1, kind: input, shape index: {}]   ;;  %s924_s0 = inlined_call_operand.vmem [shape: bf16[16,720], index: 0, kind: input, shape index: {}]   ;;  %s925_s2 = inlined_call_operand.vmem [shape: f32[16,1], index: 2, kind: input, shape index: {}]   ;;  %s926_s3 = inlined_call_operand.vmem [shape: bf16[16,128], index: 3, kind: output, shape index: {}]  }
   0x1   :  { %v672_v0 = vld [vmem:[%s923_s1 + $0x40] sm:$0xff]   ;;  %508 = vmatprep.subr.bf16.mxu0 %v726_v1  ;;  %671 = vset.pattern.permute.xlu0 %v726_v1  ;;  %v674_v3 = vld [vmem:[%s923_s1 + $0x48] sm:$0xff]   ;;  %v676_v5 = vld [vmem:[%s923_s1 + $0x50] sm:$0xff]  }
   0x2   :  { %v673_v2 = vld [vmem:[%s923_s1] sm:$0xff]   ;;  %626 = vmatprep.subr.bf16.mxu1 %v672_v0  ;;  %v675_v4 = vld [vmem:[%s923_s1 + $0x8] sm:$0xff]   ;;  %v677_v6 = vld [vmem:[%s923_s1 + $0x10] sm:$0xff]  }
   0x3   :  { %627 = vmatpush3.bf16.msra.mxu1 %v673_v2  ;;  %v678_v7 = vld [vmem:[%s923_s1 + $0x58] sm:$0xff]   ;;  %v680_v8 = vld [vmem:[%s923_s1 + $0x100] sm:$0xff]   ;;  %v683_v10 = vld [vmem:[%s923_s1 + $0x108] sm:$0xff]  }
   0x4   :  { %628 = vmatprep.subr.bf16.mxu1 %v674_v3  ;;  %v679_v9 = vld [vmem:[%s923_s1 + $0x18] sm:$0xff]   ;;  %509 = vmatpush1.bf16.msra.mxu0 %v680_v8  ;;  %v681_v11 = vld [vmem:[%s923_s1 + $0x60] sm:$0xff]   ;;  %v686_v12 = vld [vmem:[%s923_s1 + $0x110] sm:$0xff]  }
   0x5   :  { %510 = vmatprep.subr.bf16.mxu0 %v726_v1  ;;  %v682_v13 = vld [vmem:[%s923_s1 + $0x20] sm:$0xff]   ;;  %v684_v14 = vld [vmem:[%s923_s1 + $0x68] sm:$0xff]   ;;  %v689_v15 = vld [vmem:[%s923_s1 + $0x118] sm:$0xff]  }
   0x6   :  { %v685_v16 = vld [vmem:[%s923_s1 + $0x28] sm:$0xff]   ;;  %v687_v17 = vld [vmem:[%s923_s1 + $0x70] sm:$0xff]   ;;  %v694_v18 = vld [vmem:[%s924_s0 + $0x4] ss:$24 sps:$4 sm:$0xff]  }
   0x7   :  { %629 = vmatpush3.bf16.msra.mxu1 %v675_v4  ;;  %v695_v19 = vld [vmem:[%s923_s1 + $0x120] sm:$0xff]   ;;  %v688_v20 = vld [vmem:[%s923_s1 + $0x30] sm:$0xff]   ;;  %v690_v21 = vld [vmem:[%s923_s1 + $0x78] sm:$0xff]   ;;  %458 = vmatprep.mubr.bf16.mxu1 %v694_v18 }
   0x8   :  { %630 = vmatprep.subr.bf16.mxu1 %v676_v5  ;;  %511 = vmatpush1.bf16.msra.mxu0 %v683_v10  ;;  %v698_v22 = vld [vmem:[%s923_s1 + $0x128] sm:$0xff]   ;;  %v691_v23 = vld [vmem:[%s923_s1 + $0x38] sm:$0xff]   ;;  %v696_v24 = vld [vmem:[%s923_s1 + $0xc0] sm:$0xff]  }
   0x9   :  { %512 = vmatprep.subr.bf16.mxu0 %v726_v1  ;;  %v692_v25 = vld [vmem:[%s924_s0] ss:$24 sps:$4 sm:$0xff]   ;;  %v701_v26 = vld [vmem:[%s923_s1 + $0x130] sm:$0xff]   ;;  %v699_v28 = vld [vmem:[%s923_s1 + $0xc8] sm:$0xff]  }
   0xa   :  { %v697_v27 = vld [vmem:[%s923_s1 + $0x80] sm:$0xff]   ;;  %v704_v29 = vld [vmem:[%s923_s1 + $0x138] sm:$0xff]   ;;  %v700_v30 = vld [vmem:[%s923_s1 + $0x88] sm:$0xff]  }
   0xb   :  { %631 = vmatpush3.bf16.msra.mxu1 %v677_v6  ;;  %v702_v31 = vld [vmem:[%s923_s1 + $0xd0] sm:$0xff]   ;;  %v707_v32 = vld [vmem:[%s923_s1 + $0x140] sm:$0xff]   ;;  %v705_v34 = vld [vmem:[%s923_s1 + $0xd8] sm:$0xff]  }
   0xc   :  { %632 = vmatprep.subr.bf16.mxu1 %v678_v7  ;;  %513 = vmatpush1.bf16.msra.mxu0 %v686_v12  ;;  %v703_v33 = vld [vmem:[%s923_s1 + $0x90] sm:$0xff]   ;;  %v710_v35 = vld [vmem:[%s923_s1 + $0x148] sm:$0xff]   ;;  %v706_v36 = vld [vmem:[%s923_s1 + $0x98] sm:$0xff]  }
   0xd   :  { %514 = vmatprep.subr.bf16.mxu0 %v726_v1  ;;  %v708_v37 = vld [vmem:[%s923_s1 + $0xe0] sm:$0xff]   ;;  %v713_v38 = vld [vmem:[%s923_s1 + $0x150] sm:$0xff]   ;;  %v711_v41 = vld [vmem:[%s923_s1 + $0xe8] sm:$0xff]  }
   0xe   :  { %v721_v39 = vld [vmem:[%s924_s0 + $0xc] ss:$24 sps:$4 sm:$0xff]   ;;  %v716_v44 = vld [vmem:[%s923_s1 + $0x158] sm:$0xff]   ;;  %v714_v46 = vld [vmem:[%s923_s1 + $0xf0] sm:$0xff]  }
   0xf   :  { %633 = vmatpush3.bf16.msra.mxu1 %v679_v9  ;;  %v709_v40 = vld [vmem:[%s923_s1 + $0xa0] sm:$0xff]   ;;  %v725_v42 = vld [vmem:[%s924_s0 + $0x14] ss:$24 sps:$4 sm:$0xff]   ;;  %v717_v50 = vld [vmem:[%s923_s1 + $0xf8] sm:$0xff]  }
  0x10   :  { %634 = vmatprep.subr.bf16.mxu1 %v681_v11  ;;  %515 = vmatpush1.bf16.msra.mxu0 %v689_v15  ;;  %v111_v43 = vld [vmem:[%s925_s2] sm:$0xff]  ;;  %v712_v45 = vld [vmem:[%s923_s1 + $0xa8] sm:$0xff]   ;;  %v715_v49 = vld [vmem:[%s923_s1 + $0xb0] sm:$0xff]  }
  0x11   :  { %516 = vmatprep.subr.bf16.mxu0 %v726_v1  ;;  %616 = vmatprep.mubr.msk.bf16.mxu0 %vm422_vm0, %v725_v42  ;;  %v112_v47 = vld [vmem:[%s925_s2 + $0x8] sm:$0xff]  ;;  %v722_v48 = vld [vmem:[%s923_s1 + $0x160] sm:$0xff]   ;;  %v718_v52 = vld [vmem:[%s923_s1 + $0xb8] sm:$0xff]  }
  0x12   :  { %115 = vperm.xlu0 %671, %v111_v43   ;;  %v723_v51 = vld [vmem:[%s924_s0 + $0x10] ss:$24 sps:$4 sm:$0xff]  }
  0x13   :  { %635 = vmatpush3.bf16.msra.mxu1 %v682_v13  ;;  %v719_v53 = vld [vmem:[%s924_s0 + $0x8] ss:$24 sps:$4 sm:$0xff]  }
  0x14   :  { %636 = vmatprep.subr.bf16.mxu1 %v684_v14  ;;  %517 = vmatpush1.bf16.msra.mxu0 %v695_v19 }
  0x15   :  { %518 = vmatprep.subr.bf16.mxu0 %v726_v1 }
  0x16   :  { %120 = vperm.xlu0 %671, %v112_v47  }
  0x17   :  { %637 = vmatpush3.bf16.msra.mxu1 %v685_v16 }
  0x18   :  { %638 = vmatprep.subr.bf16.mxu1 %v687_v17  ;;  %519 = vmatpush1.bf16.msra.mxu0 %v698_v22 }
  0x19   :  { %520 = vmatprep.subr.bf16.mxu0 %v726_v1 }
  0x1b   :  { %639 = vmatpush3.bf16.msra.mxu1 %v688_v20 }
  0x1c   :  { %640 = vmatprep.subr.bf16.mxu1 %v690_v21  ;;  %521 = vmatpush1.bf16.msra.mxu0 %v701_v26 }
  0x1d   :  { %522 = vmatprep.subr.bf16.mxu0 %v726_v1 }
  0x1f   :  { %641 = vmatpush3.bf16.msra.mxu1 %v691_v23 }
  0x20   :  { %648 = vmatprep.subr.bf16.mxu1 %v696_v24  ;;  %523 = vmatpush1.bf16.msra.mxu0 %v704_v29 }
  0x21   :  { %524 = vmatprep.subr.bf16.mxu0 %v726_v1 }
  0x22   :  { %459 = vmatmul.mubr.bf16.vlgmr.msra.gmra.mrb[0].mxu1 %v692_v25 }
  0x23   :  { %649 = vmatpush3.bf16.msra.mxu1 %v697_v27  ;;  %499 = vmatprep.mubr.bf16.mxu1 %v721_v39 }
  0x24   :  { %650 = vmatprep.subr.bf16.mxu1 %v699_v28  ;;  %525 = vmatpush1.bf16.msra.mxu0 %v707_v32 }
  0x25   :  { %526 = vmatprep.subr.bf16.mxu0 %v726_v1 }
  0x27   :  { %651 = vmatpush3.bf16.msra.mxu1 %v700_v30 }
  0x28   :  { %652 = vmatprep.subr.bf16.mxu1 %v702_v31  ;;  %527 = vmatpush1.bf16.msra.mxu0 %v710_v35 }
  0x29   :  { %528 = vmatprep.subr.bf16.mxu0 %v726_v1 }
  0x2b   :  { %653 = vmatpush3.bf16.msra.mxu1 %v703_v33 }
  0x2c   :  { %654 = vmatprep.subr.bf16.mxu1 %v705_v34  ;;  %529 = vmatpush1.bf16.msra.mxu0 %v713_v38 }
  0x2d   :  { %530 = vmatprep.subr.bf16.mxu0 %v726_v1 }
  0x2f   :  { %655 = vmatpush3.bf16.msra.mxu1 %v706_v36 }
  0x30   :  { %656 = vmatprep.subr.bf16.mxu1 %v708_v37  ;;  %531 = vmatpush1.bf16.msra.mxu0 %v716_v44 }
  0x31   :  { %532 = vmatprep.subr.bf16.mxu0 %v726_v1 }
  0x33   :  { %657 = vmatpush3.bf16.msra.mxu1 %v709_v40 }
  0x34   :  { %658 = vmatprep.subr.bf16.mxu1 %v711_v41  ;;  %533 = vmatpush1.bf16.msra.mxu0 %v722_v48 }
  0x37   :  { %659 = vmatpush3.bf16.msra.mxu1 %v712_v45  ;;  %541 = vmatmul.mubr.bf16.vlgmr.msra.gmra.mrb[0].mxu0 %v723_v51 }
  0x38   :  { %660 = vmatprep.subr.bf16.mxu1 %v714_v46 }
  0x3b   :  { %661 = vmatpush3.bf16.msra.mxu1 %v715_v49 }
  0x3c   :  { %662 = vmatprep.subr.bf16.mxu1 %v717_v50 }
  0x3f   :  { %663 = vmatpush3.bf16.msra.mxu1 %v718_v52 }
  0x42   :  { %500 = vmatmul.mubr.bf16.vlgmr.msra.gmra.mrb[4].mxu1 %v719_v53 }
  0x91   :  { %v116_v60 = vpop.permute.xlu0 %115 }
  0x95   :  { %v121_v2 = vpop.permute.xlu0 %120 }
  0xf5   :  { %v642_v54 = vpop.f32.mrb[0].mxu1 }
  0xf6   :  { %v643_v55 = vpop.f32.mrb[1].mxu1 }
  0xf7   :  { %v644_v56 = vadd.f32 %v643_v55, %v642_v54  ;;  %v645_v57 = vpop.f32.mrb[2].mxu1 }
  0xf8   :  { %v646_v58 = vpop.f32.mrb[3].mxu1 }
  0xf9   :  { %v647_v59 = vadd.f32 %v646_v58, %v645_v57  ;;  %v461_v4 = vadd.f32 %v644_v56, %v116_v60 }
  0xfb   :  { %v464_v8 = vadd.f32 %v647_v59, %v121_v2 }
 0x10a   :  { %v542_v61 = vpop.f32.mrb[0].mxu0 }
 0x10b   :  { %v544_v62 = vpop.f32.mrb[1].mxu0 }
 0x10c   :  { %v545_v63 = vpop.f32.mrb[2].mxu0 }
 0x10d   :  { %v547_v0 = vpop.f32.mrb[3].mxu0 }
 0x115   :  { %v664_v1 = vpop.f32.mrb[4].mxu1 }
 0x116   :  { %v665_v3 = vpop.f32.mrb[5].mxu1 }
 0x117   :  { %v666_v5 = vadd.f32 %v665_v3, %v664_v1  ;;  %v667_v6 = vpop.f32.mrb[6].mxu1 }
 0x118   :  { %v668_v7 = vpop.f32.mrb[7].mxu1 }
 0x119   :  { %v502_v9 = vadd.f32 %v666_v5, %v461_v4  ;;  %v669_v10 = vadd.f32 %v668_v7, %v667_v6 }
 0x11b   :  { %v543_v11 = vadd.f32 %v542_v61, %v502_v9  ;;  %v505_v12 = vadd.f32 %v669_v10, %v464_v8 }
 0x11d   :  { %v546_v13 = vadd.f32 %v545_v63, %v505_v12  ;;  %v549_v14 = vmax.f32 %v543_v11, 0.0 }
 0x11f   :  { %v550_v15 = vmax.f32 %v546_v13, 0.0 }
 0x121   :  { %v624_v16 = vpack.c.bf16 %v550_v15, %v549_v14 }
 0x123   :  { %625 = vst [vmem:[%s926_s3] sm:$0xff] %v624_v16  }

// kernel: unetpp_forward.40
= control target key start
LH: loop header
LB: loop body
LE: loop exit
PB: predicated region body
PF: predicated region fallthrough
CT: control target
= control target key end

     0   :  { %v629_v1 = vmov 0   ;;  %vm352_vm0 = vcmask 719872   ;;  %vm356_vm1 = vcmask 1043456   ;;  %s824_s1 = inlined_call_operand.vmem [shape: bf16[216,512], index: 1, kind: input, shape index: {}]   ;;  %s825_s0 = inlined_call_operand.vmem [shape: bf16[8,216], index: 0, kind: input, shape index: {}]   ;;  %s826_s2 = inlined_call_operand.vmem [shape: f32[8,1], index: 2, kind: input, shape index: {}]   ;;  %s827_s3 = inlined_call_operand.vmem [shape: bf16[8,512], index: 3, kind: output, shape index: {}]  }
   0x1   :  { %v545_v0 = vld [vmem:[%s824_s1 + $0x4] ss:$16 sps:$4 sm:$0xff]   ;;  %544 = vset.pattern.permute.xlu0 %v629_v1  ;;  %v547_v2 = vld [vmem:[%s824_s1 + $0xc] ss:$16 sps:$4 sm:$0xff]   ;;  %v549_v3 = vld [vmem:[%s824_s1] ss:$16 sps:$4 sm:$0xff]  }
   0x2   :  { %369 = vmatprep.subr.bf16.mxu0 %v545_v0  ;;  %v550_v4 = vld [vmem:[%s824_s1 + $0x8] ss:$16 sps:$4 sm:$0xff]   ;;  %410 = vmatprep.subr.bf16.mxu1 %v547_v2  ;;  %v551_v5 = vld [vmem:[%s824_s1 + $0x24] ss:$16 sps:$4 sm:$0xff]   ;;  %v553_v6 = vld [vmem:[%s824_s1 + $0x2c] ss:$16 sps:$4 sm:$0xff]  }
   0x3   :  { %370 = vmatpush1.bf16.msra.mxu0 %v549_v3  ;;  %411 = vmatpush1.bf16.msra.mxu1 %v550_v4  ;;  %v555_v7 = vld [vmem:[%s824_s1 + $0x20] ss:$16 sps:$4 sm:$0xff]   ;;  %v556_v8 = vld [vmem:[%s824_s1 + $0x28] ss:$16 sps:$4 sm:$0xff]   ;;  %v557_v9 = vld [vmem:[%s824_s1 + $0x44] ss:$16 sps:$4 sm:$0xff]  }
   0x4   :  { %371 = vmatprep.subr.bf16.mxu0 %v551_v5  ;;  %412 = vmatprep.subr.bf16.mxu1 %v553_v6  ;;  %v559_v10 = vld [vmem:[%s824_s1 + $0x4c] ss:$16 sps:$4 sm:$0xff]   ;;  %v561_v11 = vld [vmem:[%s824_s1 + $0x40] ss:$16 sps:$4 sm:$0xff]   ;;  %v562_v12 = vld [vmem:[%s824_s1 + $0x48] ss:$16 sps:$4 sm:$0xff]  }
   0x5   :  { %v563_v13 = vld [vmem:[%s824_s1 + $0x64] ss:$16 sps:$4 sm:$0xff]   ;;  %v565_v14 = vld [vmem:[%s824_s1 + $0x6c] ss:$16 sps:$4 sm:$0xff]   ;;  %v567_v15 = vld [vmem:[%s824_s1 + $0x60] ss:$16 sps:$4 sm:$0xff]  }
   0x6   :  { %v568_v16 = vld [vmem:[%s824_s1 + $0x68] ss:$16 sps:$4 sm:$0xff]   ;;  %v569_v17 = vld [vmem:[%s824_s1 + $0x84] ss:$16 sps:$4 sm:$0xff]   ;;  %v571_v18 = vld [vmem:[%s824_s1 + $0x8c] ss:$16 sps:$4 sm:$0xff]  }
   0x7   :  { %372 = vmatpush1.bf16.msra.mxu0 %v555_v7  ;;  %413 = vmatpush1.bf16.msra.mxu1 %v556_v8  ;;  %v573_v19 = vld [vmem:[%s824_s1 + $0x80] ss:$16 sps:$4 sm:$0xff]   ;;  %v574_v20 = vld [vmem:[%s824_s1 + $0x88] ss:$16 sps:$4 sm:$0xff]   ;;  %v575_v21 = vld [vmem:[%s824_s1 + $0xa4] ss:$16 sps:$4 sm:$0xff]  }
   0x8   :  { %373 = vmatprep.subr.bf16.mxu0 %v557_v9  ;;  %414 = vmatprep.subr.bf16.mxu1 %v559_v10  ;;  %v577_v22 = vld [vmem:[%s824_s1 + $0xac] ss:$16 sps:$4 sm:$0xff]   ;;  %v579_v23 = vld [vmem:[%s824_s1 + $0xa0] ss:$16 sps:$4 sm:$0xff]   ;;  %v580_v24 = vld [vmem:[%s824_s1 + $0xa8] ss:$16 sps:$4 sm:$0xff]  }
   0x9   :  { %v581_v25 = vld [vmem:[%s824_s1 + $0xc4] ss:$16 sps:$4 sm:$0xff]   ;;  %v583_v26 = vld [vmem:[%s824_s1 + $0xcc] ss:$16 sps:$4 sm:$0xff]   ;;  %v585_v27 = vld [vmem:[%s824_s1 + $0xc0] ss:$16 sps:$4 sm:$0xff]  }
   0xa   :  { %v586_v28 = vld [vmem:[%s824_s1 + $0xc8] ss:$16 sps:$4 sm:$0xff]   ;;  %v587_v29 = vld [vmem:[%s824_s1 + $0xe4] ss:$16 sps:$4 sm:$0xff]   ;;  %v589_v30 = vld [vmem:[%s824_s1 + $0xec] ss:$16 sps:$4 sm:$0xff]  }
   0xb   :  { %374 = vmatpush1.bf16.msra.mxu0 %v561_v11  ;;  %415 = vmatpush1.bf16.msra.mxu1 %v562_v12  ;;  %v591_v31 = vld [vmem:[%s824_s1 + $0xe0] ss:$16 sps:$4 sm:$0xff]   ;;  %v592_v32 = vld [vmem:[%s824_s1 + $0xe8] ss:$16 sps:$4 sm:$0xff]   ;;  %v593_v33 = vld [vmem:[%s824_s1 + $0x104] ss:$16 sps:$4 sm:$0xff]  }
   0xc   :  { %375 = vmatprep.subr.bf16.mxu0 %v563_v13  ;;  %416 = vmatprep.subr.bf16.mxu1 %v565_v14  ;;  %v595_v34 = vld [vmem:[%s824_s1 + $0x10c] ss:$16 sps:$4 sm:$0xff]   ;;  %v597_v35 = vld [vmem:[%s824_s1 + $0x100] ss:$16 sps:$4 sm:$0xff]   ;;  %v598_v36 = vld [vmem:[%s824_s1 + $0x108] ss:$16 sps:$4 sm:$0xff]  }
   0xd   :  { %v599_v37 = vld [vmem:[%s824_s1 + $0x124] ss:$16 sps:$4 sm:$0xff]   ;;  %v601_v38 = vld [vmem:[%s824_s1 + $0x12c] ss:$16 sps:$4 sm:$0xff]   ;;  %v603_v41 = vld [vmem:[%s824_s1 + $0x120] ss:$16 sps:$4 sm:$0xff]  }
   0xe   :  { %v15_v39 = vld [vmem:[%s825_s0] sm:$0xff]  ;;  %v604_v42 = vld [vmem:[%s824_s1 + $0x128] ss:$16 sps:$4 sm:$0xff]   ;;  %v607_v44 = vld [vmem:[%s824_s1 + $0x14c] ss:$16 sps:$4 sm:$0xff]  }
   0xf   :  { %376 = vmatpush1.bf16.msra.mxu0 %v567_v15  ;;  %417 = vmatpush1.bf16.msra.mxu1 %v568_v16  ;;  %v70_v40 = vld [vmem:[%s826_s2] sm:$0xff]  ;;  %v478_v45 = vcombine.high %v15_v39, %v15_v39  ;;  %v610_v47 = vld [vmem:[%s824_s1 + $0x148] ss:$16 sps:$4 sm:$0xff]   ;;  %v613_v49 = vld [vmem:[%s824_s1 + $0x16c] ss:$16 sps:$4 sm:$0xff]   ;;  %v477_v0 = vcombine.low %v15_v39, %v15_v39 }
  0x10   :  { %377 = vmatprep.subr.bf16.mxu0 %v569_v17  ;;  %418 = vmatprep.subr.bf16.mxu1 %v571_v18  ;;  %v605_v43 = vld [vmem:[%s824_s1 + $0x144] ss:$16 sps:$4 sm:$0xff]   ;;  %v609_v46 = vld [vmem:[%s824_s1 + $0x140] ss:$16 sps:$4 sm:$0xff]   ;;  %v616_v51 = vld [vmem:[%s824_s1 + $0x168] ss:$16 sps:$4 sm:$0xff]  }
  0x11   :  { %73 = vperm.xlu0 %544, %v70_v40   ;;  %536 = vmatprep.mubr.msk.bf16.mxu0 %vm352_vm0, %v478_v45  ;;  %v611_v48 = vld [vmem:[%s824_s1 + $0x164] ss:$16 sps:$4 sm:$0xff]   ;;  %v615_v50 = vld [vmem:[%s824_s1 + $0x160] ss:$16 sps:$4 sm:$0xff]   ;;  %v619_v53 = vld [vmem:[%s824_s1 + $0x18c] ss:$16 sps:$4 sm:$0xff]  }
  0x12   :  { %538 = vmatprep.mubr.msk.bf16.mxu1 %vm352_vm0, %v478_v45  ;;  %v617_v52 = vld [vmem:[%s824_s1 + $0x184] ss:$16 sps:$4 sm:$0xff]   ;;  %v69_v55 = vld [vmem:[%s824_s1 + $0x1a8] sm:$0xff]  ;;  %v621_v56 = vld [vmem:[%s824_s1 + $0x180] ss:$16 sps:$4 sm:$0xff]  }
  0x13   :  { %378 = vmatpush1.bf16.msra.mxu0 %v573_v19  ;;  %419 = vmatpush1.bf16.msra.mxu1 %v574_v20  ;;  %v68_v54 = vld [vmem:[%s824_s1 + $0x1a0] sm:$0xff]  ;;  %v622_v57 = vld [vmem:[%s824_s1 + $0x188] ss:$16 sps:$4 sm:$0xff]   ;;  %v534_v59 = vcombine.high %v69_v55, %v69_v55  ;;  %v533_v61 = vcombine.low %v69_v55, %v69_v55 }
  0x14   :  { %379 = vmatprep.subr.bf16.mxu0 %v575_v21  ;;  %420 = vmatprep.subr.bf16.mxu1 %v577_v22  ;;  %v532_v58 = vcombine.high %v68_v54, %v68_v54  ;;  %v531_v60 = vcombine.low %v68_v54, %v68_v54 }
  0x15   :  { %v364_v63 = vsel %vm356_vm1, %v533_v61, 0 }
  0x16   :  { %v358_v62 = vsel %vm356_vm1, %v531_v60, 0 }
  0x17   :  { %380 = vmatpush1.bf16.msra.mxu0 %v579_v23  ;;  %421 = vmatpush1.bf16.msra.mxu1 %v580_v24 }
  0x18   :  { %381 = vmatprep.subr.bf16.mxu0 %v581_v25  ;;  %422 = vmatprep.subr.bf16.mxu1 %v583_v26 }
  0x1b   :  { %382 = vmatpush1.bf16.msra.mxu0 %v585_v27  ;;  %423 = vmatpush1.bf16.msra.mxu1 %v586_v28 }
  0x1c   :  { %383 = vmatprep.subr.bf16.mxu0 %v587_v29  ;;  %424 = vmatprep.subr.bf16.mxu1 %v589_v30 }
  0x1f   :  { %384 = vmatpush1.bf16.msra.mxu0 %v591_v31  ;;  %425 = vmatpush1.bf16.msra.mxu1 %v592_v32 }
  0x20   :  { %385 = vmatprep.subr.bf16.mxu0 %v593_v33  ;;  %426 = vmatprep.subr.bf16.mxu1 %v595_v34 }
  0x23   :  { %386 = vmatpush1.bf16.msra.mxu0 %v597_v35  ;;  %427 = vmatpush1.bf16.msra.mxu1 %v598_v36 }
  0x24   :  { %387 = vmatprep.subr.bf16.mxu0 %v599_v37  ;;  %428 = vmatprep.subr.bf16.mxu1 %v601_v38 }
  0x27   :  { %388 = vmatpush1.bf16.msra.mxu0 %v603_v41  ;;  %429 = vmatpush1.bf16.msra.mxu1 %v604_v42 }
  0x28   :  { %389 = vmatprep.subr.bf16.mxu0 %v605_v43  ;;  %430 = vmatprep.subr.bf16.mxu1 %v607_v44 }
  0x2b   :  { %390 = vmatpush1.bf16.msra.mxu0 %v609_v46  ;;  %431 = vmatpush1.bf16.msra.mxu1 %v610_v47 }
  0x2c   :  { %391 = vmatprep.subr.bf16.mxu0 %v611_v48  ;;  %432 = vmatprep.subr.bf16.mxu1 %v613_v49 }
  0x2f   :  { %392 = vmatpush1.bf16.msra.mxu0 %v615_v50  ;;  %433 = vmatpush1.bf16.msra.mxu1 %v616_v51 }
  0x30   :  { %393 = vmatprep.subr.bf16.mxu0 %v617_v52  ;;  %434 = vmatprep.subr.bf16.mxu1 %v619_v53 }
  0x33   :  { %394 = vmatpush1.bf16.msra.mxu0 %v621_v56  ;;  %435 = vmatpush1.bf16.msra.mxu1 %v622_v57 }
  0x34   :  { %535 = vmatprep.subr.msk.bf16.mxu0 %vm356_vm1, %v532_v58  ;;  %537 = vmatprep.subr.msk.bf16.mxu1 %vm356_vm1, %v534_v59 }
  0x37   :  { %396 = vmatpush1.bf16.msra.mxu0 %v358_v62  ;;  %437 = vmatpush1.bf16.msra.mxu1 %v364_v63 }
  0x3a   :  { %402 = vmatmul.mubr.bf16.vlgmr.msra.gmra.mrb[0].mxu0 %v477_v0  ;;  %443 = vmatmul.mubr.bf16.vlgmr.msra.gmra.mrb[0].mxu1 %v477_v0 }
  0x90   :  { %v74_v1 = vpop.permute.xlu0 %73 }
 0x10d   :  { %v403_v2 = vpop.f32.mrb[0].mxu0  ;;  %v444_v3 = vpop.f32.mrb[0].mxu1 }
 0x10e   :  { %v404_v4 = vadd.f32 %v403_v2, %v74_v1  ;;  %v445_v5 = vadd.f32 %v444_v3, %v74_v1  ;;  %v405_v6 = vpop.f32.mrb[1].mxu0  ;;  %v446_v7 = vpop.f32.mrb[1].mxu1 }
 0x10f   :  { %v406_v8 = vadd.f32 %v405_v6, %v74_v1  ;;  %v447_v9 = vadd.f32 %v446_v7, %v74_v1  ;;  %v407_v10 = vpop.f32.mrb[2].mxu0  ;;  %v448_v11 = vpop.f32.mrb[2].mxu1 }
 0x110   :  { %v451_v12 = vmax.f32 %v404_v4, 0.0  ;;  %v453_v13 = vmax.f32 %v445_v5, 0.0  ;;  %v408_v14 = vpop.f32.mrb[3].mxu0  ;;  %v449_v15 = vpop.f32.mrb[3].mxu1 }
 0x111   :  { %v452_v16 = vmax.f32 %v406_v8, 0.0  ;;  %v454_v17 = vmax.f32 %v447_v9, 0.0 }
 0x113   :  { %v541_v18 = vpack.c.bf16 %v452_v16, %v451_v12  ;;  %v542_v19 = vpack.c.bf16 %v454_v17, %v453_v13 }
 0x115   :  { %471 = vst [vmem:[%s827_s3] sm:$0xff] %v541_v18  ;;  %472 = vst [vmem:[%s827_s3 + $0x8] sm:$0xff] %v542_v19 }

// kernel: unetpp_forward.47
= control target key start
LH: loop header
LB: loop body
LE: loop exit
PB: predicated region body
PF: predicated region fallthrough
CT: control target
= control target key end

     0   :  { %v865_v1 = vmov 0   ;;  %vm465_vm0 = vcmask 261120   ;;  %s1120_s1 = inlined_call_operand.vmem [shape: bf16[288,512], index: 1, kind: input, shape index: {}]   ;;  %s1121_s0 = inlined_call_operand.vmem [shape: bf16[8,288], index: 0, kind: input, shape index: {}]   ;;  %s1122_s2 = inlined_call_operand.vmem [shape: f32[8,1], index: 2, kind: input, shape index: {}]   ;;  %s1123_s3 = inlined_call_operand.vmem [shape: bf16[8,512], index: 3, kind: output, shape index: {}]  }
   0x1   :  { %v754_v0 = vld [vmem:[%s1120_s1 + $0x4] ss:$16 sps:$4 sm:$0xff]   ;;  %753 = vset.pattern.permute.xlu0 %v865_v1  ;;  %v756_v2 = vld [vmem:[%s1120_s1 + $0xc] ss:$16 sps:$4 sm:$0xff]   ;;  %v758_v3 = vld [vmem:[%s1120_s1] ss:$16 sps:$4 sm:$0xff]  }
   0x2   :  { %469 = vmatprep.subr.bf16.mxu0 %v754_v0  ;;  %v759_v4 = vld [vmem:[%s1120_s1 + $0x8] ss:$16 sps:$4 sm:$0xff]   ;;  %551 = vmatprep.subr.bf16.mxu1 %v756_v2  ;;  %v760_v5 = vld [vmem:[%s1120_s1 + $0x24] ss:$16 sps:$4 sm:$0xff]   ;;  %v762_v6 = vld [vmem:[%s1120_s1 + $0x2c] ss:$16 sps:$4 sm:$0xff]  }
   0x3   :  { %470 = vmatpush1.bf16.msra.mxu0 %v758_v3  ;;  %552 = vmatpush1.bf16.msra.mxu1 %v759_v4  ;;  %v764_v7 = vld [vmem:[%s1120_s1 + $0x20] ss:$16 sps:$4 sm:$0xff]   ;;  %v765_v8 = vld [vmem:[%s1120_s1 + $0x28] ss:$16 sps:$4 sm:$0xff]   ;;  %v766_v9 = vld [vmem:[%s1120_s1 + $0x44] ss:$16 sps:$4 sm:$0xff]  }
   0x4   :  { %471 = vmatprep.subr.bf16.mxu0 %v760_v5  ;;  %553 = vmatprep.subr.bf16.mxu1 %v762_v6  ;;  %v768_v10 = vld [vmem:[%s1120_s1 + $0x4c] ss:$16 sps:$4 sm:$0xff]   ;;  %v770_v11 = vld [vmem:[%s1120_s1 + $0x40] ss:$16 sps:$4 sm:$0xff]   ;;  %v771_v12 = vld [vmem:[%s1120_s1 + $0x48] ss:$16 sps:$4 sm:$0xff]  }
   0x5   :  { %v772_v13 = vld [vmem:[%s1120_s1 + $0x64] ss:$16 sps:$4 sm:$0xff]   ;;  %v774_v14 = vld [vmem:[%s1120_s1 + $0x6c] ss:$16 sps:$4 sm:$0xff]   ;;  %v776_v15 = vld [vmem:[%s1120_s1 + $0x60] ss:$16 sps:$4 sm:$0xff]  }
   0x6   :  { %v777_v16 = vld [vmem:[%s1120_s1 + $0x68] ss:$16 sps:$4 sm:$0xff]   ;;  %v778_v17 = vld [vmem:[%s1120_s1 + $0x84] ss:$16 sps:$4 sm:$0xff]   ;;  %v780_v18 = vld [vmem:[%s1120_s1 + $0x8c] ss:$16 sps:$4 sm:$0xff]  }
   0x7   :  { %472 = vmatpush1.bf16.msra.mxu0 %v764_v7  ;;  %554 = vmatpush1.bf16.msra.mxu1 %v765_v8  ;;  %v782_v19 = vld [vmem:[%s1120_s1 + $0x80] ss:$16 sps:$4 sm:$0xff]   ;;  %v783_v20 = vld [vmem:[%s1120_s1 + $0x88] ss:$16 sps:$4 sm:$0xff]   ;;  %v784_v21 = vld [vmem:[%s1120_s1 + $0xa4] ss:$16 sps:$4 sm:$0xff]  }
   0x8   :  { %473 = vmatprep.subr.bf16.mxu0 %v766_v9  ;;  %555 = vmatprep.subr.bf16.mxu1 %v768_v10  ;;  %v786_v22 = vld [vmem:[%s1120_s1 + $0xac] ss:$16 sps:$4 sm:$0xff]   ;;  %v788_v23 = vld [vmem:[%s1120_s1 + $0xa0] ss:$16 sps:$4 sm:$0xff]   ;;  %v789_v24 = vld [vmem:[%s1120_s1 + $0xa8] ss:$16 sps:$4 sm:$0xff]  }
   0x9   :  { %v790_v25 = vld [vmem:[%s1120_s1 + $0xc4] ss:$16 sps:$4 sm:$0xff]   ;;  %v792_v26 = vld [vmem:[%s1120_s1 + $0xcc] ss:$16 sps:$4 sm:$0xff]   ;;  %v794_v27 = vld [vmem:[%s1120_s1 + $0xc0] ss:$16 sps:$4 sm:$0xff]  }
   0xa   :  { %v795_v28 = vld [vmem:[%s1120_s1 + $0xc8] ss:$16 sps:$4 sm:$0xff]   ;;  %v796_v29 = vld [vmem:[%s1120_s1 + $0xe4] ss:$16 sps:$4 sm:$0xff]   ;;  %v798_v30 = vld [vmem:[%s1120_s1 + $0xec] ss:$16 sps:$4 sm:$0xff]  }
   0xb   :  { %474 = vmatpush1.bf16.msra.mxu0 %v770_v11  ;;  %556 = vmatpush1.bf16.msra.mxu1 %v771_v12  ;;  %v800_v31 = vld [vmem:[%s1120_s1 + $0xe0] ss:$16 sps:$4 sm:$0xff]   ;;  %v801_v32 = vld [vmem:[%s1120_s1 + $0xe8] ss:$16 sps:$4 sm:$0xff]   ;;  %v802_v33 = vld [vmem:[%s1120_s1 + $0x104] ss:$16 sps:$4 sm:$0xff]  }
   0xc   :  { %475 = vmatprep.subr.bf16.mxu0 %v772_v13  ;;  %557 = vmatprep.subr.bf16.mxu1 %v774_v14  ;;  %v804_v34 = vld [vmem:[%s1120_s1 + $0x10c] ss:$16 sps:$4 sm:$0xff]   ;;  %v806_v35 = vld [vmem:[%s1120_s1 + $0x100] ss:$16 sps:$4 sm:$0xff]   ;;  %v807_v36 = vld [vmem:[%s1120_s1 + $0x108] ss:$16 sps:$4 sm:$0xff]  }
   0xd   :  { %v808_v37 = vld [vmem:[%s1120_s1 + $0x124] ss:$16 sps:$4 sm:$0xff]   ;;  %v810_v38 = vld [vmem:[%s1120_s1 + $0x12c] ss:$16 sps:$4 sm:$0xff]   ;;  %v812_v39 = vld [vmem:[%s1120_s1 + $0x120] ss:$16 sps:$4 sm:$0xff]  }
   0xe   :  { %v813_v40 = vld [vmem:[%s1120_s1 + $0x128] ss:$16 sps:$4 sm:$0xff]   ;;  %v814_v41 = vld [vmem:[%s1120_s1 + $0x144] ss:$16 sps:$4 sm:$0xff]   ;;  %v816_v42 = vld [vmem:[%s1120_s1 + $0x14c] ss:$16 sps:$4 sm:$0xff]  }
   0xf   :  { %476 = vmatpush1.bf16.msra.mxu0 %v776_v15  ;;  %558 = vmatpush1.bf16.msra.mxu1 %v777_v16  ;;  %v818_v43 = vld [vmem:[%s1120_s1 + $0x140] ss:$16 sps:$4 sm:$0xff]   ;;  %v819_v44 = vld [vmem:[%s1120_s1 + $0x148] ss:$16 sps:$4 sm:$0xff]   ;;  %v820_v45 = vld [vmem:[%s1120_s1 + $0x164] ss:$16 sps:$4 sm:$0xff]  }
  0x10   :  { %477 = vmatprep.subr.bf16.mxu0 %v778_v17  ;;  %559 = vmatprep.subr.bf16.mxu1 %v780_v18  ;;  %v822_v46 = vld [vmem:[%s1120_s1 + $0x16c] ss:$16 sps:$4 sm:$0xff]   ;;  %v15_v47 = vld [vmem:[%s1121_s0] sm:$0xff]  ;;  %v825_v50 = vld [vmem:[%s1120_s1 + $0x168] ss:$16 sps:$4 sm:$0xff]  }
  0x11   :  { %v824_v48 = vld [vmem:[%s1120_s1 + $0x160] ss:$16 sps:$4 sm:$0xff]   ;;  %v660_v49 = vcombine.high %v15_v47, %v15_v47  ;;  %v826_v51 = vld [vmem:[%s1120_s1 + $0x184] ss:$16 sps:$4 sm:$0xff]   ;;  %v828_v52 = vld [vmem:[%s1120_s1 + $0x18c] ss:$16 sps:$4 sm:$0xff]   ;;  %v659_v7 = vcombine.low %v15_v47, %v15_v47 }
  0x12   :  { %v830_v53 = vld [vmem:[%s1120_s1 + $0x180] ss:$16 sps:$4 sm:$0xff]   ;;  %v831_v54 = vld [vmem:[%s1120_s1 + $0x188] ss:$16 sps:$4 sm:$0xff]   ;;  %v832_v55 = vld [vmem:[%s1120_s1 + $0x1a4] ss:$16 sps:$4 sm:$0xff]  }
  0x13   :  { %478 = vmatpush1.bf16.msra.mxu0 %v782_v19  ;;  %560 = vmatpush1.bf16.msra.mxu1 %v783_v20  ;;  %v834_v56 = vld [vmem:[%s1120_s1 + $0x1ac] ss:$16 sps:$4 sm:$0xff]   ;;  %v89_v57 = vld [vmem:[%s1122_s2] sm:$0xff]  ;;  %v837_v59 = vld [vmem:[%s1120_s1 + $0x1a8] ss:$16 sps:$4 sm:$0xff]  }
  0x14   :  { %479 = vmatprep.subr.bf16.mxu0 %v784_v21  ;;  %561 = vmatprep.subr.bf16.mxu1 %v786_v22  ;;  %v836_v58 = vld [vmem:[%s1120_s1 + $0x1a0] ss:$16 sps:$4 sm:$0xff]   ;;  %v838_v60 = vld [vmem:[%s1120_s1 + $0x1c4] ss:$16 sps:$4 sm:$0xff]   ;;  %v840_v61 = vld [vmem:[%s1120_s1 + $0x1cc] ss:$16 sps:$4 sm:$0xff]  }
  0x15   :  { %501 = vmatprep.mubr.bf16.mxu0 %v660_v49  ;;  %583 = vmatprep.mubr.bf16.mxu1 %v660_v49  ;;  %v842_v62 = vld [vmem:[%s1120_s1 + $0x1c0] ss:$16 sps:$4 sm:$0xff]   ;;  %v843_v63 = vld [vmem:[%s1120_s1 + $0x1c8] ss:$16 sps:$4 sm:$0xff]   ;;  %v844_v0 = vld [vmem:[%s1120_s1 + $0x1e4] ss:$16 sps:$4 sm:$0xff]  }
  0x16   :  { %92 = vperm.xlu0 %753, %v89_v57   ;;  %v846_v2 = vld [vmem:[%s1120_s1 + $0x1ec] ss:$16 sps:$4 sm:$0xff]   ;;  %v848_v3 = vld [vmem:[%s1120_s1 + $0x1e0] ss:$16 sps:$4 sm:$0xff]   ;;  %v849_v4 = vld [vmem:[%s1120_s1 + $0x1e8] ss:$16 sps:$4 sm:$0xff]  }
  0x17   :  { %480 = vmatpush1.bf16.msra.mxu0 %v788_v23  ;;  %562 = vmatpush1.bf16.msra.mxu1 %v789_v24  ;;  %v855_v5 = vld [vmem:[%s1120_s1 + $0x204] ss:$16 sps:$4 sm:$0xff]   ;;  %v858_v6 = vld [vmem:[%s1120_s1 + $0x20c] ss:$16 sps:$4 sm:$0xff]   ;;  %v853_v8 = vld [vmem:[%s1120_s1 + $0x200] ss:$16 sps:$4 sm:$0xff]  }
  0x18   :  { %481 = vmatprep.subr.bf16.mxu0 %v790_v25  ;;  %563 = vmatprep.subr.bf16.mxu1 %v792_v26  ;;  %v856_v9 = vld [vmem:[%s1120_s1 + $0x208] ss:$16 sps:$4 sm:$0xff]   ;;  %v861_v10 = vld [vmem:[%s1120_s1 + $0x224] ss:$16 sps:$4 sm:$0xff]   ;;  %v864_v11 = vld [vmem:[%s1120_s1 + $0x22c] ss:$16 sps:$4 sm:$0xff]  }
  0x19   :  { %v859_v12 = vld [vmem:[%s1120_s1 + $0x220] ss:$16 sps:$4 sm:$0xff]   ;;  %v862_v13 = vld [vmem:[%s1120_s1 + $0x228] ss:$16 sps:$4 sm:$0xff]  }
  0x1a   :  { %v852_v14 = vld [vmem:[%s1121_s0 + $0x8] ss:$0 sps:$4 sm:$0xff]  }
  0x1b   :  { %482 = vmatpush1.bf16.msra.mxu0 %v794_v27  ;;  %564 = vmatpush1.bf16.msra.mxu1 %v795_v28 }
  0x1c   :  { %483 = vmatprep.subr.bf16.mxu0 %v796_v29  ;;  %565 = vmatprep.subr.bf16.mxu1 %v798_v30 }
  0x1f   :  { %484 = vmatpush1.bf16.msra.mxu0 %v800_v31  ;;  %566 = vmatpush1.bf16.msra.mxu1 %v801_v32 }
  0x20   :  { %485 = vmatprep.subr.bf16.mxu0 %v802_v33  ;;  %567 = vmatprep.subr.bf16.mxu1 %v804_v34 }
  0x23   :  { %486 = vmatpush1.bf16.msra.mxu0 %v806_v35  ;;  %568 = vmatpush1.bf16.msra.mxu1 %v807_v36 }
  0x24   :  { %487 = vmatprep.subr.bf16.mxu0 %v808_v37  ;;  %569 = vmatprep.subr.bf16.mxu1 %v810_v38 }
  0x27   :  { %488 = vmatpush1.bf16.msra.mxu0 %v812_v39  ;;  %570 = vmatpush1.bf16.msra.mxu1 %v813_v40 }
  0x28   :  { %489 = vmatprep.subr.bf16.mxu0 %v814_v41  ;;  %571 = vmatprep.subr.bf16.mxu1 %v816_v42 }
  0x2b   :  { %490 = vmatpush1.bf16.msra.mxu0 %v818_v43  ;;  %572 = vmatpush1.bf16.msra.mxu1 %v819_v44 }
  0x2c   :  { %491 = vmatprep.subr.bf16.mxu0 %v820_v45  ;;  %573 = vmatprep.subr.bf16.mxu1 %v822_v46 }
  0x2f   :  { %492 = vmatpush1.bf16.msra.mxu0 %v824_v48  ;;  %574 = vmatpush1.bf16.msra.mxu1 %v825_v50 }
  0x30   :  { %493 = vmatprep.subr.bf16.mxu0 %v826_v51  ;;  %575 = vmatprep.subr.bf16.mxu1 %v828_v52 }
  0x33   :  { %494 = vmatpush1.bf16.msra.mxu0 %v830_v53  ;;  %576 = vmatpush1.bf16.msra.mxu1 %v831_v54 }
  0x34   :  { %495 = vmatprep.subr.bf16.mxu0 %v832_v55  ;;  %577 = vmatprep.subr.bf16.mxu1 %v834_v56 }
  0x37   :  { %496 = vmatpush1.bf16.msra.mxu0 %v836_v58  ;;  %578 = vmatpush1.bf16.msra.mxu1 %v837_v59 }
  0x38   :  { %497 = vmatprep.subr.bf16.mxu0 %v838_v60  ;;  %579 = vmatprep.subr.bf16.mxu1 %v840_v61 }
  0x3b   :  { %498 = vmatpush1.bf16.msra.mxu0 %v842_v62  ;;  %580 = vmatpush1.bf16.msra.mxu1 %v843_v63 }
  0x3c   :  { %499 = vmatprep.subr.bf16.mxu0 %v844_v0  ;;  %581 = vmatprep.subr.bf16.mxu1 %v846_v2 }
  0x3f   :  { %500 = vmatpush1.bf16.msra.mxu0 %v848_v3  ;;  %582 = vmatpush1.bf16.msra.mxu1 %v849_v4 }
  0x40   :  { %510 = vmatprep.subr.bf16.mxu0 %v855_v5  ;;  %592 = vmatprep.subr.bf16.mxu1 %v858_v6 }
  0x42   :  { %502 = vmatmul.mubr.bf16.vlgmr.msra.gmra.mrb[0].mxu0 %v659_v7  ;;  %584 = vmatmul.mubr.bf16.vlgmr.msra.gmra.mrb[0].mxu1 %v659_v7 }
  0x43   :  { %511 = vmatpush1.bf16.msra.mxu0 %v853_v8  ;;  %593 = vmatpush1.bf16.msra.mxu1 %v856_v9 }
  0x44   :  { %512 = vmatprep.subr.bf16.mxu0 %v861_v10  ;;  %594 = vmatprep.subr.bf16.mxu1 %v864_v11 }
  0x45   :  { %542 = vmatprep.mubr.bf16.mxu0 %v865_v1  ;;  %624 = vmatprep.mubr.bf16.mxu1 %v865_v1 }
  0x47   :  { %513 = vmatpush1.bf16.msra.mxu0 %v859_v12  ;;  %595 = vmatpush1.bf16.msra.mxu1 %v862_v13 }
  0x4e   :  { %734 = vmatmul.mubr.msk.bf16.vlgmr.msra.gmra.mrb[0].mxu0 %vm465_vm0, %v852_v14  ;;  %735 = vmatmul.mubr.msk.bf16.vlgmr.msra.gmra.mrb[0].mxu1 %vm465_vm0, %v852_v14 }
  0x95   :  { %v93_v15 = vpop.permute.xlu0 %92 }
 0x121   :  { %v544_v16 = vpop.f32.mrb[0].mxu0  ;;  %v626_v17 = vpop.f32.mrb[0].mxu1 }
 0x122   :  { %v740_v18 = vadd.f32 %v544_v16, %v93_v15  ;;  %v742_v19 = vadd.f32 %v626_v17, %v93_v15  ;;  %v546_v20 = vpop.f32.mrb[1].mxu0  ;;  %v628_v21 = vpop.f32.mrb[1].mxu1 }
 0x123   :  { %v741_v22 = vadd.f32 %v546_v20, %v93_v15  ;;  %v743_v23 = vadd.f32 %v628_v21, %v93_v15  ;;  %v548_v24 = vpop.f32.mrb[2].mxu0  ;;  %v630_v1 = vpop.f32.mrb[2].mxu1 }
 0x124   :  { %v633_v25 = vmax.f32 %v740_v18, 0.0  ;;  %v635_v26 = vmax.f32 %v742_v19, 0.0  ;;  %v549_v27 = vpop.f32.mrb[3].mxu0  ;;  %v631_v28 = vpop.f32.mrb[3].mxu1 }
 0x125   :  { %v634_v29 = vmax.f32 %v741_v22, 0.0  ;;  %v636_v30 = vmax.f32 %v743_v23, 0.0 }
 0x127   :  { %v738_v31 = vpack.c.bf16 %v634_v29, %v633_v25  ;;  %v739_v32 = vpack.c.bf16 %v636_v30, %v635_v26 }
 0x129   :  { %653 = vst [vmem:[%s1123_s3] sm:$0xff] %v738_v31  ;;  %654 = vst [vmem:[%s1123_s3 + $0x8] sm:$0xff] %v739_v32 }

// kernel: unetpp_forward.56
= control target key start
LH: loop header
LB: loop body
LE: loop exit
PB: predicated region body
PF: predicated region fallthrough
CT: control target
= control target key end

     0   :  { %v1036_v1 = vmov 0   ;;  %vm577_vm0 = vcmask 1043456   ;;  %vm573_vm1 = vcmask 850944   ;;  %s1345_s1 = inlined_call_operand.vmem [shape: bf16[360,512], index: 1, kind: input, shape index: {}]   ;;  %s1346_s0 = inlined_call_operand.vmem [shape: bf16[8,360], index: 0, kind: input, shape index: {}]   ;;  %s1347_s2 = inlined_call_operand.vmem [shape: f32[8,1], index: 2, kind: input, shape index: {}]   ;;  %s1348_s3 = inlined_call_operand.vmem [shape: bf16[8,512], index: 3, kind: output, shape index: {}]  }
   0x1   :  { %v897_v0 = vld [vmem:[%s1345_s1 + $0x4] ss:$16 sps:$4 sm:$0xff]   ;;  %896 = vset.pattern.permute.xlu0 %v1036_v1  ;;  %v899_v2 = vld [vmem:[%s1345_s1 + $0xc] ss:$16 sps:$4 sm:$0xff]   ;;  %v901_v3 = vld [vmem:[%s1345_s1] ss:$16 sps:$4 sm:$0xff]  }
   0x2   :  { %590 = vmatprep.subr.bf16.mxu0 %v897_v0  ;;  %v902_v4 = vld [vmem:[%s1345_s1 + $0x8] ss:$16 sps:$4 sm:$0xff]   ;;  %672 = vmatprep.subr.bf16.mxu1 %v899_v2  ;;  %v903_v5 = vld [vmem:[%s1345_s1 + $0x24] ss:$16 sps:$4 sm:$0xff]   ;;  %v905_v6 = vld [vmem:[%s1345_s1 + $0x2c] ss:$16 sps:$4 sm:$0xff]  }
   0x3   :  { %591 = vmatpush1.bf16.msra.mxu0 %v901_v3  ;;  %673 = vmatpush1.bf16.msra.mxu1 %v902_v4  ;;  %v907_v7 = vld [vmem:[%s1345_s1 + $0x20] ss:$16 sps:$4 sm:$0xff]   ;;  %v908_v8 = vld [vmem:[%s1345_s1 + $0x28] ss:$16 sps:$4 sm:$0xff]   ;;  %v909_v9 = vld [vmem:[%s1345_s1 + $0x44] ss:$16 sps:$4 sm:$0xff]  }
   0x4   :  { %592 = vmatprep.subr.bf16.mxu0 %v903_v5  ;;  %674 = vmatprep.subr.bf16.mxu1 %v905_v6  ;;  %v911_v10 = vld [vmem:[%s1345_s1 + $0x4c] ss:$16 sps:$4 sm:$0xff]   ;;  %v913_v11 = vld [vmem:[%s1345_s1 + $0x40] ss:$16 sps:$4 sm:$0xff]   ;;  %v914_v12 = vld [vmem:[%s1345_s1 + $0x48] ss:$16 sps:$4 sm:$0xff]  }
   0x5   :  { %v915_v13 = vld [vmem:[%s1345_s1 + $0x64] ss:$16 sps:$4 sm:$0xff]   ;;  %v917_v14 = vld [vmem:[%s1345_s1 + $0x6c] ss:$16 sps:$4 sm:$0xff]   ;;  %v919_v15 = vld [vmem:[%s1345_s1 + $0x60] ss:$16 sps:$4 sm:$0xff]  }
   0x6   :  { %v920_v16 = vld [vmem:[%s1345_s1 + $0x68] ss:$16 sps:$4 sm:$0xff]   ;;  %v921_v17 = vld [vmem:[%s1345_s1 + $0x84] ss:$16 sps:$4 sm:$0xff]   ;;  %v923_v18 = vld [vmem:[%s1345_s1 + $0x8c] ss:$16 sps:$4 sm:$0xff]  }
   0x7   :  { %593 = vmatpush1.bf16.msra.mxu0 %v907_v7  ;;  %675 = vmatpush1.bf16.msra.mxu1 %v908_v8  ;;  %v925_v19 = vld [vmem:[%s1345_s1 + $0x80] ss:$16 sps:$4 sm:$0xff]   ;;  %v926_v20 = vld [vmem:[%s1345_s1 + $0x88] ss:$16 sps:$4 sm:$0xff]   ;;  %v927_v21 = vld [vmem:[%s1345_s1 + $0xa4] ss:$16 sps:$4 sm:$0xff]  }
   0x8   :  { %594 = vmatprep.subr.bf16.mxu0 %v909_v9  ;;  %676 = vmatprep.subr.bf16.mxu1 %v911_v10  ;;  %v929_v22 = vld [vmem:[%s1345_s1 + $0xac] ss:$16 sps:$4 sm:$0xff]   ;;  %v931_v23 = vld [vmem:[%s1345_s1 + $0xa0] ss:$16 sps:$4 sm:$0xff]   ;;  %v932_v24 = vld [vmem:[%s1345_s1 + $0xa8] ss:$16 sps:$4 sm:$0xff]  }
   0x9   :  { %v933_v25 = vld [vmem:[%s1345_s1 + $0xc4] ss:$16 sps:$4 sm:$0xff]   ;;  %v935_v26 = vld [vmem:[%s1345_s1 + $0xcc] ss:$16 sps:$4 sm:$0xff]   ;;  %v937_v27 = vld [vmem:[%s1345_s1 + $0xc0] ss:$16 sps:$4 sm:$0xff]  }
   0xa   :  { %v938_v28 = vld [vmem:[%s1345_s1 + $0xc8] ss:$16 sps:$4 sm:$0xff]   ;;  %v939_v29 = vld [vmem:[%s1345_s1 + $0xe4] ss:$16 sps:$4 sm:$0xff]   ;;  %v941_v30 = vld [vmem:[%s1345_s1 + $0xec] ss:$16 sps:$4 sm:$0xff]  }
   0xb   :  { %595 = vmatpush1.bf16.msra.mxu0 %v913_v11  ;;  %677 = vmatpush1.bf16.msra.mxu1 %v914_v12  ;;  %v943_v31 = vld [vmem:[%s1345_s1 + $0xe0] ss:$16 sps:$4 sm:$0xff]   ;;  %v944_v32 = vld [vmem:[%s1345_s1 + $0xe8] ss:$16 sps:$4 sm:$0xff]   ;;  %v945_v33 = vld [vmem:[%s1345_s1 + $0x104] ss:$16 sps:$4 sm:$0xff]  }
   0xc   :  { %596 = vmatprep.subr.bf16.mxu0 %v915_v13  ;;  %678 = vmatprep.subr.bf16.mxu1 %v917_v14  ;;  %v947_v34 = vld [vmem:[%s1345_s1 + $0x10c] ss:$16 sps:$4 sm:$0xff]   ;;  %v949_v35 = vld [vmem:[%s1345_s1 + $0x100] ss:$16 sps:$4 sm:$0xff]   ;;  %v950_v36 = vld [vmem:[%s1345_s1 + $0x108] ss:$16 sps:$4 sm:$0xff]  }
   0xd   :  { %v951_v37 = vld [vmem:[%s1345_s1 + $0x124] ss:$16 sps:$4 sm:$0xff]   ;;  %v953_v38 = vld [vmem:[%s1345_s1 + $0x12c] ss:$16 sps:$4 sm:$0xff]   ;;  %v955_v39 = vld [vmem:[%s1345_s1 + $0x120] ss:$16 sps:$4 sm:$0xff]  }
   0xe   :  { %v956_v40 = vld [vmem:[%s1345_s1 + $0x128] ss:$16 sps:$4 sm:$0xff]   ;;  %v957_v41 = vld [vmem:[%s1345_s1 + $0x144] ss:$16 sps:$4 sm:$0xff]   ;;  %v959_v42 = vld [vmem:[%s1345_s1 + $0x14c] ss:$16 sps:$4 sm:$0xff]  }
   0xf   :  { %597 = vmatpush1.bf16.msra.mxu0 %v919_v15  ;;  %679 = vmatpush1.bf16.msra.mxu1 %v920_v16  ;;  %v961_v43 = vld [vmem:[%s1345_s1 + $0x140] ss:$16 sps:$4 sm:$0xff]   ;;  %v962_v44 = vld [vmem:[%s1345_s1 + $0x148] ss:$16 sps:$4 sm:$0xff]   ;;  %v963_v45 = vld [vmem:[%s1345_s1 + $0x164] ss:$16 sps:$4 sm:$0xff]  }
  0x10   :  { %598 = vmatprep.subr.bf16.mxu0 %v921_v17  ;;  %680 = vmatprep.subr.bf16.mxu1 %v923_v18  ;;  %v965_v46 = vld [vmem:[%s1345_s1 + $0x16c] ss:$16 sps:$4 sm:$0xff]   ;;  %v15_v47 = vld [vmem:[%s1346_s0] sm:$0xff]  ;;  %v968_v50 = vld [vmem:[%s1345_s1 + $0x168] ss:$16 sps:$4 sm:$0xff]  }
  0x11   :  { %v967_v48 = vld [vmem:[%s1345_s1 + $0x160] ss:$16 sps:$4 sm:$0xff]   ;;  %v781_v49 = vcombine.high %v15_v47, %v15_v47  ;;  %v969_v51 = vld [vmem:[%s1345_s1 + $0x184] ss:$16 sps:$4 sm:$0xff]   ;;  %v971_v52 = vld [vmem:[%s1345_s1 + $0x18c] ss:$16 sps:$4 sm:$0xff]   ;;  %v780_v7 = vcombine.low %v15_v47, %v15_v47 }
  0x12   :  { %v973_v53 = vld [vmem:[%s1345_s1 + $0x180] ss:$16 sps:$4 sm:$0xff]   ;;  %v974_v54 = vld [vmem:[%s1345_s1 + $0x188] ss:$16 sps:$4 sm:$0xff]   ;;  %v975_v55 = vld [vmem:[%s1345_s1 + $0x1a4] ss:$16 sps:$4 sm:$0xff]  }
  0x13   :  { %599 = vmatpush1.bf16.msra.mxu0 %v925_v19  ;;  %681 = vmatpush1.bf16.msra.mxu1 %v926_v20  ;;  %v977_v56 = vld [vmem:[%s1345_s1 + $0x1ac] ss:$16 sps:$4 sm:$0xff]   ;;  %v979_v57 = vld [vmem:[%s1345_s1 + $0x1a0] ss:$16 sps:$4 sm:$0xff]   ;;  %v980_v58 = vld [vmem:[%s1345_s1 + $0x1a8] ss:$16 sps:$4 sm:$0xff]  }
  0x14   :  { %600 = vmatprep.subr.bf16.mxu0 %v927_v21  ;;  %682 = vmatprep.subr.bf16.mxu1 %v929_v22  ;;  %v981_v59 = vld [vmem:[%s1345_s1 + $0x1c4] ss:$16 sps:$4 sm:$0xff]   ;;  %v983_v60 = vld [vmem:[%s1345_s1 + $0x1cc] ss:$16 sps:$4 sm:$0xff]   ;;  %v985_v61 = vld [vmem:[%s1345_s1 + $0x1c0] ss:$16 sps:$4 sm:$0xff]  }
  0x15   :  { %622 = vmatprep.mubr.bf16.mxu0 %v781_v49  ;;  %704 = vmatprep.mubr.bf16.mxu1 %v781_v49  ;;  %v986_v62 = vld [vmem:[%s1345_s1 + $0x1c8] ss:$16 sps:$4 sm:$0xff]   ;;  %v987_v63 = vld [vmem:[%s1345_s1 + $0x1e4] ss:$16 sps:$4 sm:$0xff]   ;;  %v989_v0 = vld [vmem:[%s1345_s1 + $0x1ec] ss:$16 sps:$4 sm:$0xff]  }
  0x16   :  { %v991_v2 = vld [vmem:[%s1345_s1 + $0x1e0] ss:$16 sps:$4 sm:$0xff]   ;;  %v992_v3 = vld [vmem:[%s1345_s1 + $0x1e8] ss:$16 sps:$4 sm:$0xff]   ;;  %v998_v5 = vld [vmem:[%s1345_s1 + $0x204] ss:$16 sps:$4 sm:$0xff]  }
  0x17   :  { %601 = vmatpush1.bf16.msra.mxu0 %v931_v23  ;;  %683 = vmatpush1.bf16.msra.mxu1 %v932_v24  ;;  %v107_v4 = vld [vmem:[%s1347_s2] sm:$0xff]  ;;  %v1001_v6 = vld [vmem:[%s1345_s1 + $0x20c] ss:$16 sps:$4 sm:$0xff]   ;;  %v999_v9 = vld [vmem:[%s1345_s1 + $0x208] ss:$16 sps:$4 sm:$0xff]  }
  0x18   :  { %602 = vmatprep.subr.bf16.mxu0 %v933_v25  ;;  %684 = vmatprep.subr.bf16.mxu1 %v935_v26  ;;  %v996_v8 = vld [vmem:[%s1345_s1 + $0x200] ss:$16 sps:$4 sm:$0xff]   ;;  %v1004_v10 = vld [vmem:[%s1345_s1 + $0x224] ss:$16 sps:$4 sm:$0xff]   ;;  %v1007_v11 = vld [vmem:[%s1345_s1 + $0x22c] ss:$16 sps:$4 sm:$0xff]  }
  0x19   :  { %110 = vperm.xlu0 %896, %v107_v4   ;;  %v1002_v12 = vld [vmem:[%s1345_s1 + $0x220] ss:$16 sps:$4 sm:$0xff]   ;;  %v1005_v13 = vld [vmem:[%s1345_s1 + $0x228] ss:$16 sps:$4 sm:$0xff]   ;;  %v1010_v14 = vld [vmem:[%s1345_s1 + $0x244] ss:$16 sps:$4 sm:$0xff]  }
  0x1a   :  { %v1013_v15 = vld [vmem:[%s1345_s1 + $0x24c] ss:$16 sps:$4 sm:$0xff]   ;;  %v1008_v16 = vld [vmem:[%s1345_s1 + $0x240] ss:$16 sps:$4 sm:$0xff]   ;;  %v1011_v17 = vld [vmem:[%s1345_s1 + $0x248] ss:$16 sps:$4 sm:$0xff]  }
  0x1b   :  { %603 = vmatpush1.bf16.msra.mxu0 %v937_v27  ;;  %685 = vmatpush1.bf16.msra.mxu1 %v938_v28  ;;  %v1016_v18 = vld [vmem:[%s1345_s1 + $0x264] ss:$16 sps:$4 sm:$0xff]   ;;  %v1014_v19 = vld [vmem:[%s1345_s1 + $0x260] ss:$16 sps:$4 sm:$0xff]   ;;  %v1017_v20 = vld [vmem:[%s1345_s1 + $0x268] ss:$16 sps:$4 sm:$0xff]  }
  0x1c   :  { %604 = vmatprep.subr.bf16.mxu0 %v939_v29  ;;  %686 = vmatprep.subr.bf16.mxu1 %v941_v30  ;;  %v1022_v21 = vld [vmem:[%s1345_s1 + $0x284] ss:$16 sps:$4 sm:$0xff]   ;;  %v1025_v22 = vld [vmem:[%s1345_s1 + $0x28c] ss:$16 sps:$4 sm:$0xff]   ;;  %v1020_v23 = vld [vmem:[%s1345_s1 + $0x280] ss:$16 sps:$4 sm:$0xff]  }
  0x1d   :  { %v1023_v24 = vld [vmem:[%s1345_s1 + $0x288] ss:$16 sps:$4 sm:$0xff]   ;;  %v1028_v25 = vld [vmem:[%s1345_s1 + $0x2a4] ss:$16 sps:$4 sm:$0xff]   ;;  %v1031_v26 = vld [vmem:[%s1345_s1 + $0x2ac] ss:$16 sps:$4 sm:$0xff]  }
  0x1e   :  { %v105_v27 = vld [vmem:[%s1345_s1 + $0x2c0] sm:$0xff]  ;;  %v106_v28 = vld [vmem:[%s1345_s1 + $0x2c8] sm:$0xff] }
  0x1f   :  { %605 = vmatpush1.bf16.msra.mxu0 %v943_v31  ;;  %687 = vmatpush1.bf16.msra.mxu1 %v944_v32  ;;  %v1026_v29 = vld [vmem:[%s1345_s1 + $0x2a0] ss:$16 sps:$4 sm:$0xff]   ;;  %v1029_v30 = vld [vmem:[%s1345_s1 + $0x2a8] ss:$16 sps:$4 sm:$0xff]   ;;  %v872_v31 = vcombine.high %v105_v27, %v105_v27  ;;  %v874_v32 = vcombine.high %v106_v28, %v106_v28 }
  0x20   :  { %606 = vmatprep.subr.bf16.mxu0 %v945_v33  ;;  %688 = vmatprep.subr.bf16.mxu1 %v947_v34  ;;  %v871_v33 = vcombine.low %v105_v27, %v105_v27  ;;  %v873_v34 = vcombine.low %v106_v28, %v106_v28 }
  0x23   :  { %607 = vmatpush1.bf16.msra.mxu0 %v949_v35  ;;  %689 = vmatpush1.bf16.msra.mxu1 %v950_v36  ;;  %v579_v35 = vsel %vm577_vm0, %v871_v33, 0  ;;  %v585_v36 = vsel %vm577_vm0, %v873_v34, 0 }
  0x24   :  { %608 = vmatprep.subr.bf16.mxu0 %v951_v37  ;;  %690 = vmatprep.subr.bf16.mxu1 %v953_v38  ;;  %v995_v37 = vld [vmem:[%s1346_s0 + $0x8] ss:$0 sps:$4 sm:$0xff]  }
  0x27   :  { %609 = vmatpush1.bf16.msra.mxu0 %v955_v39  ;;  %691 = vmatpush1.bf16.msra.mxu1 %v956_v40 }
  0x28   :  { %610 = vmatprep.subr.bf16.mxu0 %v957_v41  ;;  %692 = vmatprep.subr.bf16.mxu1 %v959_v42 }
  0x2b   :  { %611 = vmatpush1.bf16.msra.mxu0 %v961_v43  ;;  %693 = vmatpush1.bf16.msra.mxu1 %v962_v44 }
  0x2c   :  { %612 = vmatprep.subr.bf16.mxu0 %v963_v45  ;;  %694 = vmatprep.subr.bf16.mxu1 %v965_v46 }
  0x2f   :  { %613 = vmatpush1.bf16.msra.mxu0 %v967_v48  ;;  %695 = vmatpush1.bf16.msra.mxu1 %v968_v50 }
  0x30   :  { %614 = vmatprep.subr.bf16.mxu0 %v969_v51  ;;  %696 = vmatprep.subr.bf16.mxu1 %v971_v52 }
  0x33   :  { %615 = vmatpush1.bf16.msra.mxu0 %v973_v53  ;;  %697 = vmatpush1.bf16.msra.mxu1 %v974_v54 }
  0x34   :  { %616 = vmatprep.subr.bf16.mxu0 %v975_v55  ;;  %698 = vmatprep.subr.bf16.mxu1 %v977_v56 }
  0x37   :  { %617 = vmatpush1.bf16.msra.mxu0 %v979_v57  ;;  %699 = vmatpush1.bf16.msra.mxu1 %v980_v58 }
  0x38   :  { %618 = vmatprep.subr.bf16.mxu0 %v981_v59  ;;  %700 = vmatprep.subr.bf16.mxu1 %v983_v60 }
  0x3b   :  { %619 = vmatpush1.bf16.msra.mxu0 %v985_v61  ;;  %701 = vmatpush1.bf16.msra.mxu1 %v986_v62 }
  0x3c   :  { %620 = vmatprep.subr.bf16.mxu0 %v987_v63  ;;  %702 = vmatprep.subr.bf16.mxu1 %v989_v0 }
  0x3f   :  { %621 = vmatpush1.bf16.msra.mxu0 %v991_v2  ;;  %703 = vmatpush1.bf16.msra.mxu1 %v992_v3 }
  0x40   :  { %631 = vmatprep.subr.bf16.mxu0 %v998_v5  ;;  %713 = vmatprep.subr.bf16.mxu1 %v1001_v6 }
  0x42   :  { %623 = vmatmul.mubr.bf16.vlgmr.msra.gmra.mrb[0].mxu0 %v780_v7  ;;  %705 = vmatmul.mubr.bf16.vlgmr.msra.gmra.mrb[0].mxu1 %v780_v7 }
  0x43   :  { %632 = vmatpush1.bf16.msra.mxu0 %v996_v8  ;;  %714 = vmatpush1.bf16.msra.mxu1 %v999_v9 }
  0x44   :  { %633 = vmatprep.subr.bf16.mxu0 %v1004_v10  ;;  %715 = vmatprep.subr.bf16.mxu1 %v1007_v11 }
  0x45   :  { %663 = vmatprep.mubr.bf16.mxu0 %v1036_v1  ;;  %745 = vmatprep.mubr.bf16.mxu1 %v1036_v1  ;;  %v1019_v1 = vld [vmem:[%s1345_s1 + $0x26c] ss:$16 sps:$4 sm:$0xff]  }
  0x47   :  { %634 = vmatpush1.bf16.msra.mxu0 %v1002_v12  ;;  %716 = vmatpush1.bf16.msra.mxu1 %v1005_v13 }
  0x48   :  { %635 = vmatprep.subr.bf16.mxu0 %v1010_v14  ;;  %717 = vmatprep.subr.bf16.mxu1 %v1013_v15 }
  0x4b   :  { %636 = vmatpush1.bf16.msra.mxu0 %v1008_v16  ;;  %718 = vmatpush1.bf16.msra.mxu1 %v1011_v17 }
  0x4c   :  { %637 = vmatprep.subr.bf16.mxu0 %v1016_v18  ;;  %719 = vmatprep.subr.bf16.mxu1 %v1019_v1 }
  0x4f   :  { %638 = vmatpush1.bf16.msra.mxu0 %v1014_v19  ;;  %720 = vmatpush1.bf16.msra.mxu1 %v1017_v20 }
  0x50   :  { %639 = vmatprep.subr.bf16.mxu0 %v1022_v21  ;;  %721 = vmatprep.subr.bf16.mxu1 %v1025_v22 }
  0x53   :  { %640 = vmatpush1.bf16.msra.mxu0 %v1020_v23  ;;  %722 = vmatpush1.bf16.msra.mxu1 %v1023_v24 }
  0x54   :  { %641 = vmatprep.subr.bf16.mxu0 %v1028_v25  ;;  %723 = vmatprep.subr.bf16.mxu1 %v1031_v26 }
  0x57   :  { %642 = vmatpush1.bf16.msra.mxu0 %v1026_v29  ;;  %724 = vmatpush1.bf16.msra.mxu1 %v1029_v30 }
  0x58   :  { %875 = vmatprep.subr.msk.bf16.mxu0 %vm577_vm0, %v872_v31  ;;  %877 = vmatprep.subr.msk.bf16.mxu1 %vm577_vm0, %v874_v32 }
  0x5b   :  { %644 = vmatpush1.bf16.msra.mxu0 %v579_v35  ;;  %726 = vmatpush1.bf16.msra.mxu1 %v585_v36 }
  0x5e   :  { %876 = vmatmul.mubr.msk.bf16.vlgmr.msra.gmra.mrb[0].mxu0 %vm573_vm1, %v995_v37  ;;  %878 = vmatmul.mubr.msk.bf16.vlgmr.msra.gmra.mrb[0].mxu1 %vm573_vm1, %v995_v37 }
  0x98   :  { %v111_v38 = vpop.permute.xlu0 %110 }
 0x131   :  { %v665_v39 = vpop.f32.mrb[0].mxu0  ;;  %v747_v40 = vpop.f32.mrb[0].mxu1 }
 0x132   :  { %v883_v41 = vadd.f32 %v665_v39, %v111_v38  ;;  %v885_v42 = vadd.f32 %v747_v40, %v111_v38  ;;  %v667_v43 = vpop.f32.mrb[1].mxu0  ;;  %v749_v44 = vpop.f32.mrb[1].mxu1 }
 0x133   :  { %v884_v45 = vadd.f32 %v667_v43, %v111_v38  ;;  %v886_v46 = vadd.f32 %v749_v44, %v111_v38  ;;  %v669_v47 = vpop.f32.mrb[2].mxu0  ;;  %v751_v48 = vpop.f32.mrb[2].mxu1 }
 0x134   :  { %v754_v49 = vmax.f32 %v883_v41, 0.0  ;;  %v756_v50 = vmax.f32 %v885_v42, 0.0  ;;  %v670_v51 = vpop.f32.mrb[3].mxu0  ;;  %v752_v52 = vpop.f32.mrb[3].mxu1 }
 0x135   :  { %v755_v53 = vmax.f32 %v884_v45, 0.0  ;;  %v757_v54 = vmax.f32 %v886_v46, 0.0 }
 0x137   :  { %v881_v55 = vpack.c.bf16 %v755_v53, %v754_v49  ;;  %v882_v56 = vpack.c.bf16 %v757_v54, %v756_v50 }
 0x139   :  { %774 = vst [vmem:[%s1348_s3] sm:$0xff] %v881_v55  ;;  %775 = vst [vmem:[%s1348_s3 + $0x8] sm:$0xff] %v882_v56 }

// kernel: unetpp_forward.69
= control target key start
LH: loop header
LB: loop body
LE: loop exit
PB: predicated region body
PF: predicated region fallthrough
CT: control target
= control target key end

     0   :  { %v225_v1 = vmov 0   ;;  %vm76_vm0 = vcmask 261120   ;;  %v32_v12 = vlaneseq  ;;  %v226_v15 = vmov 1966171168   ;;  %s280_s1 = inlined_call_operand.vmem [shape: bf16[32,512], index: 1, kind: input, shape index: {}]   ;;  %s281_s2 = inlined_call_operand.<no memory space> [shape: f32[1,1], index: 2, kind: input, shape index: {}]   ;;  %s282_s0 = inlined_call_operand.vmem [shape: bf16[1,32], index: 0, kind: input, shape index: {}]   ;;  %s283_s3 = inlined_call_operand.vmem [shape: f32[1,512], index: 3, kind: output, shape index: {}]  }
   0x1   :  { %v213_v0 = vld [vmem:[%s280_s1 + $0x4] ss:$16 sps:$4 sm:$0xff]   ;;  %112 = vmatprep.mubr.bf16.mxu0 %v225_v1  ;;  %153 = vmatprep.mubr.bf16.mxu1 %v225_v1  ;;  %v8_v2 = vstv %s281_s2  ;;  %v215_v3 = vld [vmem:[%s280_s1 + $0xc] ss:$16 sps:$4 sm:$0xff]   ;;  %v217_v4 = vld [vmem:[%s280_s1] ss:$16 sps:$4 sm:$0xff]   ;;  %v169_v16 = vunpack.c.l.s4 %v226_v15 }
   0x2   :  { %212 = vset.pattern.permute.xlu0 %v225_v1  ;;  %9 = vst [vmem:[#allocation2] sm:$0x1] %v8_v2  ;;  %80 = vmatprep.subr.bf16.mxu0 %v213_v0  ;;  %v218_v5 = vld [vmem:[%s280_s1 + $0x8] ss:$16 sps:$4 sm:$0xff]   ;;  %v219_v6 = vld [vmem:[%s280_s1 + $0x24] ss:$16 sps:$4 sm:$0xff]  }
   0x3   :  { %121 = vmatprep.subr.bf16.mxu1 %v215_v3  ;;  %81 = vmatpush1.bf16.msra.mxu0 %v217_v4  ;;  %v221_v7 = vld [vmem:[%s280_s1 + $0x2c] ss:$16 sps:$4 sm:$0xff]   ;;  %v223_v8 = vld [vmem:[%s280_s1 + $0x20] ss:$16 sps:$4 sm:$0xff]   ;;  %v224_v9 = vld [vmem:[%s280_s1 + $0x28] ss:$16 sps:$4 sm:$0xff]   ;;  %v170_v19 = vunpack.c.0.s8 %v169_v16 }
   0x4   :  { %122 = vmatpush1.bf16.msra.mxu1 %v218_v5  ;;  %82 = vmatprep.subr.bf16.mxu0 %v219_v6  ;;  %v17_v10 = vld [vmem:[%s282_s0] sm:$0x1]  ;;  %v33_v13 = vshrl.u32 %v32_v12, 7  ;;  %vm193_vm1 = vcmp.lt.s32.totalorder %v32_v12, 512 }
   0x5   :  { %123 = vmatprep.subr.bf16.mxu1 %v221_v7 }
   0x6   :  { %v34_v14 = vsub.s32 0, %v33_v13  ;;  %v173_v26 = vsub.s32 %v170_v19, %v33_v13 }
   0x7   :  { %83 = vmatpush1.bf16.msra.mxu0 %v223_v8 }
   0x8   :  { %124 = vmatpush1.bf16.msra.mxu1 %v224_v9 }
   0x9   :  { %v26_v11 = vld [vmem:[#allocation2] sm:$0x1] }
   0xa   :  { %29 = vperm.xlu0 %212, %v26_v11   ;;  %208 = vmatmul.mubr.msk.bf16.vlgmr.msra.gmra.mrb[0].mxu0 %vm76_vm0, %v17_v10 }
   0xb   :  { %209 = vmatmul.mubr.msk.bf16.vlgmr.msra.gmra.mrb[0].mxu1 %vm76_vm0, %v17_v10 }
  0x89   :  { %v30_v17 = vpop.permute.xlu0 %29 }
  0x8a   :  { %v35_v18 = vrot.slane %v30_v17, %v34_v14 }
  0xdd   :  { %v114_v20 = vpop.f32.mrb[0].mxu0 }
  0xde   :  { %v155_v21 = vpop.f32.mrb[0].mxu1  ;;  %v115_v22 = vadd.f32 %v114_v20, %v35_v18  ;;  %v116_v24 = vpop.f32.mrb[1].mxu0 }
  0xdf   :  { %v156_v23 = vadd.f32 %v155_v21, %v35_v18  ;;  %v157_v25 = vpop.f32.mrb[1].mxu1  ;;  %v117_v27 = vadd.f32 %v116_v24, %v35_v18  ;;  %v118_v29 = vpop.f32.mrb[2].mxu0 }
  0xe0   :  { %v158_v28 = vadd.f32 %v157_v25, %v35_v18  ;;  %v159_v30 = vpop.f32.mrb[2].mxu1  ;;  %v119_v31 = vpop.f32.mrb[3].mxu0 }
  0xe1   :  { %v160_v32 = vpop.f32.mrb[3].mxu1  ;;  %v166_v33 = vcombine.low %v115_v22, %v117_v27 }
  0xe2   :  { %v167_v34 = vcombine.low %v156_v23, %v158_v28 }
  0xe3   :  { %v174_v35 = vrot.slane %v166_v33, %v173_v26 }
  0xe4   :  { %v181_v36 = vrot.slane %v167_v34, %v173_v26 }
  0xe6   :  { %v182_v37 = vcombine.low %v174_v35, %v181_v36 }
  0xe8   :  { %v189_v38 = vrot.slane %v182_v37, %v173_v26 }
  0xea   :  { %195 = vst.msk [vmem:[%s283_s3] sm:$0xf] %vm193_vm1, %v189_v38 }

// kernel: unetpp_forward.67
= control target key start
LH: loop header
LB: loop body
LE: loop exit
PB: predicated region body
PF: predicated region fallthrough
CT: control target
= control target key end

     0   :  { %v1176_v1 = vmov 0   ;;  %vm684_vm0 = vcmask 392192   ;;  %s1542_s1 = inlined_call_operand.vmem [shape: bf16[432,512], index: 1, kind: input, shape index: {}]   ;;  %s1543_s0 = inlined_call_operand.vmem [shape: bf16[8,432], index: 0, kind: input, shape index: {}]   ;;  %s1544_s2 = inlined_call_operand.vmem [shape: f32[8,1], index: 2, kind: input, shape index: {}]   ;;  %s1545_s3 = inlined_call_operand.vmem [shape: bf16[8,512], index: 3, kind: output, shape index: {}]  }
   0x1   :  { %v1010_v0 = vld [vmem:[%s1542_s1 + $0x4] ss:$16 sps:$4 sm:$0xff]   ;;  %1009 = vset.pattern.permute.xlu0 %v1176_v1  ;;  %v1012_v2 = vld [vmem:[%s1542_s1 + $0xc] ss:$16 sps:$4 sm:$0xff]   ;;  %v1014_v3 = vld [vmem:[%s1542_s1] ss:$16 sps:$4 sm:$0xff]  }
   0x2   :  { %688 = vmatprep.subr.bf16.mxu0 %v1010_v0  ;;  %v1015_v4 = vld [vmem:[%s1542_s1 + $0x8] ss:$16 sps:$4 sm:$0xff]   ;;  %770 = vmatprep.subr.bf16.mxu1 %v1012_v2  ;;  %v1016_v5 = vld [vmem:[%s1542_s1 + $0x24] ss:$16 sps:$4 sm:$0xff]   ;;  %v1018_v6 = vld [vmem:[%s1542_s1 + $0x2c] ss:$16 sps:$4 sm:$0xff]  }
   0x3   :  { %689 = vmatpush1.bf16.msra.mxu0 %v1014_v3  ;;  %771 = vmatpush1.bf16.msra.mxu1 %v1015_v4  ;;  %v1020_v7 = vld [vmem:[%s1542_s1 + $0x20] ss:$16 sps:$4 sm:$0xff]   ;;  %v1021_v8 = vld [vmem:[%s1542_s1 + $0x28] ss:$16 sps:$4 sm:$0xff]   ;;  %v1022_v9 = vld [vmem:[%s1542_s1 + $0x44] ss:$16 sps:$4 sm:$0xff]  }
   0x4   :  { %690 = vmatprep.subr.bf16.mxu0 %v1016_v5  ;;  %772 = vmatprep.subr.bf16.mxu1 %v1018_v6  ;;  %v1024_v10 = vld [vmem:[%s1542_s1 + $0x4c] ss:$16 sps:$4 sm:$0xff]   ;;  %v1026_v11 = vld [vmem:[%s1542_s1 + $0x40] ss:$16 sps:$4 sm:$0xff]   ;;  %v1027_v12 = vld [vmem:[%s1542_s1 + $0x48] ss:$16 sps:$4 sm:$0xff]  }
   0x5   :  { %v1028_v13 = vld [vmem:[%s1542_s1 + $0x64] ss:$16 sps:$4 sm:$0xff]   ;;  %v1030_v14 = vld [vmem:[%s1542_s1 + $0x6c] ss:$16 sps:$4 sm:$0xff]   ;;  %v1032_v15 = vld [vmem:[%s1542_s1 + $0x60] ss:$16 sps:$4 sm:$0xff]  }
   0x6   :  { %v1033_v16 = vld [vmem:[%s1542_s1 + $0x68] ss:$16 sps:$4 sm:$0xff]   ;;  %v1034_v17 = vld [vmem:[%s1542_s1 + $0x84] ss:$16 sps:$4 sm:$0xff]   ;;  %v1036_v18 = vld [vmem:[%s1542_s1 + $0x8c] ss:$16 sps:$4 sm:$0xff]  }
   0x7   :  { %691 = vmatpush1.bf16.msra.mxu0 %v1020_v7  ;;  %773 = vmatpush1.bf16.msra.mxu1 %v1021_v8  ;;  %v1038_v19 = vld [vmem:[%s1542_s1 + $0x80] ss:$16 sps:$4 sm:$0xff]   ;;  %v1039_v20 = vld [vmem:[%s1542_s1 + $0x88] ss:$16 sps:$4 sm:$0xff]   ;;  %v1040_v21 = vld [vmem:[%s1542_s1 + $0xa4] ss:$16 sps:$4 sm:$0xff]  }
   0x8   :  { %692 = vmatprep.subr.bf16.mxu0 %v1022_v9  ;;  %774 = vmatprep.subr.bf16.mxu1 %v1024_v10  ;;  %v1042_v22 = vld [vmem:[%s1542_s1 + $0xac] ss:$16 sps:$4 sm:$0xff]   ;;  %v1044_v23 = vld [vmem:[%s1542_s1 + $0xa0] ss:$16 sps:$4 sm:$0xff]   ;;  %v1045_v24 = vld [vmem:[%s1542_s1 + $0xa8] ss:$16 sps:$4 sm:$0xff]  }
   0x9   :  { %v1046_v25 = vld [vmem:[%s1542_s1 + $0xc4] ss:$16 sps:$4 sm:$0xff]   ;;  %v1048_v26 = vld [vmem:[%s1542_s1 + $0xcc] ss:$16 sps:$4 sm:$0xff]   ;;  %v1050_v27 = vld [vmem:[%s1542_s1 + $0xc0] ss:$16 sps:$4 sm:$0xff]  }
   0xa   :  { %v1051_v28 = vld [vmem:[%s1542_s1 + $0xc8] ss:$16 sps:$4 sm:$0xff]   ;;  %v1052_v29 = vld [vmem:[%s1542_s1 + $0xe4] ss:$16 sps:$4 sm:$0xff]   ;;  %v1054_v30 = vld [vmem:[%s1542_s1 + $0xec] ss:$16 sps:$4 sm:$0xff]  }
   0xb   :  { %693 = vmatpush1.bf16.msra.mxu0 %v1026_v11  ;;  %775 = vmatpush1.bf16.msra.mxu1 %v1027_v12  ;;  %v1056_v31 = vld [vmem:[%s1542_s1 + $0xe0] ss:$16 sps:$4 sm:$0xff]   ;;  %v1057_v32 = vld [vmem:[%s1542_s1 + $0xe8] ss:$16 sps:$4 sm:$0xff]   ;;  %v1058_v33 = vld [vmem:[%s1542_s1 + $0x104] ss:$16 sps:$4 sm:$0xff]  }
   0xc   :  { %694 = vmatprep.subr.bf16.mxu0 %v1028_v13  ;;  %776 = vmatprep.subr.bf16.mxu1 %v1030_v14  ;;  %v1060_v34 = vld [vmem:[%s1542_s1 + $0x10c] ss:$16 sps:$4 sm:$0xff]   ;;  %v1062_v35 = vld [vmem:[%s1542_s1 + $0x100] ss:$16 sps:$4 sm:$0xff]   ;;  %v1063_v36 = vld [vmem:[%s1542_s1 + $0x108] ss:$16 sps:$4 sm:$0xff]  }
   0xd   :  { %v1064_v37 = vld [vmem:[%s1542_s1 + $0x124] ss:$16 sps:$4 sm:$0xff]   ;;  %v1066_v38 = vld [vmem:[%s1542_s1 + $0x12c] ss:$16 sps:$4 sm:$0xff]   ;;  %v1068_v39 = vld [vmem:[%s1542_s1 + $0x120] ss:$16 sps:$4 sm:$0xff]  }
   0xe   :  { %v1069_v40 = vld [vmem:[%s1542_s1 + $0x128] ss:$16 sps:$4 sm:$0xff]   ;;  %v1070_v41 = vld [vmem:[%s1542_s1 + $0x144] ss:$16 sps:$4 sm:$0xff]   ;;  %v1072_v42 = vld [vmem:[%s1542_s1 + $0x14c] ss:$16 sps:$4 sm:$0xff]  }
   0xf   :  { %695 = vmatpush1.bf16.msra.mxu0 %v1032_v15  ;;  %777 = vmatpush1.bf16.msra.mxu1 %v1033_v16  ;;  %v1074_v43 = vld [vmem:[%s1542_s1 + $0x140] ss:$16 sps:$4 sm:$0xff]   ;;  %v1075_v44 = vld [vmem:[%s1542_s1 + $0x148] ss:$16 sps:$4 sm:$0xff]   ;;  %v1076_v45 = vld [vmem:[%s1542_s1 + $0x164] ss:$16 sps:$4 sm:$0xff]  }
  0x10   :  { %696 = vmatprep.subr.bf16.mxu0 %v1034_v17  ;;  %778 = vmatprep.subr.bf16.mxu1 %v1036_v18  ;;  %v1078_v46 = vld [vmem:[%s1542_s1 + $0x16c] ss:$16 sps:$4 sm:$0xff]   ;;  %v15_v47 = vld [vmem:[%s1543_s0] sm:$0xff]  ;;  %v1081_v50 = vld [vmem:[%s1542_s1 + $0x168] ss:$16 sps:$4 sm:$0xff]  }
  0x11   :  { %v879_v48 = vcombine.high %v15_v47, %v15_v47  ;;  %v1080_v49 = vld [vmem:[%s1542_s1 + $0x160] ss:$16 sps:$4 sm:$0xff]   ;;  %v1082_v51 = vld [vmem:[%s1542_s1 + $0x184] ss:$16 sps:$4 sm:$0xff]   ;;  %v1084_v52 = vld [vmem:[%s1542_s1 + $0x18c] ss:$16 sps:$4 sm:$0xff]   ;;  %v878_v6 = vcombine.low %v15_v47, %v15_v47 }
  0x12   :  { %v1086_v53 = vld [vmem:[%s1542_s1 + $0x180] ss:$16 sps:$4 sm:$0xff]   ;;  %v1087_v54 = vld [vmem:[%s1542_s1 + $0x188] ss:$16 sps:$4 sm:$0xff]   ;;  %v1088_v55 = vld [vmem:[%s1542_s1 + $0x1a4] ss:$16 sps:$4 sm:$0xff]  }
  0x13   :  { %697 = vmatpush1.bf16.msra.mxu0 %v1038_v19  ;;  %779 = vmatpush1.bf16.msra.mxu1 %v1039_v20  ;;  %v1090_v56 = vld [vmem:[%s1542_s1 + $0x1ac] ss:$16 sps:$4 sm:$0xff]   ;;  %v1092_v57 = vld [vmem:[%s1542_s1 + $0x1a0] ss:$16 sps:$4 sm:$0xff]   ;;  %v1093_v58 = vld [vmem:[%s1542_s1 + $0x1a8] ss:$16 sps:$4 sm:$0xff]  }
  0x14   :  { %698 = vmatprep.subr.bf16.mxu0 %v1040_v21  ;;  %780 = vmatprep.subr.bf16.mxu1 %v1042_v22  ;;  %v1094_v59 = vld [vmem:[%s1542_s1 + $0x1c4] ss:$16 sps:$4 sm:$0xff]   ;;  %v1096_v60 = vld [vmem:[%s1542_s1 + $0x1cc] ss:$16 sps:$4 sm:$0xff]   ;;  %v1098_v61 = vld [vmem:[%s1542_s1 + $0x1c0] ss:$16 sps:$4 sm:$0xff]  }
  0x15   :  { %720 = vmatprep.mubr.bf16.mxu0 %v879_v48  ;;  %802 = vmatprep.mubr.bf16.mxu1 %v879_v48  ;;  %v1099_v62 = vld [vmem:[%s1542_s1 + $0x1c8] ss:$16 sps:$4 sm:$0xff]   ;;  %v1100_v63 = vld [vmem:[%s1542_s1 + $0x1e4] ss:$16 sps:$4 sm:$0xff]   ;;  %v1102_v0 = vld [vmem:[%s1542_s1 + $0x1ec] ss:$16 sps:$4 sm:$0xff]  }
  0x16   :  { %v1104_v1 = vld [vmem:[%s1542_s1 + $0x1e0] ss:$16 sps:$4 sm:$0xff]   ;;  %v1105_v2 = vld [vmem:[%s1542_s1 + $0x1e8] ss:$16 sps:$4 sm:$0xff]   ;;  %v1112_v3 = vld [vmem:[%s1542_s1 + $0x204] ss:$16 sps:$4 sm:$0xff]  }
  0x17   :  { %699 = vmatpush1.bf16.msra.mxu0 %v1044_v23  ;;  %781 = vmatpush1.bf16.msra.mxu1 %v1045_v24  ;;  %v1115_v4 = vld [vmem:[%s1542_s1 + $0x20c] ss:$16 sps:$4 sm:$0xff]   ;;  %v1110_v7 = vld [vmem:[%s1542_s1 + $0x200] ss:$16 sps:$4 sm:$0xff]   ;;  %v1113_v8 = vld [vmem:[%s1542_s1 + $0x208] ss:$16 sps:$4 sm:$0xff]  }
  0x18   :  { %700 = vmatprep.subr.bf16.mxu0 %v1046_v25  ;;  %782 = vmatprep.subr.bf16.mxu1 %v1048_v26  ;;  %v1401_v5 = vld [vmem:[%s1543_s0 + $0x8] sm:$0xff]  ;;  %v1118_v9 = vld [vmem:[%s1542_s1 + $0x224] ss:$16 sps:$4 sm:$0xff]   ;;  %v1116_v12 = vld [vmem:[%s1542_s1 + $0x220] ss:$16 sps:$4 sm:$0xff]  }
  0x19   :  { %v1121_v10 = vld [vmem:[%s1542_s1 + $0x22c] ss:$16 sps:$4 sm:$0xff]   ;;  %v881_v11 = vcombine.high %v1401_v5, %v1401_v5  ;;  %v1119_v13 = vld [vmem:[%s1542_s1 + $0x228] ss:$16 sps:$4 sm:$0xff]   ;;  %v1124_v14 = vld [vmem:[%s1542_s1 + $0x244] ss:$16 sps:$4 sm:$0xff]  }
  0x1a   :  { %v1127_v15 = vld [vmem:[%s1542_s1 + $0x24c] ss:$16 sps:$4 sm:$0xff]   ;;  %v1122_v16 = vld [vmem:[%s1542_s1 + $0x240] ss:$16 sps:$4 sm:$0xff]   ;;  %v1125_v17 = vld [vmem:[%s1542_s1 + $0x248] ss:$16 sps:$4 sm:$0xff]  }
  0x1b   :  { %701 = vmatpush1.bf16.msra.mxu0 %v1050_v27  ;;  %783 = vmatpush1.bf16.msra.mxu1 %v1051_v28  ;;  %v125_v18 = vld [vmem:[%s1544_s2] sm:$0xff]  ;;  %v1133_v20 = vld [vmem:[%s1542_s1 + $0x26c] ss:$16 sps:$4 sm:$0xff]   ;;  %v1131_v22 = vld [vmem:[%s1542_s1 + $0x268] ss:$16 sps:$4 sm:$0xff]  }
  0x1c   :  { %702 = vmatprep.subr.bf16.mxu0 %v1052_v29  ;;  %784 = vmatprep.subr.bf16.mxu1 %v1054_v30  ;;  %v1130_v19 = vld [vmem:[%s1542_s1 + $0x264] ss:$16 sps:$4 sm:$0xff]   ;;  %v1128_v21 = vld [vmem:[%s1542_s1 + $0x260] ss:$16 sps:$4 sm:$0xff]   ;;  %v1139_v24 = vld [vmem:[%s1542_s1 + $0x28c] ss:$16 sps:$4 sm:$0xff]  }
  0x1d   :  { %128 = vperm.xlu0 %1009, %v125_v18   ;;  %v1136_v23 = vld [vmem:[%s1542_s1 + $0x284] ss:$16 sps:$4 sm:$0xff]   ;;  %v1134_v25 = vld [vmem:[%s1542_s1 + $0x280] ss:$16 sps:$4 sm:$0xff]   ;;  %v1137_v26 = vld [vmem:[%s1542_s1 + $0x288] ss:$16 sps:$4 sm:$0xff]  }
  0x1e   :  { %v1142_v27 = vld [vmem:[%s1542_s1 + $0x2a4] ss:$16 sps:$4 sm:$0xff]   ;;  %v1145_v28 = vld [vmem:[%s1542_s1 + $0x2ac] ss:$16 sps:$4 sm:$0xff]   ;;  %v1140_v29 = vld [vmem:[%s1542_s1 + $0x2a0] ss:$16 sps:$4 sm:$0xff]  }
  0x1f   :  { %703 = vmatpush1.bf16.msra.mxu0 %v1056_v31  ;;  %785 = vmatpush1.bf16.msra.mxu1 %v1057_v32  ;;  %v1143_v30 = vld [vmem:[%s1542_s1 + $0x2a8] ss:$16 sps:$4 sm:$0xff]   ;;  %v1148_v31 = vld [vmem:[%s1542_s1 + $0x2c4] ss:$16 sps:$4 sm:$0xff]   ;;  %v1151_v32 = vld [vmem:[%s1542_s1 + $0x2cc] ss:$16 sps:$4 sm:$0xff]  }
  0x20   :  { %704 = vmatprep.subr.bf16.mxu0 %v1058_v33  ;;  %786 = vmatprep.subr.bf16.mxu1 %v1060_v34  ;;  %v1146_v33 = vld [vmem:[%s1542_s1 + $0x2c0] ss:$16 sps:$4 sm:$0xff]   ;;  %v1149_v34 = vld [vmem:[%s1542_s1 + $0x2c8] ss:$16 sps:$4 sm:$0xff]   ;;  %v1172_v47 = vld [vmem:[%s1542_s1 + $0x344] ss:$16 sps:$4 sm:$0xff]  }
  0x21   :  { %v1175_v48 = vld [vmem:[%s1542_s1 + $0x34c] ss:$16 sps:$4 sm:$0xff]  }
  0x23   :  { %705 = vmatpush1.bf16.msra.mxu0 %v1062_v35  ;;  %787 = vmatpush1.bf16.msra.mxu1 %v1063_v36  ;;  %v1154_v35 = vld [vmem:[%s1542_s1 + $0x2e4] ss:$16 sps:$4 sm:$0xff]   ;;  %v1157_v36 = vld [vmem:[%s1542_s1 + $0x2ec] ss:$16 sps:$4 sm:$0xff]  }
  0x24   :  { %706 = vmatprep.subr.bf16.mxu0 %v1064_v37  ;;  %788 = vmatprep.subr.bf16.mxu1 %v1066_v38  ;;  %v1152_v37 = vld [vmem:[%s1542_s1 + $0x2e0] ss:$16 sps:$4 sm:$0xff]   ;;  %v1155_v38 = vld [vmem:[%s1542_s1 + $0x2e8] ss:$16 sps:$4 sm:$0xff]  }
  0x27   :  { %707 = vmatpush1.bf16.msra.mxu0 %v1068_v39  ;;  %789 = vmatpush1.bf16.msra.mxu1 %v1069_v40  ;;  %v1160_v39 = vld [vmem:[%s1542_s1 + $0x304] ss:$16 sps:$4 sm:$0xff]   ;;  %v1163_v40 = vld [vmem:[%s1542_s1 + $0x30c] ss:$16 sps:$4 sm:$0xff]  }
  0x28   :  { %708 = vmatprep.subr.bf16.mxu0 %v1070_v41  ;;  %790 = vmatprep.subr.bf16.mxu1 %v1072_v42  ;;  %v1158_v41 = vld [vmem:[%s1542_s1 + $0x300] ss:$16 sps:$4 sm:$0xff]   ;;  %v1161_v42 = vld [vmem:[%s1542_s1 + $0x308] ss:$16 sps:$4 sm:$0xff]  }
  0x2b   :  { %709 = vmatpush1.bf16.msra.mxu0 %v1074_v43  ;;  %791 = vmatpush1.bf16.msra.mxu1 %v1075_v44  ;;  %v1166_v43 = vld [vmem:[%s1542_s1 + $0x324] ss:$16 sps:$4 sm:$0xff]   ;;  %v1169_v44 = vld [vmem:[%s1542_s1 + $0x32c] ss:$16 sps:$4 sm:$0xff]  }
  0x2c   :  { %710 = vmatprep.subr.bf16.mxu0 %v1076_v45  ;;  %792 = vmatprep.subr.bf16.mxu1 %v1078_v46  ;;  %v1164_v45 = vld [vmem:[%s1542_s1 + $0x320] ss:$16 sps:$4 sm:$0xff]   ;;  %v1167_v46 = vld [vmem:[%s1542_s1 + $0x328] ss:$16 sps:$4 sm:$0xff]  }
  0x2f   :  { %711 = vmatpush1.bf16.msra.mxu0 %v1080_v49  ;;  %793 = vmatpush1.bf16.msra.mxu1 %v1081_v50  ;;  %v1170_v49 = vld [vmem:[%s1542_s1 + $0x340] ss:$16 sps:$4 sm:$0xff]   ;;  %v1173_v50 = vld [vmem:[%s1542_s1 + $0x348] ss:$16 sps:$4 sm:$0xff]  }
  0x30   :  { %712 = vmatprep.subr.bf16.mxu0 %v1082_v51  ;;  %794 = vmatprep.subr.bf16.mxu1 %v1084_v52  ;;  %v880_v51 = vcombine.low %v1401_v5, %v1401_v5 }
  0x33   :  { %713 = vmatpush1.bf16.msra.mxu0 %v1086_v53  ;;  %795 = vmatpush1.bf16.msra.mxu1 %v1087_v54 }
  0x34   :  { %714 = vmatprep.subr.bf16.mxu0 %v1088_v55  ;;  %796 = vmatprep.subr.bf16.mxu1 %v1090_v56 }
  0x37   :  { %715 = vmatpush1.bf16.msra.mxu0 %v1092_v57  ;;  %797 = vmatpush1.bf16.msra.mxu1 %v1093_v58 }
  0x38   :  { %716 = vmatprep.subr.bf16.mxu0 %v1094_v59  ;;  %798 = vmatprep.subr.bf16.mxu1 %v1096_v60 }
  0x3b   :  { %717 = vmatpush1.bf16.msra.mxu0 %v1098_v61  ;;  %799 = vmatpush1.bf16.msra.mxu1 %v1099_v62 }
  0x3c   :  { %718 = vmatprep.subr.bf16.mxu0 %v1100_v63  ;;  %800 = vmatprep.subr.bf16.mxu1 %v1102_v0 }
  0x3f   :  { %719 = vmatpush1.bf16.msra.mxu0 %v1104_v1  ;;  %801 = vmatpush1.bf16.msra.mxu1 %v1105_v2 }
  0x40   :  { %729 = vmatprep.subr.bf16.mxu0 %v1112_v3  ;;  %811 = vmatprep.subr.bf16.mxu1 %v1115_v4 }
  0x42   :  { %721 = vmatmul.mubr.bf16.vlgmr.msra.gmra.mrb[0].mxu0 %v878_v6  ;;  %803 = vmatmul.mubr.bf16.vlgmr.msra.gmra.mrb[0].mxu1 %v878_v6 }
  0x43   :  { %730 = vmatpush1.bf16.msra.mxu0 %v1110_v7  ;;  %812 = vmatpush1.bf16.msra.mxu1 %v1113_v8 }
  0x44   :  { %731 = vmatprep.subr.bf16.mxu0 %v1118_v9  ;;  %813 = vmatprep.subr.bf16.mxu1 %v1121_v10 }
  0x45   :  { %990 = vmatprep.mubr.msk.bf16.mxu0 %vm684_vm0, %v881_v11  ;;  %991 = vmatprep.mubr.msk.bf16.mxu1 %vm684_vm0, %v881_v11 }
  0x47   :  { %732 = vmatpush1.bf16.msra.mxu0 %v1116_v12  ;;  %814 = vmatpush1.bf16.msra.mxu1 %v1119_v13 }
  0x48   :  { %733 = vmatprep.subr.bf16.mxu0 %v1124_v14  ;;  %815 = vmatprep.subr.bf16.mxu1 %v1127_v15 }
  0x4b   :  { %734 = vmatpush1.bf16.msra.mxu0 %v1122_v16  ;;  %816 = vmatpush1.bf16.msra.mxu1 %v1125_v17 }
  0x4c   :  { %735 = vmatprep.subr.bf16.mxu0 %v1130_v19  ;;  %817 = vmatprep.subr.bf16.mxu1 %v1133_v20 }
  0x4f   :  { %736 = vmatpush1.bf16.msra.mxu0 %v1128_v21  ;;  %818 = vmatpush1.bf16.msra.mxu1 %v1131_v22 }
  0x50   :  { %737 = vmatprep.subr.bf16.mxu0 %v1136_v23  ;;  %819 = vmatprep.subr.bf16.mxu1 %v1139_v24 }
  0x53   :  { %738 = vmatpush1.bf16.msra.mxu0 %v1134_v25  ;;  %820 = vmatpush1.bf16.msra.mxu1 %v1137_v26 }
  0x54   :  { %739 = vmatprep.subr.bf16.mxu0 %v1142_v27  ;;  %821 = vmatprep.subr.bf16.mxu1 %v1145_v28 }
  0x57   :  { %740 = vmatpush1.bf16.msra.mxu0 %v1140_v29  ;;  %822 = vmatpush1.bf16.msra.mxu1 %v1143_v30 }
  0x58   :  { %741 = vmatprep.subr.bf16.mxu0 %v1148_v31  ;;  %823 = vmatprep.subr.bf16.mxu1 %v1151_v32 }
  0x5b   :  { %742 = vmatpush1.bf16.msra.mxu0 %v1146_v33  ;;  %824 = vmatpush1.bf16.msra.mxu1 %v1149_v34 }
  0x5c   :  { %743 = vmatprep.subr.bf16.mxu0 %v1154_v35  ;;  %825 = vmatprep.subr.bf16.mxu1 %v1157_v36 }
  0x5f   :  { %744 = vmatpush1.bf16.msra.mxu0 %v1152_v37  ;;  %826 = vmatpush1.bf16.msra.mxu1 %v1155_v38 }
  0x60   :  { %745 = vmatprep.subr.bf16.mxu0 %v1160_v39  ;;  %827 = vmatprep.subr.bf16.mxu1 %v1163_v40 }
  0x63   :  { %746 = vmatpush1.bf16.msra.mxu0 %v1158_v41  ;;  %828 = vmatpush1.bf16.msra.mxu1 %v1161_v42 }
  0x64   :  { %747 = vmatprep.subr.bf16.mxu0 %v1166_v43  ;;  %829 = vmatprep.subr.bf16.mxu1 %v1169_v44 }
  0x67   :  { %748 = vmatpush1.bf16.msra.mxu0 %v1164_v45  ;;  %830 = vmatpush1.bf16.msra.mxu1 %v1167_v46 }
  0x68   :  { %749 = vmatprep.subr.bf16.mxu0 %v1172_v47  ;;  %831 = vmatprep.subr.bf16.mxu1 %v1175_v48 }
  0x6b   :  { %750 = vmatpush1.bf16.msra.mxu0 %v1170_v49  ;;  %832 = vmatpush1.bf16.msra.mxu1 %v1173_v50 }
  0x6e   :  { %762 = vmatmul.mubr.bf16.vlgmr.msra.gmra.mrb[0].mxu0 %v880_v51  ;;  %844 = vmatmul.mubr.bf16.vlgmr.msra.gmra.mrb[0].mxu1 %v880_v51 }
  0x9c   :  { %v129_v52 = vpop.permute.xlu0 %128 }
 0x141   :  { %v763_v53 = vpop.f32.mrb[0].mxu0  ;;  %v845_v54 = vpop.f32.mrb[0].mxu1 }
 0x142   :  { %v996_v55 = vadd.f32 %v763_v53, %v129_v52  ;;  %v998_v56 = vadd.f32 %v845_v54, %v129_v52  ;;  %v765_v57 = vpop.f32.mrb[1].mxu0  ;;  %v847_v58 = vpop.f32.mrb[1].mxu1 }
 0x143   :  { %v997_v59 = vadd.f32 %v765_v57, %v129_v52  ;;  %v999_v60 = vadd.f32 %v847_v58, %v129_v52  ;;  %v767_v61 = vpop.f32.mrb[2].mxu0  ;;  %v849_v62 = vpop.f32.mrb[2].mxu1 }
 0x144   :  { %v852_v63 = vmax.f32 %v996_v55, 0.0  ;;  %v854_v0 = vmax.f32 %v998_v56, 0.0  ;;  %v768_v1 = vpop.f32.mrb[3].mxu0  ;;  %v850_v2 = vpop.f32.mrb[3].mxu1 }
 0x145   :  { %v853_v3 = vmax.f32 %v997_v59, 0.0  ;;  %v855_v4 = vmax.f32 %v999_v60, 0.0 }
 0x147   :  { %v994_v5 = vpack.c.bf16 %v853_v3, %v852_v63  ;;  %v995_v6 = vpack.c.bf16 %v855_v4, %v854_v0 }
 0x149   :  { %872 = vst [vmem:[%s1545_s3] sm:$0xff] %v994_v5  ;;  %873 = vst [vmem:[%s1545_s3 + $0x8] sm:$0xff] %v995_v6 }

</bundles_post_ra>
